<compile_context>
chip_gen: v7x
topology: tpu7x:2x2x1
jax: 0.10.0
libtpu: 0.0.40
codegen_flags: <defaults>
</compile_context>

<pallas_src>
import jax
import jax.numpy as jnp
from jax.experimental import pallas as pl
from jax.experimental.pallas import tpu as pltpu

CP = 128            # lane-dense padded Cout for conv1..conv3
CP4 = 256           # padded Cout for conv4 (160 -> 256)
FC_IN = 256         # padded fc1 input  (160 -> 256)
FC_OUT = 512        # padded fc1 output (500 -> 512)
CONV4_POS = (0, 2, 12, 14)   # flat top-left of the 4 valid stride-2 conv4 taps


# ---------------------------------------------------------------------------
# Fused conv + 2x2-maxpool + bias + ReLU kernel for the stride-1 layers.
# One grid step = one row tile of one image; a single K-folded MXU matmul
# fills the f32 accumulator, then the pool reads it (vertical max on
# contiguous slabs, then one stride-2 horizontal reduce), and bias+ReLU are
# applied only to the pooled (PW, 128) rows before the bf16 store.
# ---------------------------------------------------------------------------
def _make_conv_pool_kernel(W, ph_tile, PW):
    def kernel(x_ref, w_ref, b_ref, o_ref, acc_ref, vrow_ref):
        # One K-folded MXU matmul for the whole row tile (f32 accumulation).
        acc_ref[...] = jnp.dot(x_ref[0, :, :], w_ref[...],
                               preferred_element_type=jnp.float32)
        bias = jnp.broadcast_to(b_ref[...], (PW, CP))       # hoisted broadcast
        for py in range(ph_tile):
            r0 = 2 * py * W
            # vertical 2-row max on contiguous (W, 128) accumulator slabs
            vrow_ref[...] = jnp.maximum(acc_ref[pl.ds(r0, W), :],
                                        acc_ref[pl.ds(r0 + W, W), :])
            # horizontal even/odd max: only two stride-2 sublane gathers
            row = jnp.maximum(vrow_ref[pl.ds(0, PW, 2), :],
                              vrow_ref[pl.ds(1, PW, 2), :])
            # bias + ReLU after the pool (== relu-before-pool: max is
            # monotone and the bias is per-channel)
            o_ref[0, py, :, :] = jnp.maximum(row + bias, 0.0).astype(o_ref.dtype)
    return kernel


def conv_relu_pool(flat, H, W, Cin, w_packed, b_packed, KH, KW, ph_tile=None):
    """One fused conv(+ReLU)+2x2-pool layer (stride-1 conv).

    flat: (N, H*W, C_stored) bf16 channels-last activation (>= Cin channels).
    w_packed: (KH*KW*Cin, 128) bf16 ; b_packed: (1, 128) f32.
    Returns ((N, PH*PW, 128) bf16 pooled activation, PH, PW).
    """
    N, L, _ = flat.shape
    OH, OW = H - KH + 1, W - KW + 1
    PH, PW = OH // 2, OW // 2
    if ph_tile is None:
        ph_tile = PH
    n_tiles = pl.cdiv(PH, ph_tile)
    R = 2 * ph_tile * W                      # accumulator rows per tile
    assert R % 8 == 0, "row tile must be sublane aligned"
    rows = n_tiles * R
    K = KH * KW * Cin

    # XLA glue: K-folded sliding window,
    #   xwin[n, f, (ky*KW+kx)*Cin + ci] = x[n, f + ky*W + kx, ci]
    x = flat[:, :, :Cin]
    max_shift = (KH - 1) * W + (KW - 1)
    xp = jnp.pad(x, ((0, 0), (0, max(0, rows - L) + max_shift), (0, 0)))
    xwin = jnp.concatenate(
        [xp[:, ky * W + kx: ky * W + kx + rows, :]
         for ky in range(KH) for kx in range(KW)], axis=-1)   # (N, rows, K)

    PH_pad = n_tiles * ph_tile
    out = pl.pallas_call(
        _make_conv_pool_kernel(W, ph_tile, PW),
        out_shape=jax.ShapeDtypeStruct((N, PH_pad, PW, CP), jnp.bfloat16),
        grid=(N, n_tiles),
        in_specs=[
            pl.BlockSpec((1, R, K), lambda n, t: (n, t, 0)),
            pl.BlockSpec((K, CP), lambda n, t: (0, 0)),
            pl.BlockSpec((1, CP), lambda n, t: (0, 0)),
        ],
        out_specs=pl.BlockSpec((1, ph_tile, PW, CP), lambda n, t: (n, t, 0, 0)),
        scratch_shapes=[pltpu.VMEM((R, CP), jnp.float32),
                        pltpu.VMEM((W, CP), jnp.float32)],
        compiler_params=pltpu.CompilerParams(
            dimension_semantics=("parallel", "parallel"),   # batch x row-tile
            vmem_limit_bytes=32 * 1024 * 1024),
    )(xwin, w_packed, b_packed)
    out = out[:, :PH].reshape(N, PH * PW, CP)   # drop padded pooled rows
    return out, PH, PW


# ---------------------------------------------------------------------------
# Tail: conv4 (4x4, stride 2) + ReLU + 2x2 max-pool + fc1 + ReLU,
# one grid step per image ("parallel" so both v7x TCs are used).
# ---------------------------------------------------------------------------
def _tail_kernel(x_ref, w4_ref, b4_ref, wf_ref, bf_ref, o_ref):
    # x_ref: (1, 4, 1280) -- the 4 valid stride-2 conv4 patches of one image.
    acc = jnp.dot(x_ref[0, :, :], w4_ref[...],
                  preferred_element_type=jnp.float32)             # (4, 256)
    # 2x2 max-pool of the 2x2 conv4 output == max over the 4 patch rows;
    # bias + ReLU applied after the max (equivalent, see conv kernel).
    p = jnp.maximum(jnp.maximum(acc[0:1], acc[1:2]),
                    jnp.maximum(acc[2:3], acc[3:4]))              # (1, 256)
    z = jnp.maximum(p + b4_ref[...], 0.0)
    y = jnp.dot(z.astype(jnp.bfloat16), wf_ref[...],
                preferred_element_type=jnp.float32)               # (1, 512)
    o_ref[0, :, :] = jnp.maximum(y + bf_ref[...], 0.0)


def tail_forward(flat, H, W, w4, b4, wf, bf):
    # TODO(synk): like PyTorch's view(-1, 160), this assumes the conv4+pool
    # output is spatially 1x1 (true for 80x80 network inputs).
    assert (H, W) == (6, 6), "tail kernel assumes a 6x6x80 conv4 input"
    N = flat.shape[0]
    x = flat[:, :, :80]                                   # (N, 36, 80) real ch
    patches = []
    for p0 in CONV4_POS:
        cols = [x[:, p0 + ky * 6 + kx, :] for ky in range(4) for kx in range(4)]
        patches.append(jnp.concatenate(cols, axis=-1)[:, None, :])
    xt = jnp.concatenate(patches, axis=1)                 # (N, 4, 1280) bf16

    out = pl.pallas_call(
        _tail_kernel,
        out_shape=jax.ShapeDtypeStruct((N, 1, FC_OUT), jnp.float32),
        grid=(N,),
        in_specs=[
            pl.BlockSpec((1, 4, 4 * 4 * 80), lambda n: (n, 0, 0)),
            pl.BlockSpec((4 * 4 * 80, CP4), lambda n: (0, 0)),
            pl.BlockSpec((1, CP4), lambda n: (0, 0)),
            pl.BlockSpec((FC_IN, FC_OUT), lambda n: (0, 0)),
            pl.BlockSpec((1, FC_OUT), lambda n: (0, 0)),
        ],
        out_specs=pl.BlockSpec((1, 1, FC_OUT), lambda n: (n, 0, 0)),
        compiler_params=pltpu.CompilerParams(
            dimension_semantics=("parallel",)),
    )(xt, w4, b4, wf, bf)
    return out[:, 0, :]


# ---------------------------------------------------------------------------
# Parameters (deterministic uniform init, PyTorch weight layouts) + packing
# ---------------------------------------------------------------------------
def init_params(key):
    def conv_p(k, cout, cin, kh, kw):
        k1, k2 = jax.random.split(k)
        bound = 1.0 / ((cin * kh * kw) ** 0.5)
        w = jax.random.uniform(k1, (cout, cin, kh, kw), jnp.float32, -bound, bound)
        b = jax.random.uniform(k2, (cout,), jnp.float32, -bound, bound)
        return w, b

    keys = jax.random.split(key, 5)
    params = {
        "conv1": conv_p(keys[0], 20, 3, 7, 7),
        "conv2": conv_p(keys[1], 40, 20, 5, 5),
        "conv3": conv_p(keys[2], 80, 40, 4, 4),
        "conv4": conv_p(keys[3], 160, 80, 4, 4),
    }
    k1, k2 = jax.random.split(keys[4])
    bound = 1.0 / (160 ** 0.5)
    fw = jax.random.uniform(k1, (500, 160), jnp.float32, -bound, bound)
    fb = jax.random.uniform(k2, (500,), jnp.float32, -bound, bound)
    params["fc1"] = (fw, fb)
    return params


def prepare_params(params):
    """One-time packing: (KH*KW*Cin, Cout_pad) bf16 weights + padded f32 bias."""
    def pack_conv(w, b, cout_p):
        cout, cin, kh, kw = w.shape
        wp = jnp.transpose(w, (2, 3, 1, 0)).reshape(kh * kw * cin, cout)
        wp = jnp.pad(wp, ((0, 0), (0, cout_p - cout))).astype(jnp.bfloat16)
        bp = jnp.pad(b, (0, cout_p - cout)).reshape(1, cout_p).astype(jnp.float32)
        return wp, bp

    packed = {
        "conv1": pack_conv(*params["conv1"], CP),
        "conv2": pack_conv(*params["conv2"], CP),
        "conv3": pack_conv(*params["conv3"], CP),
        "conv4": pack_conv(*params["conv4"], CP4),
    }
    fw, fb = params["fc1"]                                  # (500,160), (500,)
    wf = jnp.zeros((FC_IN, FC_OUT), jnp.float32).at[:160, :500].set(fw.T)
    bf = jnp.pad(fb, (0, FC_OUT - 500)).reshape(1, FC_OUT).astype(jnp.float32)
    packed["fc1"] = (wf.astype(jnp.bfloat16), bf)
    return packed


# ---------------------------------------------------------------------------
# Forward pass (matches ReprNet.forward) + pure-XLA reference
# ---------------------------------------------------------------------------
def repr_net_forward(x_nchw, packed):
    N, _, H, W = x_nchw.shape
    x = jnp.transpose(x_nchw, (0, 2, 3, 1)).astype(jnp.bfloat16)   # NCHW -> NHWC
    flat = x.reshape(N, H * W, 3)
    flat, H, W = conv_relu_pool(flat, H, W, 3, *packed["conv1"], 7, 7, ph_tile=10)
    flat, H, W = conv_relu_pool(flat, H, W, 20, *packed["conv2"], 5, 5)
    flat, H, W = conv_relu_pool(flat, H, W, 40, *packed["conv3"], 4, 4)
    w4, b4 = packed["conv4"]
    wf, bf = packed["fc1"]
    out = tail_forward(flat, H, W, w4, b4, wf, bf)
    return out[:, :500]


def reference_forward(x_nchw, params):
    """Pure-JAX (XLA) reference of ReprNet.forward, used only as sanity check."""
    x = jnp.transpose(x_nchw, (0, 2, 3, 1))

    def conv(x, w, b, stride):
        wh = jnp.transpose(w, (2, 3, 1, 0))                 # -> HWIO
        y = jax.lax.conv_general_dilated(
            x, wh, (stride, stride), "VALID",
            dimension_numbers=("NHWC", "HWIO", "NHWC"))
        return jax.nn.relu(y + b)

    def pool(x):
        return jax.lax.reduce_window(
            x, -jnp.inf, jax.lax.max, (1, 2, 2, 1), (1, 2, 2, 1), "VALID")

    x = pool(conv(x, *params["conv1"], 1))
    x = pool(conv(x, *params["conv2"], 1))
    x = pool(conv(x, *params["conv3"], 1))
    x = pool(conv(x, *params["conv4"], 2))
    x = x.reshape(-1, 160)
    fw, fb = params["fc1"]
    return jax.nn.relu(x @ fw.T + fb)


if __name__ == "__main__":
    key = jax.random.PRNGKey(0)
    pkey, xkey = jax.random.split(key)
    params = init_params(pkey)
    packed = prepare_params(params)     # one-time weight packing (not in fwd)
    # smallest square input for which view(-1, 160) keeps the batch dim is 74;
    # use 80x80 so every stage has non-degenerate spatial extent.
    x = jax.random.normal(xkey, (2, 3, 80, 80), jnp.float32)

    fwd = jax.jit(repr_net_forward)
    out = jax.block_until_ready(fwd(x, packed))
    assert out.shape == (2, 500), out.shape
    assert out.dtype == jnp.float32

    # loose sanity check vs. the pure-XLA reference (kernel path uses bf16)
    ref = jax.jit(reference_forward)(x, params)
    err = float(jnp.max(jnp.abs(out - ref)) / (jnp.max(jnp.abs(ref)) + 1e-6))
    assert err < 0.1, f"kernel/reference mismatch: rel max err {err:.4f}"

    print("KERNEL_OK")
</pallas_src>

<mosaic_0001>
module attributes {stable_mosaic.version = 11 : i64} {
  func.func @kernel(%arg0: i32, %arg1: i32, %arg2: memref<1x1600x147xbf16, #tpu.memory_space<vmem>>, %arg3: memref<147x128xbf16, #tpu.memory_space<vmem>>, %arg4: memref<1x128xf32, #tpu.memory_space<vmem>>, %arg5: memref<1x10x37x128xbf16, #tpu.memory_space<vmem>>, %arg6: memref<1600x128xf32, #tpu.memory_space<vmem>>, %arg7: memref<80x128xf32, #tpu.memory_space<vmem>>) attributes {dimension_semantics = [#tpu.dimension_semantics<parallel>, #tpu.dimension_semantics<parallel>], iteration_bounds = array<i64: 2, 4>, scalar_prefetch = 0 : i64, scratch_operands = 2 : i64, tpu.core_type = #tpu.core_type<tc>, window_params = [{transform_indices = @transform_0, window_bounds = array<i64: 1, 1600, 147>}, {pipeline_mode = #tpu.pipeline_mode<synchronous>, transform_indices = @transform_1, window_bounds = array<i64: 147, 128>}, {pipeline_mode = #tpu.pipeline_mode<synchronous>, transform_indices = @transform_2, window_bounds = array<i64: 1, 128>}, {transform_indices = @transform_3, window_bounds = array<i64: 1, 10, 37, 128>}]} {
    %c0 = arith.constant 0 : index
    %c0_0 = arith.constant 0 : index
    %c0_1 = arith.constant 0 : index
    %0 = vector.load %arg2[%c0, %c0_0, %c0_1] : memref<1x1600x147xbf16, #tpu.memory_space<vmem>>, vector<1x1600x147xbf16>
    %1 = vector.shape_cast %0 : vector<1x1600x147xbf16> to vector<1600x147xbf16>
    %c0_2 = arith.constant 0 : index
    %c0_3 = arith.constant 0 : index
    %2 = vector.load %arg3[%c0_2, %c0_3] : memref<147x128xbf16, #tpu.memory_space<vmem>>, vector<147x128xbf16>
    %cst = arith.constant dense<0.000000e+00> : vector<1600x128xf32>
    %3 = tpu.matmul %1, %2, %cst {dimension_numbers = #tpu.dot_dimension_numbers<[1], [0], [0], [1], [0, 0, 1, 1], [], []>} : vector<1600x147xbf16>, vector<147x128xbf16>, vector<1600x128xf32> -> vector<1600x128xf32>
    %c0_4 = arith.constant 0 : index
    %c0_5 = arith.constant 0 : index
    %4 = vector.load %arg6[%c0_4, %c0_5] : memref<1600x128xf32, #tpu.memory_space<vmem>>, vector<1600x128xf32>
    tpu.vector_store %arg6[%c0_4, %c0_5], %3 {strides = array<i32>} : memref<1600x128xf32, #tpu.memory_space<vmem>>, vector<1600x128xf32>,
    %c0_6 = arith.constant 0 : index
    %c0_7 = arith.constant 0 : index
    %5 = vector.load %arg4[%c0_6, %c0_7] : memref<1x128xf32, #tpu.memory_space<vmem>>, vector<1x128xf32>
    %6 = vector.shape_cast %5 : vector<1x128xf32> to vector<1x128xf32>
    %7 = vector.broadcast %6 : vector<1x128xf32> to vector<37x128xf32>
    %c0_8 = arith.constant 0 : index
    %c0_9 = arith.constant 0 : index
    %8 = vector.load %arg6[%c0_8, %c0_9] : memref<1600x128xf32, #tpu.memory_space<vmem>>, vector<80x128xf32>
    %c80 = arith.constant 80 : index
    %c0_10 = arith.constant 0 : index
    %9 = vector.load %arg6[%c80, %c0_10] : memref<1600x128xf32, #tpu.memory_space<vmem>>, vector<80x128xf32>
    %10 = arith.maximumf %8, %9 : vector<80x128xf32>
    %c0_11 = arith.constant 0 : index
    %c0_12 = arith.constant 0 : index
    %11 = vector.load %arg7[%c0_11, %c0_12] : memref<80x128xf32, #tpu.memory_space<vmem>>, vector<80x128xf32>
    tpu.vector_store %arg7[%c0_11, %c0_12], %10 {strides = array<i32>} : memref<80x128xf32, #tpu.memory_space<vmem>>, vector<80x128xf32>,
    %c0_13 = arith.constant 0 : index
    %c0_14 = arith.constant 0 : index
    %12 = tpu.strided_load %arg7[%c0_13, %c0_14] {strides = array<i32: 2, 1>} : memref<80x128xf32, #tpu.memory_space<vmem>>, vector<37x128xf32>
    %c1 = arith.constant 1 : index
    %c0_15 = arith.constant 0 : index
    %13 = tpu.strided_load %arg7[%c1, %c0_15] {strides = array<i32: 2, 1>} : memref<80x128xf32, #tpu.memory_space<vmem>>, vector<37x128xf32>
    %14 = arith.maximumf %12, %13 : vector<37x128xf32>
    %15 = arith.addf %14, %7 : vector<37x128xf32>
    %cst_16 = arith.constant 0.000000e+00 : f32
    %16 = vector.broadcast %cst_16 : f32 to vector<37x128xf32>
    %17 = arith.maximumf %15, %16 : vector<37x128xf32>
    %18 = arith.truncf %17 : vector<37x128xf32> to vector<37x128xbf16>
    %c0_17 = arith.constant 0 : index
    %c0_18 = arith.constant 0 : index
    %c0_19 = arith.constant 0 : index
    %c0_20 = arith.constant 0 : index
    %19 = vector.load %arg5[%c0_17, %c0_18, %c0_19, %c0_20] : memref<1x10x37x128xbf16, #tpu.memory_space<vmem>>, vector<1x1x37x128xbf16>
    %20 = vector.shape_cast %19 : vector<1x1x37x128xbf16> to vector<37x128xbf16>
    %21 = vector.shape_cast %18 : vector<37x128xbf16> to vector<1x1x37x128xbf16>
    tpu.vector_store %arg5[%c0_17, %c0_18, %c0_19, %c0_20], %21 {strides = array<i32>} : memref<1x10x37x128xbf16, #tpu.memory_space<vmem>>, vector<1x1x37x128xbf16>,
    %c160 = arith.constant 160 : index
    %c0_21 = arith.constant 0 : index
    %22 = vector.load %arg6[%c160, %c0_21] : memref<1600x128xf32, #tpu.memory_space<vmem>>, vector<80x128xf32>
    %c240 = arith.constant 240 : index
    %c0_22 = arith.constant 0 : index
    %23 = vector.load %arg6[%c240, %c0_22] : memref<1600x128xf32, #tpu.memory_space<vmem>>, vector<80x128xf32>
    %24 = arith.maximumf %22, %23 : vector<80x128xf32>
    %c0_23 = arith.constant 0 : index
    %c0_24 = arith.constant 0 : index
    %25 = vector.load %arg7[%c0_23, %c0_24] : memref<80x128xf32, #tpu.memory_space<vmem>>, vector<80x128xf32>
    tpu.vector_store %arg7[%c0_23, %c0_24], %24 {strides = array<i32>} : memref<80x128xf32, #tpu.memory_space<vmem>>, vector<80x128xf32>,
    %c0_25 = arith.constant 0 : index
    %c0_26 = arith.constant 0 : index
    %26 = tpu.strided_load %arg7[%c0_25, %c0_26] {strides = array<i32: 2, 1>} : memref<80x128xf32, #tpu.memory_space<vmem>>, vector<37x128xf32>
    %c1_27 = arith.constant 1 : index
    %c0_28 = arith.constant 0 : index
    %27 = tpu.strided_load %arg7[%c1_27, %c0_28] {strides = array<i32: 2, 1>} : memref<80x128xf32, #tpu.memory_space<vmem>>, vector<37x128xf32>
    %28 = arith.maximumf %26, %27 : vector<37x128xf32>
    %29 = arith.addf %28, %7 : vector<37x128xf32>
    %cst_29 = arith.constant 0.000000e+00 : f32
    %30 = vector.broadcast %cst_29 : f32 to vector<37x128xf32>
    %31 = arith.maximumf %29, %30 : vector<37x128xf32>
    %32 = arith.truncf %31 : vector<37x128xf32> to vector<37x128xbf16>
    %c0_30 = arith.constant 0 : index
    %c1_31 = arith.constant 1 : index
    %c0_32 = arith.constant 0 : index
    %c0_33 = arith.constant 0 : index
    %33 = vector.load %arg5[%c0_30, %c1_31, %c0_32, %c0_33] : memref<1x10x37x128xbf16, #tpu.memory_space<vmem>>, vector<1x1x37x128xbf16>
    %34 = vector.shape_cast %33 : vector<1x1x37x128xbf16> to vector<37x128xbf16>
    %35 = vector.shape_cast %32 : vector<37x128xbf16> to vector<1x1x37x128xbf16>
    tpu.vector_store %arg5[%c0_30, %c1_31, %c0_32, %c0_33], %35 {strides = array<i32>} : memref<1x10x37x128xbf16, #tpu.memory_space<vmem>>, vector<1x1x37x128xbf16>,
    %c320 = arith.constant 320 : index
    %c0_34 = arith.constant 0 : index
    %36 = vector.load %arg6[%c320, %c0_34] : memref<1600x128xf32, #tpu.memory_space<vmem>>, vector<80x128xf32>
    %c400 = arith.constant 400 : index
    %c0_35 = arith.constant 0 : index
    %37 = vector.load %arg6[%c400, %c0_35] : memref<1600x128xf32, #tpu.memory_space<vmem>>, vector<80x128xf32>
    %38 = arith.maximumf %36, %37 : vector<80x128xf32>
    %c0_36 = arith.constant 0 : index
    %c0_37 = arith.constant 0 : index
    %39 = vector.load %arg7[%c0_36, %c0_37] : memref<80x128xf32, #tpu.memory_space<vmem>>, vector<80x128xf32>
    tpu.vector_store %arg7[%c0_36, %c0_37], %38 {strides = array<i32>} : memref<80x128xf32, #tpu.memory_space<vmem>>, vector<80x128xf32>,
    %c0_38 = arith.constant 0 : index
    %c0_39 = arith.constant 0 : index
    %40 = tpu.strided_load %arg7[%c0_38, %c0_39] {strides = array<i32: 2, 1>} : memref<80x128xf32, #tpu.memory_space<vmem>>, vector<37x128xf32>
    %c1_40 = arith.constant 1 : index
    %c0_41 = arith.constant 0 : index
    %41 = tpu.strided_load %arg7[%c1_40, %c0_41] {strides = array<i32: 2, 1>} : memref<80x128xf32, #tpu.memory_space<vmem>>, vector<37x128xf32>
    %42 = arith.maximumf %40, %41 : vector<37x128xf32>
    %43 = arith.addf %42, %7 : vector<37x128xf32>
    %cst_42 = arith.constant 0.000000e+00 : f32
    %44 = vector.broadcast %cst_42 : f32 to vector<37x128xf32>
    %45 = arith.maximumf %43, %44 : vector<37x128xf32>
    %46 = arith.truncf %45 : vector<37x128xf32> to vector<37x128xbf16>
    %c0_43 = arith.constant 0 : index
    %c2 = arith.constant 2 : index
    %c0_44 = arith.constant 0 : index
    %c0_45 = arith.constant 0 : index
    %47 = vector.load %arg5[%c0_43, %c2, %c0_44, %c0_45] : memref<1x10x37x128xbf16, #tpu.memory_space<vmem>>, vector<1x1x37x128xbf16>
    %48 = vector.shape_cast %47 : vector<1x1x37x128xbf16> to vector<37x128xbf16>
    %49 = vector.shape_cast %46 : vector<37x128xbf16> to vector<1x1x37x128xbf16>
    tpu.vector_store %arg5[%c0_43, %c2, %c0_44, %c0_45], %49 {strides = array<i32>} : memref<1x10x37x128xbf16, #tpu.memory_space<vmem>>, vector<1x1x37x128xbf16>,
    %c480 = arith.constant 480 : index
    %c0_46 = arith.constant 0 : index
    %50 = vector.load %arg6[%c480, %c0_46] : memref<1600x128xf32, #tpu.memory_space<vmem>>, vector<80x128xf32>
    %c560 = arith.constant 560 : index
    %c0_47 = arith.constant 0 : index
    %51 = vector.load %arg6[%c560, %c0_47] : memref<1600x128xf32, #tpu.memory_space<vmem>>, vector<80x128xf32>
    %52 = arith.maximumf %50, %51 : vector<80x128xf32>
    %c0_48 = arith.constant 0 : index
    %c0_49 = arith.constant 0 : index
    %53 = vector.load %arg7[%c0_48, %c0_49] : memref<80x128xf32, #tpu.memory_space<vmem>>, vector<80x128xf32>
    tpu.vector_store %arg7[%c0_48, %c0_49], %52 {strides = array<i32>} : memref<80x128xf32, #tpu.memory_space<vmem>>, vector<80x128xf32>,
    %c0_50 = arith.constant 0 : index
    %c0_51 = arith.constant 0 : index
    %54 = tpu.strided_load %arg7[%c0_50, %c0_51] {strides = array<i32: 2, 1>} : memref<80x128xf32, #tpu.memory_space<vmem>>, vector<37x128xf32>
    %c1_52 = arith.constant 1 : index
    %c0_53 = arith.constant 0 : index
    %55 = tpu.strided_load %arg7[%c1_52, %c0_53] {strides = array<i32: 2, 1>} : memref<80x128xf32, #tpu.memory_space<vmem>>, vector<37x128xf32>
    %56 = arith.maximumf %54, %55 : vector<37x128xf32>
    %57 = arith.addf %56, %7 : vector<37x128xf32>
    %cst_54 = arith.constant 0.000000e+00 : f32
    %58 = vector.broadcast %cst_54 : f32 to vector<37x128xf32>
    %59 = arith.maximumf %57, %58 : vector<37x128xf32>
    %60 = arith.truncf %59 : vector<37x128xf32> to vector<37x128xbf16>
    %c0_55 = arith.constant 0 : index
    %c3 = arith.constant 3 : index
    %c0_56 = arith.constant 0 : index
    %c0_57 = arith.constant 0 : index
    %61 = vector.load %arg5[%c0_55, %c3, %c0_56, %c0_57] : memref<1x10x37x128xbf16, #tpu.memory_space<vmem>>, vector<1x1x37x128xbf16>
    %62 = vector.shape_cast %61 : vector<1x1x37x128xbf16> to vector<37x128xbf16>
    %63 = vector.shape_cast %60 : vector<37x128xbf16> to vector<1x1x37x128xbf16>
    tpu.vector_store %arg5[%c0_55, %c3, %c0_56, %c0_57], %63 {strides = array<i32>} : memref<1x10x37x128xbf16, #tpu.memory_space<vmem>>, vector<1x1x37x128xbf16>,
    %c640 = arith.constant 640 : index
    %c0_58 = arith.constant 0 : index
    %64 = vector.load %arg6[%c640, %c0_58] : memref<1600x128xf32, #tpu.memory_space<vmem>>, vector<80x128xf32>
    %c720 = arith.constant 720 : index
    %c0_59 = arith.constant 0 : index
    %65 = vector.load %arg6[%c720, %c0_59] : memref<1600x128xf32, #tpu.memory_space<vmem>>, vector<80x128xf32>
    %66 = arith.maximumf %64, %65 : vector<80x128xf32>
    %c0_60 = arith.constant 0 : index
    %c0_61 = arith.constant 0 : index
    %67 = vector.load %arg7[%c0_60, %c0_61] : memref<80x128xf32, #tpu.memory_space<vmem>>, vector<80x128xf32>
    tpu.vector_store %arg7[%c0_60, %c0_61], %66 {strides = array<i32>} : memref<80x128xf32, #tpu.memory_space<vmem>>, vector<80x128xf32>,
    %c0_62 = arith.constant 0 : index
    %c0_63 = arith.constant 0 : index
    %68 = tpu.strided_load %arg7[%c0_62, %c0_63] {strides = array<i32: 2, 1>} : memref<80x128xf32, #tpu.memory_space<vmem>>, vector<37x128xf32>
    %c1_64 = arith.constant 1 : index
    %c0_65 = arith.constant 0 : index
    %69 = tpu.strided_load %arg7[%c1_64, %c0_65] {strides = array<i32: 2, 1>} : memref<80x128xf32, #tpu.memory_space<vmem>>, vector<37x128xf32>
    %70 = arith.maximumf %68, %69 : vector<37x128xf32>
    %71 = arith.addf %70, %7 : vector<37x128xf32>
    %cst_66 = arith.constant 0.000000e+00 : f32
    %72 = vector.broadcast %cst_66 : f32 to vector<37x128xf32>
    %73 = arith.maximumf %71, %72 : vector<37x128xf32>
    %74 = arith.truncf %73 : vector<37x128xf32> to vector<37x128xbf16>
    %c0_67 = arith.constant 0 : index
    %c4 = arith.constant 4 : index
    %c0_68 = arith.constant 0 : index
    %c0_69 = arith.constant 0 : index
    %75 = vector.load %arg5[%c0_67, %c4, %c0_68, %c0_69] : memref<1x10x37x128xbf16, #tpu.memory_space<vmem>>, vector<1x1x37x128xbf16>
    %76 = vector.shape_cast %75 : vector<1x1x37x128xbf16> to vector<37x128xbf16>
    %77 = vector.shape_cast %74 : vector<37x128xbf16> to vector<1x1x37x128xbf16>
    tpu.vector_store %arg5[%c0_67, %c4, %c0_68, %c0_69], %77 {strides = array<i32>} : memref<1x10x37x128xbf16, #tpu.memory_space<vmem>>, vector<1x1x37x128xbf16>,
    %c800 = arith.constant 800 : index
    %c0_70 = arith.constant 0 : index
    %78 = vector.load %arg6[%c800, %c0_70] : memref<1600x128xf32, #tpu.memory_space<vmem>>, vector<80x128xf32>
    %c880 = arith.constant 880 : index
    %c0_71 = arith.constant 0 : index
    %79 = vector.load %arg6[%c880, %c0_71] : memref<1600x128xf32, #tpu.memory_space<vmem>>, vector<80x128xf32>
    %80 = arith.maximumf %78, %79 : vector<80x128xf32>
    %c0_72 = arith.constant 0 : index
    %c0_73 = arith.constant 0 : index
    %81 = vector.load %arg7[%c0_72, %c0_73] : memref<80x128xf32, #tpu.memory_space<vmem>>, vector<80x128xf32>
    tpu.vector_store %arg7[%c0_72, %c0_73], %80 {strides = array<i32>} : memref<80x128xf32, #tpu.memory_space<vmem>>, vector<80x128xf32>,
    %c0_74 = arith.constant 0 : index
    %c0_75 = arith.constant 0 : index
    %82 = tpu.strided_load %arg7[%c0_74, %c0_75] {strides = array<i32: 2, 1>} : memref<80x128xf32, #tpu.memory_space<vmem>>, vector<37x128xf32>
    %c1_76 = arith.constant 1 : index
    %c0_77 = arith.constant 0 : index
    %83 = tpu.strided_load %arg7[%c1_76, %c0_77] {strides = array<i32: 2, 1>} : memref<80x128xf32, #tpu.memory_space<vmem>>, vector<37x128xf32>
    %84 = arith.maximumf %82, %83 : vector<37x128xf32>
    %85 = arith.addf %84, %7 : vector<37x128xf32>
    %cst_78 = arith.constant 0.000000e+00 : f32
    %86 = vector.broadcast %cst_78 : f32 to vector<37x128xf32>
    %87 = arith.maximumf %85, %86 : vector<37x128xf32>
    %88 = arith.truncf %87 : vector<37x128xf32> to vector<37x128xbf16>
    %c0_79 = arith.constant 0 : index
    %c5 = arith.constant 5 : index
    %c0_80 = arith.constant 0 : index
    %c0_81 = arith.constant 0 : index
    %89 = vector.load %arg5[%c0_79, %c5, %c0_80, %c0_81] : memref<1x10x37x128xbf16, #tpu.memory_space<vmem>>, vector<1x1x37x128xbf16>
    %90 = vector.shape_cast %89 : vector<1x1x37x128xbf16> to vector<37x128xbf16>
    %91 = vector.shape_cast %88 : vector<37x128xbf16> to vector<1x1x37x128xbf16>
    tpu.vector_store %arg5[%c0_79, %c5, %c0_80, %c0_81], %91 {strides = array<i32>} : memref<1x10x37x128xbf16, #tpu.memory_space<vmem>>, vector<1x1x37x128xbf16>,
    %c960 = arith.constant 960 : index
    %c0_82 = arith.constant 0 : index
    %92 = vector.load %arg6[%c960, %c0_82] : memref<1600x128xf32, #tpu.memory_space<vmem>>, vector<80x128xf32>
    %c1040 = arith.constant 1040 : index
    %c0_83 = arith.constant 0 : index
    %93 = vector.load %arg6[%c1040, %c0_83] : memref<1600x128xf32, #tpu.memory_space<vmem>>, vector<80x128xf32>
    %94 = arith.maximumf %92, %93 : vector<80x128xf32>
    %c0_84 = arith.constant 0 : index
    %c0_85 = arith.constant 0 : index
    %95 = vector.load %arg7[%c0_84, %c0_85] : memref<80x128xf32, #tpu.memory_space<vmem>>, vector<80x128xf32>
    tpu.vector_store %arg7[%c0_84, %c0_85], %94 {strides = array<i32>} : memref<80x128xf32, #tpu.memory_space<vmem>>, vector<80x128xf32>,
    %c0_86 = arith.constant 0 : index
    %c0_87 = arith.constant 0 : index
    %96 = tpu.strided_load %arg7[%c0_86, %c0_87] {strides = array<i32: 2, 1>} : memref<80x128xf32, #tpu.memory_space<vmem>>, vector<37x128xf32>
    %c1_88 = arith.constant 1 : index
    %c0_89 = arith.constant 0 : index
    %97 = tpu.strided_load %arg7[%c1_88, %c0_89] {strides = array<i32: 2, 1>} : memref<80x128xf32, #tpu.memory_space<vmem>>, vector<37x128xf32>
    %98 = arith.maximumf %96, %97 : vector<37x128xf32>
    %99 = arith.addf %98, %7 : vector<37x128xf32>
    %cst_90 = arith.constant 0.000000e+00 : f32
    %100 = vector.broadcast %cst_90 : f32 to vector<37x128xf32>
    %101 = arith.maximumf %99, %100 : vector<37x128xf32>
    %102 = arith.truncf %101 : vector<37x128xf32> to vector<37x128xbf16>
    %c0_91 = arith.constant 0 : index
    %c6 = arith.constant 6 : index
    %c0_92 = arith.constant 0 : index
    %c0_93 = arith.constant 0 : index
    %103 = vector.load %arg5[%c0_91, %c6, %c0_92, %c0_93] : memref<1x10x37x128xbf16, #tpu.memory_space<vmem>>, vector<1x1x37x128xbf16>
    %104 = vector.shape_cast %103 : vector<1x1x37x128xbf16> to vector<37x128xbf16>
    %105 = vector.shape_cast %102 : vector<37x128xbf16> to vector<1x1x37x128xbf16>
    tpu.vector_store %arg5[%c0_91, %c6, %c0_92, %c0_93], %105 {strides = array<i32>} : memref<1x10x37x128xbf16, #tpu.memory_space<vmem>>, vector<1x1x37x128xbf16>,
    %c1120 = arith.constant 1120 : index
    %c0_94 = arith.constant 0 : index
    %106 = vector.load %arg6[%c1120, %c0_94] : memref<1600x128xf32, #tpu.memory_space<vmem>>, vector<80x128xf32>
    %c1200 = arith.constant 1200 : index
    %c0_95 = arith.constant 0 : index
    %107 = vector.load %arg6[%c1200, %c0_95] : memref<1600x128xf32, #tpu.memory_space<vmem>>, vector<80x128xf32>
    %108 = arith.maximumf %106, %107 : vector<80x128xf32>
    %c0_96 = arith.constant 0 : index
    %c0_97 = arith.constant 0 : index
    %109 = vector.load %arg7[%c0_96, %c0_97] : memref<80x128xf32, #tpu.memory_space<vmem>>, vector<80x128xf32>
    tpu.vector_store %arg7[%c0_96, %c0_97], %108 {strides = array<i32>} : memref<80x128xf32, #tpu.memory_space<vmem>>, vector<80x128xf32>,
    %c0_98 = arith.constant 0 : index
    %c0_99 = arith.constant 0 : index
    %110 = tpu.strided_load %arg7[%c0_98, %c0_99] {strides = array<i32: 2, 1>} : memref<80x128xf32, #tpu.memory_space<vmem>>, vector<37x128xf32>
    %c1_100 = arith.constant 1 : index
    %c0_101 = arith.constant 0 : index
    %111 = tpu.strided_load %arg7[%c1_100, %c0_101] {strides = array<i32: 2, 1>} : memref<80x128xf32, #tpu.memory_space<vmem>>, vector<37x128xf32>
    %112 = arith.maximumf %110, %111 : vector<37x128xf32>
    %113 = arith.addf %112, %7 : vector<37x128xf32>
    %cst_102 = arith.constant 0.000000e+00 : f32
    %114 = vector.broadcast %cst_102 : f32 to vector<37x128xf32>
    %115 = arith.maximumf %113, %114 : vector<37x128xf32>
    %116 = arith.truncf %115 : vector<37x128xf32> to vector<37x128xbf16>
    %c0_103 = arith.constant 0 : index
    %c7 = arith.constant 7 : index
    %c0_104 = arith.constant 0 : index
    %c0_105 = arith.constant 0 : index
    %117 = vector.load %arg5[%c0_103, %c7, %c0_104, %c0_105] : memref<1x10x37x128xbf16, #tpu.memory_space<vmem>>, vector<1x1x37x128xbf16>
    %118 = vector.shape_cast %117 : vector<1x1x37x128xbf16> to vector<37x128xbf16>
    %119 = vector.shape_cast %116 : vector<37x128xbf16> to vector<1x1x37x128xbf16>
    tpu.vector_store %arg5[%c0_103, %c7, %c0_104, %c0_105], %119 {strides = array<i32>} : memref<1x10x37x128xbf16, #tpu.memory_space<vmem>>, vector<1x1x37x128xbf16>,
    %c1280 = arith.constant 1280 : index
    %c0_106 = arith.constant 0 : index
    %120 = vector.load %arg6[%c1280, %c0_106] : memref<1600x128xf32, #tpu.memory_space<vmem>>, vector<80x128xf32>
    %c1360 = arith.constant 1360 : index
    %c0_107 = arith.constant 0 : index
    %121 = vector.load %arg6[%c1360, %c0_107] : memref<1600x128xf32, #tpu.memory_space<vmem>>, vector<80x128xf32>
    %122 = arith.maximumf %120, %121 : vector<80x128xf32>
    %c0_108 = arith.constant 0 : index
    %c0_109 = arith.constant 0 : index
    %123 = vector.load %arg7[%c0_108, %c0_109] : memref<80x128xf32, #tpu.memory_space<vmem>>, vector<80x128xf32>
    tpu.vector_store %arg7[%c0_108, %c0_109], %122 {strides = array<i32>} : memref<80x128xf32, #tpu.memory_space<vmem>>, vector<80x128xf32>,
    %c0_110 = arith.constant 0 : index
    %c0_111 = arith.constant 0 : index
    %124 = tpu.strided_load %arg7[%c0_110, %c0_111] {strides = array<i32: 2, 1>} : memref<80x128xf32, #tpu.memory_space<vmem>>, vector<37x128xf32>
    %c1_112 = arith.constant 1 : index
    %c0_113 = arith.constant 0 : index
    %125 = tpu.strided_load %arg7[%c1_112, %c0_113] {strides = array<i32: 2, 1>} : memref<80x128xf32, #tpu.memory_space<vmem>>, vector<37x128xf32>
    %126 = arith.maximumf %124, %125 : vector<37x128xf32>
    %127 = arith.addf %126, %7 : vector<37x128xf32>
    %cst_114 = arith.constant 0.000000e+00 : f32
    %128 = vector.broadcast %cst_114 : f32 to vector<37x128xf32>
    %129 = arith.maximumf %127, %128 : vector<37x128xf32>
    %130 = arith.truncf %129 : vector<37x128xf32> to vector<37x128xbf16>
    %c0_115 = arith.constant 0 : index
    %c8 = arith.constant 8 : index
    %c0_116 = arith.constant 0 : index
    %c0_117 = arith.constant 0 : index
    %131 = vector.load %arg5[%c0_115, %c8, %c0_116, %c0_117] : memref<1x10x37x128xbf16, #tpu.memory_space<vmem>>, vector<1x1x37x128xbf16>
    %132 = vector.shape_cast %131 : vector<1x1x37x128xbf16> to vector<37x128xbf16>
    %133 = vector.shape_cast %130 : vector<37x128xbf16> to vector<1x1x37x128xbf16>
    tpu.vector_store %arg5[%c0_115, %c8, %c0_116, %c0_117], %133 {strides = array<i32>} : memref<1x10x37x128xbf16, #tpu.memory_space<vmem>>, vector<1x1x37x128xbf16>,
    %c1440 = arith.constant 1440 : index
    %c0_118 = arith.constant 0 : index
    %134 = vector.load %arg6[%c1440, %c0_118] : memref<1600x128xf32, #tpu.memory_space<vmem>>, vector<80x128xf32>
    %c1520 = arith.constant 1520 : index
    %c0_119 = arith.constant 0 : index
    %135 = vector.load %arg6[%c1520, %c0_119] : memref<1600x128xf32, #tpu.memory_space<vmem>>, vector<80x128xf32>
    %136 = arith.maximumf %134, %135 : vector<80x128xf32>
    %c0_120 = arith.constant 0 : index
    %c0_121 = arith.constant 0 : index
    %137 = vector.load %arg7[%c0_120, %c0_121] : memref<80x128xf32, #tpu.memory_space<vmem>>, vector<80x128xf32>
    tpu.vector_store %arg7[%c0_120, %c0_121], %136 {strides = array<i32>} : memref<80x128xf32, #tpu.memory_space<vmem>>, vector<80x128xf32>,
    %c0_122 = arith.constant 0 : index
    %c0_123 = arith.constant 0 : index
    %138 = tpu.strided_load %arg7[%c0_122, %c0_123] {strides = array<i32: 2, 1>} : memref<80x128xf32, #tpu.memory_space<vmem>>, vector<37x128xf32>
    %c1_124 = arith.constant 1 : index
    %c0_125 = arith.constant 0 : index
    %139 = tpu.strided_load %arg7[%c1_124, %c0_125] {strides = array<i32: 2, 1>} : memref<80x128xf32, #tpu.memory_space<vmem>>, vector<37x128xf32>
    %140 = arith.maximumf %138, %139 : vector<37x128xf32>
    %141 = arith.addf %140, %7 : vector<37x128xf32>
    %cst_126 = arith.constant 0.000000e+00 : f32
    %142 = vector.broadcast %cst_126 : f32 to vector<37x128xf32>
    %143 = arith.maximumf %141, %142 : vector<37x128xf32>
    %144 = arith.truncf %143 : vector<37x128xf32> to vector<37x128xbf16>
    %c0_127 = arith.constant 0 : index
    %c9 = arith.constant 9 : index
    %c0_128 = arith.constant 0 : index
    %c0_129 = arith.constant 0 : index
    %145 = vector.load %arg5[%c0_127, %c9, %c0_128, %c0_129] : memref<1x10x37x128xbf16, #tpu.memory_space<vmem>>, vector<1x1x37x128xbf16>
    %146 = vector.shape_cast %145 : vector<1x1x37x128xbf16> to vector<37x128xbf16>
    %147 = vector.shape_cast %144 : vector<37x128xbf16> to vector<1x1x37x128xbf16>
    tpu.vector_store %arg5[%c0_127, %c9, %c0_128, %c0_129], %147 {strides = array<i32>} : memref<1x10x37x128xbf16, #tpu.memory_space<vmem>>, vector<1x1x37x128xbf16>,
    return
  }
  func.func @transform_0(%arg0: i32, %arg1: i32) -> (i32, i32, i32) {
    %c0_i32 = arith.constant 0 : i32
    %c0_i32_0 = arith.constant 0 : i32
    return %arg0, %arg1, %c0_i32 : i32, i32, i32
  }
  func.func @transform_1(%arg0: i32, %arg1: i32) -> (i32, i32) {
    %c0_i32 = arith.constant 0 : i32
    %c0_i32_0 = arith.constant 0 : i32
    %c0_i32_1 = arith.constant 0 : i32
    return %c0_i32, %c0_i32_0 : i32, i32
  }
  func.func @transform_2(%arg0: i32, %arg1: i32) -> (i32, i32) {
    %c0_i32 = arith.constant 0 : i32
    %c0_i32_0 = arith.constant 0 : i32
    %c0_i32_1 = arith.constant 0 : i32
    return %c0_i32, %c0_i32_0 : i32, i32
  }
  func.func @transform_3(%arg0: i32, %arg1: i32) -> (i32, i32, i32, i32) {
    %c0_i32 = arith.constant 0 : i32
    %c0_i32_0 = arith.constant 0 : i32
    %c0_i32_1 = arith.constant 0 : i32
    return %arg0, %arg1, %c0_i32, %c0_i32_0 : i32, i32, i32, i32
  }
}

module attributes {stable_mosaic.version = 11 : i64} {
  func.func @kernel(%arg0: i32, %arg1: i32, %arg2: memref<1x1184x500xbf16, #tpu.memory_space<vmem>>, %arg3: memref<500x128xbf16, #tpu.memory_space<vmem>>, %arg4: memref<1x128xf32, #tpu.memory_space<vmem>>, %arg5: memref<1x16x16x128xbf16, #tpu.memory_space<vmem>>, %arg6: memref<1184x128xf32, #tpu.memory_space<vmem>>, %arg7: memref<37x128xf32, #tpu.memory_space<vmem>>) attributes {dimension_semantics = [#tpu.dimension_semantics<parallel>, #tpu.dimension_semantics<parallel>], iteration_bounds = array<i64: 2, 1>, scalar_prefetch = 0 : i64, scratch_operands = 2 : i64, tpu.core_type = #tpu.core_type<tc>, window_params = [{transform_indices = @transform_0, window_bounds = array<i64: 1, 1184, 500>}, {pipeline_mode = #tpu.pipeline_mode<synchronous>, transform_indices = @transform_1, window_bounds = array<i64: 500, 128>}, {pipeline_mode = #tpu.pipeline_mode<synchronous>, transform_indices = @transform_2, window_bounds = array<i64: 1, 128>}, {transform_indices = @transform_3, window_bounds = array<i64: 1, 16, 16, 128>}]} {
    %c0 = arith.constant 0 : index
    %c0_0 = arith.constant 0 : index
    %c0_1 = arith.constant 0 : index
    %0 = vector.load %arg2[%c0, %c0_0, %c0_1] : memref<1x1184x500xbf16, #tpu.memory_space<vmem>>, vector<1x1184x500xbf16>
    %1 = vector.shape_cast %0 : vector<1x1184x500xbf16> to vector<1184x500xbf16>
    %c0_2 = arith.constant 0 : index
    %c0_3 = arith.constant 0 : index
    %2 = vector.load %arg3[%c0_2, %c0_3] : memref<500x128xbf16, #tpu.memory_space<vmem>>, vector<500x128xbf16>
    %cst = arith.constant dense<0.000000e+00> : vector<1184x128xf32>
    %3 = tpu.matmul %1, %2, %cst {dimension_numbers = #tpu.dot_dimension_numbers<[1], [0], [0], [1], [0, 0, 1, 1], [], []>} : vector<1184x500xbf16>, vector<500x128xbf16>, vector<1184x128xf32> -> vector<1184x128xf32>
    %c0_4 = arith.constant 0 : index
    %c0_5 = arith.constant 0 : index
    %4 = vector.load %arg6[%c0_4, %c0_5] : memref<1184x128xf32, #tpu.memory_space<vmem>>, vector<1184x128xf32>
    tpu.vector_store %arg6[%c0_4, %c0_5], %3 {strides = array<i32>} : memref<1184x128xf32, #tpu.memory_space<vmem>>, vector<1184x128xf32>,
    %c0_6 = arith.constant 0 : index
    %c0_7 = arith.constant 0 : index
    %5 = vector.load %arg4[%c0_6, %c0_7] : memref<1x128xf32, #tpu.memory_space<vmem>>, vector<1x128xf32>
    %6 = vector.shape_cast %5 : vector<1x128xf32> to vector<1x128xf32>
    %7 = vector.broadcast %6 : vector<1x128xf32> to vector<16x128xf32>
    %c0_8 = arith.constant 0 : index
    %c0_9 = arith.constant 0 : index
    %8 = vector.load %arg6[%c0_8, %c0_9] : memref<1184x128xf32, #tpu.memory_space<vmem>>, vector<37x128xf32>
    %c37 = arith.constant 37 : index
    %c0_10 = arith.constant 0 : index
    %9 = vector.load %arg6[%c37, %c0_10] : memref<1184x128xf32, #tpu.memory_space<vmem>>, vector<37x128xf32>
    %10 = arith.maximumf %8, %9 : vector<37x128xf32>
    %c0_11 = arith.constant 0 : index
    %c0_12 = arith.constant 0 : index
    %11 = vector.load %arg7[%c0_11, %c0_12] : memref<37x128xf32, #tpu.memory_space<vmem>>, vector<37x128xf32>
    tpu.vector_store %arg7[%c0_11, %c0_12], %10 {strides = array<i32>} : memref<37x128xf32, #tpu.memory_space<vmem>>, vector<37x128xf32>,
    %c0_13 = arith.constant 0 : index
    %c0_14 = arith.constant 0 : index
    %12 = tpu.strided_load %arg7[%c0_13, %c0_14] {strides = array<i32: 2, 1>} : memref<37x128xf32, #tpu.memory_space<vmem>>, vector<16x128xf32>
    %c1 = arith.constant 1 : index
    %c0_15 = arith.constant 0 : index
    %13 = tpu.strided_load %arg7[%c1, %c0_15] {strides = array<i32: 2, 1>} : memref<37x128xf32, #tpu.memory_space<vmem>>, vector<16x128xf32>
    %14 = arith.maximumf %12, %13 : vector<16x128xf32>
    %15 = arith.addf %14, %7 : vector<16x128xf32>
    %cst_16 = arith.constant 0.000000e+00 : f32
    %16 = vector.broadcast %cst_16 : f32 to vector<16x128xf32>
    %17 = arith.maximumf %15, %16 : vector<16x128xf32>
    %18 = arith.truncf %17 : vector<16x128xf32> to vector<16x128xbf16>
    %c0_17 = arith.constant 0 : index
    %c0_18 = arith.constant 0 : index
    %c0_19 = arith.constant 0 : index
    %c0_20 = arith.constant 0 : index
    %19 = vector.load %arg5[%c0_17, %c0_18, %c0_19, %c0_20] : memref<1x16x16x128xbf16, #tpu.memory_space<vmem>>, vector<1x1x16x128xbf16>
    %20 = vector.shape_cast %19 : vector<1x1x16x128xbf16> to vector<16x128xbf16>
    %21 = vector.shape_cast %18 : vector<16x128xbf16> to vector<1x1x16x128xbf16>
    tpu.vector_store %arg5[%c0_17, %c0_18, %c0_19, %c0_20], %21 {strides = array<i32>} : memref<1x16x16x128xbf16, #tpu.memory_space<vmem>>, vector<1x1x16x128xbf16>,
    %c74 = arith.constant 74 : index
    %c0_21 = arith.constant 0 : index
    %22 = vector.load %arg6[%c74, %c0_21] : memref<1184x128xf32, #tpu.memory_space<vmem>>, vector<37x128xf32>
    %c111 = arith.constant 111 : index
    %c0_22 = arith.constant 0 : index
    %23 = vector.load %arg6[%c111, %c0_22] : memref<1184x128xf32, #tpu.memory_space<vmem>>, vector<37x128xf32>
    %24 = arith.maximumf %22, %23 : vector<37x128xf32>
    %c0_23 = arith.constant 0 : index
    %c0_24 = arith.constant 0 : index
    %25 = vector.load %arg7[%c0_23, %c0_24] : memref<37x128xf32, #tpu.memory_space<vmem>>, vector<37x128xf32>
    tpu.vector_store %arg7[%c0_23, %c0_24], %24 {strides = array<i32>} : memref<37x128xf32, #tpu.memory_space<vmem>>, vector<37x128xf32>,
    %c0_25 = arith.constant 0 : index
    %c0_26 = arith.constant 0 : index
    %26 = tpu.strided_load %arg7[%c0_25, %c0_26] {strides = array<i32: 2, 1>} : memref<37x128xf32, #tpu.memory_space<vmem>>, vector<16x128xf32>
    %c1_27 = arith.constant 1 : index
    %c0_28 = arith.constant 0 : index
    %27 = tpu.strided_load %arg7[%c1_27, %c0_28] {strides = array<i32: 2, 1>} : memref<37x128xf32, #tpu.memory_space<vmem>>, vector<16x128xf32>
    %28 = arith.maximumf %26, %27 : vector<16x128xf32>
    %29 = arith.addf %28, %7 : vector<16x128xf32>
    %cst_29 = arith.constant 0.000000e+00 : f32
    %30 = vector.broadcast %cst_29 : f32 to vector<16x128xf32>
    %31 = arith.maximumf %29, %30 : vector<16x128xf32>
    %32 = arith.truncf %31 : vector<16x128xf32> to vector<16x128xbf16>
    %c0_30 = arith.constant 0 : index
    %c1_31 = arith.constant 1 : index
    %c0_32 = arith.constant 0 : index
    %c0_33 = arith.constant 0 : index
    %33 = vector.load %arg5[%c0_30, %c1_31, %c0_32, %c0_33] : memref<1x16x16x128xbf16, #tpu.memory_space<vmem>>, vector<1x1x16x128xbf16>
    %34 = vector.shape_cast %33 : vector<1x1x16x128xbf16> to vector<16x128xbf16>
    %35 = vector.shape_cast %32 : vector<16x128xbf16> to vector<1x1x16x128xbf16>
    tpu.vector_store %arg5[%c0_30, %c1_31, %c0_32, %c0_33], %35 {strides = array<i32>} : memref<1x16x16x128xbf16, #tpu.memory_space<vmem>>, vector<1x1x16x128xbf16>,
    %c148 = arith.constant 148 : index
    %c0_34 = arith.constant 0 : index
    %36 = vector.load %arg6[%c148, %c0_34] : memref<1184x128xf32, #tpu.memory_space<vmem>>, vector<37x128xf32>
    %c185 = arith.constant 185 : index
    %c0_35 = arith.constant 0 : index
    %37 = vector.load %arg6[%c185, %c0_35] : memref<1184x128xf32, #tpu.memory_space<vmem>>, vector<37x128xf32>
    %38 = arith.maximumf %36, %37 : vector<37x128xf32>
    %c0_36 = arith.constant 0 : index
    %c0_37 = arith.constant 0 : index
    %39 = vector.load %arg7[%c0_36, %c0_37] : memref<37x128xf32, #tpu.memory_space<vmem>>, vector<37x128xf32>
    tpu.vector_store %arg7[%c0_36, %c0_37], %38 {strides = array<i32>} : memref<37x128xf32, #tpu.memory_space<vmem>>, vector<37x128xf32>,
    %c0_38 = arith.constant 0 : index
    %c0_39 = arith.constant 0 : index
    %40 = tpu.strided_load %arg7[%c0_38, %c0_39] {strides = array<i32: 2, 1>} : memref<37x128xf32, #tpu.memory_space<vmem>>, vector<16x128xf32>
    %c1_40 = arith.constant 1 : index
    %c0_41 = arith.constant 0 : index
    %41 = tpu.strided_load %arg7[%c1_40, %c0_41] {strides = array<i32: 2, 1>} : memref<37x128xf32, #tpu.memory_space<vmem>>, vector<16x128xf32>
    %42 = arith.maximumf %40, %41 : vector<16x128xf32>
    %43 = arith.addf %42, %7 : vector<16x128xf32>
    %cst_42 = arith.constant 0.000000e+00 : f32
    %44 = vector.broadcast %cst_42 : f32 to vector<16x128xf32>
    %45 = arith.maximumf %43, %44 : vector<16x128xf32>
    %46 = arith.truncf %45 : vector<16x128xf32> to vector<16x128xbf16>
    %c0_43 = arith.constant 0 : index
    %c2 = arith.constant 2 : index
    %c0_44 = arith.constant 0 : index
    %c0_45 = arith.constant 0 : index
    %47 = vector.load %arg5[%c0_43, %c2, %c0_44, %c0_45] : memref<1x16x16x128xbf16, #tpu.memory_space<vmem>>, vector<1x1x16x128xbf16>
    %48 = vector.shape_cast %47 : vector<1x1x16x128xbf16> to vector<16x128xbf16>
    %49 = vector.shape_cast %46 : vector<16x128xbf16> to vector<1x1x16x128xbf16>
    tpu.vector_store %arg5[%c0_43, %c2, %c0_44, %c0_45], %49 {strides = array<i32>} : memref<1x16x16x128xbf16, #tpu.memory_space<vmem>>, vector<1x1x16x128xbf16>,
    %c222 = arith.constant 222 : index
    %c0_46 = arith.constant 0 : index
    %50 = vector.load %arg6[%c222, %c0_46] : memref<1184x128xf32, #tpu.memory_space<vmem>>, vector<37x128xf32>
    %c259 = arith.constant 259 : index
    %c0_47 = arith.constant 0 : index
    %51 = vector.load %arg6[%c259, %c0_47] : memref<1184x128xf32, #tpu.memory_space<vmem>>, vector<37x128xf32>
    %52 = arith.maximumf %50, %51 : vector<37x128xf32>
    %c0_48 = arith.constant 0 : index
    %c0_49 = arith.constant 0 : index
    %53 = vector.load %arg7[%c0_48, %c0_49] : memref<37x128xf32, #tpu.memory_space<vmem>>, vector<37x128xf32>
    tpu.vector_store %arg7[%c0_48, %c0_49], %52 {strides = array<i32>} : memref<37x128xf32, #tpu.memory_space<vmem>>, vector<37x128xf32>,
    %c0_50 = arith.constant 0 : index
    %c0_51 = arith.constant 0 : index
    %54 = tpu.strided_load %arg7[%c0_50, %c0_51] {strides = array<i32: 2, 1>} : memref<37x128xf32, #tpu.memory_space<vmem>>, vector<16x128xf32>
    %c1_52 = arith.constant 1 : index
    %c0_53 = arith.constant 0 : index
    %55 = tpu.strided_load %arg7[%c1_52, %c0_53] {strides = array<i32: 2, 1>} : memref<37x128xf32, #tpu.memory_space<vmem>>, vector<16x128xf32>
    %56 = arith.maximumf %54, %55 : vector<16x128xf32>
    %57 = arith.addf %56, %7 : vector<16x128xf32>
    %cst_54 = arith.constant 0.000000e+00 : f32
    %58 = vector.broadcast %cst_54 : f32 to vector<16x128xf32>
    %59 = arith.maximumf %57, %58 : vector<16x128xf32>
    %60 = arith.truncf %59 : vector<16x128xf32> to vector<16x128xbf16>
    %c0_55 = arith.constant 0 : index
    %c3 = arith.constant 3 : index
    %c0_56 = arith.constant 0 : index
    %c0_57 = arith.constant 0 : index
    %61 = vector.load %arg5[%c0_55, %c3, %c0_56, %c0_57] : memref<1x16x16x128xbf16, #tpu.memory_space<vmem>>, vector<1x1x16x128xbf16>
    %62 = vector.shape_cast %61 : vector<1x1x16x128xbf16> to vector<16x128xbf16>
    %63 = vector.shape_cast %60 : vector<16x128xbf16> to vector<1x1x16x128xbf16>
    tpu.vector_store %arg5[%c0_55, %c3, %c0_56, %c0_57], %63 {strides = array<i32>} : memref<1x16x16x128xbf16, #tpu.memory_space<vmem>>, vector<1x1x16x128xbf16>,
    %c296 = arith.constant 296 : index
    %c0_58 = arith.constant 0 : index
    %64 = vector.load %arg6[%c296, %c0_58] : memref<1184x128xf32, #tpu.memory_space<vmem>>, vector<37x128xf32>
    %c333 = arith.constant 333 : index
    %c0_59 = arith.constant 0 : index
    %65 = vector.load %arg6[%c333, %c0_59] : memref<1184x128xf32, #tpu.memory_space<vmem>>, vector<37x128xf32>
    %66 = arith.maximumf %64, %65 : vector<37x128xf32>
    %c0_60 = arith.constant 0 : index
    %c0_61 = arith.constant 0 : index
    %67 = vector.load %arg7[%c0_60, %c0_61] : memref<37x128xf32, #tpu.memory_space<vmem>>, vector<37x128xf32>
    tpu.vector_store %arg7[%c0_60, %c0_61], %66 {strides = array<i32>} : memref<37x128xf32, #tpu.memory_space<vmem>>, vector<37x128xf32>,
    %c0_62 = arith.constant 0 : index
    %c0_63 = arith.constant 0 : index
    %68 = tpu.strided_load %arg7[%c0_62, %c0_63] {strides = array<i32: 2, 1>} : memref<37x128xf32, #tpu.memory_space<vmem>>, vector<16x128xf32>
    %c1_64 = arith.constant 1 : index
    %c0_65 = arith.constant 0 : index
    %69 = tpu.strided_load %arg7[%c1_64, %c0_65] {strides = array<i32: 2, 1>} : memref<37x128xf32, #tpu.memory_space<vmem>>, vector<16x128xf32>
    %70 = arith.maximumf %68, %69 : vector<16x128xf32>
    %71 = arith.addf %70, %7 : vector<16x128xf32>
    %cst_66 = arith.constant 0.000000e+00 : f32
    %72 = vector.broadcast %cst_66 : f32 to vector<16x128xf32>
    %73 = arith.maximumf %71, %72 : vector<16x128xf32>
    %74 = arith.truncf %73 : vector<16x128xf32> to vector<16x128xbf16>
    %c0_67 = arith.constant 0 : index
    %c4 = arith.constant 4 : index
    %c0_68 = arith.constant 0 : index
    %c0_69 = arith.constant 0 : index
    %75 = vector.load %arg5[%c0_67, %c4, %c0_68, %c0_69] : memref<1x16x16x128xbf16, #tpu.memory_space<vmem>>, vector<1x1x16x128xbf16>
    %76 = vector.shape_cast %75 : vector<1x1x16x128xbf16> to vector<16x128xbf16>
    %77 = vector.shape_cast %74 : vector<16x128xbf16> to vector<1x1x16x128xbf16>
    tpu.vector_store %arg5[%c0_67, %c4, %c0_68, %c0_69], %77 {strides = array<i32>} : memref<1x16x16x128xbf16, #tpu.memory_space<vmem>>, vector<1x1x16x128xbf16>,
    %c370 = arith.constant 370 : index
    %c0_70 = arith.constant 0 : index
    %78 = vector.load %arg6[%c370, %c0_70] : memref<1184x128xf32, #tpu.memory_space<vmem>>, vector<37x128xf32>
    %c407 = arith.constant 407 : index
    %c0_71 = arith.constant 0 : index
    %79 = vector.load %arg6[%c407, %c0_71] : memref<1184x128xf32, #tpu.memory_space<vmem>>, vector<37x128xf32>
    %80 = arith.maximumf %78, %79 : vector<37x128xf32>
    %c0_72 = arith.constant 0 : index
    %c0_73 = arith.constant 0 : index
    %81 = vector.load %arg7[%c0_72, %c0_73] : memref<37x128xf32, #tpu.memory_space<vmem>>, vector<37x128xf32>
    tpu.vector_store %arg7[%c0_72, %c0_73], %80 {strides = array<i32>} : memref<37x128xf32, #tpu.memory_space<vmem>>, vector<37x128xf32>,
    %c0_74 = arith.constant 0 : index
    %c0_75 = arith.constant 0 : index
    %82 = tpu.strided_load %arg7[%c0_74, %c0_75] {strides = array<i32: 2, 1>} : memref<37x128xf32, #tpu.memory_space<vmem>>, vector<16x128xf32>
    %c1_76 = arith.constant 1 : index
    %c0_77 = arith.constant 0 : index
    %83 = tpu.strided_load %arg7[%c1_76, %c0_77] {strides = array<i32: 2, 1>} : memref<37x128xf32, #tpu.memory_space<vmem>>, vector<16x128xf32>
    %84 = arith.maximumf %82, %83 : vector<16x128xf32>
    %85 = arith.addf %84, %7 : vector<16x128xf32>
    %cst_78 = arith.constant 0.000000e+00 : f32
    %86 = vector.broadcast %cst_78 : f32 to vector<16x128xf32>
    %87 = arith.maximumf %85, %86 : vector<16x128xf32>
    %88 = arith.truncf %87 : vector<16x128xf32> to vector<16x128xbf16>
    %c0_79 = arith.constant 0 : index
    %c5 = arith.constant 5 : index
    %c0_80 = arith.constant 0 : index
    %c0_81 = arith.constant 0 : index
    %89 = vector.load %arg5[%c0_79, %c5, %c0_80, %c0_81] : memref<1x16x16x128xbf16, #tpu.memory_space<vmem>>, vector<1x1x16x128xbf16>
    %90 = vector.shape_cast %89 : vector<1x1x16x128xbf16> to vector<16x128xbf16>
    %91 = vector.shape_cast %88 : vector<16x128xbf16> to vector<1x1x16x128xbf16>
    tpu.vector_store %arg5[%c0_79, %c5, %c0_80, %c0_81], %91 {strides = array<i32>} : memref<1x16x16x128xbf16, #tpu.memory_space<vmem>>, vector<1x1x16x128xbf16>,
    %c444 = arith.constant 444 : index
    %c0_82 = arith.constant 0 : index
    %92 = vector.load %arg6[%c444, %c0_82] : memref<1184x128xf32, #tpu.memory_space<vmem>>, vector<37x128xf32>
    %c481 = arith.constant 481 : index
    %c0_83 = arith.constant 0 : index
    %93 = vector.load %arg6[%c481, %c0_83] : memref<1184x128xf32, #tpu.memory_space<vmem>>, vector<37x128xf32>
    %94 = arith.maximumf %92, %93 : vector<37x128xf32>
    %c0_84 = arith.constant 0 : index
    %c0_85 = arith.constant 0 : index
    %95 = vector.load %arg7[%c0_84, %c0_85] : memref<37x128xf32, #tpu.memory_space<vmem>>, vector<37x128xf32>
    tpu.vector_store %arg7[%c0_84, %c0_85], %94 {strides = array<i32>} : memref<37x128xf32, #tpu.memory_space<vmem>>, vector<37x128xf32>,
    %c0_86 = arith.constant 0 : index
    %c0_87 = arith.constant 0 : index
    %96 = tpu.strided_load %arg7[%c0_86, %c0_87] {strides = array<i32: 2, 1>} : memref<37x128xf32, #tpu.memory_space<vmem>>, vector<16x128xf32>
    %c1_88 = arith.constant 1 : index
    %c0_89 = arith.constant 0 : index
    %97 = tpu.strided_load %arg7[%c1_88, %c0_89] {strides = array<i32: 2, 1>} : memref<37x128xf32, #tpu.memory_space<vmem>>, vector<16x128xf32>
    %98 = arith.maximumf %96, %97 : vector<16x128xf32>
    %99 = arith.addf %98, %7 : vector<16x128xf32>
    %cst_90 = arith.constant 0.000000e+00 : f32
    %100 = vector.broadcast %cst_90 : f32 to vector<16x128xf32>
    %101 = arith.maximumf %99, %100 : vector<16x128xf32>
    %102 = arith.truncf %101 : vector<16x128xf32> to vector<16x128xbf16>
    %c0_91 = arith.constant 0 : index
    %c6 = arith.constant 6 : index
    %c0_92 = arith.constant 0 : index
    %c0_93 = arith.constant 0 : index
    %103 = vector.load %arg5[%c0_91, %c6, %c0_92, %c0_93] : memref<1x16x16x128xbf16, #tpu.memory_space<vmem>>, vector<1x1x16x128xbf16>
    %104 = vector.shape_cast %103 : vector<1x1x16x128xbf16> to vector<16x128xbf16>
    %105 = vector.shape_cast %102 : vector<16x128xbf16> to vector<1x1x16x128xbf16>
    tpu.vector_store %arg5[%c0_91, %c6, %c0_92, %c0_93], %105 {strides = array<i32>} : memref<1x16x16x128xbf16, #tpu.memory_space<vmem>>, vector<1x1x16x128xbf16>,
    %c518 = arith.constant 518 : index
    %c0_94 = arith.constant 0 : index
    %106 = vector.load %arg6[%c518, %c0_94] : memref<1184x128xf32, #tpu.memory_space<vmem>>, vector<37x128xf32>
    %c555 = arith.constant 555 : index
    %c0_95 = arith.constant 0 : index
    %107 = vector.load %arg6[%c555, %c0_95] : memref<1184x128xf32, #tpu.memory_space<vmem>>, vector<37x128xf32>
    %108 = arith.maximumf %106, %107 : vector<37x128xf32>
    %c0_96 = arith.constant 0 : index
    %c0_97 = arith.constant 0 : index
    %109 = vector.load %arg7[%c0_96, %c0_97] : memref<37x128xf32, #tpu.memory_space<vmem>>, vector<37x128xf32>
    tpu.vector_store %arg7[%c0_96, %c0_97], %108 {strides = array<i32>} : memref<37x128xf32, #tpu.memory_space<vmem>>, vector<37x128xf32>,
    %c0_98 = arith.constant 0 : index
    %c0_99 = arith.constant 0 : index
    %110 = tpu.strided_load %arg7[%c0_98, %c0_99] {strides = array<i32: 2, 1>} : memref<37x128xf32, #tpu.memory_space<vmem>>, vector<16x128xf32>
    %c1_100 = arith.constant 1 : index
    %c0_101 = arith.constant 0 : index
    %111 = tpu.strided_load %arg7[%c1_100, %c0_101] {strides = array<i32: 2, 1>} : memref<37x128xf32, #tpu.memory_space<vmem>>, vector<16x128xf32>
    %112 = arith.maximumf %110, %111 : vector<16x128xf32>
    %113 = arith.addf %112, %7 : vector<16x128xf32>
    %cst_102 = arith.constant 0.000000e+00 : f32
    %114 = vector.broadcast %cst_102 : f32 to vector<16x128xf32>
    %115 = arith.maximumf %113, %114 : vector<16x128xf32>
    %116 = arith.truncf %115 : vector<16x128xf32> to vector<16x128xbf16>
    %c0_103 = arith.constant 0 : index
    %c7 = arith.constant 7 : index
    %c0_104 = arith.constant 0 : index
    %c0_105 = arith.constant 0 : index
    %117 = vector.load %arg5[%c0_103, %c7, %c0_104, %c0_105] : memref<1x16x16x128xbf16, #tpu.memory_space<vmem>>, vector<1x1x16x128xbf16>
    %118 = vector.shape_cast %117 : vector<1x1x16x128xbf16> to vector<16x128xbf16>
    %119 = vector.shape_cast %116 : vector<16x128xbf16> to vector<1x1x16x128xbf16>
    tpu.vector_store %arg5[%c0_103, %c7, %c0_104, %c0_105], %119 {strides = array<i32>} : memref<1x16x16x128xbf16, #tpu.memory_space<vmem>>, vector<1x1x16x128xbf16>,
    %c592 = arith.constant 592 : index
    %c0_106 = arith.constant 0 : index
    %120 = vector.load %arg6[%c592, %c0_106] : memref<1184x128xf32, #tpu.memory_space<vmem>>, vector<37x128xf32>
    %c629 = arith.constant 629 : index
    %c0_107 = arith.constant 0 : index
    %121 = vector.load %arg6[%c629, %c0_107] : memref<1184x128xf32, #tpu.memory_space<vmem>>, vector<37x128xf32>
    %122 = arith.maximumf %120, %121 : vector<37x128xf32>
    %c0_108 = arith.constant 0 : index
    %c0_109 = arith.constant 0 : index
    %123 = vector.load %arg7[%c0_108, %c0_109] : memref<37x128xf32, #tpu.memory_space<vmem>>, vector<37x128xf32>
    tpu.vector_store %arg7[%c0_108, %c0_109], %122 {strides = array<i32>} : memref<37x128xf32, #tpu.memory_space<vmem>>, vector<37x128xf32>,
    %c0_110 = arith.constant 0 : index
    %c0_111 = arith.constant 0 : index
    %124 = tpu.strided_load %arg7[%c0_110, %c0_111] {strides = array<i32: 2, 1>} : memref<37x128xf32, #tpu.memory_space<vmem>>, vector<16x128xf32>
    %c1_112 = arith.constant 1 : index
    %c0_113 = arith.constant 0 : index
    %125 = tpu.strided_load %arg7[%c1_112, %c0_113] {strides = array<i32: 2, 1>} : memref<37x128xf32, #tpu.memory_space<vmem>>, vector<16x128xf32>
    %126 = arith.maximumf %124, %125 : vector<16x128xf32>
    %127 = arith.addf %126, %7 : vector<16x128xf32>
    %cst_114 = arith.constant 0.000000e+00 : f32
    %128 = vector.broadcast %cst_114 : f32 to vector<16x128xf32>
    %129 = arith.maximumf %127, %128 : vector<16x128xf32>
    %130 = arith.truncf %129 : vector<16x128xf32> to vector<16x128xbf16>
    %c0_115 = arith.constant 0 : index
    %c8 = arith.constant 8 : index
    %c0_116 = arith.constant 0 : index
    %c0_117 = arith.constant 0 : index
    %131 = vector.load %arg5[%c0_115, %c8, %c0_116, %c0_117] : memref<1x16x16x128xbf16, #tpu.memory_space<vmem>>, vector<1x1x16x128xbf16>
    %132 = vector.shape_cast %131 : vector<1x1x16x128xbf16> to vector<16x128xbf16>
    %133 = vector.shape_cast %130 : vector<16x128xbf16> to vector<1x1x16x128xbf16>
    tpu.vector_store %arg5[%c0_115, %c8, %c0_116, %c0_117], %133 {strides = array<i32>} : memref<1x16x16x128xbf16, #tpu.memory_space<vmem>>, vector<1x1x16x128xbf16>,
    %c666 = arith.constant 666 : index
    %c0_118 = arith.constant 0 : index
    %134 = vector.load %arg6[%c666, %c0_118] : memref<1184x128xf32, #tpu.memory_space<vmem>>, vector<37x128xf32>
    %c703 = arith.constant 703 : index
    %c0_119 = arith.constant 0 : index
    %135 = vector.load %arg6[%c703, %c0_119] : memref<1184x128xf32, #tpu.memory_space<vmem>>, vector<37x128xf32>
    %136 = arith.maximumf %134, %135 : vector<37x128xf32>
    %c0_120 = arith.constant 0 : index
    %c0_121 = arith.constant 0 : index
    %137 = vector.load %arg7[%c0_120, %c0_121] : memref<37x128xf32, #tpu.memory_space<vmem>>, vector<37x128xf32>
    tpu.vector_store %arg7[%c0_120, %c0_121], %136 {strides = array<i32>} : memref<37x128xf32, #tpu.memory_space<vmem>>, vector<37x128xf32>,
    %c0_122 = arith.constant 0 : index
    %c0_123 = arith.constant 0 : index
    %138 = tpu.strided_load %arg7[%c0_122, %c0_123] {strides = array<i32: 2, 1>} : memref<37x128xf32, #tpu.memory_space<vmem>>, vector<16x128xf32>
    %c1_124 = arith.constant 1 : index
    %c0_125 = arith.constant 0 : index
    %139 = tpu.strided_load %arg7[%c1_124, %c0_125] {strides = array<i32: 2, 1>} : memref<37x128xf32, #tpu.memory_space<vmem>>, vector<16x128xf32>
    %140 = arith.maximumf %138, %139 : vector<16x128xf32>
    %141 = arith.addf %140, %7 : vector<16x128xf32>
    %cst_126 = arith.constant 0.000000e+00 : f32
    %142 = vector.broadcast %cst_126 : f32 to vector<16x128xf32>
    %143 = arith.maximumf %141, %142 : vector<16x128xf32>
    %144 = arith.truncf %143 : vector<16x128xf32> to vector<16x128xbf16>
    %c0_127 = arith.constant 0 : index
    %c9 = arith.constant 9 : index
    %c0_128 = arith.constant 0 : index
    %c0_129 = arith.constant 0 : index
    %145 = vector.load %arg5[%c0_127, %c9, %c0_128, %c0_129] : memref<1x16x16x128xbf16, #tpu.memory_space<vmem>>, vector<1x1x16x128xbf16>
    %146 = vector.shape_cast %145 : vector<1x1x16x128xbf16> to vector<16x128xbf16>
    %147 = vector.shape_cast %144 : vector<16x128xbf16> to vector<1x1x16x128xbf16>
    tpu.vector_store %arg5[%c0_127, %c9, %c0_128, %c0_129], %147 {strides = array<i32>} : memref<1x16x16x128xbf16, #tpu.memory_space<vmem>>, vector<1x1x16x128xbf16>,
    %c740 = arith.constant 740 : index
    %c0_130 = arith.constant 0 : index
    %148 = vector.load %arg6[%c740, %c0_130] : memref<1184x128xf32, #tpu.memory_space<vmem>>, vector<37x128xf32>
    %c777 = arith.constant 777 : index
    %c0_131 = arith.constant 0 : index
    %149 = vector.load %arg6[%c777, %c0_131] : memref<1184x128xf32, #tpu.memory_space<vmem>>, vector<37x128xf32>
    %150 = arith.maximumf %148, %149 : vector<37x128xf32>
    %c0_132 = arith.constant 0 : index
    %c0_133 = arith.constant 0 : index
    %151 = vector.load %arg7[%c0_132, %c0_133] : memref<37x128xf32, #tpu.memory_space<vmem>>, vector<37x128xf32>
    tpu.vector_store %arg7[%c0_132, %c0_133], %150 {strides = array<i32>} : memref<37x128xf32, #tpu.memory_space<vmem>>, vector<37x128xf32>,
    %c0_134 = arith.constant 0 : index
    %c0_135 = arith.constant 0 : index
    %152 = tpu.strided_load %arg7[%c0_134, %c0_135] {strides = array<i32: 2, 1>} : memref<37x128xf32, #tpu.memory_space<vmem>>, vector<16x128xf32>
    %c1_136 = arith.constant 1 : index
    %c0_137 = arith.constant 0 : index
    %153 = tpu.strided_load %arg7[%c1_136, %c0_137] {strides = array<i32: 2, 1>} : memref<37x128xf32, #tpu.memory_space<vmem>>, vector<16x128xf32>
    %154 = arith.maximumf %152, %153 : vector<16x128xf32>
    %155 = arith.addf %154, %7 : vector<16x128xf32>
    %cst_138 = arith.constant 0.000000e+00 : f32
    %156 = vector.broadcast %cst_138 : f32 to vector<16x128xf32>
    %157 = arith.maximumf %155, %156 : vector<16x128xf32>
    %158 = arith.truncf %157 : vector<16x128xf32> to vector<16x128xbf16>
    %c0_139 = arith.constant 0 : index
    %c10 = arith.constant 10 : index
    %c0_140 = arith.constant 0 : index
    %c0_141 = arith.constant 0 : index
    %159 = vector.load %arg5[%c0_139, %c10, %c0_140, %c0_141] : memref<1x16x16x128xbf16, #tpu.memory_space<vmem>>, vector<1x1x16x128xbf16>
    %160 = vector.shape_cast %159 : vector<1x1x16x128xbf16> to vector<16x128xbf16>
    %161 = vector.shape_cast %158 : vector<16x128xbf16> to vector<1x1x16x128xbf16>
    tpu.vector_store %arg5[%c0_139, %c10, %c0_140, %c0_141], %161 {strides = array<i32>} : memref<1x16x16x128xbf16, #tpu.memory_space<vmem>>, vector<1x1x16x128xbf16>,
    %c814 = arith.constant 814 : index
    %c0_142 = arith.constant 0 : index
    %162 = vector.load %arg6[%c814, %c0_142] : memref<1184x128xf32, #tpu.memory_space<vmem>>, vector<37x128xf32>
    %c851 = arith.constant 851 : index
    %c0_143 = arith.constant 0 : index
    %163 = vector.load %arg6[%c851, %c0_143] : memref<1184x128xf32, #tpu.memory_space<vmem>>, vector<37x128xf32>
    %164 = arith.maximumf %162, %163 : vector<37x128xf32>
    %c0_144 = arith.constant 0 : index
    %c0_145 = arith.constant 0 : index
    %165 = vector.load %arg7[%c0_144, %c0_145] : memref<37x128xf32, #tpu.memory_space<vmem>>, vector<37x128xf32>
    tpu.vector_store %arg7[%c0_144, %c0_145], %164 {strides = array<i32>} : memref<37x128xf32, #tpu.memory_space<vmem>>, vector<37x128xf32>,
    %c0_146 = arith.constant 0 : index
    %c0_147 = arith.constant 0 : index
    %166 = tpu.strided_load %arg7[%c0_146, %c0_147] {strides = array<i32: 2, 1>} : memref<37x128xf32, #tpu.memory_space<vmem>>, vector<16x128xf32>
    %c1_148 = arith.constant 1 : index
    %c0_149 = arith.constant 0 : index
    %167 = tpu.strided_load %arg7[%c1_148, %c0_149] {strides = array<i32: 2, 1>} : memref<37x128xf32, #tpu.memory_space<vmem>>, vector<16x128xf32>
    %168 = arith.maximumf %166, %167 : vector<16x128xf32>
    %169 = arith.addf %168, %7 : vector<16x128xf32>
    %cst_150 = arith.constant 0.000000e+00 : f32
    %170 = vector.broadcast %cst_150 : f32 to vector<16x128xf32>
    %171 = arith.maximumf %169, %170 : vector<16x128xf32>
    %172 = arith.truncf %171 : vector<16x128xf32> to vector<16x128xbf16>
    %c0_151 = arith.constant 0 : index
    %c11 = arith.constant 11 : index
    %c0_152 = arith.constant 0 : index
    %c0_153 = arith.constant 0 : index
    %173 = vector.load %arg5[%c0_151, %c11, %c0_152, %c0_153] : memref<1x16x16x128xbf16, #tpu.memory_space<vmem>>, vector<1x1x16x128xbf16>
    %174 = vector.shape_cast %173 : vector<1x1x16x128xbf16> to vector<16x128xbf16>
    %175 = vector.shape_cast %172 : vector<16x128xbf16> to vector<1x1x16x128xbf16>
    tpu.vector_store %arg5[%c0_151, %c11, %c0_152, %c0_153], %175 {strides = array<i32>} : memref<1x16x16x128xbf16, #tpu.memory_space<vmem>>, vector<1x1x16x128xbf16>,
    %c888 = arith.constant 888 : index
    %c0_154 = arith.constant 0 : index
    %176 = vector.load %arg6[%c888, %c0_154] : memref<1184x128xf32, #tpu.memory_space<vmem>>, vector<37x128xf32>
    %c925 = arith.constant 925 : index
    %c0_155 = arith.constant 0 : index
    %177 = vector.load %arg6[%c925, %c0_155] : memref<1184x128xf32, #tpu.memory_space<vmem>>, vector<37x128xf32>
    %178 = arith.maximumf %176, %177 : vector<37x128xf32>
    %c0_156 = arith.constant 0 : index
    %c0_157 = arith.constant 0 : index
    %179 = vector.load %arg7[%c0_156, %c0_157] : memref<37x128xf32, #tpu.memory_space<vmem>>, vector<37x128xf32>
    tpu.vector_store %arg7[%c0_156, %c0_157], %178 {strides = array<i32>} : memref<37x128xf32, #tpu.memory_space<vmem>>, vector<37x128xf32>,
    %c0_158 = arith.constant 0 : index
    %c0_159 = arith.constant 0 : index
    %180 = tpu.strided_load %arg7[%c0_158, %c0_159] {strides = array<i32: 2, 1>} : memref<37x128xf32, #tpu.memory_space<vmem>>, vector<16x128xf32>
    %c1_160 = arith.constant 1 : index
    %c0_161 = arith.constant 0 : index
    %181 = tpu.strided_load %arg7[%c1_160, %c0_161] {strides = array<i32: 2, 1>} : memref<37x128xf32, #tpu.memory_space<vmem>>, vector<16x128xf32>
    %182 = arith.maximumf %180, %181 : vector<16x128xf32>
    %183 = arith.addf %182, %7 : vector<16x128xf32>
    %cst_162 = arith.constant 0.000000e+00 : f32
    %184 = vector.broadcast %cst_162 : f32 to vector<16x128xf32>
    %185 = arith.maximumf %183, %184 : vector<16x128xf32>
    %186 = arith.truncf %185 : vector<16x128xf32> to vector<16x128xbf16>
    %c0_163 = arith.constant 0 : index
    %c12 = arith.constant 12 : index
    %c0_164 = arith.constant 0 : index
    %c0_165 = arith.constant 0 : index
    %187 = vector.load %arg5[%c0_163, %c12, %c0_164, %c0_165] : memref<1x16x16x128xbf16, #tpu.memory_space<vmem>>, vector<1x1x16x128xbf16>
    %188 = vector.shape_cast %187 : vector<1x1x16x128xbf16> to vector<16x128xbf16>
    %189 = vector.shape_cast %186 : vector<16x128xbf16> to vector<1x1x16x128xbf16>
    tpu.vector_store %arg5[%c0_163, %c12, %c0_164, %c0_165], %189 {strides = array<i32>} : memref<1x16x16x128xbf16, #tpu.memory_space<vmem>>, vector<1x1x16x128xbf16>,
    %c962 = arith.constant 962 : index
    %c0_166 = arith.constant 0 : index
    %190 = vector.load %arg6[%c962, %c0_166] : memref<1184x128xf32, #tpu.memory_space<vmem>>, vector<37x128xf32>
    %c999 = arith.constant 999 : index
    %c0_167 = arith.constant 0 : index
    %191 = vector.load %arg6[%c999, %c0_167] : memref<1184x128xf32, #tpu.memory_space<vmem>>, vector<37x128xf32>
    %192 = arith.maximumf %190, %191 : vector<37x128xf32>
    %c0_168 = arith.constant 0 : index
    %c0_169 = arith.constant 0 : index
    %193 = vector.load %arg7[%c0_168, %c0_169] : memref<37x128xf32, #tpu.memory_space<vmem>>, vector<37x128xf32>
    tpu.vector_store %arg7[%c0_168, %c0_169], %192 {strides = array<i32>} : memref<37x128xf32, #tpu.memory_space<vmem>>, vector<37x128xf32>,
    %c0_170 = arith.constant 0 : index
    %c0_171 = arith.constant 0 : index
    %194 = tpu.strided_load %arg7[%c0_170, %c0_171] {strides = array<i32: 2, 1>} : memref<37x128xf32, #tpu.memory_space<vmem>>, vector<16x128xf32>
    %c1_172 = arith.constant 1 : index
    %c0_173 = arith.constant 0 : index
    %195 = tpu.strided_load %arg7[%c1_172, %c0_173] {strides = array<i32: 2, 1>} : memref<37x128xf32, #tpu.memory_space<vmem>>, vector<16x128xf32>
    %196 = arith.maximumf %194, %195 : vector<16x128xf32>
    %197 = arith.addf %196, %7 : vector<16x128xf32>
    %cst_174 = arith.constant 0.000000e+00 : f32
    %198 = vector.broadcast %cst_174 : f32 to vector<16x128xf32>
    %199 = arith.maximumf %197, %198 : vector<16x128xf32>
    %200 = arith.truncf %199 : vector<16x128xf32> to vector<16x128xbf16>
    %c0_175 = arith.constant 0 : index
    %c13 = arith.constant 13 : index
    %c0_176 = arith.constant 0 : index
    %c0_177 = arith.constant 0 : index
    %201 = vector.load %arg5[%c0_175, %c13, %c0_176, %c0_177] : memref<1x16x16x128xbf16, #tpu.memory_space<vmem>>, vector<1x1x16x128xbf16>
    %202 = vector.shape_cast %201 : vector<1x1x16x128xbf16> to vector<16x128xbf16>
    %203 = vector.shape_cast %200 : vector<16x128xbf16> to vector<1x1x16x128xbf16>
    tpu.vector_store %arg5[%c0_175, %c13, %c0_176, %c0_177], %203 {strides = array<i32>} : memref<1x16x16x128xbf16, #tpu.memory_space<vmem>>, vector<1x1x16x128xbf16>,
    %c1036 = arith.constant 1036 : index
    %c0_178 = arith.constant 0 : index
    %204 = vector.load %arg6[%c1036, %c0_178] : memref<1184x128xf32, #tpu.memory_space<vmem>>, vector<37x128xf32>
    %c1073 = arith.constant 1073 : index
    %c0_179 = arith.constant 0 : index
    %205 = vector.load %arg6[%c1073, %c0_179] : memref<1184x128xf32, #tpu.memory_space<vmem>>, vector<37x128xf32>
    %206 = arith.maximumf %204, %205 : vector<37x128xf32>
    %c0_180 = arith.constant 0 : index
    %c0_181 = arith.constant 0 : index
    %207 = vector.load %arg7[%c0_180, %c0_181] : memref<37x128xf32, #tpu.memory_space<vmem>>, vector<37x128xf32>
    tpu.vector_store %arg7[%c0_180, %c0_181], %206 {strides = array<i32>} : memref<37x128xf32, #tpu.memory_space<vmem>>, vector<37x128xf32>,
    %c0_182 = arith.constant 0 : index
    %c0_183 = arith.constant 0 : index
    %208 = tpu.strided_load %arg7[%c0_182, %c0_183] {strides = array<i32: 2, 1>} : memref<37x128xf32, #tpu.memory_space<vmem>>, vector<16x128xf32>
    %c1_184 = arith.constant 1 : index
    %c0_185 = arith.constant 0 : index
    %209 = tpu.strided_load %arg7[%c1_184, %c0_185] {strides = array<i32: 2, 1>} : memref<37x128xf32, #tpu.memory_space<vmem>>, vector<16x128xf32>
    %210 = arith.maximumf %208, %209 : vector<16x128xf32>
    %211 = arith.addf %210, %7 : vector<16x128xf32>
    %cst_186 = arith.constant 0.000000e+00 : f32
    %212 = vector.broadcast %cst_186 : f32 to vector<16x128xf32>
    %213 = arith.maximumf %211, %212 : vector<16x128xf32>
    %214 = arith.truncf %213 : vector<16x128xf32> to vector<16x128xbf16>
    %c0_187 = arith.constant 0 : index
    %c14 = arith.constant 14 : index
    %c0_188 = arith.constant 0 : index
    %c0_189 = arith.constant 0 : index
    %215 = vector.load %arg5[%c0_187, %c14, %c0_188, %c0_189] : memref<1x16x16x128xbf16, #tpu.memory_space<vmem>>, vector<1x1x16x128xbf16>
    %216 = vector.shape_cast %215 : vector<1x1x16x128xbf16> to vector<16x128xbf16>
    %217 = vector.shape_cast %214 : vector<16x128xbf16> to vector<1x1x16x128xbf16>
    tpu.vector_store %arg5[%c0_187, %c14, %c0_188, %c0_189], %217 {strides = array<i32>} : memref<1x16x16x128xbf16, #tpu.memory_space<vmem>>, vector<1x1x16x128xbf16>,
    %c1110 = arith.constant 1110 : index
    %c0_190 = arith.constant 0 : index
    %218 = vector.load %arg6[%c1110, %c0_190] : memref<1184x128xf32, #tpu.memory_space<vmem>>, vector<37x128xf32>
    %c1147 = arith.constant 1147 : index
    %c0_191 = arith.constant 0 : index
    %219 = vector.load %arg6[%c1147, %c0_191] : memref<1184x128xf32, #tpu.memory_space<vmem>>, vector<37x128xf32>
    %220 = arith.maximumf %218, %219 : vector<37x128xf32>
    %c0_192 = arith.constant 0 : index
    %c0_193 = arith.constant 0 : index
    %221 = vector.load %arg7[%c0_192, %c0_193] : memref<37x128xf32, #tpu.memory_space<vmem>>, vector<37x128xf32>
    tpu.vector_store %arg7[%c0_192, %c0_193], %220 {strides = array<i32>} : memref<37x128xf32, #tpu.memory_space<vmem>>, vector<37x128xf32>,
    %c0_194 = arith.constant 0 : index
    %c0_195 = arith.constant 0 : index
    %222 = tpu.strided_load %arg7[%c0_194, %c0_195] {strides = array<i32: 2, 1>} : memref<37x128xf32, #tpu.memory_space<vmem>>, vector<16x128xf32>
    %c1_196 = arith.constant 1 : index
    %c0_197 = arith.constant 0 : index
    %223 = tpu.strided_load %arg7[%c1_196, %c0_197] {strides = array<i32: 2, 1>} : memref<37x128xf32, #tpu.memory_space<vmem>>, vector<16x128xf32>
    %224 = arith.maximumf %222, %223 : vector<16x128xf32>
    %225 = arith.addf %224, %7 : vector<16x128xf32>
    %cst_198 = arith.constant 0.000000e+00 : f32
    %226 = vector.broadcast %cst_198 : f32 to vector<16x128xf32>
    %227 = arith.maximumf %225, %226 : vector<16x128xf32>
    %228 = arith.truncf %227 : vector<16x128xf32> to vector<16x128xbf16>
    %c0_199 = arith.constant 0 : index
    %c15 = arith.constant 15 : index
    %c0_200 = arith.constant 0 : index
    %c0_201 = arith.constant 0 : index
    %229 = vector.load %arg5[%c0_199, %c15, %c0_200, %c0_201] : memref<1x16x16x128xbf16, #tpu.memory_space<vmem>>, vector<1x1x16x128xbf16>
    %230 = vector.shape_cast %229 : vector<1x1x16x128xbf16> to vector<16x128xbf16>
    %231 = vector.shape_cast %228 : vector<16x128xbf16> to vector<1x1x16x128xbf16>
    tpu.vector_store %arg5[%c0_199, %c15, %c0_200, %c0_201], %231 {strides = array<i32>} : memref<1x16x16x128xbf16, #tpu.memory_space<vmem>>, vector<1x1x16x128xbf16>,
    return
  }
  func.func @transform_0(%arg0: i32, %arg1: i32) -> (i32, i32, i32) {
    %c0_i32 = arith.constant 0 : i32
    %c0_i32_0 = arith.constant 0 : i32
    return %arg0, %arg1, %c0_i32 : i32, i32, i32
  }
  func.func @transform_1(%arg0: i32, %arg1: i32) -> (i32, i32) {
    %c0_i32 = arith.constant 0 : i32
    %c0_i32_0 = arith.constant 0 : i32
    %c0_i32_1 = arith.constant 0 : i32
    return %c0_i32, %c0_i32_0 : i32, i32
  }
  func.func @transform_2(%arg0: i32, %arg1: i32) -> (i32, i32) {
    %c0_i32 = arith.constant 0 : i32
    %c0_i32_0 = arith.constant 0 : i32
    %c0_i32_1 = arith.constant 0 : i32
    return %c0_i32, %c0_i32_0 : i32, i32
  }
  func.func @transform_3(%arg0: i32, %arg1: i32) -> (i32, i32, i32, i32) {
    %c0_i32 = arith.constant 0 : i32
    %c0_i32_0 = arith.constant 0 : i32
    %c0_i32_1 = arith.constant 0 : i32
    return %arg0, %arg1, %c0_i32, %c0_i32_0 : i32, i32, i32, i32
  }
}

module attributes {stable_mosaic.version = 11 : i64} {
  func.func @kernel(%arg0: i32, %arg1: i32, %arg2: memref<1x192x640xbf16, #tpu.memory_space<vmem>>, %arg3: memref<640x128xbf16, #tpu.memory_space<vmem>>, %arg4: memref<1x128xf32, #tpu.memory_space<vmem>>, %arg5: memref<1x6x6x128xbf16, #tpu.memory_space<vmem>>, %arg6: memref<192x128xf32, #tpu.memory_space<vmem>>, %arg7: memref<16x128xf32, #tpu.memory_space<vmem>>) attributes {dimension_semantics = [#tpu.dimension_semantics<parallel>, #tpu.dimension_semantics<parallel>], iteration_bounds = array<i64: 2, 1>, scalar_prefetch = 0 : i64, scratch_operands = 2 : i64, tpu.core_type = #tpu.core_type<tc>, window_params = [{transform_indices = @transform_0, window_bounds = array<i64: 1, 192, 640>}, {pipeline_mode = #tpu.pipeline_mode<synchronous>, transform_indices = @transform_1, window_bounds = array<i64: 640, 128>}, {pipeline_mode = #tpu.pipeline_mode<synchronous>, transform_indices = @transform_2, window_bounds = array<i64: 1, 128>}, {transform_indices = @transform_3, window_bounds = array<i64: 1, 6, 6, 128>}]} {
    %c0 = arith.constant 0 : index
    %c0_0 = arith.constant 0 : index
    %c0_1 = arith.constant 0 : index
    %0 = vector.load %arg2[%c0, %c0_0, %c0_1] : memref<1x192x640xbf16, #tpu.memory_space<vmem>>, vector<1x192x640xbf16>
    %1 = vector.shape_cast %0 : vector<1x192x640xbf16> to vector<192x640xbf16>
    %c0_2 = arith.constant 0 : index
    %c0_3 = arith.constant 0 : index
    %2 = vector.load %arg3[%c0_2, %c0_3] : memref<640x128xbf16, #tpu.memory_space<vmem>>, vector<640x128xbf16>
    %cst = arith.constant dense<0.000000e+00> : vector<192x128xf32>
    %3 = tpu.matmul %1, %2, %cst {dimension_numbers = #tpu.dot_dimension_numbers<[1], [0], [0], [1], [0, 0, 1, 1], [], []>} : vector<192x640xbf16>, vector<640x128xbf16>, vector<192x128xf32> -> vector<192x128xf32>
    %c0_4 = arith.constant 0 : index
    %c0_5 = arith.constant 0 : index
    %4 = vector.load %arg6[%c0_4, %c0_5] : memref<192x128xf32, #tpu.memory_space<vmem>>, vector<192x128xf32>
    tpu.vector_store %arg6[%c0_4, %c0_5], %3 {strides = array<i32>} : memref<192x128xf32, #tpu.memory_space<vmem>>, vector<192x128xf32>,
    %c0_6 = arith.constant 0 : index
    %c0_7 = arith.constant 0 : index
    %5 = vector.load %arg4[%c0_6, %c0_7] : memref<1x128xf32, #tpu.memory_space<vmem>>, vector<1x128xf32>
    %6 = vector.shape_cast %5 : vector<1x128xf32> to vector<1x128xf32>
    %7 = vector.broadcast %6 : vector<1x128xf32> to vector<6x128xf32>
    %c0_8 = arith.constant 0 : index
    %c0_9 = arith.constant 0 : index
    %8 = vector.load %arg6[%c0_8, %c0_9] : memref<192x128xf32, #tpu.memory_space<vmem>>, vector<16x128xf32>
    %c16 = arith.constant 16 : index
    %c0_10 = arith.constant 0 : index
    %9 = vector.load %arg6[%c16, %c0_10] : memref<192x128xf32, #tpu.memory_space<vmem>>, vector<16x128xf32>
    %10 = arith.maximumf %8, %9 : vector<16x128xf32>
    %c0_11 = arith.constant 0 : index
    %c0_12 = arith.constant 0 : index
    %11 = vector.load %arg7[%c0_11, %c0_12] : memref<16x128xf32, #tpu.memory_space<vmem>>, vector<16x128xf32>
    tpu.vector_store %arg7[%c0_11, %c0_12], %10 {strides = array<i32>} : memref<16x128xf32, #tpu.memory_space<vmem>>, vector<16x128xf32>,
    %c0_13 = arith.constant 0 : index
    %c0_14 = arith.constant 0 : index
    %12 = tpu.strided_load %arg7[%c0_13, %c0_14] {strides = array<i32: 2, 1>} : memref<16x128xf32, #tpu.memory_space<vmem>>, vector<6x128xf32>
    %c1 = arith.constant 1 : index
    %c0_15 = arith.constant 0 : index
    %13 = tpu.strided_load %arg7[%c1, %c0_15] {strides = array<i32: 2, 1>} : memref<16x128xf32, #tpu.memory_space<vmem>>, vector<6x128xf32>
    %14 = arith.maximumf %12, %13 : vector<6x128xf32>
    %15 = arith.addf %14, %7 : vector<6x128xf32>
    %cst_16 = arith.constant 0.000000e+00 : f32
    %16 = vector.broadcast %cst_16 : f32 to vector<6x128xf32>
    %17 = arith.maximumf %15, %16 : vector<6x128xf32>
    %18 = arith.truncf %17 : vector<6x128xf32> to vector<6x128xbf16>
    %c0_17 = arith.constant 0 : index
    %c0_18 = arith.constant 0 : index
    %c0_19 = arith.constant 0 : index
    %c0_20 = arith.constant 0 : index
    %19 = vector.load %arg5[%c0_17, %c0_18, %c0_19, %c0_20] : memref<1x6x6x128xbf16, #tpu.memory_space<vmem>>, vector<1x1x6x128xbf16>
    %20 = vector.shape_cast %19 : vector<1x1x6x128xbf16> to vector<6x128xbf16>
    %21 = vector.shape_cast %18 : vector<6x128xbf16> to vector<1x1x6x128xbf16>
    tpu.vector_store %arg5[%c0_17, %c0_18, %c0_19, %c0_20], %21 {strides = array<i32>} : memref<1x6x6x128xbf16, #tpu.memory_space<vmem>>, vector<1x1x6x128xbf16>,
    %c32 = arith.constant 32 : index
    %c0_21 = arith.constant 0 : index
    %22 = vector.load %arg6[%c32, %c0_21] : memref<192x128xf32, #tpu.memory_space<vmem>>, vector<16x128xf32>
    %c48 = arith.constant 48 : index
    %c0_22 = arith.constant 0 : index
    %23 = vector.load %arg6[%c48, %c0_22] : memref<192x128xf32, #tpu.memory_space<vmem>>, vector<16x128xf32>
    %24 = arith.maximumf %22, %23 : vector<16x128xf32>
    %c0_23 = arith.constant 0 : index
    %c0_24 = arith.constant 0 : index
    %25 = vector.load %arg7[%c0_23, %c0_24] : memref<16x128xf32, #tpu.memory_space<vmem>>, vector<16x128xf32>
    tpu.vector_store %arg7[%c0_23, %c0_24], %24 {strides = array<i32>} : memref<16x128xf32, #tpu.memory_space<vmem>>, vector<16x128xf32>,
    %c0_25 = arith.constant 0 : index
    %c0_26 = arith.constant 0 : index
    %26 = tpu.strided_load %arg7[%c0_25, %c0_26] {strides = array<i32: 2, 1>} : memref<16x128xf32, #tpu.memory_space<vmem>>, vector<6x128xf32>
    %c1_27 = arith.constant 1 : index
    %c0_28 = arith.constant 0 : index
    %27 = tpu.strided_load %arg7[%c1_27, %c0_28] {strides = array<i32: 2, 1>} : memref<16x128xf32, #tpu.memory_space<vmem>>, vector<6x128xf32>
    %28 = arith.maximumf %26, %27 : vector<6x128xf32>
    %29 = arith.addf %28, %7 : vector<6x128xf32>
    %cst_29 = arith.constant 0.000000e+00 : f32
    %30 = vector.broadcast %cst_29 : f32 to vector<6x128xf32>
    %31 = arith.maximumf %29, %30 : vector<6x128xf32>
    %32 = arith.truncf %31 : vector<6x128xf32> to vector<6x128xbf16>
    %c0_30 = arith.constant 0 : index
    %c1_31 = arith.constant 1 : index
    %c0_32 = arith.constant 0 : index
    %c0_33 = arith.constant 0 : index
    %33 = vector.load %arg5[%c0_30, %c1_31, %c0_32, %c0_33] : memref<1x6x6x128xbf16, #tpu.memory_space<vmem>>, vector<1x1x6x128xbf16>
    %34 = vector.shape_cast %33 : vector<1x1x6x128xbf16> to vector<6x128xbf16>
    %35 = vector.shape_cast %32 : vector<6x128xbf16> to vector<1x1x6x128xbf16>
    tpu.vector_store %arg5[%c0_30, %c1_31, %c0_32, %c0_33], %35 {strides = array<i32>} : memref<1x6x6x128xbf16, #tpu.memory_space<vmem>>, vector<1x1x6x128xbf16>,
    %c64 = arith.constant 64 : index
    %c0_34 = arith.constant 0 : index
    %36 = vector.load %arg6[%c64, %c0_34] : memref<192x128xf32, #tpu.memory_space<vmem>>, vector<16x128xf32>
    %c80 = arith.constant 80 : index
    %c0_35 = arith.constant 0 : index
    %37 = vector.load %arg6[%c80, %c0_35] : memref<192x128xf32, #tpu.memory_space<vmem>>, vector<16x128xf32>
    %38 = arith.maximumf %36, %37 : vector<16x128xf32>
    %c0_36 = arith.constant 0 : index
    %c0_37 = arith.constant 0 : index
    %39 = vector.load %arg7[%c0_36, %c0_37] : memref<16x128xf32, #tpu.memory_space<vmem>>, vector<16x128xf32>
    tpu.vector_store %arg7[%c0_36, %c0_37], %38 {strides = array<i32>} : memref<16x128xf32, #tpu.memory_space<vmem>>, vector<16x128xf32>,
    %c0_38 = arith.constant 0 : index
    %c0_39 = arith.constant 0 : index
    %40 = tpu.strided_load %arg7[%c0_38, %c0_39] {strides = array<i32: 2, 1>} : memref<16x128xf32, #tpu.memory_space<vmem>>, vector<6x128xf32>
    %c1_40 = arith.constant 1 : index
    %c0_41 = arith.constant 0 : index
    %41 = tpu.strided_load %arg7[%c1_40, %c0_41] {strides = array<i32: 2, 1>} : memref<16x128xf32, #tpu.memory_space<vmem>>, vector<6x128xf32>
    %42 = arith.maximumf %40, %41 : vector<6x128xf32>
    %43 = arith.addf %42, %7 : vector<6x128xf32>
    %cst_42 = arith.constant 0.000000e+00 : f32
    %44 = vector.broadcast %cst_42 : f32 to vector<6x128xf32>
    %45 = arith.maximumf %43, %44 : vector<6x128xf32>
    %46 = arith.truncf %45 : vector<6x128xf32> to vector<6x128xbf16>
    %c0_43 = arith.constant 0 : index
    %c2 = arith.constant 2 : index
    %c0_44 = arith.constant 0 : index
    %c0_45 = arith.constant 0 : index
    %47 = vector.load %arg5[%c0_43, %c2, %c0_44, %c0_45] : memref<1x6x6x128xbf16, #tpu.memory_space<vmem>>, vector<1x1x6x128xbf16>
    %48 = vector.shape_cast %47 : vector<1x1x6x128xbf16> to vector<6x128xbf16>
    %49 = vector.shape_cast %46 : vector<6x128xbf16> to vector<1x1x6x128xbf16>
    tpu.vector_store %arg5[%c0_43, %c2, %c0_44, %c0_45], %49 {strides = array<i32>} : memref<1x6x6x128xbf16, #tpu.memory_space<vmem>>, vector<1x1x6x128xbf16>,
    %c96 = arith.constant 96 : index
    %c0_46 = arith.constant 0 : index
    %50 = vector.load %arg6[%c96, %c0_46] : memref<192x128xf32, #tpu.memory_space<vmem>>, vector<16x128xf32>
    %c112 = arith.constant 112 : index
    %c0_47 = arith.constant 0 : index
    %51 = vector.load %arg6[%c112, %c0_47] : memref<192x128xf32, #tpu.memory_space<vmem>>, vector<16x128xf32>
    %52 = arith.maximumf %50, %51 : vector<16x128xf32>
    %c0_48 = arith.constant 0 : index
    %c0_49 = arith.constant 0 : index
    %53 = vector.load %arg7[%c0_48, %c0_49] : memref<16x128xf32, #tpu.memory_space<vmem>>, vector<16x128xf32>
    tpu.vector_store %arg7[%c0_48, %c0_49], %52 {strides = array<i32>} : memref<16x128xf32, #tpu.memory_space<vmem>>, vector<16x128xf32>,
    %c0_50 = arith.constant 0 : index
    %c0_51 = arith.constant 0 : index
    %54 = tpu.strided_load %arg7[%c0_50, %c0_51] {strides = array<i32: 2, 1>} : memref<16x128xf32, #tpu.memory_space<vmem>>, vector<6x128xf32>
    %c1_52 = arith.constant 1 : index
    %c0_53 = arith.constant 0 : index
    %55 = tpu.strided_load %arg7[%c1_52, %c0_53] {strides = array<i32: 2, 1>} : memref<16x128xf32, #tpu.memory_space<vmem>>, vector<6x128xf32>
    %56 = arith.maximumf %54, %55 : vector<6x128xf32>
    %57 = arith.addf %56, %7 : vector<6x128xf32>
    %cst_54 = arith.constant 0.000000e+00 : f32
    %58 = vector.broadcast %cst_54 : f32 to vector<6x128xf32>
    %59 = arith.maximumf %57, %58 : vector<6x128xf32>
    %60 = arith.truncf %59 : vector<6x128xf32> to vector<6x128xbf16>
    %c0_55 = arith.constant 0 : index
    %c3 = arith.constant 3 : index
    %c0_56 = arith.constant 0 : index
    %c0_57 = arith.constant 0 : index
    %61 = vector.load %arg5[%c0_55, %c3, %c0_56, %c0_57] : memref<1x6x6x128xbf16, #tpu.memory_space<vmem>>, vector<1x1x6x128xbf16>
    %62 = vector.shape_cast %61 : vector<1x1x6x128xbf16> to vector<6x128xbf16>
    %63 = vector.shape_cast %60 : vector<6x128xbf16> to vector<1x1x6x128xbf16>
    tpu.vector_store %arg5[%c0_55, %c3, %c0_56, %c0_57], %63 {strides = array<i32>} : memref<1x6x6x128xbf16, #tpu.memory_space<vmem>>, vector<1x1x6x128xbf16>,
    %c128 = arith.constant 128 : index
    %c0_58 = arith.constant 0 : index
    %64 = vector.load %arg6[%c128, %c0_58] : memref<192x128xf32, #tpu.memory_space<vmem>>, vector<16x128xf32>
    %c144 = arith.constant 144 : index
    %c0_59 = arith.constant 0 : index
    %65 = vector.load %arg6[%c144, %c0_59] : memref<192x128xf32, #tpu.memory_space<vmem>>, vector<16x128xf32>
    %66 = arith.maximumf %64, %65 : vector<16x128xf32>
    %c0_60 = arith.constant 0 : index
    %c0_61 = arith.constant 0 : index
    %67 = vector.load %arg7[%c0_60, %c0_61] : memref<16x128xf32, #tpu.memory_space<vmem>>, vector<16x128xf32>
    tpu.vector_store %arg7[%c0_60, %c0_61], %66 {strides = array<i32>} : memref<16x128xf32, #tpu.memory_space<vmem>>, vector<16x128xf32>,
    %c0_62 = arith.constant 0 : index
    %c0_63 = arith.constant 0 : index
    %68 = tpu.strided_load %arg7[%c0_62, %c0_63] {strides = array<i32: 2, 1>} : memref<16x128xf32, #tpu.memory_space<vmem>>, vector<6x128xf32>
    %c1_64 = arith.constant 1 : index
    %c0_65 = arith.constant 0 : index
    %69 = tpu.strided_load %arg7[%c1_64, %c0_65] {strides = array<i32: 2, 1>} : memref<16x128xf32, #tpu.memory_space<vmem>>, vector<6x128xf32>
    %70 = arith.maximumf %68, %69 : vector<6x128xf32>
    %71 = arith.addf %70, %7 : vector<6x128xf32>
    %cst_66 = arith.constant 0.000000e+00 : f32
    %72 = vector.broadcast %cst_66 : f32 to vector<6x128xf32>
    %73 = arith.maximumf %71, %72 : vector<6x128xf32>
    %74 = arith.truncf %73 : vector<6x128xf32> to vector<6x128xbf16>
    %c0_67 = arith.constant 0 : index
    %c4 = arith.constant 4 : index
    %c0_68 = arith.constant 0 : index
    %c0_69 = arith.constant 0 : index
    %75 = vector.load %arg5[%c0_67, %c4, %c0_68, %c0_69] : memref<1x6x6x128xbf16, #tpu.memory_space<vmem>>, vector<1x1x6x128xbf16>
    %76 = vector.shape_cast %75 : vector<1x1x6x128xbf16> to vector<6x128xbf16>
    %77 = vector.shape_cast %74 : vector<6x128xbf16> to vector<1x1x6x128xbf16>
    tpu.vector_store %arg5[%c0_67, %c4, %c0_68, %c0_69], %77 {strides = array<i32>} : memref<1x6x6x128xbf16, #tpu.memory_space<vmem>>, vector<1x1x6x128xbf16>,
    %c160 = arith.constant 160 : index
    %c0_70 = arith.constant 0 : index
    %78 = vector.load %arg6[%c160, %c0_70] : memref<192x128xf32, #tpu.memory_space<vmem>>, vector<16x128xf32>
    %c176 = arith.constant 176 : index
    %c0_71 = arith.constant 0 : index
    %79 = vector.load %arg6[%c176, %c0_71] : memref<192x128xf32, #tpu.memory_space<vmem>>, vector<16x128xf32>
    %80 = arith.maximumf %78, %79 : vector<16x128xf32>
    %c0_72 = arith.constant 0 : index
    %c0_73 = arith.constant 0 : index
    %81 = vector.load %arg7[%c0_72, %c0_73] : memref<16x128xf32, #tpu.memory_space<vmem>>, vector<16x128xf32>
    tpu.vector_store %arg7[%c0_72, %c0_73], %80 {strides = array<i32>} : memref<16x128xf32, #tpu.memory_space<vmem>>, vector<16x128xf32>,
    %c0_74 = arith.constant 0 : index
    %c0_75 = arith.constant 0 : index
    %82 = tpu.strided_load %arg7[%c0_74, %c0_75] {strides = array<i32: 2, 1>} : memref<16x128xf32, #tpu.memory_space<vmem>>, vector<6x128xf32>
    %c1_76 = arith.constant 1 : index
    %c0_77 = arith.constant 0 : index
    %83 = tpu.strided_load %arg7[%c1_76, %c0_77] {strides = array<i32: 2, 1>} : memref<16x128xf32, #tpu.memory_space<vmem>>, vector<6x128xf32>
    %84 = arith.maximumf %82, %83 : vector<6x128xf32>
    %85 = arith.addf %84, %7 : vector<6x128xf32>
    %cst_78 = arith.constant 0.000000e+00 : f32
    %86 = vector.broadcast %cst_78 : f32 to vector<6x128xf32>
    %87 = arith.maximumf %85, %86 : vector<6x128xf32>
    %88 = arith.truncf %87 : vector<6x128xf32> to vector<6x128xbf16>
    %c0_79 = arith.constant 0 : index
    %c5 = arith.constant 5 : index
    %c0_80 = arith.constant 0 : index
    %c0_81 = arith.constant 0 : index
    %89 = vector.load %arg5[%c0_79, %c5, %c0_80, %c0_81] : memref<1x6x6x128xbf16, #tpu.memory_space<vmem>>, vector<1x1x6x128xbf16>
    %90 = vector.shape_cast %89 : vector<1x1x6x128xbf16> to vector<6x128xbf16>
    %91 = vector.shape_cast %88 : vector<6x128xbf16> to vector<1x1x6x128xbf16>
    tpu.vector_store %arg5[%c0_79, %c5, %c0_80, %c0_81], %91 {strides = array<i32>} : memref<1x6x6x128xbf16, #tpu.memory_space<vmem>>, vector<1x1x6x128xbf16>,
    return
  }
  func.func @transform_0(%arg0: i32, %arg1: i32) -> (i32, i32, i32) {
    %c0_i32 = arith.constant 0 : i32
    %c0_i32_0 = arith.constant 0 : i32
    return %arg0, %arg1, %c0_i32 : i32, i32, i32
  }
  func.func @transform_1(%arg0: i32, %arg1: i32) -> (i32, i32) {
    %c0_i32 = arith.constant 0 : i32
    %c0_i32_0 = arith.constant 0 : i32
    %c0_i32_1 = arith.constant 0 : i32
    return %c0_i32, %c0_i32_0 : i32, i32
  }
  func.func @transform_2(%arg0: i32, %arg1: i32) -> (i32, i32) {
    %c0_i32 = arith.constant 0 : i32
    %c0_i32_0 = arith.constant 0 : i32
    %c0_i32_1 = arith.constant 0 : i32
    return %c0_i32, %c0_i32_0 : i32, i32
  }
  func.func @transform_3(%arg0: i32, %arg1: i32) -> (i32, i32, i32, i32) {
    %c0_i32 = arith.constant 0 : i32
    %c0_i32_0 = arith.constant 0 : i32
    %c0_i32_1 = arith.constant 0 : i32
    return %arg0, %arg1, %c0_i32, %c0_i32_0 : i32, i32, i32, i32
  }
}

module attributes {stable_mosaic.version = 11 : i64} {
  func.func @_tail_kernel(%arg0: i32, %arg1: memref<1x4x1280xbf16, #tpu.memory_space<vmem>>, %arg2: memref<1280x256xbf16, #tpu.memory_space<vmem>>, %arg3: memref<1x256xf32, #tpu.memory_space<vmem>>, %arg4: memref<256x512xbf16, #tpu.memory_space<vmem>>, %arg5: memref<1x512xf32, #tpu.memory_space<vmem>>, %arg6: memref<1x1x512xf32, #tpu.memory_space<vmem>>) attributes {dimension_semantics = [#tpu.dimension_semantics<parallel>], iteration_bounds = array<i64: 2>, scalar_prefetch = 0 : i64, scratch_operands = 0 : i64, tpu.core_type = #tpu.core_type<tc>, window_params = [{transform_indices = @transform_0, window_bounds = array<i64: 1, 4, 1280>}, {pipeline_mode = #tpu.pipeline_mode<synchronous>, transform_indices = @transform_1, window_bounds = array<i64: 1280, 256>}, {pipeline_mode = #tpu.pipeline_mode<synchronous>, transform_indices = @transform_2, window_bounds = array<i64: 1, 256>}, {pipeline_mode = #tpu.pipeline_mode<synchronous>, transform_indices = @transform_3, window_bounds = array<i64: 256, 512>}, {pipeline_mode = #tpu.pipeline_mode<synchronous>, transform_indices = @transform_4, window_bounds = array<i64: 1, 512>}, {transform_indices = @transform_5, window_bounds = array<i64: 1, 1, 512>}]} {
    %c0 = arith.constant 0 : index
    %c0_0 = arith.constant 0 : index
    %c0_1 = arith.constant 0 : index
    %0 = vector.load %arg1[%c0, %c0_0, %c0_1] : memref<1x4x1280xbf16, #tpu.memory_space<vmem>>, vector<1x4x1280xbf16>
    %1 = vector.shape_cast %0 : vector<1x4x1280xbf16> to vector<4x1280xbf16>
    %c0_2 = arith.constant 0 : index
    %c0_3 = arith.constant 0 : index
    %2 = vector.load %arg2[%c0_2, %c0_3] : memref<1280x256xbf16, #tpu.memory_space<vmem>>, vector<1280x256xbf16>
    %cst = arith.constant dense<0.000000e+00> : vector<4x256xf32>
    %3 = tpu.matmul %1, %2, %cst {dimension_numbers = #tpu.dot_dimension_numbers<[1], [0], [0], [1], [0, 0, 1, 1], [], []>} : vector<4x1280xbf16>, vector<1280x256xbf16>, vector<4x256xf32> -> vector<4x256xf32>
    %4 = vector.extract_strided_slice %3 {offsets = [0, 0], sizes = [1, 256], strides = [1, 1]} : vector<4x256xf32> to vector<1x256xf32>
    %5 = vector.extract_strided_slice %3 {offsets = [1, 0], sizes = [1, 256], strides = [1, 1]} : vector<4x256xf32> to vector<1x256xf32>
    %6 = arith.maximumf %4, %5 : vector<1x256xf32>
    %7 = vector.extract_strided_slice %3 {offsets = [2, 0], sizes = [1, 256], strides = [1, 1]} : vector<4x256xf32> to vector<1x256xf32>
    %8 = vector.extract_strided_slice %3 {offsets = [3, 0], sizes = [1, 256], strides = [1, 1]} : vector<4x256xf32> to vector<1x256xf32>
    %9 = arith.maximumf %7, %8 : vector<1x256xf32>
    %10 = arith.maximumf %6, %9 : vector<1x256xf32>
    %c0_4 = arith.constant 0 : index
    %c0_5 = arith.constant 0 : index
    %11 = vector.load %arg3[%c0_4, %c0_5] : memref<1x256xf32, #tpu.memory_space<vmem>>, vector<1x256xf32>
    %12 = arith.addf %10, %11 : vector<1x256xf32>
    %cst_6 = arith.constant 0.000000e+00 : f32
    %13 = vector.broadcast %cst_6 : f32 to vector<1x256xf32>
    %14 = arith.maximumf %12, %13 : vector<1x256xf32>
    %15 = arith.truncf %14 : vector<1x256xf32> to vector<1x256xbf16>
    %c0_7 = arith.constant 0 : index
    %c0_8 = arith.constant 0 : index
    %16 = vector.load %arg4[%c0_7, %c0_8] : memref<256x512xbf16, #tpu.memory_space<vmem>>, vector<256x512xbf16>
    %cst_9 = arith.constant dense<0.000000e+00> : vector<1x512xf32>
    %17 = tpu.matmul %15, %16, %cst_9 {dimension_numbers = #tpu.dot_dimension_numbers<[1], [0], [0], [1], [0, 0, 1, 1], [], []>} : vector<1x256xbf16>, vector<256x512xbf16>, vector<1x512xf32> -> vector<1x512xf32>
    %c0_10 = arith.constant 0 : index
    %c0_11 = arith.constant 0 : index
    %18 = vector.load %arg5[%c0_10, %c0_11] : memref<1x512xf32, #tpu.memory_space<vmem>>, vector<1x512xf32>
    %19 = arith.addf %17, %18 : vector<1x512xf32>
    %cst_12 = arith.constant 0.000000e+00 : f32
    %20 = vector.broadcast %cst_12 : f32 to vector<1x512xf32>
    %21 = arith.maximumf %19, %20 : vector<1x512xf32>
    %c0_13 = arith.constant 0 : index
    %c0_14 = arith.constant 0 : index
    %c0_15 = arith.constant 0 : index
    %22 = vector.load %arg6[%c0_13, %c0_14, %c0_15] : memref<1x1x512xf32, #tpu.memory_space<vmem>>, vector<1x1x512xf32>
    %23 = vector.shape_cast %22 : vector<1x1x512xf32> to vector<1x512xf32>
    %24 = vector.shape_cast %21 : vector<1x512xf32> to vector<1x1x512xf32>
    tpu.vector_store %arg6[%c0_13, %c0_14, %c0_15], %24 {strides = array<i32>} : memref<1x1x512xf32, #tpu.memory_space<vmem>>, vector<1x1x512xf32>,
    return
  }
  func.func @transform_0(%arg0: i32) -> (i32, i32, i32) {
    %c0_i32 = arith.constant 0 : i32
    %c0_i32_0 = arith.constant 0 : i32
    %c0_i32_1 = arith.constant 0 : i32
    return %arg0, %c0_i32, %c0_i32_0 : i32, i32, i32
  }
  func.func @transform_1(%arg0: i32) -> (i32, i32) {
    %c0_i32 = arith.constant 0 : i32
    %c0_i32_0 = arith.constant 0 : i32
    %c0_i32_1 = arith.constant 0 : i32
    return %c0_i32, %c0_i32_0 : i32, i32
  }
  func.func @transform_2(%arg0: i32) -> (i32, i32) {
    %c0_i32 = arith.constant 0 : i32
    %c0_i32_0 = arith.constant 0 : i32
    %c0_i32_1 = arith.constant 0 : i32
    return %c0_i32, %c0_i32_0 : i32, i32
  }
  func.func @transform_3(%arg0: i32) -> (i32, i32) {
    %c0_i32 = arith.constant 0 : i32
    %c0_i32_0 = arith.constant 0 : i32
    %c0_i32_1 = arith.constant 0 : i32
    return %c0_i32, %c0_i32_0 : i32, i32
  }
  func.func @transform_4(%arg0: i32) -> (i32, i32) {
    %c0_i32 = arith.constant 0 : i32
    %c0_i32_0 = arith.constant 0 : i32
    %c0_i32_1 = arith.constant 0 : i32
    return %c0_i32, %c0_i32_0 : i32, i32
  }
  func.func @transform_5(%arg0: i32) -> (i32, i32, i32) {
    %c0_i32 = arith.constant 0 : i32
    %c0_i32_0 = arith.constant 0 : i32
    %c0_i32_1 = arith.constant 0 : i32
    return %arg0, %c0_i32, %c0_i32_0 : i32, i32, i32
  }
}

</mosaic_0001>

<bundles_post_ra>
// kernel: repr_net_forward.4
= control target key start
LH: loop header
LB: loop body
LE: loop exit
PB: predicated region body
PF: predicated region fallthrough
CT: control target
= control target key end

     0   :  { %s4792_s12 = smov 0   ;;  %s4794_s13 = smov 0   ;;  %s5926_s0 = inlined_call_operand.vmem [shape: bf16[2,6400,147], index: 0, kind: input, shape index: {}]   ;;  %s5927_s1 = inlined_call_operand.vmem [shape: bf16[147,128], index: 1, kind: input, shape index: {}]   ;;  %s5928_s2 = inlined_call_operand.vmem [shape: f32[1,128], index: 2, kind: input, shape index: {}]   ;;  %s5929_s3 = inlined_call_operand.vmem [shape: bf16[2,40,37,128], index: 3, kind: output, shape index: {}]  }
   0x1   :  { %s4796_s14 = smov 0   ;;  %s4798_s15 = smov 0  }
   0x2   :  { %s4800_s16 = smov 0  }
   0x3 LB: > { %s22_s17 = sadd.s32 1, %s4760_s14  ;;  %s25_s18 = sadd.s32 1, %s4764_s15  ;;  %s4768_s16 = sphi %s4800_s16, %s13_s16   ;;  %s4764_s15 = sphi %s4798_s15, %s6139_s15   ;;  %s4760_s14 = sphi %s4796_s14, %s6138_s14   ;;  %s4756_s13 = sphi %s4794_s13, %s6137_s13   ;;  %s4752_s12 = sphi %s4792_s12, %s6136_s12  }
   0x4   : > { %p23_p0 = scmp.ge.s32.totalorder %s22_s17, 4  ;;  %p3794_p1 = scmp.ge.s32.totalorder %s4768_s16, 1 }
   0x5   : > { %p159_p2 = scmp.lt.s32.totalorder %s4768_s16, 9 }
   0x6   : > { %s6141_s17 = smov (%p23_p0, %s22_s17), 0  ;;  %s6143_s18 = smov (!%p23_p0, %s25_s18), %s4764_s15 }
   0x7   : > { %p160_p3 = pnand %p3794_p1, %p159_p2  ;;  %p27_p4 = scmp.ge.s32.totalorder %s6143_s18, 2 }
   0x9   : > { %s6145_s18 = smov (%p27_p4, %s6143_s18), 0  ;;  %163 = sbr.rel (%p160_p3) target bundleno = 734 (0x2de), region = 32 }
  0x10   : > { %v4419_v0 = vld [vmem:[%s5927_s1] sm:$0xff]   ;;  %v4770_v1 = vmov 0   ;;  %v4420_v2 = vld [vmem:[%s5927_s1 + $0x8] sm:$0xff]   ;;  %v4421_v3 = vld [vmem:[%s5927_s1 + $0x10] sm:$0xff]   ;;  %s193_s25 = smul.u32 200, %s4752_s12  ;;  %p194_p5 = scmp.lt.s32.totalorder %s4756_s13, 1 }
  0x11   : > { %1700 = vmatprep.subr.bf16.mxu0 %v4770_v1  ;;  %4354 = vmatprep.subr.bf16.mxu1 %v4770_v1  ;;  %v4422_v4 = vld [vmem:[%s5927_s1 + $0x18] sm:$0xff]   ;;  %v4423_v5 = vld [vmem:[%s5927_s1 + $0x20] sm:$0xff]   ;;  %vm1392_vm0 = vcmask 154624   ;;  %v4424_v7 = vld [vmem:[%s5927_s1 + $0x28] sm:$0xff]   ;;  %vm1693_vm1 = vcmask 1040384   ;;  %vm1694_vm2 = vcmask 1041408  }
  0x12   : > { %1701 = vmatpush1.bf16.msra.mxu0 %v4419_v0  ;;  %4364 = vmatpush1.bf16.msra.mxu1 %v4419_v0  ;;  %p196_p6 = scmp.lt.s32.totalorder %s193_s25, 799  ;;  %s6147_s13 = smov (!%p194_p5, %s4756_s13), 1  ;;  %v4425_v9 = vld [vmem:[%s5927_s1 + $0x30] sm:$0xff]   ;;  %v4426_v10 = vld [vmem:[%s5927_s1 + $0x38] sm:$0xff]   ;;  %v4771_v11 = vmov 65535   ;;  %v4427_v13 = vld [vmem:[%s5927_s1 + $0x40] sm:$0xff]  }
  0x13   : > { %1702 = vmatprep.subr.bf16.mxu0 %v4770_v1  ;;  %4355 = vmatprep.subr.bf16.mxu1 %v4770_v1  ;;  %s4374_s28 = smul.u32 1600, %s6147_s13  ;;  %v1695_v12 = vsel %vm1693_vm1, 4294967295, %v4771_v11  ;;  %v4428_v14 = vld [vmem:[%s5927_s1 + $0x48] ss:$0 sps:$4 sm:$0x33]   ;;  %vm2839_vm3 = vcmask 1042432  }
  0x14   : > { %s6149_s25 = smov (!%p196_p6, %s193_s25), 799  ;;  %v1696_v15 = vsel %vm1694_vm2, %v1695_v12, 0  ;;  %s204_s27 = smul.u32 10, %s4752_s12  ;;  %vm2840_vm4 = vsmask.f32 2304 }
  0x15   : > { %s3795_s29 = sshll.u32 %s6149_s25, 1  ;;  %v1698_v16 = vand.u32 %v4428_v14, %v1696_v15  ;;  %s4376_s12 = smul.u32 200, %s6147_s13  ;;  %vm5252_vm5 = vmand %vm2839_vm3, %vm2840_vm4 }
  0x16   : > { %1703 = vmatpush1.bf16.msra.mxu0 %v4420_v2  ;;  %4365 = vmatpush1.bf16.msra.mxu1 %v4420_v2  ;;  %s200_s30 = sadd.s32 %s4374_s28, %s3795_s29  ;;  %p5142_p7 = scmp.lt.s32.totalorder %s204_s27, 39 }
  0x17   : > { %1704 = vmatprep.subr.bf16.mxu0 %v4770_v1  ;;  %4356 = vmatprep.subr.bf16.mxu1 %v4770_v1  ;;  %s3796_s6 = sshll.u32 %s200_s30, 2 }
  0x18   : > { %s4860_s9 = scalar_lea.vmem %s5926_s0, %s3796_s6  ;;  %s6151_s27 = smov (!%p5142_p7, %s204_s27), 39 }
  0x19   : > { %v4431_v6 = vld [vmem:[%s4860_s9 + $0x4] ss:$8 sps:$4 sm:$0xff]   ;;  %v4429_v17 = vld [vmem:[%s4860_s9] ss:$8 sps:$4 sm:$0xff]   ;;  %v4435_v19 = vld [vmem:[%s4860_s9 + $0x14] ss:$8 sps:$4 sm:$0xff]  }
  0x1a   : > { %1705 = vmatpush1.bf16.msra.mxu0 %v4421_v3  ;;  %4366 = vmatpush1.bf16.msra.mxu1 %v4421_v3  ;;  %v4434_v8 = vld [vmem:[%s4860_s9 + $0x324] ss:$8 sps:$4 sm:$0xff]   ;;  %v4432_v18 = vld [vmem:[%s4860_s9 + $0x320] ss:$8 sps:$4 sm:$0xff]   ;;  %v4437_v20 = vld [vmem:[%s4860_s9 + $0x334] ss:$8 sps:$4 sm:$0xff]  }
  0x1b   : > { %1706 = vmatprep.subr.bf16.mxu0 %v4770_v1  ;;  %4357 = vmatprep.subr.bf16.mxu1 %v4770_v1  ;;  %v4439_v21 = vld [vmem:[%s4860_s9 + $0x10] ss:$8 sps:$4 sm:$0xff]   ;;  %v4441_v23 = vld [vmem:[%s4860_s9 + $0x24] ss:$8 sps:$4 sm:$0xff]   ;;  %v4445_v25 = vld [vmem:[%s4860_s9 + $0x20] ss:$8 sps:$4 sm:$0xff]  }
  0x1c   : > { %4008 = vmatprep.mubr.msk.bf16.mxu0 %vm1392_vm0, %v4431_v6  ;;  %4058 = vmatprep.mubr.msk.bf16.mxu1 %vm1392_vm0, %v4434_v8  ;;  %v4440_v22 = vld [vmem:[%s4860_s9 + $0x330] ss:$8 sps:$4 sm:$0xff]   ;;  %v4443_v24 = vld [vmem:[%s4860_s9 + $0x344] ss:$8 sps:$4 sm:$0xff]   ;;  %v4446_v26 = vld [vmem:[%s4860_s9 + $0x340] ss:$8 sps:$4 sm:$0xff]  }
  0x1d   : > { %v4447_v27 = vld [vmem:[%s4860_s9 + $0x34] ss:$8 sps:$4 sm:$0xff]   ;;  %v4451_v29 = vld [vmem:[%s4860_s9 + $0x30] ss:$8 sps:$4 sm:$0xff]   ;;  %v4453_v31 = vld [vmem:[%s4860_s9 + $0x44] ss:$8 sps:$4 sm:$0xff]  }
  0x1e   : > { %1707 = vmatpush1.bf16.msra.mxu0 %v4422_v4  ;;  %4367 = vmatpush1.bf16.msra.mxu1 %v4422_v4  ;;  %v4449_v28 = vld [vmem:[%s4860_s9 + $0x354] ss:$8 sps:$4 sm:$0xff]   ;;  %v4452_v30 = vld [vmem:[%s4860_s9 + $0x350] ss:$8 sps:$4 sm:$0xff]   ;;  %v4455_v32 = vld [vmem:[%s4860_s9 + $0x364] ss:$8 sps:$4 sm:$0xff]  }
  0x1f   : > { %1708 = vmatprep.subr.bf16.mxu0 %v4770_v1  ;;  %4358 = vmatprep.subr.bf16.mxu1 %v4770_v1  ;;  %v4457_v33 = vld [vmem:[%s4860_s9 + $0x40] ss:$8 sps:$4 sm:$0xff]   ;;  %v4459_v35 = vld [vmem:[%s4860_s9 + $0x54] ss:$8 sps:$4 sm:$0xff]   ;;  %v4463_v37 = vld [vmem:[%s4860_s9 + $0x50] ss:$8 sps:$4 sm:$0xff]  }
  0x20   : > { %v4458_v34 = vld [vmem:[%s4860_s9 + $0x360] ss:$8 sps:$4 sm:$0xff]   ;;  %v4461_v36 = vld [vmem:[%s4860_s9 + $0x374] ss:$8 sps:$4 sm:$0xff]   ;;  %v4464_v38 = vld [vmem:[%s4860_s9 + $0x370] ss:$8 sps:$4 sm:$0xff]  }
  0x21   : > { %v4465_v39 = vld [vmem:[%s4860_s9 + $0x64] ss:$8 sps:$4 sm:$0xff]   ;;  %v4469_v41 = vld [vmem:[%s4860_s9 + $0x60] ss:$8 sps:$4 sm:$0xff]   ;;  %v4471_v43 = vld [vmem:[%s4860_s9 + $0x74] ss:$8 sps:$4 sm:$0xff]  }
  0x22   : > { %1709 = vmatpush1.bf16.msra.mxu0 %v4423_v5  ;;  %4368 = vmatpush1.bf16.msra.mxu1 %v4423_v5  ;;  %v4467_v40 = vld [vmem:[%s4860_s9 + $0x384] ss:$8 sps:$4 sm:$0xff]   ;;  %v4470_v42 = vld [vmem:[%s4860_s9 + $0x380] ss:$8 sps:$4 sm:$0xff]   ;;  %v4473_v44 = vld [vmem:[%s4860_s9 + $0x394] ss:$8 sps:$4 sm:$0xff]  }
  0x23   : > { %1710 = vmatprep.subr.bf16.mxu0 %v4770_v1  ;;  %4359 = vmatprep.subr.bf16.mxu1 %v4770_v1  ;;  %v4475_v45 = vld [vmem:[%s4860_s9 + $0x70] ss:$8 sps:$4 sm:$0xff]   ;;  %v4477_v47 = vld [vmem:[%s4860_s9 + $0x84] ss:$8 sps:$4 sm:$0xff]   ;;  %v4481_v49 = vld [vmem:[%s4860_s9 + $0x80] ss:$8 sps:$4 sm:$0xff]  }
  0x24   : > { %v4476_v46 = vld [vmem:[%s4860_s9 + $0x390] ss:$8 sps:$4 sm:$0xff]   ;;  %v4479_v48 = vld [vmem:[%s4860_s9 + $0x3a4] ss:$8 sps:$4 sm:$0xff]   ;;  %v4482_v50 = vld [vmem:[%s4860_s9 + $0x3a0] ss:$8 sps:$4 sm:$0xff]  }
  0x25   : > { %v4483_v51 = vld [vmem:[%s4860_s9 + $0x94] ss:$8 sps:$4 sm:$0xff]   ;;  %v4487_v53 = vld [vmem:[%s4860_s9 + $0x90] ss:$8 sps:$4 sm:$0xff]   ;;  %v4489_v55 = vld [vmem:[%s4860_s9 + $0xa4] ss:$8 sps:$4 sm:$0xff]  }
  0x26   : > { %1711 = vmatpush1.bf16.msra.mxu0 %v4424_v7  ;;  %4369 = vmatpush1.bf16.msra.mxu1 %v4424_v7  ;;  %v4485_v52 = vld [vmem:[%s4860_s9 + $0x3b4] ss:$8 sps:$4 sm:$0xff]   ;;  %v4488_v54 = vld [vmem:[%s4860_s9 + $0x3b0] ss:$8 sps:$4 sm:$0xff]   ;;  %v4491_v56 = vld [vmem:[%s4860_s9 + $0x3c4] ss:$8 sps:$4 sm:$0xff]  }
  0x27   : > { %1712 = vmatprep.subr.bf16.mxu0 %v4770_v1  ;;  %4360 = vmatprep.subr.bf16.mxu1 %v4770_v1  ;;  %v4493_v57 = vld [vmem:[%s4860_s9 + $0xa0] ss:$8 sps:$4 sm:$0xff]   ;;  %v4495_v59 = vld [vmem:[%s4860_s9 + $0xb4] ss:$8 sps:$4 sm:$0xff]   ;;  %v4499_v61 = vld [vmem:[%s4860_s9 + $0xb0] ss:$8 sps:$4 sm:$0xff]  }
  0x28   : > { %v4494_v58 = vld [vmem:[%s4860_s9 + $0x3c0] ss:$8 sps:$4 sm:$0xff]   ;;  %v4497_v60 = vld [vmem:[%s4860_s9 + $0x3d4] ss:$8 sps:$4 sm:$0xff]   ;;  %v4500_v62 = vld [vmem:[%s4860_s9 + $0x3d0] ss:$8 sps:$4 sm:$0xff]  }
  0x29   : > { %v4501_v63 = vld [vmem:[%s4860_s9 + $0xc4] ss:$8 sps:$4 sm:$0xff]   ;;  %v4506_v2 = vld [vmem:[%s4860_s9 + $0x3e0] ss:$8 sps:$4 sm:$0xff]   ;;  %v4507_v3 = vld [vmem:[%s4860_s9 + $0xd4] ss:$8 sps:$4 sm:$0xff]  }
  0x2a   : > { %1713 = vmatpush1.bf16.msra.mxu0 %v4425_v9  ;;  %4370 = vmatpush1.bf16.msra.mxu1 %v4425_v9  ;;  %v4503_v0 = vld [vmem:[%s4860_s9 + $0x3e4] ss:$8 sps:$4 sm:$0xff]   ;;  %v4509_v4 = vld [vmem:[%s4860_s9 + $0x3f4] ss:$8 sps:$4 sm:$0xff]   ;;  %v4511_v5 = vld [vmem:[%s4860_s9 + $0xd0] ss:$8 sps:$4 sm:$0xff]  }
  0x2b   : > { %1714 = vmatprep.subr.bf16.mxu0 %v4770_v1  ;;  %4361 = vmatprep.subr.bf16.mxu1 %v4770_v1  ;;  %v4512_v6 = vld [vmem:[%s4860_s9 + $0x3f0] ss:$8 sps:$4 sm:$0xff]   ;;  %v4513_v7 = vld [vmem:[%s4860_s9 + $0xe4] ss:$8 sps:$4 sm:$0xff]   ;;  %v4517_v9 = vld [vmem:[%s4860_s9 + $0xe0] ss:$8 sps:$4 sm:$0xff]  }
  0x2c   : > { %v4515_v8 = vld [vmem:[%s4860_s9 + $0x404] ss:$8 sps:$4 sm:$0xff]   ;;  %v4519_v11 = vld [vmem:[%s4860_s9 + $0xf4] ss:$8 sps:$4 sm:$0xff]   ;;  %v4524_v14 = vld [vmem:[%s4860_s9 + $0x410] ss:$8 sps:$4 sm:$0xff]  }
  0x2d   : > { %v4521_v12 = vld [vmem:[%s4860_s9 + $0x414] ss:$8 sps:$4 sm:$0xff]   ;;  %v4525_v15 = vld [vmem:[%s4860_s9 + $0x104] ss:$8 sps:$4 sm:$0xff]   ;;  %s4375_s4 = smul.u32 5, %s6151_s27 }
  0x2e   : > { %1715 = vmatpush1.bf16.msra.mxu0 %v4426_v10  ;;  %4371 = vmatpush1.bf16.msra.mxu1 %v4426_v10  ;;  %v4518_v10 = vld [vmem:[%s4860_s9 + $0x400] ss:$8 sps:$4 sm:$0xff]  }
  0x2f   : > { %1716 = vmatprep.subr.bf16.mxu0 %v4770_v1  ;;  %4362 = vmatprep.subr.bf16.mxu1 %v4770_v1  ;;  %s211_s13 = sadd.s32 %s4376_s12, %s4375_s4 }
  0x30   : > { %s3797_s5 = sshll.u32 %s211_s13, 2 }
  0x31   : > { %s5199_s8 = scalar_lea.vmem %s5929_s3, %s3797_s5 }
  0x32   : > { %1717 = vmatpush1.bf16.msra.mxu0 %v4427_v13  ;;  %4372 = vmatpush1.bf16.msra.mxu1 %v4427_v13  ;;  %v4523_v13 = vld [vmem:[%s4860_s9 + $0xf0] ss:$8 sps:$4 sm:$0xff]  }
  0x33   : > { %1718 = vmatprep.subr.bf16.mxu0 %v4770_v1  ;;  %4363 = vmatprep.subr.bf16.mxu1 %v4770_v1  ;;  %v4505_v1 = vld [vmem:[%s4860_s9 + $0xc0] ss:$8 sps:$4 sm:$0xff]  }
  0x36   : > { %1719 = vmatpush1.bf16.msra.mxu0 %v1698_v16  ;;  %4373 = vmatpush1.bf16.msra.mxu1 %v1698_v16  ;;  %v4527_v16 = vld [vmem:[%s4860_s9 + $0x424] ss:$8 sps:$4 sm:$0xff]  }
  0x39   : > { %1733 = vmatmul.mubr.bf16.vlgmr.msra.gmra.mrb[0].mxu0 %v4429_v17  ;;  %2133 = vmatmul.mubr.bf16.vlgmr.msra.gmra.mrb[0].mxu1 %v4432_v18  ;;  %v4529_v17 = vld [vmem:[%s4860_s9 + $0x100] ss:$8 sps:$4 sm:$0xff]  }
  0x3a   : > { %4009 = vmatprep.mubr.msk.bf16.mxu0 %vm1392_vm0, %v4435_v19  ;;  %4059 = vmatprep.mubr.msk.bf16.mxu1 %vm1392_vm0, %v4437_v20  ;;  %v4530_v18 = vld [vmem:[%s4860_s9 + $0x420] ss:$8 sps:$4 sm:$0xff]   ;;  %v4531_v19 = vld [vmem:[%s4860_s9 + $0x114] ss:$8 sps:$4 sm:$0xff]  }
  0x3b   : > { %v4533_v20 = vld [vmem:[%s4860_s9 + $0x434] ss:$8 sps:$4 sm:$0xff]  }
  0x41   : > { %1741 = vmatmul.mubr.bf16.gmra.mrb[4].mxu0 %v4439_v21  ;;  %2141 = vmatmul.mubr.bf16.gmra.mrb[4].mxu1 %v4440_v22  ;;  %v4535_v21 = vld [vmem:[%s4860_s9 + $0x110] ss:$8 sps:$4 sm:$0xff]  }
  0x42   : > { %4010 = vmatprep.mubr.msk.bf16.mxu0 %vm1392_vm0, %v4441_v23  ;;  %4060 = vmatprep.mubr.msk.bf16.mxu1 %vm1392_vm0, %v4443_v24  ;;  %v4536_v22 = vld [vmem:[%s4860_s9 + $0x430] ss:$8 sps:$4 sm:$0xff]   ;;  %v4537_v23 = vld [vmem:[%s4860_s9 + $0x124] ss:$8 sps:$4 sm:$0xff]  }
  0x43   : > { %v4539_v24 = vld [vmem:[%s4860_s9 + $0x444] ss:$8 sps:$4 sm:$0xff]  }
  0x49   : > { %1749 = vmatmul.mubr.bf16.gmra.mrb[8].mxu0 %v4445_v25  ;;  %2149 = vmatmul.mubr.bf16.gmra.mrb[8].mxu1 %v4446_v26  ;;  %v4541_v25 = vld [vmem:[%s4860_s9 + $0x120] ss:$8 sps:$4 sm:$0xff]  }
  0x4a   : > { %4011 = vmatprep.mubr.msk.bf16.mxu0 %vm1392_vm0, %v4447_v27  ;;  %4061 = vmatprep.mubr.msk.bf16.mxu1 %vm1392_vm0, %v4449_v28  ;;  %v4542_v26 = vld [vmem:[%s4860_s9 + $0x440] ss:$8 sps:$4 sm:$0xff]   ;;  %v4543_v27 = vld [vmem:[%s4860_s9 + $0x134] ss:$8 sps:$4 sm:$0xff]  }
  0x4b   : > { %v4545_v28 = vld [vmem:[%s4860_s9 + $0x454] ss:$8 sps:$4 sm:$0xff]  }
  0x51   : > { %1757 = vmatmul.mubr.bf16.gmra.mrb[12].mxu0 %v4451_v29  ;;  %2157 = vmatmul.mubr.bf16.gmra.mrb[12].mxu1 %v4452_v30  ;;  %v4547_v29 = vld [vmem:[%s4860_s9 + $0x130] ss:$8 sps:$4 sm:$0xff]  }
  0x52   : > { %4012 = vmatprep.mubr.msk.bf16.mxu0 %vm1392_vm0, %v4453_v31  ;;  %4062 = vmatprep.mubr.msk.bf16.mxu1 %vm1392_vm0, %v4455_v32  ;;  %v4548_v30 = vld [vmem:[%s4860_s9 + $0x450] ss:$8 sps:$4 sm:$0xff]   ;;  %v4549_v31 = vld [vmem:[%s4860_s9 + $0x144] ss:$8 sps:$4 sm:$0xff]  }
  0x53   : > { %v4551_v32 = vld [vmem:[%s4860_s9 + $0x464] ss:$8 sps:$4 sm:$0xff]  }
  0x59   : > { %1765 = vmatmul.mubr.bf16.gmra.mrb[16].mxu0 %v4457_v33  ;;  %2165 = vmatmul.mubr.bf16.gmra.mrb[16].mxu1 %v4458_v34  ;;  %v4553_v33 = vld [vmem:[%s4860_s9 + $0x140] ss:$8 sps:$4 sm:$0xff]  }
  0x5a   : > { %4013 = vmatprep.mubr.msk.bf16.mxu0 %vm1392_vm0, %v4459_v35  ;;  %4063 = vmatprep.mubr.msk.bf16.mxu1 %vm1392_vm0, %v4461_v36  ;;  %v4554_v34 = vld [vmem:[%s4860_s9 + $0x460] ss:$8 sps:$4 sm:$0xff]   ;;  %v4555_v35 = vld [vmem:[%s4860_s9 + $0x154] ss:$8 sps:$4 sm:$0xff]  }
  0x5b   : > { %v4557_v36 = vld [vmem:[%s4860_s9 + $0x474] ss:$8 sps:$4 sm:$0xff]  }
  0x61   : > { %1773 = vmatmul.mubr.bf16.gmra.mrb[20].mxu0 %v4463_v37  ;;  %2173 = vmatmul.mubr.bf16.gmra.mrb[20].mxu1 %v4464_v38  ;;  %v4559_v37 = vld [vmem:[%s4860_s9 + $0x150] ss:$8 sps:$4 sm:$0xff]  }
  0x62   : > { %4014 = vmatprep.mubr.msk.bf16.mxu0 %vm1392_vm0, %v4465_v39  ;;  %4064 = vmatprep.mubr.msk.bf16.mxu1 %vm1392_vm0, %v4467_v40  ;;  %v4560_v38 = vld [vmem:[%s4860_s9 + $0x470] ss:$8 sps:$4 sm:$0xff]   ;;  %v4561_v39 = vld [vmem:[%s4860_s9 + $0x164] ss:$8 sps:$4 sm:$0xff]  }
  0x63   : > { %v4563_v40 = vld [vmem:[%s4860_s9 + $0x484] ss:$8 sps:$4 sm:$0xff]  }
  0x69   : > { %1781 = vmatmul.mubr.bf16.gmra.mrb[24].mxu0 %v4469_v41  ;;  %2181 = vmatmul.mubr.bf16.gmra.mrb[24].mxu1 %v4470_v42  ;;  %v4565_v41 = vld [vmem:[%s4860_s9 + $0x160] ss:$8 sps:$4 sm:$0xff]  }
  0x6a   : > { %4015 = vmatprep.mubr.msk.bf16.mxu0 %vm1392_vm0, %v4471_v43  ;;  %4065 = vmatprep.mubr.msk.bf16.mxu1 %vm1392_vm0, %v4473_v44  ;;  %v4566_v42 = vld [vmem:[%s4860_s9 + $0x480] ss:$8 sps:$4 sm:$0xff]   ;;  %v4567_v43 = vld [vmem:[%s4860_s9 + $0x174] ss:$8 sps:$4 sm:$0xff]  }
  0x6b   : > { %v4569_v44 = vld [vmem:[%s4860_s9 + $0x494] ss:$8 sps:$4 sm:$0xff]  }
  0x71   : > { %1789 = vmatmul.mubr.bf16.gmra.mrb[28].mxu0 %v4475_v45  ;;  %2189 = vmatmul.mubr.bf16.gmra.mrb[28].mxu1 %v4476_v46  ;;  %v4571_v45 = vld [vmem:[%s4860_s9 + $0x170] ss:$8 sps:$4 sm:$0xff]  }
  0x72   : > { %4016 = vmatprep.mubr.msk.bf16.mxu0 %vm1392_vm0, %v4477_v47  ;;  %4066 = vmatprep.mubr.msk.bf16.mxu1 %vm1392_vm0, %v4479_v48  ;;  %v4572_v46 = vld [vmem:[%s4860_s9 + $0x490] ss:$8 sps:$4 sm:$0xff]   ;;  %v4573_v47 = vld [vmem:[%s4860_s9 + $0x184] ss:$8 sps:$4 sm:$0xff]  }
  0x73   : > { %v4575_v48 = vld [vmem:[%s4860_s9 + $0x4a4] ss:$8 sps:$4 sm:$0xff]  }
  0x79   : > { %1797 = vmatmul.mubr.bf16.gmra.mrb[32].mxu0 %v4481_v49  ;;  %2197 = vmatmul.mubr.bf16.gmra.mrb[32].mxu1 %v4482_v50  ;;  %v4577_v49 = vld [vmem:[%s4860_s9 + $0x180] ss:$8 sps:$4 sm:$0xff]  }
  0x7a   : > { %4017 = vmatprep.mubr.msk.bf16.mxu0 %vm1392_vm0, %v4483_v51  ;;  %4067 = vmatprep.mubr.msk.bf16.mxu1 %vm1392_vm0, %v4485_v52  ;;  %v4578_v50 = vld [vmem:[%s4860_s9 + $0x4a0] ss:$8 sps:$4 sm:$0xff]   ;;  %v4579_v51 = vld [vmem:[%s4860_s9 + $0x194] ss:$8 sps:$4 sm:$0xff]  }
  0x7b   : > { %v4581_v52 = vld [vmem:[%s4860_s9 + $0x4b4] ss:$8 sps:$4 sm:$0xff]  }
  0x81   : > { %1805 = vmatmul.mubr.bf16.gmra.mrb[36].mxu0 %v4487_v53  ;;  %2205 = vmatmul.mubr.bf16.gmra.mrb[36].mxu1 %v4488_v54  ;;  %v4583_v53 = vld [vmem:[%s4860_s9 + $0x190] ss:$8 sps:$4 sm:$0xff]  }
  0x82   : > { %4018 = vmatprep.mubr.msk.bf16.mxu0 %vm1392_vm0, %v4489_v55  ;;  %4068 = vmatprep.mubr.msk.bf16.mxu1 %vm1392_vm0, %v4491_v56  ;;  %v4584_v54 = vld [vmem:[%s4860_s9 + $0x4b0] ss:$8 sps:$4 sm:$0xff]   ;;  %v4585_v55 = vld [vmem:[%s4860_s9 + $0x1a4] ss:$8 sps:$4 sm:$0xff]  }
  0x83   : > { %v4587_v56 = vld [vmem:[%s4860_s9 + $0x4c4] ss:$8 sps:$4 sm:$0xff]  }
  0x89   : > { %1813 = vmatmul.mubr.bf16.gmra.mrb[40].mxu0 %v4493_v57  ;;  %2213 = vmatmul.mubr.bf16.gmra.mrb[40].mxu1 %v4494_v58  ;;  %v4589_v57 = vld [vmem:[%s4860_s9 + $0x1a0] ss:$8 sps:$4 sm:$0xff]  }
  0x8a   : > { %4019 = vmatprep.mubr.msk.bf16.mxu0 %vm1392_vm0, %v4495_v59  ;;  %4069 = vmatprep.mubr.msk.bf16.mxu1 %vm1392_vm0, %v4497_v60  ;;  %v4590_v58 = vld [vmem:[%s4860_s9 + $0x4c0] ss:$8 sps:$4 sm:$0xff]   ;;  %v4591_v59 = vld [vmem:[%s4860_s9 + $0x1b4] ss:$8 sps:$4 sm:$0xff]  }
  0x8b   : > { %v4593_v60 = vld [vmem:[%s4860_s9 + $0x4d4] ss:$8 sps:$4 sm:$0xff]  }
  0x91   : > { %1821 = vmatmul.mubr.bf16.gmra.mrb[44].mxu0 %v4499_v61  ;;  %2221 = vmatmul.mubr.bf16.gmra.mrb[44].mxu1 %v4500_v62 }
  0x92   : > { %4020 = vmatprep.mubr.msk.bf16.mxu0 %vm1392_vm0, %v4501_v63  ;;  %4070 = vmatprep.mubr.msk.bf16.mxu1 %vm1392_vm0, %v4503_v0  ;;  %v4595_v0 = vld [vmem:[%s4860_s9 + $0x1b0] ss:$8 sps:$4 sm:$0xff]  }
  0x99   : > { %1829 = vmatmul.mubr.bf16.gmra.mrb[48].mxu0 %v4505_v1  ;;  %2229 = vmatmul.mubr.bf16.gmra.mrb[48].mxu1 %v4506_v2  ;;  %v4596_v1 = vld [vmem:[%s4860_s9 + $0x4d0] ss:$8 sps:$4 sm:$0xff]  }
  0x9a   : > { %4021 = vmatprep.mubr.msk.bf16.mxu0 %vm1392_vm0, %v4507_v3  ;;  %4071 = vmatprep.mubr.msk.bf16.mxu1 %vm1392_vm0, %v4509_v4  ;;  %v4597_v4 = vld [vmem:[%s4860_s9 + $0x1c4] ss:$8 sps:$4 sm:$0xff]  }
  0xa1   : > { %1837 = vmatmul.mubr.bf16.gmra.mrb[52].mxu0 %v4511_v5  ;;  %2237 = vmatmul.mubr.bf16.gmra.mrb[52].mxu1 %v4512_v6  ;;  %v4599_v5 = vld [vmem:[%s4860_s9 + $0x4e4] ss:$8 sps:$4 sm:$0xff]  }
  0xa2   : > { %4022 = vmatprep.mubr.msk.bf16.mxu0 %vm1392_vm0, %v4513_v7  ;;  %4072 = vmatprep.mubr.msk.bf16.mxu1 %vm1392_vm0, %v4515_v8 }
  0xa9   : > { %1845 = vmatmul.mubr.bf16.gmra.mrb[56].mxu0 %v4517_v9  ;;  %2245 = vmatmul.mubr.bf16.gmra.mrb[56].mxu1 %v4518_v10 }
  0xaa   : > { %4023 = vmatprep.mubr.msk.bf16.mxu0 %vm1392_vm0, %v4519_v11  ;;  %4073 = vmatprep.mubr.msk.bf16.mxu1 %vm1392_vm0, %v4521_v12  ;;  %v4601_v12 = vld [vmem:[%s4860_s9 + $0x1c0] ss:$8 sps:$4 sm:$0xff]  }
  0xb1   : > { %1853 = vmatmul.mubr.bf16.gmra.mrb[60].mxu0 %v4523_v13  ;;  %2253 = vmatmul.mubr.bf16.gmra.mrb[60].mxu1 %v4524_v14  ;;  %v4602_v13 = vld [vmem:[%s4860_s9 + $0x4e0] ss:$8 sps:$4 sm:$0xff]  }
  0xb2   : > { %4024 = vmatprep.mubr.msk.bf16.mxu0 %vm1392_vm0, %v4525_v15  ;;  %4074 = vmatprep.mubr.msk.bf16.mxu1 %vm1392_vm0, %v4527_v16  ;;  %v4603_v16 = vld [vmem:[%s4860_s9 + $0x1d4] ss:$8 sps:$4 sm:$0xff]  }
  0xb9   : > { %1861 = vmatmul.mubr.bf16.gmra.mrb[64].mxu0 %v4529_v17  ;;  %2261 = vmatmul.mubr.bf16.gmra.mrb[64].mxu1 %v4530_v18  ;;  %v4605_v17 = vld [vmem:[%s4860_s9 + $0x4f4] ss:$8 sps:$4 sm:$0xff]  }
  0xba   : > { %4025 = vmatprep.mubr.msk.bf16.mxu0 %vm1392_vm0, %v4531_v19  ;;  %4075 = vmatprep.mubr.msk.bf16.mxu1 %vm1392_vm0, %v4533_v20 }
  0xc1   : > { %1869 = vmatmul.mubr.bf16.gmra.mrb[68].mxu0 %v4535_v21  ;;  %2269 = vmatmul.mubr.bf16.gmra.mrb[68].mxu1 %v4536_v22 }
  0xc2   : > { %4026 = vmatprep.mubr.msk.bf16.mxu0 %vm1392_vm0, %v4537_v23  ;;  %4076 = vmatprep.mubr.msk.bf16.mxu1 %vm1392_vm0, %v4539_v24  ;;  %v4607_v24 = vld [vmem:[%s4860_s9 + $0x1d0] ss:$8 sps:$4 sm:$0xff]  }
  0xc9   : > { %1877 = vmatmul.mubr.bf16.gmra.mrb[72].mxu0 %v4541_v25  ;;  %2277 = vmatmul.mubr.bf16.gmra.mrb[72].mxu1 %v4542_v26  ;;  %v4608_v25 = vld [vmem:[%s4860_s9 + $0x4f0] ss:$8 sps:$4 sm:$0xff]  }
  0xca   : > { %4027 = vmatprep.mubr.msk.bf16.mxu0 %vm1392_vm0, %v4543_v27  ;;  %4077 = vmatprep.mubr.msk.bf16.mxu1 %vm1392_vm0, %v4545_v28  ;;  %v4609_v28 = vld [vmem:[%s4860_s9 + $0x1e4] ss:$8 sps:$4 sm:$0xff]  }
  0xd1   : > { %1885 = vmatmul.mubr.bf16.gmra.mrb[76].mxu0 %v4547_v29  ;;  %2285 = vmatmul.mubr.bf16.gmra.mrb[76].mxu1 %v4548_v30  ;;  %v4611_v29 = vld [vmem:[%s4860_s9 + $0x504] ss:$8 sps:$4 sm:$0xff]  }
  0xd2   : > { %4028 = vmatprep.mubr.msk.bf16.mxu0 %vm1392_vm0, %v4549_v31  ;;  %4078 = vmatprep.mubr.msk.bf16.mxu1 %vm1392_vm0, %v4551_v32 }
  0xd9   : > { %1893 = vmatmul.mubr.bf16.gmra.mrb[80].mxu0 %v4553_v33  ;;  %2293 = vmatmul.mubr.bf16.gmra.mrb[80].mxu1 %v4554_v34 }
  0xda   : > { %4029 = vmatprep.mubr.msk.bf16.mxu0 %vm1392_vm0, %v4555_v35  ;;  %4079 = vmatprep.mubr.msk.bf16.mxu1 %vm1392_vm0, %v4557_v36  ;;  %v4613_v36 = vld [vmem:[%s4860_s9 + $0x1e0] ss:$8 sps:$4 sm:$0xff]  }
  0xe1   : > { %1901 = vmatmul.mubr.bf16.gmra.mrb[84].mxu0 %v4559_v37  ;;  %2301 = vmatmul.mubr.bf16.gmra.mrb[84].mxu1 %v4560_v38  ;;  %v4614_v37 = vld [vmem:[%s4860_s9 + $0x500] ss:$8 sps:$4 sm:$0xff]  }
  0xe2   : > { %4030 = vmatprep.mubr.msk.bf16.mxu0 %vm1392_vm0, %v4561_v39  ;;  %4080 = vmatprep.mubr.msk.bf16.mxu1 %vm1392_vm0, %v4563_v40 }
  0xe9   : > { %1909 = vmatmul.mubr.bf16.gmra.mrb[88].mxu0 %v4565_v41  ;;  %2309 = vmatmul.mubr.bf16.gmra.mrb[88].mxu1 %v4566_v42  ;;  %v4615_v41 = vld [vmem:[%s4860_s9 + $0x1f4] ss:$8 sps:$4 sm:$0xff]  }
  0xea   : > { %4031 = vmatprep.mubr.msk.bf16.mxu0 %vm1392_vm0, %v4567_v43  ;;  %4081 = vmatprep.mubr.msk.bf16.mxu1 %vm1392_vm0, %v4569_v44  ;;  %v4617_v42 = vld [vmem:[%s4860_s9 + $0x514] ss:$8 sps:$4 sm:$0xff]  }
  0xf1   : > { %1917 = vmatmul.mubr.bf16.gmra.mrb[92].mxu0 %v4571_v45  ;;  %2317 = vmatmul.mubr.bf16.gmra.mrb[92].mxu1 %v4572_v46 }
  0xf2   : > { %4032 = vmatprep.mubr.msk.bf16.mxu0 %vm1392_vm0, %v4573_v47  ;;  %4082 = vmatprep.mubr.msk.bf16.mxu1 %vm1392_vm0, %v4575_v48  ;;  %v4619_v48 = vld [vmem:[%s4860_s9 + $0x1f0] ss:$8 sps:$4 sm:$0xff]  }
  0xf9   : > { %1925 = vmatmul.mubr.bf16.gmra.mrb[96].mxu0 %v4577_v49  ;;  %2325 = vmatmul.mubr.bf16.gmra.mrb[96].mxu1 %v4578_v50  ;;  %v4620_v50 = vld [vmem:[%s4860_s9 + $0x510] ss:$8 sps:$4 sm:$0xff]  }
  0xfa   : > { %4033 = vmatprep.mubr.msk.bf16.mxu0 %vm1392_vm0, %v4579_v51  ;;  %4083 = vmatprep.mubr.msk.bf16.mxu1 %vm1392_vm0, %v4581_v52 }
 0x101   : > { %1933 = vmatmul.mubr.bf16.gmra.mrb[100].mxu0 %v4583_v53  ;;  %2333 = vmatmul.mubr.bf16.gmra.mrb[100].mxu1 %v4584_v54  ;;  %v4621_v53 = vld [vmem:[%s4860_s9 + $0x204] ss:$8 sps:$4 sm:$0xff]  }
 0x102   : > { %4034 = vmatprep.mubr.msk.bf16.mxu0 %vm1392_vm0, %v4585_v55  ;;  %4084 = vmatprep.mubr.msk.bf16.mxu1 %vm1392_vm0, %v4587_v56  ;;  %v4623_v54 = vld [vmem:[%s4860_s9 + $0x524] ss:$8 sps:$4 sm:$0xff]  }
 0x109   : > { %1941 = vmatmul.mubr.bf16.gmra.mrb[104].mxu0 %v4589_v57  ;;  %2341 = vmatmul.mubr.bf16.gmra.mrb[104].mxu1 %v4590_v58 }
 0x10a   : > { %4035 = vmatprep.mubr.msk.bf16.mxu0 %vm1392_vm0, %v4591_v59  ;;  %4085 = vmatprep.mubr.msk.bf16.mxu1 %vm1392_vm0, %v4593_v60  ;;  %v4727_v60 = vld [vmem:[%s4860_s9 + $0x310] ss:$8 sps:$4 sm:$0xff]  }
 0x10c   : > { %v5053_v61 = vpop.f32.mrb[0].mxu0  ;;  %v5055_v62 = vpop.f32.mrb[0].mxu1 }
 0x10d   : > { %v1736_v63 = vpop.f32.mrb[1].mxu0  ;;  %v2136_v2 = vpop.f32.mrb[1].mxu1 }
 0x10e   : > { %v5059_v3 = vpop.f32.mrb[2].mxu0  ;;  %v5063_v6 = vpop.f32.mrb[2].mxu1  ;;  %v4626_v2 = vld [vmem:[%s4860_s9 + $0x520] ss:$8 sps:$4 sm:$0xff]  }
 0x10f   : > { %v1739_v7 = vpop.f32.mrb[3].mxu0  ;;  %v2139_v8 = vpop.f32.mrb[3].mxu1 }
 0x110   : > { %v4627_v7 = vld [vmem:[%s4860_s9 + $0x214] ss:$8 sps:$4 sm:$0xff]  }
 0x111   : > { %1949 = vmatmul.mubr.bf16.gmra.mrb[108].mxu0 %v4595_v0  ;;  %2349 = vmatmul.mubr.bf16.gmra.mrb[108].mxu1 %v4596_v1  ;;  %v4625_v1 = vld [vmem:[%s4860_s9 + $0x200] ss:$8 sps:$4 sm:$0xff]   ;;  %v4629_v8 = vld [vmem:[%s4860_s9 + $0x534] ss:$8 sps:$4 sm:$0xff]  }
 0x112   : > { %4036 = vmatprep.mubr.msk.bf16.mxu0 %vm1392_vm0, %v4597_v4  ;;  %4086 = vmatprep.mubr.msk.bf16.mxu1 %vm1392_vm0, %v4599_v5 }
 0x114   : > { %v5067_v9 = vpop.f32.mrb[4].mxu0  ;;  %v5069_v10 = vpop.f32.mrb[4].mxu1 }
 0x115   : > { %v1744_v11 = vpop.f32.mrb[5].mxu0  ;;  %v2144_v14 = vpop.f32.mrb[5].mxu1 }
 0x116   : > { %v5073_v15 = vpop.f32.mrb[6].mxu0  ;;  %v5077_v18 = vpop.f32.mrb[6].mxu1 }
 0x117   : > { %v1747_v19 = vpop.f32.mrb[7].mxu0  ;;  %v2147_v20 = vpop.f32.mrb[7].mxu1 }
 0x119   : > { %1957 = vmatmul.mubr.bf16.gmra.mrb[112].mxu0 %v4601_v12  ;;  %2357 = vmatmul.mubr.bf16.gmra.mrb[112].mxu1 %v4602_v13 }
 0x11a   : > { %4037 = vmatprep.mubr.msk.bf16.mxu0 %vm1392_vm0, %v4603_v16  ;;  %4087 = vmatprep.mubr.msk.bf16.mxu1 %vm1392_vm0, %v4605_v17 }
 0x11c   : > { %v5081_v21 = vpop.f32.mrb[8].mxu0  ;;  %v5083_v22 = vpop.f32.mrb[8].mxu1 }
 0x11d   : > { %v1752_v23 = vpop.f32.mrb[9].mxu0  ;;  %v2152_v26 = vpop.f32.mrb[9].mxu1 }
 0x11e   : > { %v5087_v27 = vpop.f32.mrb[10].mxu0  ;;  %v5091_v30 = vpop.f32.mrb[10].mxu1  ;;  %v4631_v23 = vld [vmem:[%s4860_s9 + $0x210] ss:$8 sps:$4 sm:$0xff]  }
 0x11f   : > { %v1755_v31 = vpop.f32.mrb[11].mxu0  ;;  %v2155_v32 = vpop.f32.mrb[11].mxu1 }
 0x121   : > { %1965 = vmatmul.mubr.bf16.gmra.mrb[116].mxu0 %v4607_v24  ;;  %2365 = vmatmul.mubr.bf16.gmra.mrb[116].mxu1 %v4608_v25  ;;  %v4632_v24 = vld [vmem:[%s4860_s9 + $0x530] ss:$8 sps:$4 sm:$0xff]  }
 0x122   : > { %4038 = vmatprep.mubr.msk.bf16.mxu0 %vm1392_vm0, %v4609_v28  ;;  %4088 = vmatprep.mubr.msk.bf16.mxu1 %vm1392_vm0, %v4611_v29  ;;  %v4633_v28 = vld [vmem:[%s4860_s9 + $0x224] ss:$8 sps:$4 sm:$0xff]  }
 0x123   : > { %v4635_v29 = vld [vmem:[%s4860_s9 + $0x544] ss:$8 sps:$4 sm:$0xff]  }
 0x124   : > { %v5095_v33 = vpop.f32.mrb[12].mxu0  ;;  %v5097_v34 = vpop.f32.mrb[12].mxu1 }
 0x125   : > { %5984 = vst [vmem:[#allocation4_spill] sm:$0xff] %v5097_v34  ;;  %v1760_v35 = vpop.f32.mrb[13].mxu0  ;;  %v2160_v38 = vpop.f32.mrb[13].mxu1 }
 0x126   : > { %v5101_v39 = vpop.f32.mrb[14].mxu0  ;;  %v5103_v40 = vpop.f32.mrb[14].mxu1 }
 0x127   : > { %5985 = vst [vmem:[#allocation5_spill] sm:$0xff] %v5103_v40  ;;  %v1763_v43 = vpop.f32.mrb[15].mxu0  ;;  %v2163_v44 = vpop.f32.mrb[15].mxu1 }
 0x129   : > { %1973 = vmatmul.mubr.bf16.gmra.mrb[120].mxu0 %v4613_v36  ;;  %2373 = vmatmul.mubr.bf16.gmra.mrb[120].mxu1 %v4614_v37 }
 0x12a   : > { %4039 = vmatprep.mubr.msk.bf16.mxu0 %vm1392_vm0, %v4615_v41  ;;  %4089 = vmatprep.mubr.msk.bf16.mxu1 %vm1392_vm0, %v4617_v42 }
 0x12c   : > { %v5109_v45 = vpop.f32.mrb[16].mxu0  ;;  %v5111_v46 = vpop.f32.mrb[16].mxu1 }
 0x12d   : > { %5986 = vst [vmem:[#allocation6_spill] sm:$0xff] %v5111_v46  ;;  %v1768_v47 = vpop.f32.mrb[17].mxu0  ;;  %v2168_v49 = vpop.f32.mrb[17].mxu1 }
 0x12e   : > { %v5115_v51 = vpop.f32.mrb[18].mxu0  ;;  %v5117_v52 = vpop.f32.mrb[18].mxu1  ;;  %v4637_v49 = vld [vmem:[%s4860_s9 + $0x220] ss:$8 sps:$4 sm:$0xff]  }
 0x12f   : > { %5987 = vst [vmem:[#allocation7_spill] sm:$0xff] %v5117_v52  ;;  %v1771_v55 = vpop.f32.mrb[19].mxu0  ;;  %v2171_v56 = vpop.f32.mrb[19].mxu1 }
 0x130   : > { %v4639_v55 = vld [vmem:[%s4860_s9 + $0x234] ss:$8 sps:$4 sm:$0xff]  }
 0x131   : > { %1981 = vmatmul.mubr.bf16.gmra.mrb[124].mxu0 %v4619_v48  ;;  %2381 = vmatmul.mubr.bf16.gmra.mrb[124].mxu1 %v4620_v50  ;;  %v4638_v50 = vld [vmem:[%s4860_s9 + $0x540] ss:$8 sps:$4 sm:$0xff]   ;;  %v4641_v56 = vld [vmem:[%s4860_s9 + $0x554] ss:$8 sps:$4 sm:$0xff]  }
 0x132   : > { %4040 = vmatprep.mubr.msk.bf16.mxu0 %vm1392_vm0, %v4621_v53  ;;  %4090 = vmatprep.mubr.msk.bf16.mxu1 %vm1392_vm0, %v4623_v54 }
 0x134   : > { %v1774_v57 = vpop.f32.mrb[20].mxu0  ;;  %v5123_v58 = vpop.f32.mrb[20].mxu1 }
 0x135   : > { %v2760_v59 = vmax.f32 %v5053_v61, %v1774_v57  ;;  %v1776_v63 = vpop.f32.mrb[21].mxu0  ;;  %v2176_v0 = vpop.f32.mrb[21].mxu1 }
 0x136   : > { %v1777_v4 = vpop.f32.mrb[22].mxu0  ;;  %v5130_v5 = vpop.f32.mrb[22].mxu1 }
 0x137   : > { %2770 = vst [vmem:[#allocation3] sm:$0xff] %v2760_v59  ;;  %v2761_v11 = vmax.f32 %v5059_v3, %v1777_v4  ;;  %v1779_v61 = vpop.f32.mrb[23].mxu0  ;;  %v2179_v13 = vpop.f32.mrb[23].mxu1 }
 0x139   : > { %2771 = vst [vmem:[#allocation3 + $0x8] sm:$0xff] %v2761_v11  ;;  %1989 = vmatmul.mubr.bf16.gmra.mrb[128].mxu0 %v4625_v1  ;;  %2389 = vmatmul.mubr.bf16.gmra.mrb[128].mxu1 %v4626_v2  ;;  %v4643_v11 = vld [vmem:[%s4860_s9 + $0x230] ss:$8 sps:$4 sm:$0xff]  }
 0x13a   : > { %4041 = vmatprep.mubr.msk.bf16.mxu0 %vm1392_vm0, %v4627_v7  ;;  %4091 = vmatprep.mubr.msk.bf16.mxu1 %vm1392_vm0, %v4629_v8 }
 0x13c   : > { %v1782_v14 = vpop.f32.mrb[24].mxu0  ;;  %v5140_v16 = vpop.f32.mrb[24].mxu1 }
 0x13d   : > { %v2762_v3 = vmax.f32 %v5067_v9, %v1782_v14  ;;  %v1784_v19 = vpop.f32.mrb[25].mxu0  ;;  %v2184_v20 = vpop.f32.mrb[25].mxu1 }
 0x13e   : > { %v1785_v25 = vpop.f32.mrb[26].mxu0  ;;  %v5151_v26 = vpop.f32.mrb[26].mxu1 }
 0x13f   : > { %2772 = vst [vmem:[#allocation3 + $0x10] sm:$0xff] %v2762_v3  ;;  %v2763_v31 = vmax.f32 %v5073_v15, %v1785_v25  ;;  %v1787_v9 = vpop.f32.mrb[27].mxu0  ;;  %v2187_v35 = vpop.f32.mrb[27].mxu1  ;;  %v5168_v15 = vld [vmem:[%s5928_s2] ss:$0 sm:$0xff] }
 0x140   : > { %v2780_v36 = vld [vmem:[#allocation3] ss:$2 sm:$0xff]  ;;  %v2790_v37 = vld [vmem:[#allocation3 + $0x1] ss:$2 sm:$0xff]  ;;  %v4692_v9 = vld [vmem:[%s4860_s9 + $0x5d0] ss:$8 sps:$4 sm:$0xff]  }
 0x141   : > { %2773 = vst [vmem:[#allocation3 + $0x18] sm:$0xff] %v2763_v31  ;;  %1997 = vmatmul.mubr.bf16.gmra.mrb[132].mxu0 %v4631_v23  ;;  %2397 = vmatmul.mubr.bf16.gmra.mrb[132].mxu1 %v4632_v24  ;;  %v2799_v42 = vmax.f32 %v2780_v36, %v2790_v37  ;;  %v4644_v23 = vld [vmem:[%s4860_s9 + $0x550] ss:$8 sps:$4 sm:$0xff]  }
 0x142   : > { %4042 = vmatprep.mubr.msk.bf16.mxu0 %vm1392_vm0, %v4633_v28  ;;  %4092 = vmatprep.mubr.msk.bf16.mxu1 %vm1392_vm0, %v4635_v29  ;;  %v4645_v28 = vld [vmem:[%s4860_s9 + $0x244] ss:$8 sps:$4 sm:$0xff]  }
 0x143   : > { %v2804_v2 = vadd.f32 %v5168_v15, %v2799_v42  ;;  %v4647_v29 = vld [vmem:[%s4860_s9 + $0x564] ss:$8 sps:$4 sm:$0xff]  }
 0x144   : > { %v1790_v38 = vpop.f32.mrb[28].mxu0  ;;  %v5171_v41 = vpop.f32.mrb[28].mxu1 }
 0x145   : > { %v2764_v43 = vmax.f32 %v5081_v21, %v1790_v38  ;;  %v1792_v47 = vpop.f32.mrb[29].mxu0  ;;  %v2192_v48 = vpop.f32.mrb[29].mxu1  ;;  %v2809_v61 = vmax.f32 %v2804_v2, 0.0 }
 0x146   : > { %v1793_v53 = vpop.f32.mrb[30].mxu0  ;;  %v5178_v54 = vpop.f32.mrb[30].mxu1 }
 0x147   : > { %2774 = vst [vmem:[#allocation3 + $0x20] sm:$0xff] %v2764_v43  ;;  %v2765_v57 = vmax.f32 %v5087_v27, %v1793_v53  ;;  %v1795_v63 = vpop.f32.mrb[31].mxu0  ;;  %v2195_v21 = vpop.f32.mrb[31].mxu1  ;;  %v4649_v53 = vld [vmem:[%s4860_s9 + $0x240] ss:$8 sps:$4 sm:$0xff]  }
 0x148   : > { %v2782_v0 = vld [vmem:[#allocation3 + $0x10] ss:$2 sm:$0xff]  ;;  %v2792_v1 = vld [vmem:[#allocation3 + $0x11] ss:$2 sm:$0xff] }
 0x149   : > { %v2800_v4 = vmax.f32 %v2782_v0, %v2792_v1  ;;  %2775 = vst [vmem:[#allocation3 + $0x28] sm:$0xff] %v2765_v57  ;;  %2005 = vmatmul.mubr.bf16.gmra.mrb[136].mxu0 %v4637_v49  ;;  %2405 = vmatmul.mubr.bf16.gmra.mrb[136].mxu1 %v4638_v50  ;;  %v4651_v63 = vld [vmem:[%s4860_s9 + $0x254] ss:$8 sps:$4 sm:$0xff]   ;;  %v4686_v1 = vld [vmem:[%s4860_s9 + $0x5c0] ss:$8 sps:$4 sm:$0xff]  }
 0x14a   : > { %4043 = vmatprep.mubr.msk.bf16.mxu0 %vm1392_vm0, %v4639_v55  ;;  %4093 = vmatprep.mubr.msk.bf16.mxu1 %vm1392_vm0, %v4641_v56  ;;  %v4650_v55 = vld [vmem:[%s4860_s9 + $0x560] ss:$8 sps:$4 sm:$0xff]   ;;  %v4653_v21 = vld [vmem:[%s4860_s9 + $0x574] ss:$8 sps:$4 sm:$0xff]  }
 0x14b   : > { %v2805_v27 = vadd.f32 %v5168_v15, %v2800_v4 }
 0x14c   : > { %v1798_v7 = vpop.f32.mrb[32].mxu0  ;;  %v5189_v8 = vpop.f32.mrb[32].mxu1 }
 0x14d   : > { %5989 = vst [vmem:[#allocation8_spill] sm:$0xff] %v5189_v8  ;;  %v2810_v13 = vmax.f32 %v2805_v27, 0.0  ;;  %v2766_v14 = vmax.f32 %v5095_v33, %v1798_v7  ;;  %v1800_v19 = vpop.f32.mrb[33].mxu0  ;;  %v2200_v20 = vpop.f32.mrb[33].mxu1 }
 0x14e   : > { %v1801_v24 = vpop.f32.mrb[34].mxu0  ;;  %v5201_v25 = vpop.f32.mrb[34].mxu1 }
 0x14f   : > { %5990 = vst [vmem:[#allocation9_spill] sm:$0xff] %v5201_v25  ;;  %v4268_v31 = vpack.c.bf16 %v2810_v13, %v2809_v61  ;;  %2776 = vst [vmem:[#allocation3 + $0x30] sm:$0xff] %v2766_v14  ;;  %v2767_v33 = vmax.f32 %v5101_v39, %v1801_v24  ;;  %v1803_v35 = vpop.f32.mrb[35].mxu0  ;;  %v2203_v36 = vpop.f32.mrb[35].mxu1  ;;  %v4655_v13 = vld [vmem:[%s4860_s9 + $0x250] ss:$8 sps:$4 sm:$0xff]  }
 0x150   : > { %v2784_v37 = vld [vmem:[#allocation3 + $0x20] ss:$2 sm:$0xff]  ;;  %v2794_v38 = vld [vmem:[#allocation3 + $0x21] ss:$2 sm:$0xff]  ;;  %v4656_v24 = vld [vmem:[%s4860_s9 + $0x570] ss:$8 sps:$4 sm:$0xff]  }
 0x151   : > { %4269 = vst [vmem:[%s5199_s8] sm:$0xff] %v4268_v31   ;;  %2777 = vst [vmem:[#allocation3 + $0x38] sm:$0xff] %v2767_v33  ;;  %2013 = vmatmul.mubr.bf16.gmra.mrb[140].mxu0 %v4643_v11  ;;  %2413 = vmatmul.mubr.bf16.gmra.mrb[140].mxu1 %v4644_v23  ;;  %v2801_v43 = vmax.f32 %v2784_v37, %v2794_v38  ;;  %v4657_v31 = vld [vmem:[%s4860_s9 + $0x264] ss:$8 sps:$4 sm:$0xff]  }
 0x152   : > { %4044 = vmatprep.mubr.msk.bf16.mxu0 %vm1392_vm0, %v4645_v28  ;;  %4094 = vmatprep.mubr.msk.bf16.mxu1 %vm1392_vm0, %v4647_v29  ;;  %v4659_v33 = vld [vmem:[%s4860_s9 + $0x584] ss:$8 sps:$4 sm:$0xff]  }
 0x153   : > { %v2806_v7 = vadd.f32 %v5168_v15, %v2801_v43 }
 0x154   : > { %v1806_v39 = vpop.f32.mrb[36].mxu0  ;;  %v5211_v42 = vpop.f32.mrb[36].mxu1 }
 0x155   : > { %5991 = vst [vmem:[#allocation10_spill] sm:$0xff] %v5211_v42  ;;  %v2768_v47 = vmax.f32 %v5109_v45, %v1806_v39  ;;  %v1808_v49 = vpop.f32.mrb[37].mxu0  ;;  %v2208_v50 = vpop.f32.mrb[37].mxu1  ;;  %v2811_v19 = vmax.f32 %v2806_v7, 0.0  ;;  %v4665_v7 = vld [vmem:[%s4860_s9 + $0x594] ss:$8 sps:$4 sm:$0xff]  }
 0x156   : > { %v1809_v56 = vpop.f32.mrb[38].mxu0  ;;  %v5218_v57 = vpop.f32.mrb[38].mxu1  ;;  %v2842_v50 = vld [vmem:[%s5199_s8 + $0x10] sm:$0x7] }
 0x157   : > { %5992 = vst [vmem:[#allocation11_spill] sm:$0xff] %v5218_v57  ;;  %2778 = vst [vmem:[#allocation3 + $0x40] sm:$0xff] %v2768_v47  ;;  %v2769_v0 = vmax.f32 %v5115_v51, %v1809_v56  ;;  %v1811_v45 = vpop.f32.mrb[39].mxu0  ;;  %v2211_v2 = vpop.f32.mrb[39].mxu1 }
 0x158   : > { %v2786_v4 = vld [vmem:[#allocation3 + $0x30] ss:$2 sm:$0xff]  ;;  %v2796_v27 = vld [vmem:[#allocation3 + $0x31] ss:$2 sm:$0xff]  ;;  %v5993_v2 = vmov 0 }
 0x159   : > { %v2802_v11 = vmax.f32 %v2786_v4, %v2796_v27  ;;  %2779 = vst [vmem:[#allocation3 + $0x48] sm:$0xff] %v2769_v0  ;;  %2021 = vmatmul.mubr.bf16.gmra.mrb[144].mxu0 %v4649_v53  ;;  %2421 = vmatmul.mubr.bf16.gmra.mrb[144].mxu1 %v4650_v55  ;;  %v4661_v55 = vld [vmem:[%s4860_s9 + $0x260] ss:$8 sps:$4 sm:$0xff]   ;;  %v5994_v2 = vsel %vm5252_vm5, 4294967295, %v5993_v2  ;;  %v4663_v27 = vld [vmem:[%s4860_s9 + $0x274] ss:$8 sps:$4 sm:$0xff]  }
 0x15a   : > { %4045 = vmatprep.mubr.msk.bf16.mxu0 %vm1392_vm0, %v4651_v63  ;;  %4095 = vmatprep.mubr.msk.bf16.mxu1 %vm1392_vm0, %v4653_v21  ;;  %v4662_v0 = vld [vmem:[%s4860_s9 + $0x580] ss:$8 sps:$4 sm:$0xff]   ;;  %5995 = vst [vmem:[#allocation12_spill] sm:$0xff] %v5994_v2 }
 0x15b   : > { %v2807_v51 = vadd.f32 %v5168_v15, %v2802_v11 }
 0x15c   : > { %v5229_v61 = vpop.f32.mrb[40].mxu0  ;;  %v5232_v14 = vpop.f32.mrb[40].mxu1 }
 0x15d   : > { %v2812_v20 = vmax.f32 %v2807_v51, 0.0  ;;  %v1816_v23 = vpop.f32.mrb[41].mxu0  ;;  %v2216_v28 = vpop.f32.mrb[41].mxu1 }
 0x15e   : > { %v5235_v29 = vpop.f32.mrb[42].mxu0  ;;  %v5239_v35 = vpop.f32.mrb[42].mxu1 }
 0x15f   : > { %v4273_v36 = vpack.c.bf16 %v2812_v20, %v2811_v19  ;;  %v1819_v37 = vpop.f32.mrb[43].mxu0  ;;  %v2219_v38 = vpop.f32.mrb[43].mxu1 }
 0x160   : > { %v2788_v39 = vld [vmem:[#allocation3 + $0x40] ss:$2 sm:$0x1f]  ;;  %v2798_v43 = vld [vmem:[#allocation3 + $0x41] ss:$2 sm:$0x1f] }
 0x161   : > { %4340 = vst [vmem:[%s5199_s8 + $0x8] sm:$0xff] %v4273_v36   ;;  %v2803_v47 = vmax.f32 %v2788_v39, %v2798_v43  ;;  %2029 = vmatmul.mubr.bf16.gmra.mrb[148].mxu0 %v4655_v13  ;;  %2429 = vmatmul.mubr.bf16.gmra.mrb[148].mxu1 %v4656_v24  ;;  %v4669_v38 = vld [vmem:[%s4860_s9 + $0x284] ss:$8 sps:$4 sm:$0xff]  }
 0x162   : > { %4046 = vmatprep.mubr.msk.bf16.mxu0 %vm1392_vm0, %v4657_v31  ;;  %4096 = vmatprep.mubr.msk.bf16.mxu1 %vm1392_vm0, %v4659_v33  ;;  %v4667_v31 = vld [vmem:[%s4860_s9 + $0x270] ss:$8 sps:$4 sm:$0xff]   ;;  %v4671_v39 = vld [vmem:[%s4860_s9 + $0x5a4] ss:$8 sps:$4 sm:$0xff]  }
 0x163   : > { %v2808_v49 = vadd.f32 %v5168_v15, %v2803_v47  ;;  %v4668_v33 = vld [vmem:[%s4860_s9 + $0x590] ss:$8 sps:$4 sm:$0xff]  }
 0x164   : > { %v5246_v53 = vpop.f32.mrb[44].mxu0  ;;  %v5249_v56 = vpop.f32.mrb[44].mxu1 }
 0x165   : > { %v2813_v63 = vmax.f32 %v2808_v49, 0.0  ;;  %v1824_v21 = vpop.f32.mrb[45].mxu0  ;;  %v2224_v45 = vpop.f32.mrb[45].mxu1 }
 0x166   : > { %v5256_v4 = vpop.f32.mrb[46].mxu0  ;;  %v5260_v11 = vpop.f32.mrb[46].mxu1  ;;  %v4673_v21 = vld [vmem:[%s4860_s9 + $0x280] ss:$8 sps:$4 sm:$0xff]  }
 0x167   : > { %v4219_v51 = vpack.c.bf16 %v2813_v63, %v2813_v63  ;;  %v1827_v13 = vpop.f32.mrb[47].mxu0  ;;  %v2227_v19 = vpop.f32.mrb[47].mxu1 }
 0x168   : > { %v4677_v13 = vld [vmem:[%s4860_s9 + $0x5b4] ss:$8 sps:$4 sm:$0xff]  }
 0x169   : > { %v2843_v20 = vsel %vm5252_vm5, %v4219_v51, %v2842_v50  ;;  %2037 = vmatmul.mubr.bf16.gmra.mrb[152].mxu0 %v4661_v55  ;;  %2437 = vmatmul.mubr.bf16.gmra.mrb[152].mxu1 %v4662_v0  ;;  %v4674_v0 = vld [vmem:[%s4860_s9 + $0x5a0] ss:$8 sps:$4 sm:$0xff]   ;;  %v4675_v51 = vld [vmem:[%s4860_s9 + $0x294] ss:$8 sps:$4 sm:$0xff]  }
 0x16a   : > { %2844 = vst [vmem:[%s5199_s8 + $0x10] sm:$0x7] %v2843_v20  ;;  %4047 = vmatprep.mubr.msk.bf16.mxu0 %vm1392_vm0, %v4663_v27  ;;  %4097 = vmatprep.mubr.msk.bf16.mxu1 %vm1392_vm0, %v4665_v7 }
 0x16c   : > { %v5267_v23 = vpop.f32.mrb[48].mxu0  ;;  %v5269_v24 = vpop.f32.mrb[48].mxu1 }
 0x16d   : > { %5996 = vst [vmem:[#allocation13_spill] sm:$0xff] %v5269_v24  ;;  %v1832_v28 = vpop.f32.mrb[49].mxu0  ;;  %v2232_v36 = vpop.f32.mrb[49].mxu1 }
 0x16e   : > { %v5273_v37 = vpop.f32.mrb[50].mxu0  ;;  %v5277_v43 = vpop.f32.mrb[50].mxu1  ;;  %v4679_v36 = vld [vmem:[%s4860_s9 + $0x290] ss:$8 sps:$4 sm:$0xff]  }
 0x16f   : > { %5997 = vst [vmem:[#allocation14_spill] sm:$0xff] %v5277_v43  ;;  %v1835_v47 = vpop.f32.mrb[51].mxu0  ;;  %v2235_v49 = vpop.f32.mrb[51].mxu1 }
 0x171   : > { %2045 = vmatmul.mubr.bf16.gmra.mrb[156].mxu0 %v4667_v31  ;;  %2445 = vmatmul.mubr.bf16.gmra.mrb[156].mxu1 %v4668_v33 }
 0x172   : > { %4048 = vmatprep.mubr.msk.bf16.mxu0 %vm1392_vm0, %v4669_v38  ;;  %4098 = vmatprep.mubr.msk.bf16.mxu1 %vm1392_vm0, %v4671_v39  ;;  %v4680_v39 = vld [vmem:[%s4860_s9 + $0x5b0] ss:$8 sps:$4 sm:$0xff]  }
 0x174   : > { %v5281_v50 = vpop.f32.mrb[52].mxu0  ;;  %v5283_v55 = vpop.f32.mrb[52].mxu1 }
 0x175   : > { %5998 = vst [vmem:[#allocation15_spill] sm:$0xff] %v5283_v55  ;;  %v1840_v63 = vpop.f32.mrb[53].mxu0  ;;  %v2240_v45 = vpop.f32.mrb[53].mxu1 }
 0x176   : > { %v5287_v27 = vpop.f32.mrb[54].mxu0  ;;  %v5289_v7 = vpop.f32.mrb[54].mxu1  ;;  %v4681_v63 = vld [vmem:[%s4860_s9 + $0x2a4] ss:$8 sps:$4 sm:$0xff]  }
 0x177   : > { %5999 = vst [vmem:[#allocation16_spill] sm:$0xff] %v5289_v7  ;;  %v1843_v19 = vpop.f32.mrb[55].mxu0  ;;  %v2243_v20 = vpop.f32.mrb[55].mxu1 }
 0x179   : > { %2053 = vmatmul.mubr.bf16.gmra.mrb[160].mxu0 %v4673_v21  ;;  %2453 = vmatmul.mubr.bf16.gmra.mrb[160].mxu1 %v4674_v0  ;;  %v4683_v21 = vld [vmem:[%s4860_s9 + $0x5c4] ss:$8 sps:$4 sm:$0xff]  }
 0x17a   : > { %4049 = vmatprep.mubr.msk.bf16.mxu0 %vm1392_vm0, %v4675_v51  ;;  %4099 = vmatprep.mubr.msk.bf16.mxu1 %vm1392_vm0, %v4677_v13 }
 0x17c   : > { %v5295_v28 = vpop.f32.mrb[56].mxu0  ;;  %v5297_v31 = vpop.f32.mrb[56].mxu1 }
 0x17d   : > { %6000 = vst [vmem:[#allocation17_spill] sm:$0xff] %v5297_v31  ;;  %v1848_v33 = vpop.f32.mrb[57].mxu0  ;;  %v2248_v38 = vpop.f32.mrb[57].mxu1 }
 0x17e   : > { %v5301_v47 = vpop.f32.mrb[58].mxu0  ;;  %v5303_v49 = vpop.f32.mrb[58].mxu1 }
 0x17f   : > { %6001 = vst [vmem:[#allocation18_spill] sm:$0xff] %v5303_v49  ;;  %v1851_v0 = vpop.f32.mrb[59].mxu0  ;;  %v2251_v45 = vpop.f32.mrb[59].mxu1 }
 0x180   : > { %v4685_v0 = vld [vmem:[%s4860_s9 + $0x2a0] ss:$8 sps:$4 sm:$0xff]  }
 0x181   : > { %2061 = vmatmul.mubr.bf16.gmra.mrb[164].mxu0 %v4679_v36  ;;  %2461 = vmatmul.mubr.bf16.gmra.mrb[164].mxu1 %v4680_v39  ;;  %v4687_v36 = vld [vmem:[%s4860_s9 + $0x2b4] ss:$8 sps:$4 sm:$0xff]  }
 0x182   : > { %4050 = vmatprep.mubr.msk.bf16.mxu0 %vm1392_vm0, %v4681_v63  ;;  %4100 = vmatprep.mubr.msk.bf16.mxu1 %vm1392_vm0, %v4683_v21  ;;  %v4689_v39 = vld [vmem:[%s4860_s9 + $0x5d4] ss:$8 sps:$4 sm:$0xff]  }
 0x184   : > { %v1854_v51 = vpop.f32.mrb[60].mxu0  ;;  %v5309_v13 = vpop.f32.mrb[60].mxu1 }
 0x185   : > { %v2865_v19 = vmax.f32 %v5229_v61, %v1854_v51  ;;  %v1856_v33 = vpop.f32.mrb[61].mxu0  ;;  %v2256_v38 = vpop.f32.mrb[61].mxu1  ;;  %v4722_v61 = vld [vmem:[%s4860_s9 + $0x620] ss:$8 sps:$4 sm:$0xff]  }
 0x186   : > { %v1857_v45 = vpop.f32.mrb[62].mxu0  ;;  %v5316_v48 = vpop.f32.mrb[62].mxu1 }
 0x187   : > { %2875 = vst [vmem:[#allocation3] sm:$0xff] %v2865_v19  ;;  %v2866_v63 = vmax.f32 %v5235_v29, %v1857_v45  ;;  %v1859_v21 = vpop.f32.mrb[63].mxu0  ;;  %v2259_v51 = vpop.f32.mrb[63].mxu1 }
 0x188   : > { %v4691_v51 = vld [vmem:[%s4860_s9 + $0x2b0] ss:$8 sps:$4 sm:$0xff]  }
 0x189   : > { %2876 = vst [vmem:[#allocation3 + $0x8] sm:$0xff] %v2866_v63  ;;  %2069 = vmatmul.mubr.bf16.gmra.mrb[168].mxu0 %v4685_v0  ;;  %2469 = vmatmul.mubr.bf16.gmra.mrb[168].mxu1 %v4686_v1  ;;  %v4693_v1 = vld [vmem:[%s4860_s9 + $0x2c4] ss:$8 sps:$4 sm:$0xff]  }
 0x18a   : > { %4051 = vmatprep.mubr.msk.bf16.mxu0 %vm1392_vm0, %v4687_v36  ;;  %4101 = vmatprep.mubr.msk.bf16.mxu1 %vm1392_vm0, %v4689_v39  ;;  %v4695_v0 = vld [vmem:[%s4860_s9 + $0x5e4] ss:$8 sps:$4 sm:$0xff]   ;;  %v4701_v39 = vld [vmem:[%s4860_s9 + $0x5f4] ss:$8 sps:$4 sm:$0xff]  }
 0x18c   : > { %v1862_v33 = vpop.f32.mrb[64].mxu0  ;;  %v5325_v19 = vpop.f32.mrb[64].mxu1 }
 0x18d   : > { %v2867_v29 = vmax.f32 %v5246_v53, %v1862_v33  ;;  %v1864_v45 = vpop.f32.mrb[65].mxu0  ;;  %v2264_v21 = vpop.f32.mrb[65].mxu1 }
 0x18e   : > { %v1865_v63 = vpop.f32.mrb[66].mxu0  ;;  %v5332_v3 = vpop.f32.mrb[66].mxu1 }
 0x18f   : > { %2877 = vst [vmem:[#allocation3 + $0x10] sm:$0xff] %v2867_v29  ;;  %v2868_v36 = vmax.f32 %v5256_v4, %v1865_v63  ;;  %v1867_v53 = vpop.f32.mrb[67].mxu0  ;;  %v2267_v33 = vpop.f32.mrb[67].mxu1  ;;  %v4697_v63 = vld [vmem:[%s4860_s9 + $0x2c0] ss:$8 sps:$4 sm:$0xff]  }
 0x190   : > { %v2885_v59 = vld [vmem:[#allocation3] ss:$2 sm:$0xff]  ;;  %v2890_v44 = vld [vmem:[#allocation3 + $0x1] ss:$2 sm:$0xff] }
 0x191   : > { %v2895_v45 = vmax.f32 %v2885_v59, %v2890_v44  ;;  %2878 = vst [vmem:[#allocation3 + $0x18] sm:$0xff] %v2868_v36  ;;  %2077 = vmatmul.mubr.bf16.gmra.mrb[172].mxu0 %v4691_v51  ;;  %2477 = vmatmul.mubr.bf16.gmra.mrb[172].mxu1 %v4692_v9  ;;  %v4698_v51 = vld [vmem:[%s4860_s9 + $0x5e0] ss:$8 sps:$4 sm:$0xff]  }
 0x192   : > { %4052 = vmatprep.mubr.msk.bf16.mxu0 %vm1392_vm0, %v4693_v1  ;;  %4102 = vmatprep.mubr.msk.bf16.mxu1 %vm1392_vm0, %v4695_v0  ;;  %v4699_v0 = vld [vmem:[%s4860_s9 + $0x2d4] ss:$8 sps:$4 sm:$0xff]  }
 0x193   : > { %v2900_v4 = vadd.f32 %v5168_v15, %v2895_v45 }
 0x194   : > { %v1870_v29 = vpop.f32.mrb[68].mxu0  ;;  %v5342_v21 = vpop.f32.mrb[68].mxu1 }
 0x195   : > { %6002 = vst [vmem:[#allocation19_spill] sm:$0xff] %v5342_v21  ;;  %v2905_v53 = vmax.f32 %v2900_v4, 0.0  ;;  %v2869_v33 = vmax.f32 %v5267_v23, %v1870_v29  ;;  %v1872_v59 = vpop.f32.mrb[69].mxu0  ;;  %v2272_v9 = vpop.f32.mrb[69].mxu1  ;;  %v4705_v4 = vld [vmem:[%s4860_s9 + $0x2e4] ss:$8 sps:$4 sm:$0xff]  }
 0x196   : > { %v1873_v36 = vpop.f32.mrb[70].mxu0  ;;  %v5349_v1 = vpop.f32.mrb[70].mxu1 }
 0x197   : > { %6003 = vst [vmem:[#allocation20_spill] sm:$0xff] %v5349_v1  ;;  %v4220_v45 = vpack.c.bf16 %v2905_v53, %v2905_v53  ;;  %2879 = vst [vmem:[#allocation3 + $0x20] sm:$0xff] %v2869_v33  ;;  %v2870_v38 = vmax.f32 %v5273_v37, %v1873_v36  ;;  %v1875_v32 = vpop.f32.mrb[71].mxu0  ;;  %v2275_v23 = vpop.f32.mrb[71].mxu1  ;;  %v4704_v36 = vld [vmem:[%s4860_s9 + $0x5f0] ss:$8 sps:$4 sm:$0xff]  }
 0x198   : > { %v2886_v29 = vld [vmem:[#allocation3 + $0x10] ss:$2 sm:$0xff]  ;;  %v2891_v59 = vld [vmem:[#allocation3 + $0x11] ss:$2 sm:$0xff] }
 0x199   : > { %4119 = vst [vmem:[%s5199_s8 + $0x14] sm:$0xf] %v4220_v45  ;;  %2880 = vst [vmem:[#allocation3 + $0x28] sm:$0xff] %v2870_v38  ;;  %2085 = vmatmul.mubr.bf16.gmra.mrb[176].mxu0 %v4697_v63  ;;  %2485 = vmatmul.mubr.bf16.gmra.mrb[176].mxu1 %v4698_v51  ;;  %v2896_v33 = vmax.f32 %v2886_v29, %v2891_v59  ;;  %v4703_v51 = vld [vmem:[%s4860_s9 + $0x2d0] ss:$8 sps:$4 sm:$0xff]  }
 0x19a   : > { %4053 = vmatprep.mubr.msk.bf16.mxu0 %vm1392_vm0, %v4699_v0  ;;  %4103 = vmatprep.mubr.msk.bf16.mxu1 %vm1392_vm0, %v4701_v39  ;;  %v4707_v0 = vld [vmem:[%s4860_s9 + $0x604] ss:$8 sps:$4 sm:$0xff]  }
 0x19c   : > { %v1878_v37 = vpop.f32.mrb[72].mxu0  ;;  %v5359_v53 = vpop.f32.mrb[72].mxu1 }
 0x19d   : > { %6004 = vst [vmem:[#allocation21_spill] sm:$0xff] %v5359_v53  ;;  %v2871_v32 = vmax.f32 %v5281_v50, %v1878_v37  ;;  %v1880_v38 = vpop.f32.mrb[73].mxu0  ;;  %v2280_v63 = vpop.f32.mrb[73].mxu1 }
 0x19e   : > { %v1881_v45 = vpop.f32.mrb[74].mxu0  ;;  %v5366_v23 = vpop.f32.mrb[74].mxu1  ;;  %v2901_v38 = vadd.f32 %v5168_v15, %v2896_v33 }
 0x19f   : > { %6005 = vst [vmem:[#allocation22_spill] sm:$0xff] %v5366_v23  ;;  %2881 = vst [vmem:[#allocation3 + $0x30] sm:$0xff] %v2871_v32  ;;  %v2872_v39 = vmax.f32 %v5287_v27, %v1881_v45  ;;  %v1883_v50 = vpop.f32.mrb[75].mxu0  ;;  %v2283_v59 = vpop.f32.mrb[75].mxu1 }
 0x1a0   : > { %v2887_v37 = vld [vmem:[#allocation3 + $0x20] ss:$2 sm:$0xff]  ;;  %v2892_v9 = vld [vmem:[#allocation3 + $0x21] ss:$2 sm:$0xff]  ;;  %v2906_v59 = vmax.f32 %v2901_v38, 0.0 }
 0x1a1   : > { %v2897_v63 = vmax.f32 %v2887_v37, %v2892_v9  ;;  %2882 = vst [vmem:[#allocation3 + $0x38] sm:$0xff] %v2872_v39  ;;  %2093 = vmatmul.mubr.bf16.gmra.mrb[180].mxu0 %v4703_v51  ;;  %2493 = vmatmul.mubr.bf16.gmra.mrb[180].mxu1 %v4704_v36  ;;  %v4709_v50 = vld [vmem:[%s4860_s9 + $0x2e0] ss:$8 sps:$4 sm:$0xff]  }
 0x1a2   : > { %4054 = vmatprep.mubr.msk.bf16.mxu0 %vm1392_vm0, %v4705_v4  ;;  %4104 = vmatprep.mubr.msk.bf16.mxu1 %vm1392_vm0, %v4707_v0  ;;  %v4710_v4 = vld [vmem:[%s4860_s9 + $0x600] ss:$8 sps:$4 sm:$0xff]   ;;  %v4711_v0 = vld [vmem:[%s4860_s9 + $0x2f4] ss:$8 sps:$4 sm:$0xff]  }
 0x1a3   : > { %v2902_v27 = vadd.f32 %v5168_v15, %v2897_v63  ;;  %v4713_v63 = vld [vmem:[%s4860_s9 + $0x614] ss:$8 sps:$4 sm:$0xff]  }
 0x1a4   : > { %v1886_v32 = vpop.f32.mrb[76].mxu0  ;;  %v5377_v45 = vpop.f32.mrb[76].mxu1 }
 0x1a5   : > { %6006 = vst [vmem:[#allocation23_spill] sm:$0xff] %v5377_v45  ;;  %v2907_v29 = vmax.f32 %v2902_v27, 0.0  ;;  %v2873_v33 = vmax.f32 %v5295_v28, %v1886_v32  ;;  %v1888_v51 = vpop.f32.mrb[77].mxu0  ;;  %v2288_v36 = vpop.f32.mrb[77].mxu1 }
 0x1a6   : > { %v1889_v39 = vpop.f32.mrb[78].mxu0  ;;  %v5384_v37 = vpop.f32.mrb[78].mxu1 }
 0x1a7   : > { %6007 = vst [vmem:[#allocation24_spill] sm:$0xff] %v5384_v37  ;;  %v4278_v44 = vpack.c.bf16 %v2907_v29, %v2906_v59  ;;  %2883 = vst [vmem:[#allocation3 + $0x40] sm:$0xff] %v2873_v33  ;;  %v2874_v38 = vmax.f32 %v5301_v47, %v1889_v39  ;;  %v1891_v27 = vpop.f32.mrb[79].mxu0  ;;  %v2291_v32 = vpop.f32.mrb[79].mxu1  ;;  %v4715_v59 = vld [vmem:[%s4860_s9 + $0x2f0] ss:$8 sps:$4 sm:$0xff]  }
 0x1a8   : > { %v2888_v9 = vld [vmem:[#allocation3 + $0x30] ss:$2 sm:$0xff]  ;;  %v2893_v51 = vld [vmem:[#allocation3 + $0x31] ss:$2 sm:$0xff] }
 0x1a9   : > { %4341 = vst [vmem:[%s5199_s8 + $0x18] sm:$0xff] %v4278_v44   ;;  %v2898_v36 = vmax.f32 %v2888_v9, %v2893_v51  ;;  %2884 = vst [vmem:[#allocation3 + $0x48] sm:$0xff] %v2874_v38  ;;  %2101 = vmatmul.mubr.bf16.gmra.mrb[184].mxu0 %v4709_v50  ;;  %2501 = vmatmul.mubr.bf16.gmra.mrb[184].mxu1 %v4710_v4  ;;  %v4716_v27 = vld [vmem:[%s4860_s9 + $0x610] ss:$8 sps:$4 sm:$0xff]   ;;  %v4717_v50 = vld [vmem:[%s4860_s9 + $0x304] ss:$8 sps:$4 sm:$0xff]  }
 0x1aa   : > { %4055 = vmatprep.mubr.msk.bf16.mxu0 %vm1392_vm0, %v4711_v0  ;;  %4105 = vmatprep.mubr.msk.bf16.mxu1 %vm1392_vm0, %v4713_v63  ;;  %v4719_v4 = vld [vmem:[%s4860_s9 + $0x624] ss:$8 sps:$4 sm:$0xff]   ;;  %v4728_v37 = vld [vmem:[%s4860_s9 + $0x630] ss:$8 sps:$4 sm:$0xff]  }
 0x1ab   : > { %v2903_v47 = vadd.f32 %v5168_v15, %v2898_v36 }
 0x1ac   : > { %v5395_v29 = vpop.f32.mrb[80].mxu0  ;;  %v5398_v33 = vpop.f32.mrb[80].mxu1 }
 0x1ad   : > { %v2908_v39 = vmax.f32 %v2903_v47, 0.0  ;;  %v1896_v44 = vpop.f32.mrb[81].mxu0  ;;  %v2296_v9 = vpop.f32.mrb[81].mxu1 }
 0x1ae   : > { %v5401_v32 = vpop.f32.mrb[82].mxu0  ;;  %v5405_v0 = vpop.f32.mrb[82].mxu1  ;;  %v4123_v9 = vld [vmem:[%s5199_s8 + $0x24] sm:$0x7] }
 0x1af   : > { %v4223_v63 = vpack.c.bf16 %v2908_v39, %v2908_v39  ;;  %v1899_v38 = vpop.f32.mrb[83].mxu0  ;;  %v2299_v51 = vpop.f32.mrb[83].mxu1  ;;  %v4721_v39 = vld [vmem:[%s4860_s9 + $0x300] ss:$8 sps:$4 sm:$0xff]  }
 0x1b0   : > { %v2889_v36 = vld [vmem:[#allocation3 + $0x40] ss:$2 sm:$0x1f]  ;;  %v2894_v28 = vld [vmem:[#allocation3 + $0x41] ss:$2 sm:$0x1f] }
 0x1b1   : > { %4122 = vst [vmem:[%s5199_s8 + $0x20] sm:$0xf] %v4223_v63  ;;  %v2899_v47 = vmax.f32 %v2889_v36, %v2894_v28  ;;  %2109 = vmatmul.mubr.bf16.gmra.mrb[188].mxu0 %v4715_v59  ;;  %2509 = vmatmul.mubr.bf16.gmra.mrb[188].mxu1 %v4716_v27  ;;  %v4723_v59 = vld [vmem:[%s4860_s9 + $0x314] ss:$8 sps:$4 sm:$0xff]  }
 0x1b2   : > { %4056 = vmatprep.mubr.msk.bf16.mxu0 %vm1392_vm0, %v4717_v50  ;;  %4106 = vmatprep.mubr.msk.bf16.mxu1 %vm1392_vm0, %v4719_v4  ;;  %v4725_v27 = vld [vmem:[%s4860_s9 + $0x634] ss:$8 sps:$4 sm:$0xff]  }
 0x1b3   : > { %v2904_v44 = vadd.f32 %v5168_v15, %v2899_v47 }
 0x1b4   : > { %v5412_v17 = vpop.f32.mrb[84].mxu0  ;;  %v5415_v38 = vpop.f32.mrb[84].mxu1 }
 0x1b5   : > { %v2909_v51 = vmax.f32 %v2904_v44, 0.0  ;;  %v1904_v63 = vpop.f32.mrb[85].mxu0  ;;  %v2304_v28 = vpop.f32.mrb[85].mxu1 }
 0x1b6   : > { %v5418_v36 = vpop.f32.mrb[86].mxu0  ;;  %v5422_v50 = vpop.f32.mrb[86].mxu1 }
 0x1b7   : > { %6008 = vst [vmem:[#allocation25_spill] sm:$0xff] %v5422_v50  ;;  %v4224_v4 = vpack.c.bf16 %v2909_v51, %v2909_v51  ;;  %v1907_v47 = vpop.f32.mrb[87].mxu0  ;;  %v2307_v20 = vpop.f32.mrb[87].mxu1 }
 0x1b9   : > { %v2937_v12 = vsel %vm5252_vm5, %v4224_v4, %v4123_v9  ;;  %2117 = vmatmul.mubr.bf16.gmra.mrb[192].mxu0 %v4721_v39  ;;  %2517 = vmatmul.mubr.bf16.gmra.mrb[192].mxu1 %v4722_v61 }
 0x1ba   : > { %4124 = vst [vmem:[%s5199_s8 + $0x24] sm:$0x7] %v2937_v12  ;;  %4057 = vmatprep.mubr.msk.bf16.mxu0 %vm1392_vm0, %v4723_v59  ;;  %4107 = vmatprep.mubr.msk.bf16.mxu1 %vm1392_vm0, %v4725_v27 }
 0x1bc   : > { %v5429_v44 = vpop.f32.mrb[88].mxu0  ;;  %v5431_v63 = vpop.f32.mrb[88].mxu1 }
 0x1bd   : > { %6009 = vst [vmem:[#allocation26_spill] sm:$0xff] %v5431_v63  ;;  %v1912_v28 = vpop.f32.mrb[89].mxu0  ;;  %v2312_v51 = vpop.f32.mrb[89].mxu1 }
 0x1be   : > { %v5435_v47 = vpop.f32.mrb[90].mxu0  ;;  %v5437_v20 = vpop.f32.mrb[90].mxu1 }
 0x1bf   : > { %6010 = vst [vmem:[#allocation27_spill] sm:$0xff] %v5437_v20  ;;  %v1915_v9 = vpop.f32.mrb[91].mxu0  ;;  %v2315_v39 = vpop.f32.mrb[91].mxu1 }
 0x1c1   : > { %2125 = vmatmul.mubr.bf16.gmra.mrb[196].mxu0 %v4727_v60  ;;  %2525 = vmatmul.mubr.bf16.gmra.mrb[196].mxu1 %v4728_v37 }
 0x1c4   : > { %v5439_v12 = vpop.f32.mrb[92].mxu0  ;;  %v5441_v61 = vpop.f32.mrb[92].mxu1 }
 0x1c5   : > { %6011 = vst [vmem:[#allocation28_spill] sm:$0xff] %v5441_v61  ;;  %v1920_v59 = vpop.f32.mrb[93].mxu0  ;;  %v2320_v27 = vpop.f32.mrb[93].mxu1 }
 0x1c6   : > { %v5443_v4 = vpop.f32.mrb[94].mxu0  ;;  %v5445_v28 = vpop.f32.mrb[94].mxu1 }
 0x1c7   : > { %6012 = vst [vmem:[#allocation29_spill] sm:$0xff] %v5445_v28  ;;  %v1923_v49 = vpop.f32.mrb[95].mxu0  ;;  %v2323_v51 = vpop.f32.mrb[95].mxu1 }
 0x1cc   : > { %v5447_v45 = vpop.f32.mrb[96].mxu0  ;;  %v5449_v31 = vpop.f32.mrb[96].mxu1 }
 0x1cd   : > { %6013 = vst [vmem:[#allocation30_spill] sm:$0xff] %v5449_v31  ;;  %v1928_v9 = vpop.f32.mrb[97].mxu0  ;;  %v2328_v39 = vpop.f32.mrb[97].mxu1 }
 0x1ce   : > { %v5451_v60 = vpop.f32.mrb[98].mxu0  ;;  %v5453_v37 = vpop.f32.mrb[98].mxu1 }
 0x1cf   : > { %6014 = vst [vmem:[#allocation31_spill] sm:$0xff] %v5453_v37  ;;  %v1931_v57 = vpop.f32.mrb[99].mxu0  ;;  %v2331_v52 = vpop.f32.mrb[99].mxu1 }
 0x1d4   : > { %v1934_v59 = vpop.f32.mrb[100].mxu0  ;;  %v5455_v27 = vpop.f32.mrb[100].mxu1 }
 0x1d5   : > { %v2959_v42 = vmax.f32 %v5395_v29, %v1934_v59  ;;  %v1936_v51 = vpop.f32.mrb[101].mxu0  ;;  %v2336_v46 = vpop.f32.mrb[101].mxu1 }
 0x1d6   : > { %v1937_v23 = vpop.f32.mrb[102].mxu0  ;;  %v5460_v7 = vpop.f32.mrb[102].mxu1 }
 0x1d7   : > { %2969 = vst [vmem:[#allocation3] sm:$0xff] %v2959_v42  ;;  %v2960_v9 = vmax.f32 %v5401_v32, %v1937_v23  ;;  %v1939_v52 = vpop.f32.mrb[103].mxu0  ;;  %v2339_v39 = vpop.f32.mrb[103].mxu1 }
 0x1d9   : > { %2970 = vst [vmem:[#allocation3 + $0x8] sm:$0xff] %v2960_v9 }
 0x1dc   : > { %v1942_v53 = vpop.f32.mrb[104].mxu0  ;;  %v5465_v55 = vpop.f32.mrb[104].mxu1 }
 0x1dd   : > { %6015 = vst [vmem:[#allocation32_spill] sm:$0xff] %v5465_v55  ;;  %v2961_v29 = vmax.f32 %v5412_v17, %v1942_v53  ;;  %v1944_v59 = vpop.f32.mrb[105].mxu0  ;;  %v2344_v51 = vpop.f32.mrb[105].mxu1 }
 0x1de   : > { %v1945_v49 = vpop.f32.mrb[106].mxu0  ;;  %v5470_v42 = vpop.f32.mrb[106].mxu1 }
 0x1df   : > { %6016 = vst [vmem:[#allocation33_spill] sm:$0xff] %v5470_v42  ;;  %2971 = vst [vmem:[#allocation3 + $0x10] sm:$0xff] %v2961_v29  ;;  %v2962_v23 = vmax.f32 %v5418_v36, %v1945_v49  ;;  %v1947_v9 = vpop.f32.mrb[107].mxu0  ;;  %v2347_v52 = vpop.f32.mrb[107].mxu1 }
 0x1e0   : > { %v2979_v39 = vld [vmem:[#allocation3] ss:$2 sm:$0xff]  ;;  %v2984_v57 = vld [vmem:[#allocation3 + $0x1] ss:$2 sm:$0xff] }
 0x1e1   : > { %2972 = vst [vmem:[#allocation3 + $0x18] sm:$0xff] %v2962_v23  ;;  %v2989_v46 = vmax.f32 %v2979_v39, %v2984_v57 }
 0x1e4   : > { %v1950_v17 = vpop.f32.mrb[108].mxu0  ;;  %v5475_v53 = vpop.f32.mrb[108].mxu1 }
 0x1e5   : > { %6017 = vst [vmem:[#allocation34_spill] sm:$0xff] %v5475_v53  ;;  %v2963_v59 = vmax.f32 %v5429_v44, %v1950_v17  ;;  %v1952_v29 = vpop.f32.mrb[109].mxu0  ;;  %v2352_v25 = vpop.f32.mrb[109].mxu1  ;;  %v2994_v44 = vadd.f32 %v5168_v15, %v2989_v46 }
 0x1e6   : > { %v1953_v36 = vpop.f32.mrb[110].mxu0  ;;  %v5480_v49 = vpop.f32.mrb[110].mxu1 }
 0x1e7   : > { %6018 = vst [vmem:[#allocation35_spill] sm:$0xff] %v5480_v49  ;;  %2973 = vst [vmem:[#allocation3 + $0x20] sm:$0xff] %v2963_v59  ;;  %v2964_v9 = vmax.f32 %v5435_v47, %v1953_v36  ;;  %v1955_v52 = vpop.f32.mrb[111].mxu0  ;;  %v2355_v32 = vpop.f32.mrb[111].mxu1  ;;  %v2999_v59 = vmax.f32 %v2994_v44, 0.0 }
 0x1e8   : > { %v2980_v40 = vld [vmem:[#allocation3 + $0x10] ss:$2 sm:$0xff]  ;;  %v2985_v57 = vld [vmem:[#allocation3 + $0x11] ss:$2 sm:$0xff] }
 0x1e9   : > { %v2990_v39 = vmax.f32 %v2980_v40, %v2985_v57  ;;  %2974 = vst [vmem:[#allocation3 + $0x28] sm:$0xff] %v2964_v9 }
 0x1eb   : > { %v2995_v17 = vadd.f32 %v5168_v15, %v2990_v39 }
 0x1ec   : > { %v1958_v25 = vpop.f32.mrb[112].mxu0  ;;  %v5487_v29 = vpop.f32.mrb[112].mxu1 }
 0x1ed   : > { %6019 = vst [vmem:[#allocation36_spill] sm:$0xff] %v5487_v29  ;;  %v3000_v51 = vmax.f32 %v2995_v17, 0.0  ;;  %v2965_v47 = vmax.f32 %v5439_v12, %v1958_v25  ;;  %v1960_v32 = vpop.f32.mrb[113].mxu0  ;;  %v2360_v52 = vpop.f32.mrb[113].mxu1 }
 0x1ee   : > { %v1961_v23 = vpop.f32.mrb[114].mxu0  ;;  %v5492_v49 = vpop.f32.mrb[114].mxu1 }
 0x1ef   : > { %6020 = vst [vmem:[#allocation37_spill] sm:$0xff] %v5492_v49  ;;  %v4283_v40 = vpack.c.bf16 %v3000_v51, %v2999_v59  ;;  %2975 = vst [vmem:[#allocation3 + $0x30] sm:$0xff] %v2965_v47  ;;  %v2966_v46 = vmax.f32 %v5443_v4, %v1961_v23  ;;  %v1963_v57 = vpop.f32.mrb[115].mxu0  ;;  %v2363_v44 = vpop.f32.mrb[115].mxu1 }
 0x1f0   : > { %v2981_v12 = vld [vmem:[#allocation3 + $0x20] ss:$2 sm:$0xff]  ;;  %v2986_v39 = vld [vmem:[#allocation3 + $0x21] ss:$2 sm:$0xff] }
 0x1f1   : > { %4342 = vst [vmem:[%s5199_s8 + $0x28] sm:$0xff] %v4283_v40   ;;  %2976 = vst [vmem:[#allocation3 + $0x38] sm:$0xff] %v2966_v46  ;;  %v2991_v32 = vmax.f32 %v2981_v12, %v2986_v39 }
 0x1f4   : > { %v1966_v17 = vpop.f32.mrb[116].mxu0  ;;  %v5498_v25 = vpop.f32.mrb[116].mxu1 }
 0x1f5   : > { %6021 = vst [vmem:[#allocation38_spill] sm:$0xff] %v5498_v25  ;;  %v2967_v52 = vmax.f32 %v5447_v45, %v1966_v17  ;;  %v1968_v59 = vpop.f32.mrb[117].mxu0  ;;  %v2368_v4 = vpop.f32.mrb[117].mxu1  ;;  %v2996_v45 = vadd.f32 %v5168_v15, %v2991_v32 }
 0x1f6   : > { %v1969_v23 = vpop.f32.mrb[118].mxu0  ;;  %v5503_v47 = vpop.f32.mrb[118].mxu1 }
 0x1f7   : > { %6022 = vst [vmem:[#allocation39_spill] sm:$0xff] %v5503_v47  ;;  %2977 = vst [vmem:[#allocation3 + $0x40] sm:$0xff] %v2967_v52  ;;  %v2968_v40 = vmax.f32 %v5451_v60, %v1969_v23  ;;  %v1971_v57 = vpop.f32.mrb[119].mxu0  ;;  %v2371_v44 = vpop.f32.mrb[119].mxu1  ;;  %v3001_v52 = vmax.f32 %v2996_v45, 0.0 }
 0x1f8   : > { %v2982_v9 = vld [vmem:[#allocation3 + $0x30] ss:$2 sm:$0xff]  ;;  %v2987_v12 = vld [vmem:[#allocation3 + $0x31] ss:$2 sm:$0xff] }
 0x1f9   : > { %v2992_v39 = vmax.f32 %v2982_v9, %v2987_v12  ;;  %2978 = vst [vmem:[#allocation3 + $0x48] sm:$0xff] %v2968_v40 }
 0x1fb   : > { %v2997_v17 = vadd.f32 %v5168_v15, %v2992_v39 }
 0x1fc   : > { %v1974_v59 = vpop.f32.mrb[120].mxu0  ;;  %v5510_v4 = vpop.f32.mrb[120].mxu1 }
 0x1fd   : > { %v3002_v51 = vmax.f32 %v2997_v17, 0.0  ;;  %v1976_v60 = vpop.f32.mrb[121].mxu0  ;;  %v2376_v23 = vpop.f32.mrb[121].mxu1 }
 0x1fe   : > { %v1977_v46 = vpop.f32.mrb[122].mxu0  ;;  %v5512_v57 = vpop.f32.mrb[122].mxu1  ;;  %v4134_v23 = vld [vmem:[%s5199_s8 + $0x38] sm:$0x7] }
 0x1ff   : > { %v4288_v44 = vpack.c.bf16 %v3002_v51, %v3001_v52  ;;  %v1979_v36 = vpop.f32.mrb[123].mxu0  ;;  %v2379_v47 = vpop.f32.mrb[123].mxu1 }
 0x200   : > { %v2983_v32 = vld [vmem:[#allocation3 + $0x40] ss:$2 sm:$0x1f]  ;;  %v2988_v9 = vld [vmem:[#allocation3 + $0x41] ss:$2 sm:$0x1f] }
 0x201   : > { %4343 = vst [vmem:[%s5199_s8 + $0x30] sm:$0xff] %v4288_v44   ;;  %v2993_v40 = vmax.f32 %v2983_v32, %v2988_v9 }
 0x203   : > { %v2998_v12 = vadd.f32 %v5168_v15, %v2993_v40 }
 0x204   : > { %v1982_v39 = vpop.f32.mrb[124].mxu0  ;;  %v5516_v37 = vpop.f32.mrb[124].mxu1 }
 0x205   : > { %6023 = vst [vmem:[#allocation40_spill] sm:$0xff] %v5516_v37  ;;  %v3003_v45 = vmax.f32 %v2998_v12, 0.0  ;;  %v1984_v17 = vpop.f32.mrb[125].mxu0  ;;  %v2384_v60 = vpop.f32.mrb[125].mxu1 }
 0x206   : > { %v1985_v25 = vpop.f32.mrb[126].mxu0  ;;  %v5519_v31 = vpop.f32.mrb[126].mxu1 }
 0x207   : > { %6024 = vst [vmem:[#allocation41_spill] sm:$0xff] %v5519_v31  ;;  %v4229_v51 = vpack.c.bf16 %v3003_v45, %v3003_v45  ;;  %v1987_v36 = vpop.f32.mrb[127].mxu0  ;;  %v2387_v47 = vpop.f32.mrb[127].mxu1 }
 0x209   : > { %v3031_v52 = vsel %vm5252_vm5, %v4229_v51, %v4134_v23 }
 0x20a   : > { %4135 = vst [vmem:[%s5199_s8 + $0x38] sm:$0x7] %v3031_v52 }
 0x20c   : > { %v5524_v44 = vpop.f32.mrb[128].mxu0  ;;  %v5526_v15 = vpop.f32.mrb[128].mxu1 }
 0x20d   : > { %6025 = vst [vmem:[#allocation42_spill] sm:$0xff] %v5526_v15  ;;  %v1992_v32 = vpop.f32.mrb[129].mxu0  ;;  %v2392_v9 = vpop.f32.mrb[129].mxu1 }
 0x20e   : > { %v5528_v40 = vpop.f32.mrb[130].mxu0  ;;  %v5530_v12 = vpop.f32.mrb[130].mxu1 }
 0x20f   : > { %6026 = vst [vmem:[#allocation43_spill] sm:$0xff] %v5530_v12  ;;  %v1995_v17 = vpop.f32.mrb[131].mxu0  ;;  %v2395_v60 = vpop.f32.mrb[131].mxu1 }
 0x214   : > { %v5532_v49 = vpop.f32.mrb[132].mxu0  ;;  %v5534_v45 = vpop.f32.mrb[132].mxu1 }
 0x215   : > { %6027 = vst [vmem:[#allocation44_spill] sm:$0xff] %v5534_v45  ;;  %v2000_v36 = vpop.f32.mrb[133].mxu0  ;;  %v2400_v47 = vpop.f32.mrb[133].mxu1 }
 0x216   : > { %v5536_v23 = vpop.f32.mrb[134].mxu0  ;;  %v5538_v51 = vpop.f32.mrb[134].mxu1 }
 0x217   : > { %6028 = vst [vmem:[#allocation45_spill] sm:$0xff] %v5538_v51  ;;  %v2003_v52 = vpop.f32.mrb[135].mxu0  ;;  %v2403_v28 = vpop.f32.mrb[135].mxu1 }
 0x21c   : > { %v5540_v32 = vpop.f32.mrb[136].mxu0  ;;  %v5542_v9 = vpop.f32.mrb[136].mxu1 }
 0x21d   : > { %6029 = vst [vmem:[#allocation46_spill] sm:$0xff] %v5542_v9  ;;  %v2008_v29 = vpop.f32.mrb[137].mxu0  ;;  %v2408_v61 = vpop.f32.mrb[137].mxu1 }
 0x21e   : > { %v5544_v17 = vpop.f32.mrb[138].mxu0  ;;  %v5546_v60 = vpop.f32.mrb[138].mxu1 }
 0x21f   : > { %6030 = vst [vmem:[#allocation47_spill] sm:$0xff] %v5546_v60  ;;  %v2011_v20 = vpop.f32.mrb[139].mxu0  ;;  %v2411_v53 = vpop.f32.mrb[139].mxu1 }
 0x224   : > { %v2014_v36 = vpop.f32.mrb[140].mxu0  ;;  %v5548_v47 = vpop.f32.mrb[140].mxu1 }
 0x225   : > { %v3053_v63 = vmax.f32 %v1974_v59, %v2014_v36  ;;  %v2016_v28 = vpop.f32.mrb[141].mxu0  ;;  %v2416_v8 = vpop.f32.mrb[141].mxu1 }
 0x226   : > { %v2017_v34 = vpop.f32.mrb[142].mxu0  ;;  %v5552_v1 = vpop.f32.mrb[142].mxu1 }
 0x227   : > { %3063 = vst [vmem:[#allocation3] sm:$0xff] %v3053_v63  ;;  %v3054_v61 = vmax.f32 %v1977_v46, %v2017_v34  ;;  %v2019_v43 = vpop.f32.mrb[143].mxu0  ;;  %v2419_v20 = vpop.f32.mrb[143].mxu1 }
 0x229   : > { %3064 = vst [vmem:[#allocation3 + $0x8] sm:$0xff] %v3054_v61 }
 0x22c   : > { %v2022_v53 = vpop.f32.mrb[144].mxu0  ;;  %v5556_v21 = vpop.f32.mrb[144].mxu1 }
 0x22d   : > { %6031 = vst [vmem:[#allocation48_spill] sm:$0xff] %v5556_v21  ;;  %v3055_v59 = vmax.f32 %v1982_v39, %v2022_v53  ;;  %v2024_v28 = vpop.f32.mrb[145].mxu0  ;;  %v2424_v8 = vpop.f32.mrb[145].mxu1  ;;  %v5567_v39 = vld [vmem:[%s5928_s2] ss:$0 sm:$0xff] }
 0x22e   : > { %v2025_v52 = vpop.f32.mrb[146].mxu0  ;;  %v5560_v24 = vpop.f32.mrb[146].mxu1 }
 0x22f   : > { %6032 = vst [vmem:[#allocation49_spill] sm:$0xff] %v5560_v24  ;;  %3065 = vst [vmem:[#allocation3 + $0x10] sm:$0xff] %v3055_v59  ;;  %v3056_v34 = vmax.f32 %v1985_v25, %v2025_v52  ;;  %v2027_v43 = vpop.f32.mrb[147].mxu0  ;;  %v2427_v46 = vpop.f32.mrb[147].mxu1 }
 0x230   : > { %v3073_v61 = vld [vmem:[#allocation3] ss:$2 sm:$0xff]  ;;  %v3078_v20 = vld [vmem:[#allocation3 + $0x1] ss:$2 sm:$0xff] }
 0x231   : > { %v3083_v29 = vmax.f32 %v3073_v61, %v3078_v20  ;;  %3066 = vst [vmem:[#allocation3 + $0x18] sm:$0xff] %v3056_v34 }
 0x233   : > { %v3088_v53 = vadd.f32 %v5567_v39, %v3083_v29 }
 0x234   : > { %v2030_v28 = vpop.f32.mrb[148].mxu0  ;;  %v5570_v59 = vpop.f32.mrb[148].mxu1 }
 0x235   : > { %6033 = vst [vmem:[#allocation50_spill] sm:$0xff] %v5570_v59  ;;  %v3093_v25 = vmax.f32 %v3088_v53, 0.0  ;;  %v3057_v52 = vmax.f32 %v5524_v44, %v2030_v28  ;;  %v2032_v43 = vpop.f32.mrb[149].mxu0  ;;  %v2432_v46 = vpop.f32.mrb[149].mxu1 }
 0x236   : > { %v2033_v34 = vpop.f32.mrb[150].mxu0  ;;  %v5575_v61 = vpop.f32.mrb[150].mxu1 }
 0x237   : > { %6034 = vst [vmem:[#allocation51_spill] sm:$0xff] %v5575_v61  ;;  %v4230_v20 = vpack.c.bf16 %v3093_v25, %v3093_v25  ;;  %3067 = vst [vmem:[#allocation3 + $0x20] sm:$0xff] %v3057_v52  ;;  %v3058_v63 = vmax.f32 %v5528_v40, %v2033_v34  ;;  %v2035_v36 = vpop.f32.mrb[151].mxu0  ;;  %v2435_v24 = vpop.f32.mrb[151].mxu1 }
 0x238   : > { %v3074_v44 = vld [vmem:[#allocation3 + $0x10] ss:$2 sm:$0xff]  ;;  %v3079_v53 = vld [vmem:[#allocation3 + $0x11] ss:$2 sm:$0xff] }
 0x239   : > { %4141 = vst [vmem:[%s5199_s8 + $0x3c] sm:$0xf] %v4230_v20  ;;  %3068 = vst [vmem:[#allocation3 + $0x28] sm:$0xff] %v3058_v63  ;;  %v3084_v43 = vmax.f32 %v3074_v44, %v3079_v53 }
 0x23c   : > { %v2038_v28 = vpop.f32.mrb[152].mxu0  ;;  %v5581_v8 = vpop.f32.mrb[152].mxu1 }
 0x23d   : > { %6035 = vst [vmem:[#allocation52_spill] sm:$0xff] %v5581_v8  ;;  %v3059_v46 = vmax.f32 %v5532_v49, %v2038_v28  ;;  %v2040_v52 = vpop.f32.mrb[153].mxu0  ;;  %v2440_v40 = vpop.f32.mrb[153].mxu1  ;;  %v3089_v49 = vadd.f32 %v5567_v39, %v3084_v43 }
 0x23e   : > { %v2041_v34 = vpop.f32.mrb[154].mxu0  ;;  %v5586_v59 = vpop.f32.mrb[154].mxu1 }
 0x23f   : > { %6036 = vst [vmem:[#allocation53_spill] sm:$0xff] %v5586_v59  ;;  %3069 = vst [vmem:[#allocation3 + $0x30] sm:$0xff] %v3059_v46  ;;  %v3060_v24 = vmax.f32 %v5536_v23, %v2041_v34  ;;  %v2043_v63 = vpop.f32.mrb[155].mxu0  ;;  %v2443_v20 = vpop.f32.mrb[155].mxu1  ;;  %v3094_v25 = vmax.f32 %v3089_v49, 0.0 }
 0x240   : > { %v3075_v29 = vld [vmem:[#allocation3 + $0x20] ss:$2 sm:$0xff]  ;;  %v3080_v44 = vld [vmem:[#allocation3 + $0x21] ss:$2 sm:$0xff] }
 0x241   : > { %v3085_v53 = vmax.f32 %v3075_v29, %v3080_v44  ;;  %3070 = vst [vmem:[#allocation3 + $0x38] sm:$0xff] %v3060_v24 }
 0x243   : > { %v3090_v28 = vadd.f32 %v5567_v39, %v3085_v53 }
 0x244   : > { %v2046_v52 = vpop.f32.mrb[156].mxu0  ;;  %v5593_v40 = vpop.f32.mrb[156].mxu1 }
 0x245   : > { %6037 = vst [vmem:[#allocation54_spill] sm:$0xff] %v5593_v40  ;;  %v3095_v46 = vmax.f32 %v3090_v28, 0.0  ;;  %v3061_v23 = vmax.f32 %v5540_v32, %v2046_v52  ;;  %v2048_v63 = vpop.f32.mrb[157].mxu0  ;;  %v2448_v20 = vpop.f32.mrb[157].mxu1 }
 0x246   : > { %v2049_v36 = vpop.f32.mrb[158].mxu0  ;;  %v5598_v59 = vpop.f32.mrb[158].mxu1 }
 0x247   : > { %6038 = vst [vmem:[#allocation55_spill] sm:$0xff] %v5598_v59  ;;  %v4293_v29 = vpack.c.bf16 %v3095_v46, %v3094_v25  ;;  %3071 = vst [vmem:[#allocation3 + $0x40] sm:$0xff] %v3061_v23  ;;  %v3062_v43 = vmax.f32 %v5544_v17, %v2049_v36  ;;  %v2051_v44 = vpop.f32.mrb[159].mxu0  ;;  %v2451_v49 = vpop.f32.mrb[159].mxu1 }
 0x248   : > { %v3076_v53 = vld [vmem:[#allocation3 + $0x30] ss:$2 sm:$0xff]  ;;  %v3081_v28 = vld [vmem:[#allocation3 + $0x31] ss:$2 sm:$0xff] }
 0x249   : > { %4344 = vst [vmem:[%s5199_s8 + $0x40] sm:$0xff] %v4293_v29   ;;  %v3086_v32 = vmax.f32 %v3076_v53, %v3081_v28  ;;  %3072 = vst [vmem:[#allocation3 + $0x48] sm:$0xff] %v3062_v43 }
 0x24b   : > { %v3091_v52 = vadd.f32 %v5567_v39, %v3086_v32 }
 0x24c   : > { %v2054_v63 = vpop.f32.mrb[160].mxu0  ;;  %v5605_v20 = vpop.f32.mrb[160].mxu1 }
 0x24d   : > { %v3096_v25 = vmax.f32 %v3091_v52, 0.0  ;;  %v2056_v46 = vpop.f32.mrb[161].mxu0  ;;  %v2456_v23 = vpop.f32.mrb[161].mxu1 }
 0x24e   : > { %v2057_v17 = vpop.f32.mrb[162].mxu0  ;;  %v5607_v36 = vpop.f32.mrb[162].mxu1 }
 0x24f   : > { %v4233_v44 = vpack.c.bf16 %v3096_v25, %v3096_v25  ;;  %v2059_v49 = vpop.f32.mrb[163].mxu0  ;;  %v2459_v24 = vpop.f32.mrb[163].mxu1  ;;  %v4145_v25 = vld [vmem:[%s5199_s8 + $0x4c] sm:$0x7] }
 0x250   : > { %v3082_v34 = vld [vmem:[#allocation3 + $0x41] ss:$2 sm:$0x1f]  ;;  %v3077_v29 = vld [vmem:[#allocation3 + $0x40] ss:$2 sm:$0x1f] }
 0x251   : > { %4144 = vst [vmem:[%s5199_s8 + $0x48] sm:$0xf] %v4233_v44  ;;  %v3087_v43 = vmax.f32 %v3077_v29, %v3082_v34 }
 0x253   : > { %v3092_v53 = vadd.f32 %v5567_v39, %v3087_v43 }
 0x254   : > { %v2062_v28 = vpop.f32.mrb[164].mxu0  ;;  %v5611_v32 = vpop.f32.mrb[164].mxu1 }
 0x255   : > { %v2064_v52 = vpop.f32.mrb[165].mxu0  ;;  %v2464_v46 = vpop.f32.mrb[165].mxu1  ;;  %v3097_v23 = vmax.f32 %v3092_v53, 0.0 }
 0x256   : > { %v5613_v59 = vpop.f32.mrb[166].mxu0  ;;  %v5615_v60 = vpop.f32.mrb[166].mxu1 }
 0x257   : > { %v2067_v49 = vpop.f32.mrb[167].mxu0  ;;  %v2467_v24 = vpop.f32.mrb[167].mxu1  ;;  %v4234_v40 = vpack.c.bf16 %v3097_v23, %v3097_v23 }
 0x259   : > { %v3125_v44 = vsel %vm5252_vm5, %v4234_v40, %v4145_v25 }
 0x25a   : > { %4146 = vst [vmem:[%s5199_s8 + $0x4c] sm:$0x7] %v3125_v44 }
 0x25c   : > { %v5621_v34 = vpop.f32.mrb[168].mxu0  ;;  %v5623_v29 = vpop.f32.mrb[168].mxu1 }
 0x25d   : > { %v2072_v43 = vpop.f32.mrb[169].mxu0  ;;  %v2472_v52 = vpop.f32.mrb[169].mxu1 }
 0x25e   : > { %v5625_v46 = vpop.f32.mrb[170].mxu0  ;;  %v5627_v53 = vpop.f32.mrb[170].mxu1 }
 0x25f   : > { %v2075_v9 = vpop.f32.mrb[171].mxu0  ;;  %v2475_v51 = vpop.f32.mrb[171].mxu1 }
 0x264   : > { %v5629_v8 = vpop.f32.mrb[172].mxu0  ;;  %v5631_v49 = vpop.f32.mrb[172].mxu1 }
 0x265   : > { %v2080_v23 = vpop.f32.mrb[173].mxu0  ;;  %v2480_v24 = vpop.f32.mrb[173].mxu1 }
 0x266   : > { %v5633_v40 = vpop.f32.mrb[174].mxu0  ;;  %v5635_v25 = vpop.f32.mrb[174].mxu1 }
 0x267   : > { %v2083_v44 = vpop.f32.mrb[175].mxu0  ;;  %v2483_v45 = vpop.f32.mrb[175].mxu1 }
 0x26c   : > { %v5637_v43 = vpop.f32.mrb[176].mxu0  ;;  %v5639_v52 = vpop.f32.mrb[176].mxu1 }
 0x26d   : > { %v2088_v2 = vpop.f32.mrb[177].mxu0  ;;  %v2488_v61 = vpop.f32.mrb[177].mxu1 }
 0x26e   : > { %v5641_v9 = vpop.f32.mrb[178].mxu0  ;;  %v5643_v51 = vpop.f32.mrb[178].mxu1 }
 0x26f   : > { %v2091_v12 = vpop.f32.mrb[179].mxu0  ;;  %v2491_v15 = vpop.f32.mrb[179].mxu1 }
 0x274   : > { %v2094_v23 = vpop.f32.mrb[180].mxu0  ;;  %v5645_v24 = vpop.f32.mrb[180].mxu1 }
 0x275   : > { %6039 = vst [vmem:[#allocation56_spill] sm:$0xff] %v5645_v24  ;;  %v3147_v31 = vmax.f32 %v2054_v63, %v2094_v23  ;;  %v2096_v45 = vpop.f32.mrb[181].mxu0  ;;  %v2496_v21 = vpop.f32.mrb[181].mxu1 }
 0x276   : > { %v2097_v37 = vpop.f32.mrb[182].mxu0  ;;  %v5649_v42 = vpop.f32.mrb[182].mxu1 }
 0x277   : > { %3157 = vst [vmem:[#allocation3] sm:$0xff] %v3147_v31  ;;  %v3148_v2 = vmax.f32 %v2057_v17, %v2097_v37  ;;  %v3618_v61 = vmax.f32 %v5607_v36, %v5649_v42  ;;  %v2099_v50 = vpop.f32.mrb[183].mxu0  ;;  %v2499_v12 = vpop.f32.mrb[183].mxu1  ;;  %v6080_v42 = vld [vmem:[#allocation34_spill] sm:$0xff] }
 0x279   : > { %3158 = vst [vmem:[#allocation3 + $0x8] sm:$0xff] %v3148_v2 }
 0x27c   : > { %v2102_v15 = vpop.f32.mrb[184].mxu0  ;;  %v5653_v55 = vpop.f32.mrb[184].mxu1 }
 0x27d   : > { %v3149_v63 = vmax.f32 %v2062_v28, %v2102_v15  ;;  %v2104_v45 = vpop.f32.mrb[185].mxu0  ;;  %v2504_v21 = vpop.f32.mrb[185].mxu1  ;;  %v6040_v28 = vmax.f32 %v5055_v62, %v5123_v58  ;;  %v6041_v15 = vmax.f32 %v5063_v6, %v5130_v5 }
 0x27e   : > { %v2105_v44 = vpop.f32.mrb[186].mxu0  ;;  %v5657_v24 = vpop.f32.mrb[186].mxu1 }
 0x27f   : > { %3159 = vst [vmem:[#allocation3 + $0x10] sm:$0xff] %v3149_v63  ;;  %v3150_v31 = vmax.f32 %v5613_v59, %v2105_v44  ;;  %v2107_v37 = vpop.f32.mrb[187].mxu0  ;;  %v2507_v17 = vpop.f32.mrb[187].mxu1 }
 0x280   : > { %v3167_v2 = vld [vmem:[#allocation3] ss:$2 sm:$0xff]  ;;  %v3172_v12 = vld [vmem:[#allocation3 + $0x1] ss:$2 sm:$0xff] }
 0x281   : > { %3251 = vst [vmem:[#allocation3] sm:$0xff] %v6040_v28  ;;  %3252 = vst [vmem:[#allocation3 + $0x8] sm:$0xff] %v6041_v15  ;;  %v3177_v17 = vmax.f32 %v3167_v2, %v3172_v12  ;;  %v6043_v2 = vmax.f32 %v5239_v35, %v5316_v48 }
 0x282   : > { %3160 = vst [vmem:[#allocation3 + $0x18] sm:$0xff] %v3150_v31 }
 0x284   : > { %v2110_v45 = vpop.f32.mrb[188].mxu0  ;;  %v5668_v63 = vpop.f32.mrb[188].mxu1 }
 0x285   : > { %v3151_v59 = vmax.f32 %v5621_v34, %v2110_v45  ;;  %v3621_v44 = vmax.f32 %v5623_v29, %v5668_v63  ;;  %v2112_v21 = vpop.f32.mrb[189].mxu0  ;;  %v2512_v37 = vpop.f32.mrb[189].mxu1  ;;  %v6042_v45 = vmax.f32 %v5232_v14, %v5309_v13 }
 0x286   : > { %v2113_v50 = vpop.f32.mrb[190].mxu0  ;;  %v5673_v23 = vpop.f32.mrb[190].mxu1  ;;  %v6045_v21 = vmax.f32 %v5077_v18, %v5151_v26 }
 0x287   : > { %3161 = vst [vmem:[#allocation3 + $0x20] sm:$0xff] %v3151_v59  ;;  %v3152_v62 = vmax.f32 %v5625_v46, %v2113_v50  ;;  %v3622_v6 = vmax.f32 %v5627_v53, %v5673_v23  ;;  %v2115_v58 = vpop.f32.mrb[191].mxu0  ;;  %v2515_v5 = vpop.f32.mrb[191].mxu1  ;;  %v3182_v46 = vadd.f32 %v5567_v39, %v3177_v17  ;;  %v6044_v59 = vmax.f32 %v5069_v10, %v5140_v16 }
 0x288   : > { %v3261_v31 = vld [vmem:[#allocation3] ss:$2 sm:$0xff]  ;;  %v3266_v28 = vld [vmem:[#allocation3 + $0x1] ss:$2 sm:$0xff] }
 0x289   : > { %v3168_v34 = vld [vmem:[#allocation3 + $0x10] ss:$2 sm:$0xff]  ;;  %v3271_v15 = vmax.f32 %v3261_v31, %v3266_v28  ;;  %3345 = vst [vmem:[#allocation3] sm:$0xff] %v6042_v45  ;;  %3346 = vst [vmem:[#allocation3 + $0x8] sm:$0xff] %v6043_v2  ;;  %v3173_v12 = vld [vmem:[#allocation3 + $0x11] ss:$2 sm:$0xff] }
 0x28a   : > { %3162 = vst [vmem:[#allocation3 + $0x28] sm:$0xff] %v3152_v62  ;;  %v3178_v50 = vmax.f32 %v3168_v34, %v3173_v12  ;;  %3253 = vst [vmem:[#allocation3 + $0x10] sm:$0xff] %v6044_v59  ;;  %v3187_v16 = vmax.f32 %v3182_v46, 0.0  ;;  %v6046_v46 = vmax.f32 %v5398_v33, %v5455_v27  ;;  %v6047_v59 = vmax.f32 %v5405_v0, %v5460_v7 }
 0x28b   : > { %3254 = vst [vmem:[#allocation3 + $0x18] sm:$0xff] %v6045_v21  ;;  %v3276_v14 = vadd.f32 %v5567_v39, %v3271_v15  ;;  %v6050_v33 = vmax.f32 %v5083_v22, %v5171_v41  ;;  %v6051_v7 = vmax.f32 %v5091_v30, %v5178_v54 }
 0x28c   : > { %v3183_v13 = vadd.f32 %v5567_v39, %v3178_v50  ;;  %v2118_v37 = vpop.f32.mrb[192].mxu0  ;;  %v5693_v48 = vpop.f32.mrb[192].mxu1 }
 0x28d   : > { %v3281_v35 = vmax.f32 %v3276_v14, 0.0  ;;  %v3153_v62 = vmax.f32 %v5629_v8, %v2118_v37  ;;  %v3623_v17 = vmax.f32 %v5631_v49, %v5693_v48  ;;  %v2120_v58 = vpop.f32.mrb[193].mxu0  ;;  %v2520_v10 = vpop.f32.mrb[193].mxu1  ;;  %v6049_v37 = vmax.f32 %v5260_v11, %v5332_v3  ;;  %v6133_v49 = vld [vmem:[#allocation47_spill] sm:$0xff] }
 0x28e   : > { %v3188_v5 = vmax.f32 %v3183_v13, 0.0  ;;  %v2121_v18 = vpop.f32.mrb[194].mxu0  ;;  %v5698_v26 = vpop.f32.mrb[194].mxu1  ;;  %v6048_v13 = vmax.f32 %v5249_v56, %v5325_v19  ;;  %v6134_v48 = vld [vmem:[#allocation55_spill] sm:$0xff] }
 0x28f   : > { %v4240_v31 = vpack.c.bf16 %v3281_v35, %v3281_v35  ;;  %3163 = vst [vmem:[#allocation3 + $0x30] sm:$0xff] %v3153_v62  ;;  %v3154_v28 = vmax.f32 %v5633_v40, %v2121_v18  ;;  %v3624_v34 = vmax.f32 %v5635_v25, %v5698_v26  ;;  %v2123_v8 = vpop.f32.mrb[195].mxu0  ;;  %v2523_v15 = vpop.f32.mrb[195].mxu1 }
 0x290   : > { %v3355_v45 = vld [vmem:[#allocation3] ss:$2 sm:$0xff]  ;;  %v3360_v2 = vld [vmem:[#allocation3 + $0x1] ss:$2 sm:$0xff]  ;;  %v4298_v12 = vpack.c.bf16 %v3188_v5, %v3187_v16  ;;  %v6053_v8 = vmax.f32 %v5512_v57, %v5552_v1 }
 0x291   : > { %v3169_v50 = vld [vmem:[#allocation3 + $0x20] ss:$2 sm:$0xff]  ;;  %4163 = vst [vmem:[%s5199_s8 + $0x64] sm:$0xf] %v4240_v31  ;;  %3439 = vst [vmem:[#allocation3] sm:$0xff] %v6046_v46  ;;  %v3365_v3 = vmax.f32 %v3355_v45, %v3360_v2  ;;  %v6054_v46 = vld [vmem:[#allocation32_spill] sm:$0xff] }
 0x292   : > { %3440 = vst [vmem:[#allocation3 + $0x8] sm:$0xff] %v6047_v59  ;;  %v3262_v21 = vld [vmem:[#allocation3 + $0x10] ss:$2 sm:$0xff]  ;;  %v3267_v40 = vld [vmem:[#allocation3 + $0x11] ss:$2 sm:$0xff]  ;;  %3164 = vst [vmem:[#allocation3 + $0x38] sm:$0xff] %v3154_v28  ;;  %v6052_v28 = vmax.f32 %v5510_v4, %v5548_v47  ;;  %v6055_v59 = vmax.f32 %v5415_v38, %v6054_v46 }
 0x293   : > { %v3174_v14 = vld [vmem:[#allocation3 + $0x21] ss:$2 sm:$0xff]  ;;  %4345 = vst [vmem:[%s5199_s8 + $0x50] sm:$0xff] %v4298_v12   ;;  %3347 = vst [vmem:[#allocation3 + $0x10] sm:$0xff] %v6048_v13  ;;  %v3272_v11 = vmax.f32 %v3262_v21, %v3267_v40  ;;  %v3370_v2 = vadd.f32 %v5567_v39, %v3365_v3  ;;  %v6056_v21 = vld [vmem:[#allocation25_spill] sm:$0xff] }
 0x294   : > { %3348 = vst [vmem:[#allocation3 + $0x18] sm:$0xff] %v6049_v37  ;;  %3255 = vst [vmem:[#allocation3 + $0x20] sm:$0xff] %v6050_v33  ;;  %v2126_v0 = vpop.f32.mrb[196].mxu0  ;;  %v5723_v27 = vpop.f32.mrb[196].mxu1  ;;  %v3179_v22 = vmax.f32 %v3169_v50, %v3174_v14  ;;  %v6057_v4 = vld [vmem:[#allocation33_spill] sm:$0xff]  ;;  %v6060_v33 = vld [vmem:[#allocation19_spill] sm:$0xff] }
 0x295   : > { %3256 = vst [vmem:[#allocation3 + $0x28] sm:$0xff] %v6051_v7  ;;  %v3155_v35 = vmax.f32 %v5637_v43, %v2126_v0  ;;  %v3625_v56 = vmax.f32 %v5639_v52, %v5723_v27  ;;  %v2128_v19 = vpop.f32.mrb[197].mxu0  ;;  %v2528_v62 = vpop.f32.mrb[197].mxu1  ;;  %v3277_v12 = vadd.f32 %v5567_v39, %v3272_v11  ;;  %v6058_v47 = vmax.f32 %v6056_v21, %v6057_v4  ;;  %v6059_v37 = vld [vmem:[#allocation13_spill] sm:$0xff]  ;;  %v6062_v0 = vld [vmem:[#allocation14_spill] sm:$0xff]  ;;  %v6066_v3 = vld [vmem:[#allocation8_spill] sm:$0xff] }
 0x296   : > { %v2129_v58 = vpop.f32.mrb[198].mxu0  ;;  %v5728_v10 = vpop.f32.mrb[198].mxu1  ;;  %v3184_v14 = vadd.f32 %v5567_v39, %v3179_v22  ;;  %v6061_v7 = vmax.f32 %v6059_v37, %v6060_v33  ;;  %v6065_v62 = vld [vmem:[#allocation4_spill] sm:$0xff]  ;;  %v6077_v37 = vld [vmem:[#allocation49_spill] sm:$0xff] }
 0x297   : > { %v3156_v41 = vmax.f32 %v5641_v9, %v2129_v58  ;;  %3165 = vst [vmem:[#allocation3 + $0x40] sm:$0xff] %v3155_v35  ;;  %v3626_v30 = vmax.f32 %v5643_v51, %v5728_v10  ;;  %v2131_v54 = vpop.f32.mrb[199].mxu0  ;;  %v2531_v16 = vpop.f32.mrb[199].mxu1  ;;  %v6063_v35 = vld [vmem:[#allocation20_spill] sm:$0xff]  ;;  %v6067_v11 = vmax.f32 %v6065_v62, %v6066_v3  ;;  %v6068_v58 = vld [vmem:[#allocation5_spill] sm:$0xff] }
 0x298   : > { %v6064_v19 = vmax.f32 %v6062_v0, %v6063_v35  ;;  %v6079_v35 = vld [vmem:[#allocation26_spill] sm:$0xff] }
 0x299   : > { %v3449_v43 = vld [vmem:[#allocation3] ss:$2 sm:$0xff]  ;;  %v3454_v5 = vld [vmem:[#allocation3 + $0x1] ss:$2 sm:$0xff]  ;;  %v3170_v18 = vld [vmem:[#allocation3 + $0x30] ss:$2 sm:$0xff]  ;;  %v6081_v36 = vmax.f32 %v6079_v35, %v6080_v42 }
 0x29a   : > { %v3459_v31 = vmax.f32 %v3449_v43, %v3454_v5  ;;  %3533 = vst [vmem:[#allocation3] sm:$0xff] %v6052_v28  ;;  %3534 = vst [vmem:[#allocation3 + $0x8] sm:$0xff] %v6053_v8  ;;  %v3175_v1 = vld [vmem:[#allocation3 + $0x31] ss:$2 sm:$0xff]  ;;  %v3282_v28 = vmax.f32 %v3277_v12, 0.0 }
 0x29b   : > { %v3356_v15 = vld [vmem:[#allocation3 + $0x10] ss:$2 sm:$0xff]  ;;  %v3361_v9 = vld [vmem:[#allocation3 + $0x11] ss:$2 sm:$0xff]  ;;  %3166 = vst [vmem:[#allocation3 + $0x48] sm:$0xff] %v3156_v41  ;;  %v3180_v38 = vmax.f32 %v3170_v18, %v3175_v1  ;;  %3257 = vst [vmem:[#allocation3 + $0x30] sm:$0xff] %v6067_v11 }
 0x29c   : > { %v3263_v45 = vld [vmem:[#allocation3 + $0x20] ss:$2 sm:$0xff]  ;;  %v3366_v50 = vmax.f32 %v3356_v15, %v3361_v9  ;;  %3441 = vst [vmem:[#allocation3 + $0x10] sm:$0xff] %v6055_v59  ;;  %3442 = vst [vmem:[#allocation3 + $0x18] sm:$0xff] %v6058_v47  ;;  %v3268_v40 = vld [vmem:[#allocation3 + $0x21] ss:$2 sm:$0xff]  ;;  %v3464_v57 = vadd.f32 %v5567_v39, %v3459_v31 }
 0x29d   : > { %v3273_v13 = vmax.f32 %v3263_v45, %v3268_v40  ;;  %3349 = vst [vmem:[#allocation3 + $0x20] sm:$0xff] %v6061_v7  ;;  %3350 = vst [vmem:[#allocation3 + $0x28] sm:$0xff] %v6064_v19  ;;  %v6069_v41 = vld [vmem:[#allocation9_spill] sm:$0xff]  ;;  %v3185_v5 = vadd.f32 %v5567_v39, %v3180_v38  ;;  %v3375_v31 = vmax.f32 %v3370_v2, 0.0  ;;  %v3189_v15 = vmax.f32 %v3184_v14, 0.0  ;;  %v6073_v1 = vld [vmem:[#allocation40_spill] sm:$0xff] }
 0x29e   : > { %v6070_v54 = vmax.f32 %v6068_v58, %v6069_v41  ;;  %v3371_v22 = vadd.f32 %v5567_v39, %v3366_v50  ;;  %v3469_v16 = vmax.f32 %v3464_v57, 0.0  ;;  %v6071_v50 = vld [vmem:[#allocation56_spill] sm:$0xff]  ;;  %v6083_v19 = vld [vmem:[#allocation35_spill] sm:$0xff]  ;;  %v6086_v41 = vld [vmem:[#allocation21_spill] sm:$0xff] }
 0x29f   : > { %v3278_v43 = vadd.f32 %v5567_v39, %v3273_v13  ;;  %v3190_v45 = vmax.f32 %v3185_v5, 0.0  ;;  %v6072_v4 = vmax.f32 %v5605_v20, %v6071_v50  ;;  %v6074_v57 = vld [vmem:[#allocation48_spill] sm:$0xff]  ;;  %v6076_v13 = vld [vmem:[#allocation41_spill] sm:$0xff]  ;;  %v6085_v58 = vld [vmem:[#allocation15_spill] sm:$0xff] }
 0x2a0   : > { %3258 = vst [vmem:[#allocation3 + $0x38] sm:$0xff] %v6070_v54  ;;  %v3376_v18 = vmax.f32 %v3371_v22, 0.0  ;;  %v4250_v8 = vpack.c.bf16 %v3469_v16, %v3469_v16  ;;  %v6075_v14 = vmax.f32 %v6073_v1, %v6074_v57  ;;  %v6078_v33 = vmax.f32 %v6076_v13, %v6077_v37  ;;  %v6088_v22 = vld [vmem:[#allocation16_spill] sm:$0xff]  ;;  %v6089_v16 = vld [vmem:[#allocation22_spill] sm:$0xff] }
 0x2a1   : > { %v3283_v9 = vmax.f32 %v3278_v43, 0.0  ;;  %v3543_v46 = vld [vmem:[#allocation3] ss:$2 sm:$0xff]  ;;  %v3548_v59 = vld [vmem:[#allocation3 + $0x1] ss:$2 sm:$0xff]  ;;  %v4303_v40 = vpack.c.bf16 %v3190_v45, %v3189_v15  ;;  %v6087_v54 = vmax.f32 %v6085_v58, %v6086_v41  ;;  %v6090_v43 = vmax.f32 %v6088_v22, %v6089_v16  ;;  %v6105_v16 = vld [vmem:[#allocation28_spill] sm:$0xff] }
 0x2a2   : > { %v4313_v21 = vpack.c.bf16 %v3376_v18, %v3375_v31  ;;  %4185 = vst [vmem:[%s5199_s8 + $0x8c] sm:$0xf] %v4250_v8  ;;  %3627 = vst [vmem:[#allocation3] sm:$0xff] %v6072_v4  ;;  %v3171_v3 = vld [vmem:[#allocation3 + $0x40] ss:$2 sm:$0x1f] }
 0x2a3   : > { %3628 = vst [vmem:[#allocation3 + $0x8] sm:$0xff] %v3618_v61  ;;  %v3450_v2 = vld [vmem:[#allocation3 + $0x10] ss:$2 sm:$0xff]  ;;  %v3455_v12 = vld [vmem:[#allocation3 + $0x11] ss:$2 sm:$0xff]  ;;  %v4308_v47 = vpack.c.bf16 %v3283_v9, %v3282_v28  ;;  %v6082_v61 = vld [vmem:[#allocation27_spill] sm:$0xff] }
 0x2a4   : > { %4348 = vst [vmem:[%s5199_s8 + $0x78] sm:$0xff] %v4313_v21   ;;  %3535 = vst [vmem:[#allocation3 + $0x10] sm:$0xff] %v6075_v14  ;;  %v3357_v20 = vld [vmem:[#allocation3 + $0x20] ss:$2 sm:$0xff]  ;;  %v3362_v7 = vld [vmem:[#allocation3 + $0x21] ss:$2 sm:$0xff]  ;;  %v6084_v38 = vmax.f32 %v6082_v61, %v6083_v19  ;;  %v3553_v21 = vmax.f32 %v3543_v46, %v3548_v59  ;;  %v3460_v4 = vmax.f32 %v3450_v2, %v3455_v12 }
 0x2a5   : > { %3536 = vst [vmem:[#allocation3 + $0x18] sm:$0xff] %v6078_v33  ;;  %4347 = vst [vmem:[%s5199_s8 + $0x68] sm:$0xff] %v4308_v47   ;;  %v3176_v5 = vld [vmem:[#allocation3 + $0x41] ss:$2 sm:$0x1f]  ;;  %v3367_v57 = vmax.f32 %v3357_v20, %v3362_v7  ;;  %v6097_v46 = vmax.f32 %v5611_v32, %v5653_v55  ;;  %v6098_v59 = vmax.f32 %v5615_v60, %v5657_v24 }
 0x2a6   : > { %3443 = vst [vmem:[#allocation3 + $0x20] sm:$0xff] %v6081_v36  ;;  %3444 = vst [vmem:[#allocation3 + $0x28] sm:$0xff] %v6084_v38  ;;  %v3181_v31 = vmax.f32 %v3171_v3, %v3176_v5  ;;  %v6091_v28 = vld [vmem:[#allocation6_spill] sm:$0xff]  ;;  %v6094_v15 = vld [vmem:[#allocation7_spill] sm:$0xff]  ;;  %v3558_v35 = vadd.f32 %v5567_v39, %v3553_v21  ;;  %v3465_v61 = vadd.f32 %v5567_v39, %v3460_v4 }
 0x2a7   : > { %v3264_v0 = vld [vmem:[#allocation3 + $0x30] ss:$2 sm:$0xff]  ;;  %4346 = vst [vmem:[%s5199_s8 + $0x58] sm:$0xff] %v4303_v40   ;;  %v3269_v62 = vld [vmem:[#allocation3 + $0x31] ss:$2 sm:$0xff]  ;;  %v6092_v18 = vld [vmem:[#allocation10_spill] sm:$0xff] }
 0x2a8   : > { %v3274_v11 = vmax.f32 %v3264_v0, %v3269_v62  ;;  %3351 = vst [vmem:[#allocation3 + $0x30] sm:$0xff] %v6087_v54  ;;  %3352 = vst [vmem:[#allocation3 + $0x38] sm:$0xff] %v6090_v43  ;;  %v6093_v8 = vmax.f32 %v6091_v28, %v6092_v18  ;;  %v6095_v9 = vld [vmem:[#allocation11_spill] sm:$0xff]  ;;  %v3186_v47 = vadd.f32 %v5567_v39, %v3181_v31  ;;  %v4156_v7 = vld [vmem:[%s5199_s8 + $0x60] sm:$0x7] }
 0x2a9   : > { %v6096_v45 = vmax.f32 %v6094_v15, %v6095_v9  ;;  %v6099_v38 = vld [vmem:[#allocation42_spill] sm:$0xff]  ;;  %v6102_v55 = vld [vmem:[#allocation43_spill] sm:$0xff]  ;;  %v3372_v54 = vadd.f32 %v5567_v39, %v3367_v57  ;;  %v6106_v43 = vld [vmem:[#allocation36_spill] sm:$0xff] }
 0x2aa   : > { %3259 = vst [vmem:[#allocation3 + $0x40] sm:$0xff] %v6093_v8  ;;  %v3279_v50 = vadd.f32 %v5567_v39, %v3274_v11  ;;  %v3637_v40 = vld [vmem:[#allocation3] ss:$2 sm:$0xff]  ;;  %v3642_v1 = vld [vmem:[#allocation3 + $0x1] ss:$2 sm:$0xff]  ;;  %v3191_v0 = vmax.f32 %v3186_v47, 0.0  ;;  %v6107_v5 = vmax.f32 %v6105_v16, %v6106_v43 }
 0x2ab   : > { %3260 = vst [vmem:[#allocation3 + $0x48] sm:$0xff] %v6096_v45  ;;  %v3647_v13 = vmax.f32 %v3637_v40, %v3642_v1  ;;  %v6100_v62 = vld [vmem:[#allocation50_spill] sm:$0xff]  ;;  %v6103_v32 = vld [vmem:[#allocation51_spill] sm:$0xff]  ;;  %v6108_v31 = vld [vmem:[#allocation29_spill] sm:$0xff] }
 0x2ac   : > { %v3284_v14 = vmax.f32 %v3279_v50, 0.0  ;;  %v3544_v37 = vld [vmem:[#allocation3 + $0x10] ss:$2 sm:$0xff]  ;;  %v3549_v33 = vld [vmem:[#allocation3 + $0x11] ss:$2 sm:$0xff]  ;;  %v6101_v3 = vmax.f32 %v6099_v38, %v6100_v62  ;;  %v6104_v11 = vmax.f32 %v6102_v55, %v6103_v32  ;;  %v4239_v58 = vpack.c.bf16 %v3191_v0, %v3191_v0  ;;  %v6113_v40 = vld [vmem:[#allocation23_spill] sm:$0xff] }
 0x2ad   : > { %v3554_v42 = vmax.f32 %v3544_v37, %v3549_v33  ;;  %3629 = vst [vmem:[#allocation3 + $0x10] sm:$0xff] %v6097_v46  ;;  %3630 = vst [vmem:[#allocation3 + $0x18] sm:$0xff] %v6098_v59  ;;  %v3451_v2 = vld [vmem:[#allocation3 + $0x20] ss:$2 sm:$0xff]  ;;  %v3456_v12 = vld [vmem:[#allocation3 + $0x21] ss:$2 sm:$0xff]  ;;  %v3652_v36 = vadd.f32 %v5567_v39, %v3647_v13 }
 0x2ae   : > { %v4243_v20 = vpack.c.bf16 %v3284_v14, %v3284_v14  ;;  %v3461_v19 = vmax.f32 %v3451_v2, %v3456_v12  ;;  %3537 = vst [vmem:[#allocation3 + $0x20] sm:$0xff] %v6101_v3  ;;  %3538 = vst [vmem:[#allocation3 + $0x28] sm:$0xff] %v6104_v11  ;;  %v6109_v28 = vld [vmem:[#allocation37_spill] sm:$0xff]  ;;  %v3219_v50 = vsel %vm5252_vm5, %v4239_v58, %v4156_v7  ;;  %v6115_v57 = vld [vmem:[#allocation18_spill] sm:$0xff]  ;;  %v3563_v37 = vmax.f32 %v3558_v35, 0.0 }
 0x2af   : > { %v3358_v60 = vld [vmem:[#allocation3 + $0x30] ss:$2 sm:$0xff]  ;;  %v3363_v24 = vld [vmem:[#allocation3 + $0x31] ss:$2 sm:$0xff]  ;;  %v3559_v41 = vadd.f32 %v5567_v39, %v3554_v42  ;;  %v6110_v18 = vmax.f32 %v6108_v31, %v6109_v28  ;;  %v3657_v9 = vmax.f32 %v3652_v36, 0.0  ;;  %v3470_v46 = vmax.f32 %v3465_v61, 0.0 }
 0x2b0   : > { %4166 = vst [vmem:[%s5199_s8 + $0x70] sm:$0xf] %v4243_v20  ;;  %v3368_v22 = vmax.f32 %v3358_v60, %v3363_v24  ;;  %3445 = vst [vmem:[#allocation3 + $0x30] sm:$0xff] %v6107_v5  ;;  %v3466_v45 = vadd.f32 %v5567_v39, %v3461_v19  ;;  %v6112_v47 = vld [vmem:[#allocation17_spill] sm:$0xff]  ;;  %v6116_v14 = vld [vmem:[#allocation24_spill] sm:$0xff]  ;;  %v3377_v20 = vmax.f32 %v3372_v54, 0.0 }
 0x2b1   : > { %3446 = vst [vmem:[#allocation3 + $0x38] sm:$0xff] %v6110_v18  ;;  %v6114_v1 = vmax.f32 %v6112_v47, %v6113_v40  ;;  %v6117_v13 = vmax.f32 %v6115_v57, %v6116_v14  ;;  %v3564_v33 = vmax.f32 %v3559_v41, 0.0  ;;  %4157 = vst [vmem:[%s5199_s8 + $0x60] sm:$0x7] %v3219_v50  ;;  %v4260_v42 = vpack.c.bf16 %v3657_v9, %v3657_v9  ;;  %v4167_v38 = vld [vmem:[%s5199_s8 + $0x74] sm:$0x7] }
 0x2b2   : > { %v3265_v8 = vld [vmem:[#allocation3 + $0x40] ss:$2 sm:$0x1f]  ;;  %v3270_v15 = vld [vmem:[#allocation3 + $0x41] ss:$2 sm:$0x1f]  ;;  %v3373_v0 = vadd.f32 %v5567_v39, %v3368_v22 }
 0x2b3   : > { %v3275_v4 = vmax.f32 %v3265_v8, %v3270_v15  ;;  %3353 = vst [vmem:[#allocation3 + $0x40] sm:$0xff] %v6114_v1  ;;  %3354 = vst [vmem:[#allocation3 + $0x48] sm:$0xff] %v6117_v13  ;;  %v3471_v59 = vmax.f32 %v3466_v45, 0.0  ;;  %v4328_v12 = vpack.c.bf16 %v3564_v33, %v3563_v37  ;;  %v6118_v58 = vld [vmem:[#allocation44_spill] sm:$0xff]  ;;  %v6121_v22 = vld [vmem:[#allocation45_spill] sm:$0xff] }
 0x2b4   : > { %v3378_v7 = vmax.f32 %v3373_v0, 0.0  ;;  %4207 = vst [vmem:[%s5199_s8 + $0xb4] sm:$0xf] %v4260_v42  ;;  %v3638_v35 = vld [vmem:[#allocation3 + $0x10] ss:$2 sm:$0xff]  ;;  %v6127_v31 = vld [vmem:[#allocation31_spill] sm:$0xff] }
 0x2b5   : > { %v3280_v2 = vadd.f32 %v5567_v39, %v3275_v4  ;;  %v4323_v36 = vpack.c.bf16 %v3471_v59, %v3470_v46  ;;  %4351 = vst [vmem:[%s5199_s8 + $0xa0] sm:$0xff] %v4328_v12   ;;  %v3545_v62 = vld [vmem:[#allocation3 + $0x20] ss:$2 sm:$0xff]  ;;  %v3550_v3 = vld [vmem:[#allocation3 + $0x21] ss:$2 sm:$0xff]  ;;  %v6119_v41 = vld [vmem:[#allocation52_spill] sm:$0xff] }
 0x2b6   : > { %v4318_v55 = vpack.c.bf16 %v3378_v7, %v3377_v20  ;;  %v3643_v32 = vld [vmem:[#allocation3 + $0x11] ss:$2 sm:$0xff]  ;;  %3631 = vst [vmem:[#allocation3 + $0x20] sm:$0xff] %v3621_v44  ;;  %3632 = vst [vmem:[#allocation3 + $0x28] sm:$0xff] %v3622_v6  ;;  %v6120_v54 = vmax.f32 %v6118_v58, %v6119_v41  ;;  %v6124_v44 = vld [vmem:[#allocation30_spill] sm:$0xff]  ;;  %v3555_v45 = vmax.f32 %v3545_v62, %v3550_v3 }
 0x2b7   : > { %v3285_v19 = vmax.f32 %v3280_v2, 0.0  ;;  %4350 = vst [vmem:[%s5199_s8 + $0x90] sm:$0xff] %v4323_v36   ;;  %v6122_v16 = vld [vmem:[#allocation53_spill] sm:$0xff]  ;;  %v6125_v6 = vld [vmem:[#allocation38_spill] sm:$0xff]  ;;  %v6128_v28 = vld [vmem:[#allocation39_spill] sm:$0xff]  ;;  %v3648_v15 = vmax.f32 %v3638_v35, %v3643_v32 }
 0x2b8   : > { %v3452_v61 = vld [vmem:[#allocation3 + $0x30] ss:$2 sm:$0xff]  ;;  %v3457_v11 = vld [vmem:[#allocation3 + $0x31] ss:$2 sm:$0xff]  ;;  %4349 = vst [vmem:[%s5199_s8 + $0x80] sm:$0xff] %v4318_v55   ;;  %v6123_v43 = vmax.f32 %v6121_v22, %v6122_v16  ;;  %v6126_v5 = vmax.f32 %v6124_v44, %v6125_v6  ;;  %v6129_v18 = vmax.f32 %v6127_v31, %v6128_v28  ;;  %v3560_v42 = vadd.f32 %v5567_v39, %v3555_v45  ;;  %v6130_v36 = vld [vmem:[#allocation46_spill] sm:$0xff] }
 0x2b9   : > { %v4244_v60 = vpack.c.bf16 %v3285_v19, %v3285_v19  ;;  %v3462_v24 = vmax.f32 %v3452_v61, %v3457_v11  ;;  %3539 = vst [vmem:[#allocation3 + $0x30] sm:$0xff] %v6120_v54  ;;  %v4178_v57 = vld [vmem:[%s5199_s8 + $0x88] sm:$0x7]  ;;  %v3653_v14 = vadd.f32 %v5567_v39, %v3648_v15  ;;  %v6131_v19 = vld [vmem:[#allocation54_spill] sm:$0xff]  ;;  %v4189_v11 = vld [vmem:[%s5199_s8 + $0x9c] sm:$0x7] }
 0x2ba   : > { %3540 = vst [vmem:[#allocation3 + $0x38] sm:$0xff] %v6123_v43  ;;  %v3359_v29 = vld [vmem:[#allocation3 + $0x40] ss:$2 sm:$0x1f]  ;;  %v3565_v62 = vmax.f32 %v3560_v42, 0.0 }
 0x2bb   : > { %v3364_v63 = vld [vmem:[#allocation3 + $0x41] ss:$2 sm:$0x1f]  ;;  %v3313_v53 = vsel %vm5252_vm5, %v4244_v60, %v4167_v38  ;;  %v3467_v8 = vadd.f32 %v5567_v39, %v3462_v24  ;;  %v6132_v38 = vmax.f32 %v6130_v36, %v6131_v19  ;;  %v3658_v26 = vmax.f32 %v3653_v14, 0.0  ;;  %v4200_v6 = vld [vmem:[%s5199_s8 + $0xb0] sm:$0x7] }
 0x2bc   : > { %v3369_v23 = vmax.f32 %v3359_v29, %v3364_v63  ;;  %3447 = vst [vmem:[#allocation3 + $0x40] sm:$0xff] %v6126_v5  ;;  %3448 = vst [vmem:[#allocation3 + $0x48] sm:$0xff] %v6129_v18  ;;  %v4211_v31 = vld [vmem:[%s5199_s8 + $0xc4] sm:$0x7] }
 0x2bd   : > { %4168 = vst [vmem:[%s5199_s8 + $0x74] sm:$0x7] %v3313_v53  ;;  %v3472_v50 = vmax.f32 %v3467_v8, 0.0  ;;  %v3639_v47 = vld [vmem:[#allocation3 + $0x20] ss:$2 sm:$0xff] }
 0x2be   : > { %v3374_v9 = vadd.f32 %v5567_v39, %v3369_v23  ;;  %v3644_v40 = vld [vmem:[#allocation3 + $0x21] ss:$2 sm:$0xff] }
 0x2bf   : > { %v4253_v1 = vpack.c.bf16 %v3472_v50, %v3472_v50  ;;  %v3649_v13 = vmax.f32 %v3639_v47, %v3644_v40 }
 0x2c0   : > { %v3379_v4 = vmax.f32 %v3374_v9, 0.0 }
 0x2c1   : > { %v3546_v37 = vld [vmem:[#allocation3 + $0x30] ss:$2 sm:$0xff]  ;;  %v3551_v33 = vld [vmem:[#allocation3 + $0x31] ss:$2 sm:$0xff]  ;;  %4188 = vst [vmem:[%s5199_s8 + $0x98] sm:$0xf] %v4253_v1  ;;  %v3654_v12 = vadd.f32 %v5567_v39, %v3649_v13 }
 0x2c2   : > { %v4249_v0 = vpack.c.bf16 %v3379_v4, %v3379_v4  ;;  %v3556_v46 = vmax.f32 %v3546_v37, %v3551_v33  ;;  %3633 = vst [vmem:[#allocation3 + $0x30] sm:$0xff] %v3623_v17  ;;  %3634 = vst [vmem:[#allocation3 + $0x38] sm:$0xff] %v3624_v34  ;;  %v6135_v17 = vmax.f32 %v6133_v49, %v6134_v48 }
 0x2c3   : > { %v3453_v59 = vld [vmem:[#allocation3 + $0x40] ss:$2 sm:$0x1f]  ;;  %v3458_v2 = vld [vmem:[#allocation3 + $0x41] ss:$2 sm:$0x1f] }
 0x2c4   : > { %v3407_v20 = vsel %vm5252_vm5, %v4249_v0, %v4178_v57  ;;  %v3463_v7 = vmax.f32 %v3453_v59, %v3458_v2  ;;  %3541 = vst [vmem:[#allocation3 + $0x40] sm:$0xff] %v6132_v38  ;;  %3542 = vst [vmem:[#allocation3 + $0x48] sm:$0xff] %v6135_v17  ;;  %v3561_v25 = vadd.f32 %v5567_v39, %v3556_v46  ;;  %v3659_v34 = vmax.f32 %v3654_v12, 0.0 }
 0x2c5   : > { %4179 = vst [vmem:[%s5199_s8 + $0x88] sm:$0x7] %v3407_v20 }
 0x2c6   : > { %v3468_v35 = vadd.f32 %v5567_v39, %v3463_v7  ;;  %v3566_v3 = vmax.f32 %v3561_v25, 0.0  ;;  %v4338_v55 = vpack.c.bf16 %v3659_v34, %v3658_v26 }
 0x2c8   : > { %v3473_v32 = vmax.f32 %v3468_v35, 0.0  ;;  %v4333_v61 = vpack.c.bf16 %v3566_v3, %v3565_v62  ;;  %4353 = vst [vmem:[%s5199_s8 + $0xb8] sm:$0xff] %v4338_v55  }
 0x2c9   : > { %v3640_v60 = vld [vmem:[#allocation3 + $0x30] ss:$2 sm:$0xff]  ;;  %v3645_v24 = vld [vmem:[#allocation3 + $0x31] ss:$2 sm:$0xff] }
 0x2ca   : > { %v4254_v58 = vpack.c.bf16 %v3473_v32, %v3473_v32  ;;  %4352 = vst [vmem:[%s5199_s8 + $0xa8] sm:$0xff] %v4333_v61   ;;  %v3650_v41 = vmax.f32 %v3640_v60, %v3645_v24 }
 0x2cb   : > { %v3547_v54 = vld [vmem:[#allocation3 + $0x40] ss:$2 sm:$0x1f]  ;;  %v3552_v22 = vld [vmem:[#allocation3 + $0x41] ss:$2 sm:$0x1f] }
 0x2cc   : > { %v3501_v16 = vsel %vm5252_vm5, %v4254_v58, %v4189_v11  ;;  %v3557_v43 = vmax.f32 %v3547_v54, %v3552_v22  ;;  %3635 = vst [vmem:[#allocation3 + $0x40] sm:$0xff] %v3625_v56  ;;  %3636 = vst [vmem:[#allocation3 + $0x48] sm:$0xff] %v3626_v30  ;;  %v3655_v29 = vadd.f32 %v5567_v39, %v3650_v41 }
 0x2cd   : > { %4190 = vst [vmem:[%s5199_s8 + $0x9c] sm:$0x7] %v3501_v16 }
 0x2ce   : > { %v3562_v63 = vadd.f32 %v5567_v39, %v3557_v43  ;;  %v3660_v53 = vmax.f32 %v3655_v29, 0.0 }
 0x2d0   : > { %v3567_v23 = vmax.f32 %v3562_v63, 0.0  ;;  %v4263_v44 = vpack.c.bf16 %v3660_v53, %v3660_v53 }
 0x2d2   : > { %v4259_v5 = vpack.c.bf16 %v3567_v23, %v3567_v23  ;;  %4210 = vst [vmem:[%s5199_s8 + $0xc0] sm:$0xf] %v4263_v44 }
 0x2d3   : > { %v3641_v52 = vld [vmem:[#allocation3 + $0x40] ss:$2 sm:$0x1f]  ;;  %v3646_v27 = vld [vmem:[#allocation3 + $0x41] ss:$2 sm:$0x1f] }
 0x2d4   : > { %v3595_v56 = vsel %vm5252_vm5, %v4259_v5, %v4200_v6  ;;  %v3651_v51 = vmax.f32 %v3641_v52, %v3646_v27 }
 0x2d5   : > { %4201 = vst [vmem:[%s5199_s8 + $0xb0] sm:$0x7] %v3595_v56 }
 0x2d6   : > { %v3656_v10 = vadd.f32 %v5567_v39, %v3651_v51 }
 0x2d8   : > { %v3661_v30 = vmax.f32 %v3656_v10, 0.0 }
 0x2da   : > { %v4264_v28 = vpack.c.bf16 %v3661_v30, %v3661_v30 }
 0x2dc   : > { %v3689_v18 = vsel %vm5252_vm5, %v4264_v28, %v4211_v31 }
 0x2dd   : > { %4212 = vst [vmem:[%s5199_s8 + $0xc4] sm:$0x7] %v3689_v18 }
 0x2de PF: > { %s13_s16 = sadd.s32 1, %s4768_s16   ;;  %s6136_s12 = smov %s4760_s14 }
 0x2df   : > { %p10_p8 = scmp.ge.s32.totalorder %s13_s16, 10   ;;  %s6137_s13 = smov %s4764_s15 }
 0x2e0   : > { %s6138_s14 = smov %s6141_s17  ;;  %s6139_s15 = smov %s6145_s18 }
 0x2e1   :  { %12 = sbr.rel (!%p10_p8) target bundleno = 3 (0x3), region = 80 }

// kernel: repr_net_forward.5
= control target key start
LH: loop header
LB: loop body
LE: loop exit
PB: predicated region body
PF: predicated region fallthrough
CT: control target
= control target key end

     0   :  { %s5856_s12 = smov 0   ;;  %s5858_s13 = smov 0   ;;  %s6510_s0 = inlined_call_operand.vmem [shape: bf16[2,1184,500], index: 0, kind: input, shape index: {}]   ;;  %s6511_s1 = inlined_call_operand.vmem [shape: bf16[500,128], index: 1, kind: input, shape index: {}]   ;;  %s6512_s2 = inlined_call_operand.vmem [shape: f32[1,128], index: 2, kind: input, shape index: {}]   ;;  %s6513_s3 = inlined_call_operand.vmem [shape: bf16[2,16,16,128], index: 3, kind: output, shape index: {}]  }
   0x1   :  { %s5860_s14 = smov 0  }
   0x2 LB: > { %s25_s15 = sadd.s32 1, %s5829_s13  ;;  %p4560_p0 = scmp.ge.s32.totalorder %s5833_s14, 1  ;;  %s5833_s14 = sphi %s5860_s14, %s13_s14   ;;  %s5829_s13 = sphi %s5858_s13, %s6515_s13   ;;  %s5825_s12 = sphi %s5856_s12, %s6514_s12  }
   0x3   : > { %p27_p1 = scmp.ge.s32.totalorder %s25_s15, 2  ;;  %p159_p2 = scmp.lt.s32.totalorder %s5833_s14, 3 }
   0x5   : > { %s6517_s15 = smov (%p27_p1, %s25_s15), 0  ;;  %p160_p3 = pnand %p4560_p0, %p159_p2 }
   0x6   : > { %v5333_v0 = vld [vmem:[%s6511_s1] sm:$0xff] (!%p160_p3)   ;;  %v5835_v1 = vmov (!%p160_p3), 0   ;;  %v5335_v3 = vld [vmem:[%s6511_s1 + $0x8] sm:$0xff] (!%p160_p3)   ;;  %v5337_v5 = vld [vmem:[%s6511_s1 + $0x10] sm:$0xff] (!%p160_p3)   ;;  %p194_p4 = scmp.lt.s32.totalorder (!%p160_p3), %s5825_s12, 1  ;;  %vm2170_vm0 = vcmask (!%p160_p3), 949248  }
   0x7   : > { %163 = sbr.rel (%p160_p3) target bundleno = 898 (0x382), region = 32  ;;  %2397 = vmatprep.subr.bf16.mxu1 (!%p160_p3), %v5835_v1  ;;  %3022 = vmatprep.subr.bf16.mxu0 (!%p160_p3), %v5835_v1  ;;  %v5334_v2 = vld [vmem:[%s6511_s1 + $0x80] sm:$0xff] (!%p160_p3)   ;;  %v5336_v4 = vld [vmem:[%s6511_s1 + $0x88] sm:$0xff] (!%p160_p3)   ;;  %v5338_v6 = vld [vmem:[%s6511_s1 + $0x90] sm:$0xff] (!%p160_p3)   ;;  %vm2393_vm1 = vcmask (!%p160_p3), 1041408  }
   0x8   : > { %2398 = vmatpush1.bf16.msra.mxu1 (!%p160_p3), %v5333_v0  ;;  %3023 = vmatpush1.bf16.msra.mxu0 (!%p160_p3), %v5334_v2  ;;  %v5339_v7 = vld [vmem:[%s6511_s1 + $0x18] sm:$0xff] (!%p160_p3)   ;;  %v5341_v9 = vld [vmem:[%s6511_s1 + $0x20] sm:$0xff] (!%p160_p3)   ;;  %v5343_v11 = vld [vmem:[%s6511_s1 + $0x28] sm:$0xff] (!%p160_p3)  }
   0x9   : > { %2399 = vmatprep.subr.bf16.mxu1 (!%p160_p3), %v5835_v1  ;;  %3024 = vmatprep.subr.bf16.mxu0 (!%p160_p3), %v5835_v1  ;;  %v5340_v8 = vld [vmem:[%s6511_s1 + $0x98] sm:$0xff] (!%p160_p3)   ;;  %v5342_v10 = vld [vmem:[%s6511_s1 + $0xa0] sm:$0xff] (!%p160_p3)   ;;  %v5344_v12 = vld [vmem:[%s6511_s1 + $0xa8] sm:$0xff] (!%p160_p3)  }
   0xa   : > { %v5345_v13 = vld [vmem:[%s6511_s1 + $0x30] sm:$0xff] (!%p160_p3)   ;;  %v5347_v15 = vld [vmem:[%s6511_s1 + $0x38] sm:$0xff] (!%p160_p3)   ;;  %v5349_v17 = vld [vmem:[%s6511_s1 + $0x40] sm:$0xff] (!%p160_p3)  }
   0xb   : > { %v5346_v14 = vld [vmem:[%s6511_s1 + $0xb0] sm:$0xff] (!%p160_p3)   ;;  %v5348_v16 = vld [vmem:[%s6511_s1 + $0xb8] sm:$0xff] (!%p160_p3)   ;;  %v5350_v18 = vld [vmem:[%s6511_s1 + $0xc0] sm:$0xff] (!%p160_p3)  }
   0xc   : > { %2400 = vmatpush1.bf16.msra.mxu1 (!%p160_p3), %v5335_v3  ;;  %3025 = vmatpush1.bf16.msra.mxu0 (!%p160_p3), %v5336_v4  ;;  %v5351_v20 = vld [vmem:[%s6511_s1 + $0x48] sm:$0xff] (!%p160_p3)   ;;  %v5353_v23 = vld [vmem:[%s6511_s1 + $0x50] sm:$0xff] (!%p160_p3)   ;;  %v5355_v25 = vld [vmem:[%s6511_s1 + $0x58] sm:$0xff] (!%p160_p3)  }
   0xd   : > { %2401 = vmatprep.subr.bf16.mxu1 (!%p160_p3), %v5835_v1  ;;  %3026 = vmatprep.subr.bf16.mxu0 (!%p160_p3), %v5835_v1  ;;  %v5352_v22 = vld [vmem:[%s6511_s1 + $0xc8] sm:$0xff] (!%p160_p3)   ;;  %v5354_v24 = vld [vmem:[%s6511_s1 + $0xd0] sm:$0xff] (!%p160_p3)   ;;  %v5356_v26 = vld [vmem:[%s6511_s1 + $0xd8] sm:$0xff] (!%p160_p3)  }
   0xe   : > { %s6519_s12 = smov (!%p194_p4, %s5825_s12), 1  ;;  %v5357_v27 = vld [vmem:[%s6511_s1 + $0x60] sm:$0xff]   ;;  %v5359_v29 = vld [vmem:[%s6511_s1 + $0x68] sm:$0xff]   ;;  %v5361_v31 = vld [vmem:[%s6511_s1 + $0x70] sm:$0xff]  }
   0xf   : > { %s5307_s21 = smul.u32 2368, %s6519_s12  ;;  %v5358_v28 = vld [vmem:[%s6511_s1 + $0xe0] sm:$0xff]   ;;  %v5360_v30 = vld [vmem:[%s6511_s1 + $0xe8] sm:$0xff]   ;;  %v5362_v32 = vld [vmem:[%s6511_s1 + $0xf0] sm:$0xff]   ;;  %s5031_s18 = sshll.u32 %s6519_s12, 7 }
  0x10   : > { %2402 = vmatpush1.bf16.msra.mxu1 %v5337_v5  ;;  %3027 = vmatpush1.bf16.msra.mxu0 %v5338_v6  ;;  %v5364_v33 = vld [vmem:[%s6511_s1 + $0xf8] ss:$0 sps:$4 sm:$0x33]  }
  0x11   : > { %2403 = vmatprep.subr.bf16.mxu1 %v5835_v1  ;;  %3028 = vmatprep.subr.bf16.mxu0 %v5835_v1  ;;  %s5948_s28 = scalar_lea.vmem %s6510_s0, %s5307_s21  ;;  %v5363_v34 = vld [vmem:[%s6511_s1 + $0x78] sm:$0xff]   ;;  %v2395_v35 = vsel %vm2393_vm1, %v5364_v33, 0  ;;  %s6213_s21 = scalar_lea.vmem %s6513_s3, %s5031_s18 }
  0x12   : > { %v5367_v19 = vld [vmem:[%s5948_s28 + $0x4] ss:$16 sps:$4 sm:$0xff]   ;;  %v5370_v21 = vld [vmem:[%s5948_s28 + $0xc] ss:$16 sps:$4 sm:$0xff]   ;;  %v5365_v36 = vld [vmem:[%s5948_s28] ss:$16 sps:$4 sm:$0xff]  }
  0x13   : > { %2429 = vmatprep.mubr.bf16.mxu1 %v5367_v19  ;;  %4892 = vmatprep.mubr.msk.bf16.mxu0 %vm2170_vm0, %v5370_v21  ;;  %v5368_v37 = vld [vmem:[%s5948_s28 + $0x8] ss:$16 sps:$4 sm:$0xff]   ;;  %v5371_v38 = vld [vmem:[%s5948_s28 + $0x24] ss:$16 sps:$4 sm:$0xff]   ;;  %v5373_v39 = vld [vmem:[%s5948_s28 + $0x2c] ss:$16 sps:$4 sm:$0xff]  }
  0x14   : > { %2404 = vmatpush1.bf16.msra.mxu1 %v5339_v7  ;;  %3029 = vmatpush1.bf16.msra.mxu0 %v5340_v8  ;;  %v5375_v40 = vld [vmem:[%s5948_s28 + $0x20] ss:$16 sps:$4 sm:$0xff]   ;;  %v5376_v41 = vld [vmem:[%s5948_s28 + $0x28] ss:$16 sps:$4 sm:$0xff]   ;;  %v5377_v42 = vld [vmem:[%s5948_s28 + $0x44] ss:$16 sps:$4 sm:$0xff]  }
  0x15   : > { %2405 = vmatprep.subr.bf16.mxu1 %v5835_v1  ;;  %3030 = vmatprep.subr.bf16.mxu0 %v5835_v1  ;;  %v5379_v43 = vld [vmem:[%s5948_s28 + $0x4c] ss:$16 sps:$4 sm:$0xff]   ;;  %v5381_v44 = vld [vmem:[%s5948_s28 + $0x40] ss:$16 sps:$4 sm:$0xff]   ;;  %v5382_v45 = vld [vmem:[%s5948_s28 + $0x48] ss:$16 sps:$4 sm:$0xff]  }
  0x16   : > { %v5383_v46 = vld [vmem:[%s5948_s28 + $0x64] ss:$16 sps:$4 sm:$0xff]   ;;  %v5385_v47 = vld [vmem:[%s5948_s28 + $0x6c] ss:$16 sps:$4 sm:$0xff]   ;;  %v5387_v48 = vld [vmem:[%s5948_s28 + $0x60] ss:$16 sps:$4 sm:$0xff]  }
  0x17   : > { %v5388_v49 = vld [vmem:[%s5948_s28 + $0x68] ss:$16 sps:$4 sm:$0xff]   ;;  %v5389_v50 = vld [vmem:[%s5948_s28 + $0x84] ss:$16 sps:$4 sm:$0xff]   ;;  %v5391_v51 = vld [vmem:[%s5948_s28 + $0x8c] ss:$16 sps:$4 sm:$0xff]  }
  0x18   : > { %2406 = vmatpush1.bf16.msra.mxu1 %v5341_v9  ;;  %3031 = vmatpush1.bf16.msra.mxu0 %v5342_v10  ;;  %v5393_v52 = vld [vmem:[%s5948_s28 + $0x80] ss:$16 sps:$4 sm:$0xff]   ;;  %v5394_v53 = vld [vmem:[%s5948_s28 + $0x88] ss:$16 sps:$4 sm:$0xff]   ;;  %v5395_v54 = vld [vmem:[%s5948_s28 + $0xa4] ss:$16 sps:$4 sm:$0xff]  }
  0x19   : > { %2407 = vmatprep.subr.bf16.mxu1 %v5835_v1  ;;  %3032 = vmatprep.subr.bf16.mxu0 %v5835_v1  ;;  %v5397_v55 = vld [vmem:[%s5948_s28 + $0xac] ss:$16 sps:$4 sm:$0xff]   ;;  %v5399_v56 = vld [vmem:[%s5948_s28 + $0xa0] ss:$16 sps:$4 sm:$0xff]   ;;  %v5400_v57 = vld [vmem:[%s5948_s28 + $0xa8] ss:$16 sps:$4 sm:$0xff]  }
  0x1a   : > { %v5401_v58 = vld [vmem:[%s5948_s28 + $0xc4] ss:$16 sps:$4 sm:$0xff]   ;;  %v5403_v59 = vld [vmem:[%s5948_s28 + $0xcc] ss:$16 sps:$4 sm:$0xff]   ;;  %v5405_v60 = vld [vmem:[%s5948_s28 + $0xc0] ss:$16 sps:$4 sm:$0xff]  }
  0x1b   : > { %v5406_v61 = vld [vmem:[%s5948_s28 + $0xc8] ss:$16 sps:$4 sm:$0xff]   ;;  %v5407_v62 = vld [vmem:[%s5948_s28 + $0xe4] ss:$16 sps:$4 sm:$0xff]   ;;  %v5409_v63 = vld [vmem:[%s5948_s28 + $0xec] ss:$16 sps:$4 sm:$0xff]  }
  0x1c   : > { %2408 = vmatpush1.bf16.msra.mxu1 %v5343_v11  ;;  %3033 = vmatpush1.bf16.msra.mxu0 %v5344_v12  ;;  %v5411_v0 = vld [vmem:[%s5948_s28 + $0xe0] ss:$16 sps:$4 sm:$0xff]   ;;  %v5413_v2 = vld [vmem:[%s5948_s28 + $0x104] ss:$16 sps:$4 sm:$0xff]   ;;  %v5415_v3 = vld [vmem:[%s5948_s28 + $0x10c] ss:$16 sps:$4 sm:$0xff]  }
  0x1d   : > { %2409 = vmatprep.subr.bf16.mxu1 %v5835_v1  ;;  %3034 = vmatprep.subr.bf16.mxu0 %v5835_v1  ;;  %v5417_v4 = vld [vmem:[%s5948_s28 + $0x100] ss:$16 sps:$4 sm:$0xff]   ;;  %v5418_v5 = vld [vmem:[%s5948_s28 + $0x108] ss:$16 sps:$4 sm:$0xff]   ;;  %v5419_v6 = vld [vmem:[%s5948_s28 + $0x124] ss:$16 sps:$4 sm:$0xff]  }
  0x1e   : > { %v5421_v7 = vld [vmem:[%s5948_s28 + $0x12c] ss:$16 sps:$4 sm:$0xff]   ;;  %v5423_v8 = vld [vmem:[%s5948_s28 + $0x120] ss:$16 sps:$4 sm:$0xff]   ;;  %v5424_v9 = vld [vmem:[%s5948_s28 + $0x128] ss:$16 sps:$4 sm:$0xff]  }
  0x1f   : > { %v5425_v10 = vld [vmem:[%s5948_s28 + $0x144] ss:$16 sps:$4 sm:$0xff]   ;;  %v5427_v11 = vld [vmem:[%s5948_s28 + $0x14c] ss:$16 sps:$4 sm:$0xff]   ;;  %v5429_v12 = vld [vmem:[%s5948_s28 + $0x140] ss:$16 sps:$4 sm:$0xff]  }
  0x20   : > { %2410 = vmatpush1.bf16.msra.mxu1 %v5345_v13  ;;  %3035 = vmatpush1.bf16.msra.mxu0 %v5346_v14  ;;  %v5430_v13 = vld [vmem:[%s5948_s28 + $0x148] ss:$16 sps:$4 sm:$0xff]   ;;  %v5431_v14 = vld [vmem:[%s5948_s28 + $0x164] ss:$16 sps:$4 sm:$0xff]   ;;  %v5439_v19 = vld [vmem:[%s5948_s28 + $0x18c] ss:$16 sps:$4 sm:$0xff]  }
  0x21   : > { %2411 = vmatprep.subr.bf16.mxu1 %v5835_v1  ;;  %3036 = vmatprep.subr.bf16.mxu0 %v5835_v1  ;;  %v5442_v21 = vld [vmem:[%s5948_s28 + $0x188] ss:$16 sps:$4 sm:$0xff]  }
  0x22   : > { %v5460_v33 = vld [vmem:[%s5948_s28 + $0x1e8] ss:$16 sps:$4 sm:$0xff]  }
  0x24   : > { %2412 = vmatpush1.bf16.msra.mxu1 %v5347_v15  ;;  %3037 = vmatpush1.bf16.msra.mxu0 %v5348_v16  ;;  %v5433_v15 = vld [vmem:[%s5948_s28 + $0x16c] ss:$16 sps:$4 sm:$0xff]   ;;  %v5435_v16 = vld [vmem:[%s5948_s28 + $0x160] ss:$16 sps:$4 sm:$0xff]  }
  0x25   : > { %2413 = vmatprep.subr.bf16.mxu1 %v5835_v1  ;;  %3038 = vmatprep.subr.bf16.mxu0 %v5835_v1 }
  0x28   : > { %2414 = vmatpush1.bf16.msra.mxu1 %v5349_v17  ;;  %3039 = vmatpush1.bf16.msra.mxu0 %v5350_v18  ;;  %v5436_v17 = vld [vmem:[%s5948_s28 + $0x168] ss:$16 sps:$4 sm:$0xff]   ;;  %v5437_v18 = vld [vmem:[%s5948_s28 + $0x184] ss:$16 sps:$4 sm:$0xff]  }
  0x29   : > { %2415 = vmatprep.subr.bf16.mxu1 %v5835_v1  ;;  %3040 = vmatprep.subr.bf16.mxu0 %v5835_v1 }
  0x2c   : > { %2416 = vmatpush1.bf16.msra.mxu1 %v5351_v20  ;;  %3041 = vmatpush1.bf16.msra.mxu0 %v5352_v22  ;;  %v5441_v20 = vld [vmem:[%s5948_s28 + $0x180] ss:$16 sps:$4 sm:$0xff]   ;;  %v5443_v22 = vld [vmem:[%s5948_s28 + $0x1a4] ss:$16 sps:$4 sm:$0xff]  }
  0x2d   : > { %2417 = vmatprep.subr.bf16.mxu1 %v5835_v1  ;;  %3042 = vmatprep.subr.bf16.mxu0 %v5835_v1 }
  0x30   : > { %2418 = vmatpush1.bf16.msra.mxu1 %v5353_v23  ;;  %3043 = vmatpush1.bf16.msra.mxu0 %v5354_v24  ;;  %v5445_v23 = vld [vmem:[%s5948_s28 + $0x1ac] ss:$16 sps:$4 sm:$0xff]   ;;  %v5447_v24 = vld [vmem:[%s5948_s28 + $0x1a0] ss:$16 sps:$4 sm:$0xff]  }
  0x31   : > { %2419 = vmatprep.subr.bf16.mxu1 %v5835_v1  ;;  %3044 = vmatprep.subr.bf16.mxu0 %v5835_v1 }
  0x34   : > { %2420 = vmatpush1.bf16.msra.mxu1 %v5355_v25  ;;  %3045 = vmatpush1.bf16.msra.mxu0 %v5356_v26  ;;  %v5448_v25 = vld [vmem:[%s5948_s28 + $0x1a8] ss:$16 sps:$4 sm:$0xff]   ;;  %v5449_v26 = vld [vmem:[%s5948_s28 + $0x1c4] ss:$16 sps:$4 sm:$0xff]  }
  0x35   : > { %2421 = vmatprep.subr.bf16.mxu1 %v5835_v1  ;;  %3046 = vmatprep.subr.bf16.mxu0 %v5835_v1 }
  0x38   : > { %2422 = vmatpush1.bf16.msra.mxu1 %v5357_v27  ;;  %3047 = vmatpush1.bf16.msra.mxu0 %v5358_v28  ;;  %v5451_v27 = vld [vmem:[%s5948_s28 + $0x1cc] ss:$16 sps:$4 sm:$0xff]   ;;  %v5453_v28 = vld [vmem:[%s5948_s28 + $0x1c0] ss:$16 sps:$4 sm:$0xff]  }
  0x39   : > { %2423 = vmatprep.subr.bf16.mxu1 %v5835_v1  ;;  %3048 = vmatprep.subr.bf16.mxu0 %v5835_v1 }
  0x3c   : > { %2424 = vmatpush1.bf16.msra.mxu1 %v5359_v29  ;;  %3049 = vmatpush1.bf16.msra.mxu0 %v5360_v30  ;;  %v5454_v29 = vld [vmem:[%s5948_s28 + $0x1c8] ss:$16 sps:$4 sm:$0xff]   ;;  %v5455_v30 = vld [vmem:[%s5948_s28 + $0x1e4] ss:$16 sps:$4 sm:$0xff]  }
  0x3d   : > { %2425 = vmatprep.subr.bf16.mxu1 %v5835_v1  ;;  %3050 = vmatprep.subr.bf16.mxu0 %v5835_v1 }
  0x40   : > { %2426 = vmatpush1.bf16.msra.mxu1 %v5361_v31  ;;  %3051 = vmatpush1.bf16.msra.mxu0 %v5362_v32  ;;  %v5457_v31 = vld [vmem:[%s5948_s28 + $0x1ec] ss:$16 sps:$4 sm:$0xff]   ;;  %v5459_v32 = vld [vmem:[%s5948_s28 + $0x1e0] ss:$16 sps:$4 sm:$0xff]  }
  0x41   : > { %2427 = vmatprep.subr.bf16.mxu1 %v5835_v1  ;;  %3052 = vmatprep.subr.bf16.mxu0 %v5835_v1  ;;  %v5412_v1 = vld [vmem:[%s5948_s28 + $0xe8] ss:$16 sps:$4 sm:$0xff]  }
  0x44   : > { %2428 = vmatpush1.bf16.msra.mxu1 %v5363_v34  ;;  %3053 = vmatpush1.bf16.msra.mxu0 %v2395_v35  ;;  %v5461_v34 = vld [vmem:[%s5948_s28 + $0x204] ss:$16 sps:$4 sm:$0xff]   ;;  %v5463_v35 = vld [vmem:[%s5948_s28 + $0x20c] ss:$16 sps:$4 sm:$0xff]  }
  0x47   : > { %2430 = vmatmul.mubr.bf16.vlgmr.msra.gmra.mrb[0].mxu1 %v5365_v36  ;;  %3055 = vmatmul.mubr.bf16.vlgmr.msra.gmra.mrb[0].mxu0 %v5368_v37  ;;  %v5465_v36 = vld [vmem:[%s5948_s28 + $0x200] ss:$16 sps:$4 sm:$0xff]   ;;  %v5466_v37 = vld [vmem:[%s5948_s28 + $0x208] ss:$16 sps:$4 sm:$0xff]  }
  0x48   : > { %2437 = vmatprep.mubr.bf16.mxu1 %v5371_v38  ;;  %4893 = vmatprep.mubr.msk.bf16.mxu0 %vm2170_vm0, %v5373_v39  ;;  %v5467_v38 = vld [vmem:[%s5948_s28 + $0x224] ss:$16 sps:$4 sm:$0xff]   ;;  %v5469_v39 = vld [vmem:[%s5948_s28 + $0x22c] ss:$16 sps:$4 sm:$0xff]  }
  0x4f   : > { %2438 = vmatmul.mubr.bf16.gmra.mrb[4].mxu1 %v5375_v40  ;;  %3063 = vmatmul.mubr.bf16.gmra.mrb[4].mxu0 %v5376_v41  ;;  %v5471_v40 = vld [vmem:[%s5948_s28 + $0x220] ss:$16 sps:$4 sm:$0xff]   ;;  %v5472_v41 = vld [vmem:[%s5948_s28 + $0x228] ss:$16 sps:$4 sm:$0xff]  }
  0x50   : > { %2445 = vmatprep.mubr.bf16.mxu1 %v5377_v42  ;;  %4894 = vmatprep.mubr.msk.bf16.mxu0 %vm2170_vm0, %v5379_v43  ;;  %v5473_v42 = vld [vmem:[%s5948_s28 + $0x244] ss:$16 sps:$4 sm:$0xff]   ;;  %v5475_v43 = vld [vmem:[%s5948_s28 + $0x24c] ss:$16 sps:$4 sm:$0xff]  }
  0x57   : > { %2446 = vmatmul.mubr.bf16.gmra.mrb[8].mxu1 %v5381_v44  ;;  %3071 = vmatmul.mubr.bf16.gmra.mrb[8].mxu0 %v5382_v45  ;;  %v5477_v44 = vld [vmem:[%s5948_s28 + $0x240] ss:$16 sps:$4 sm:$0xff]   ;;  %v5478_v45 = vld [vmem:[%s5948_s28 + $0x248] ss:$16 sps:$4 sm:$0xff]  }
  0x58   : > { %2453 = vmatprep.mubr.bf16.mxu1 %v5383_v46  ;;  %4895 = vmatprep.mubr.msk.bf16.mxu0 %vm2170_vm0, %v5385_v47  ;;  %v5479_v46 = vld [vmem:[%s5948_s28 + $0x264] ss:$16 sps:$4 sm:$0xff]   ;;  %v5481_v47 = vld [vmem:[%s5948_s28 + $0x26c] ss:$16 sps:$4 sm:$0xff]  }
  0x5f   : > { %2454 = vmatmul.mubr.bf16.gmra.mrb[12].mxu1 %v5387_v48  ;;  %3079 = vmatmul.mubr.bf16.gmra.mrb[12].mxu0 %v5388_v49  ;;  %v5483_v48 = vld [vmem:[%s5948_s28 + $0x260] ss:$16 sps:$4 sm:$0xff]   ;;  %v5484_v49 = vld [vmem:[%s5948_s28 + $0x268] ss:$16 sps:$4 sm:$0xff]  }
  0x60   : > { %2461 = vmatprep.mubr.bf16.mxu1 %v5389_v50  ;;  %4896 = vmatprep.mubr.msk.bf16.mxu0 %vm2170_vm0, %v5391_v51  ;;  %v5485_v50 = vld [vmem:[%s5948_s28 + $0x284] ss:$16 sps:$4 sm:$0xff]   ;;  %v5487_v51 = vld [vmem:[%s5948_s28 + $0x28c] ss:$16 sps:$4 sm:$0xff]  }
  0x67   : > { %2462 = vmatmul.mubr.bf16.gmra.mrb[16].mxu1 %v5393_v52  ;;  %3087 = vmatmul.mubr.bf16.gmra.mrb[16].mxu0 %v5394_v53  ;;  %v5489_v52 = vld [vmem:[%s5948_s28 + $0x280] ss:$16 sps:$4 sm:$0xff]   ;;  %v5490_v53 = vld [vmem:[%s5948_s28 + $0x288] ss:$16 sps:$4 sm:$0xff]  }
  0x68   : > { %2469 = vmatprep.mubr.bf16.mxu1 %v5395_v54  ;;  %4897 = vmatprep.mubr.msk.bf16.mxu0 %vm2170_vm0, %v5397_v55  ;;  %v5491_v54 = vld [vmem:[%s5948_s28 + $0x2a4] ss:$16 sps:$4 sm:$0xff]   ;;  %v5493_v55 = vld [vmem:[%s5948_s28 + $0x2ac] ss:$16 sps:$4 sm:$0xff]  }
  0x6f   : > { %2470 = vmatmul.mubr.bf16.gmra.mrb[20].mxu1 %v5399_v56  ;;  %3095 = vmatmul.mubr.bf16.gmra.mrb[20].mxu0 %v5400_v57  ;;  %v5495_v56 = vld [vmem:[%s5948_s28 + $0x2a0] ss:$16 sps:$4 sm:$0xff]   ;;  %v5496_v57 = vld [vmem:[%s5948_s28 + $0x2a8] ss:$16 sps:$4 sm:$0xff]  }
  0x70   : > { %2477 = vmatprep.mubr.bf16.mxu1 %v5401_v58  ;;  %4898 = vmatprep.mubr.msk.bf16.mxu0 %vm2170_vm0, %v5403_v59  ;;  %v5497_v58 = vld [vmem:[%s5948_s28 + $0x2c4] ss:$16 sps:$4 sm:$0xff]   ;;  %v5499_v59 = vld [vmem:[%s5948_s28 + $0x2cc] ss:$16 sps:$4 sm:$0xff]  }
  0x77   : > { %2478 = vmatmul.mubr.bf16.gmra.mrb[24].mxu1 %v5405_v60  ;;  %3103 = vmatmul.mubr.bf16.gmra.mrb[24].mxu0 %v5406_v61  ;;  %v5501_v60 = vld [vmem:[%s5948_s28 + $0x2c0] ss:$16 sps:$4 sm:$0xff]   ;;  %v5502_v61 = vld [vmem:[%s5948_s28 + $0x2c8] ss:$16 sps:$4 sm:$0xff]  }
  0x78   : > { %2485 = vmatprep.mubr.bf16.mxu1 %v5407_v62  ;;  %4899 = vmatprep.mubr.msk.bf16.mxu0 %vm2170_vm0, %v5409_v63  ;;  %v5503_v62 = vld [vmem:[%s5948_s28 + $0x2e4] ss:$16 sps:$4 sm:$0xff]   ;;  %v5505_v63 = vld [vmem:[%s5948_s28 + $0x2ec] ss:$16 sps:$4 sm:$0xff]  }
  0x7f   : > { %2486 = vmatmul.mubr.bf16.gmra.mrb[28].mxu1 %v5411_v0  ;;  %3111 = vmatmul.mubr.bf16.gmra.mrb[28].mxu0 %v5412_v1  ;;  %v5507_v0 = vld [vmem:[%s5948_s28 + $0x2e0] ss:$16 sps:$4 sm:$0xff]   ;;  %v5508_v1 = vld [vmem:[%s5948_s28 + $0x2e8] ss:$16 sps:$4 sm:$0xff]  }
  0x80   : > { %2493 = vmatprep.mubr.bf16.mxu1 %v5413_v2  ;;  %4900 = vmatprep.mubr.msk.bf16.mxu0 %vm2170_vm0, %v5415_v3  ;;  %v5509_v2 = vld [vmem:[%s5948_s28 + $0x304] ss:$16 sps:$4 sm:$0xff]   ;;  %v5511_v3 = vld [vmem:[%s5948_s28 + $0x30c] ss:$16 sps:$4 sm:$0xff]  }
  0x87   : > { %2494 = vmatmul.mubr.bf16.gmra.mrb[32].mxu1 %v5417_v4  ;;  %3119 = vmatmul.mubr.bf16.gmra.mrb[32].mxu0 %v5418_v5  ;;  %v5513_v4 = vld [vmem:[%s5948_s28 + $0x300] ss:$16 sps:$4 sm:$0xff]   ;;  %v5514_v5 = vld [vmem:[%s5948_s28 + $0x308] ss:$16 sps:$4 sm:$0xff]  }
  0x88   : > { %2501 = vmatprep.mubr.bf16.mxu1 %v5419_v6  ;;  %4901 = vmatprep.mubr.msk.bf16.mxu0 %vm2170_vm0, %v5421_v7  ;;  %v5515_v6 = vld [vmem:[%s5948_s28 + $0x324] ss:$16 sps:$4 sm:$0xff]   ;;  %v5517_v7 = vld [vmem:[%s5948_s28 + $0x32c] ss:$16 sps:$4 sm:$0xff]  }
  0x8f   : > { %2502 = vmatmul.mubr.bf16.gmra.mrb[36].mxu1 %v5423_v8  ;;  %3127 = vmatmul.mubr.bf16.gmra.mrb[36].mxu0 %v5424_v9  ;;  %v5519_v8 = vld [vmem:[%s5948_s28 + $0x320] ss:$16 sps:$4 sm:$0xff]   ;;  %v5520_v9 = vld [vmem:[%s5948_s28 + $0x328] ss:$16 sps:$4 sm:$0xff]  }
  0x90   : > { %2509 = vmatprep.mubr.bf16.mxu1 %v5425_v10  ;;  %4902 = vmatprep.mubr.msk.bf16.mxu0 %vm2170_vm0, %v5427_v11  ;;  %v5521_v10 = vld [vmem:[%s5948_s28 + $0x344] ss:$16 sps:$4 sm:$0xff]   ;;  %v5523_v11 = vld [vmem:[%s5948_s28 + $0x34c] ss:$16 sps:$4 sm:$0xff]  }
  0x97   : > { %2510 = vmatmul.mubr.bf16.gmra.mrb[40].mxu1 %v5429_v12  ;;  %3135 = vmatmul.mubr.bf16.gmra.mrb[40].mxu0 %v5430_v13  ;;  %v5525_v12 = vld [vmem:[%s5948_s28 + $0x340] ss:$16 sps:$4 sm:$0xff]   ;;  %v5526_v13 = vld [vmem:[%s5948_s28 + $0x348] ss:$16 sps:$4 sm:$0xff]  }
  0x98   : > { %2517 = vmatprep.mubr.bf16.mxu1 %v5431_v14  ;;  %4903 = vmatprep.mubr.msk.bf16.mxu0 %vm2170_vm0, %v5433_v15  ;;  %v5527_v14 = vld [vmem:[%s5948_s28 + $0x364] ss:$16 sps:$4 sm:$0xff]   ;;  %v5529_v15 = vld [vmem:[%s5948_s28 + $0x36c] ss:$16 sps:$4 sm:$0xff]  }
  0x9f   : > { %2518 = vmatmul.mubr.bf16.gmra.mrb[44].mxu1 %v5435_v16  ;;  %3143 = vmatmul.mubr.bf16.gmra.mrb[44].mxu0 %v5436_v17 }
  0xa0   : > { %2525 = vmatprep.mubr.bf16.mxu1 %v5437_v18  ;;  %4904 = vmatprep.mubr.msk.bf16.mxu0 %vm2170_vm0, %v5439_v19  ;;  %v5531_v19 = vld [vmem:[%s5948_s28 + $0x360] ss:$16 sps:$4 sm:$0xff]  }
  0xa7   : > { %2526 = vmatmul.mubr.bf16.gmra.mrb[48].mxu1 %v5441_v20  ;;  %3151 = vmatmul.mubr.bf16.gmra.mrb[48].mxu0 %v5442_v21 }
  0xa8   : > { %2533 = vmatprep.mubr.bf16.mxu1 %v5443_v22  ;;  %4905 = vmatprep.mubr.msk.bf16.mxu0 %vm2170_vm0, %v5445_v23  ;;  %v5532_v23 = vld [vmem:[%s5948_s28 + $0x368] ss:$16 sps:$4 sm:$0xff]  }
  0xaf   : > { %2534 = vmatmul.mubr.bf16.gmra.mrb[52].mxu1 %v5447_v24  ;;  %3159 = vmatmul.mubr.bf16.gmra.mrb[52].mxu0 %v5448_v25  ;;  %v5533_v24 = vld [vmem:[%s5948_s28 + $0x384] ss:$16 sps:$4 sm:$0xff]  }
  0xb0   : > { %2541 = vmatprep.mubr.bf16.mxu1 %v5449_v26  ;;  %4906 = vmatprep.mubr.msk.bf16.mxu0 %vm2170_vm0, %v5451_v27  ;;  %v5535_v27 = vld [vmem:[%s5948_s28 + $0x38c] ss:$16 sps:$4 sm:$0xff]  }
  0xb7   : > { %2542 = vmatmul.mubr.bf16.gmra.mrb[56].mxu1 %v5453_v28  ;;  %3167 = vmatmul.mubr.bf16.gmra.mrb[56].mxu0 %v5454_v29 }
  0xb8   : > { %2549 = vmatprep.mubr.bf16.mxu1 %v5455_v30  ;;  %4907 = vmatprep.mubr.msk.bf16.mxu0 %vm2170_vm0, %v5457_v31 }
  0xbf   : > { %2550 = vmatmul.mubr.bf16.gmra.mrb[60].mxu1 %v5459_v32  ;;  %3175 = vmatmul.mubr.bf16.gmra.mrb[60].mxu0 %v5460_v33  ;;  %v5537_v33 = vld [vmem:[%s5948_s28 + $0x380] ss:$16 sps:$4 sm:$0xff]  }
  0xc0   : > { %2557 = vmatprep.mubr.bf16.mxu1 %v5461_v34  ;;  %4908 = vmatprep.mubr.msk.bf16.mxu0 %vm2170_vm0, %v5463_v35 }
  0xc7   : > { %2558 = vmatmul.mubr.bf16.gmra.mrb[64].mxu1 %v5465_v36  ;;  %3183 = vmatmul.mubr.bf16.gmra.mrb[64].mxu0 %v5466_v37  ;;  %v5538_v37 = vld [vmem:[%s5948_s28 + $0x388] ss:$16 sps:$4 sm:$0xff]  }
  0xc8   : > { %2565 = vmatprep.mubr.bf16.mxu1 %v5467_v38  ;;  %4909 = vmatprep.mubr.msk.bf16.mxu0 %vm2170_vm0, %v5469_v39  ;;  %v5539_v38 = vld [vmem:[%s5948_s28 + $0x3a4] ss:$16 sps:$4 sm:$0xff]  }
  0xcf   : > { %2566 = vmatmul.mubr.bf16.gmra.mrb[68].mxu1 %v5471_v40  ;;  %3191 = vmatmul.mubr.bf16.gmra.mrb[68].mxu0 %v5472_v41  ;;  %v5541_v41 = vld [vmem:[%s5948_s28 + $0x3ac] ss:$16 sps:$4 sm:$0xff]  }
  0xd0   : > { %2573 = vmatprep.mubr.bf16.mxu1 %v5473_v42  ;;  %4910 = vmatprep.mubr.msk.bf16.mxu0 %vm2170_vm0, %v5475_v43 }
  0xd7   : > { %2574 = vmatmul.mubr.bf16.gmra.mrb[72].mxu1 %v5477_v44  ;;  %3199 = vmatmul.mubr.bf16.gmra.mrb[72].mxu0 %v5478_v45 }
  0xd8   : > { %2581 = vmatprep.mubr.bf16.mxu1 %v5479_v46  ;;  %4911 = vmatprep.mubr.msk.bf16.mxu0 %vm2170_vm0, %v5481_v47  ;;  %v5543_v47 = vld [vmem:[%s5948_s28 + $0x3a0] ss:$16 sps:$4 sm:$0xff]  }
  0xdf   : > { %2582 = vmatmul.mubr.bf16.gmra.mrb[76].mxu1 %v5483_v48  ;;  %3207 = vmatmul.mubr.bf16.gmra.mrb[76].mxu0 %v5484_v49 }
  0xe0   : > { %2589 = vmatprep.mubr.bf16.mxu1 %v5485_v50  ;;  %4912 = vmatprep.mubr.msk.bf16.mxu0 %vm2170_vm0, %v5487_v51  ;;  %v5544_v51 = vld [vmem:[%s5948_s28 + $0x3a8] ss:$16 sps:$4 sm:$0xff]  }
  0xe7   : > { %2590 = vmatmul.mubr.bf16.gmra.mrb[80].mxu1 %v5489_v52  ;;  %3215 = vmatmul.mubr.bf16.gmra.mrb[80].mxu0 %v5490_v53  ;;  %v5545_v52 = vld [vmem:[%s5948_s28 + $0x3c4] ss:$16 sps:$4 sm:$0xff]  }
  0xe8   : > { %2597 = vmatprep.mubr.bf16.mxu1 %v5491_v54  ;;  %4913 = vmatprep.mubr.msk.bf16.mxu0 %vm2170_vm0, %v5493_v55  ;;  %v5547_v55 = vld [vmem:[%s5948_s28 + $0x3cc] ss:$16 sps:$4 sm:$0xff]  }
  0xef   : > { %2598 = vmatmul.mubr.bf16.gmra.mrb[84].mxu1 %v5495_v56  ;;  %3223 = vmatmul.mubr.bf16.gmra.mrb[84].mxu0 %v5496_v57 }
  0xf0   : > { %2605 = vmatprep.mubr.bf16.mxu1 %v5497_v58  ;;  %4914 = vmatprep.mubr.msk.bf16.mxu0 %vm2170_vm0, %v5499_v59 }
  0xf7   : > { %2606 = vmatmul.mubr.bf16.gmra.mrb[88].mxu1 %v5501_v60  ;;  %3231 = vmatmul.mubr.bf16.gmra.mrb[88].mxu0 %v5502_v61  ;;  %v5549_v61 = vld [vmem:[%s5948_s28 + $0x3c0] ss:$16 sps:$4 sm:$0xff]  }
  0xf8   : > { %2613 = vmatprep.mubr.bf16.mxu1 %v5503_v62  ;;  %4915 = vmatprep.mubr.msk.bf16.mxu0 %vm2170_vm0, %v5505_v63 }
  0xff   : > { %2614 = vmatmul.mubr.bf16.gmra.mrb[92].mxu1 %v5507_v0  ;;  %3239 = vmatmul.mubr.bf16.gmra.mrb[92].mxu0 %v5508_v1  ;;  %v5550_v1 = vld [vmem:[%s5948_s28 + $0x3c8] ss:$16 sps:$4 sm:$0xff]  }
 0x100   : > { %2621 = vmatprep.mubr.bf16.mxu1 %v5509_v2  ;;  %4916 = vmatprep.mubr.msk.bf16.mxu0 %vm2170_vm0, %v5511_v3  ;;  %v5551_v2 = vld [vmem:[%s5948_s28 + $0x3e4] ss:$16 sps:$4 sm:$0xff]  }
 0x107   : > { %2622 = vmatmul.mubr.bf16.gmra.mrb[96].mxu1 %v5513_v4  ;;  %3247 = vmatmul.mubr.bf16.gmra.mrb[96].mxu0 %v5514_v5  ;;  %v5553_v5 = vld [vmem:[%s5948_s28 + $0x3ec] ss:$16 sps:$4 sm:$0xff]  }
 0x108   : > { %2629 = vmatprep.mubr.bf16.mxu1 %v5515_v6  ;;  %4917 = vmatprep.mubr.msk.bf16.mxu0 %vm2170_vm0, %v5517_v7 }
 0x10f   : > { %2630 = vmatmul.mubr.bf16.gmra.mrb[100].mxu1 %v5519_v8  ;;  %3255 = vmatmul.mubr.bf16.gmra.mrb[100].mxu0 %v5520_v9 }
 0x110   : > { %2637 = vmatprep.mubr.bf16.mxu1 %v5521_v10  ;;  %4918 = vmatprep.mubr.msk.bf16.mxu0 %vm2170_vm0, %v5523_v11 }
 0x117   : > { %2638 = vmatmul.mubr.bf16.gmra.mrb[104].mxu1 %v5525_v12  ;;  %3263 = vmatmul.mubr.bf16.gmra.mrb[104].mxu0 %v5526_v13  ;;  %v5555_v13 = vld [vmem:[%s5948_s28 + $0x3e0] ss:$16 sps:$4 sm:$0xff]  }
 0x118   : > { %2645 = vmatprep.mubr.bf16.mxu1 %v5527_v14  ;;  %4919 = vmatprep.mubr.msk.bf16.mxu0 %vm2170_vm0, %v5529_v15 }
 0x11a   : > { %v2431_v16 = vpop.f32.mrb[0].mxu1  ;;  %v3056_v17 = vpop.f32.mrb[0].mxu0 }
 0x11b   : > { %v2433_v18 = vpop.f32.mrb[1].mxu1  ;;  %v6153_v20 = vadd.f32 %v3056_v17, %v2431_v16  ;;  %v3058_v21 = vpop.f32.mrb[1].mxu0  ;;  %v5556_v17 = vld [vmem:[%s5948_s28 + $0x3e8] ss:$16 sps:$4 sm:$0xff]  }
 0x11c   : > { %v2434_v22 = vpop.f32.mrb[2].mxu1  ;;  %v3059_v25 = vpop.f32.mrb[2].mxu0  ;;  %v5557_v18 = vld [vmem:[%s5948_s28 + $0x404] ss:$16 sps:$4 sm:$0xff]  }
 0x11d   : > { %v2436_v26 = vpop.f32.mrb[3].mxu1  ;;  %v6158_v28 = vadd.f32 %v3059_v25, %v2434_v22  ;;  %v3061_v29 = vpop.f32.mrb[3].mxu0 }
 0x11f   : > { %2646 = vmatmul.mubr.bf16.gmra.mrb[108].mxu1 %v5531_v19  ;;  %3271 = vmatmul.mubr.bf16.gmra.mrb[108].mxu0 %v5532_v23 }
 0x120   : > { %2653 = vmatprep.mubr.bf16.mxu1 %v5533_v24  ;;  %4920 = vmatprep.mubr.msk.bf16.mxu0 %vm2170_vm0, %v5535_v27 }
 0x122   : > { %v2439_v30 = vpop.f32.mrb[4].mxu1  ;;  %v3064_v31 = vpop.f32.mrb[4].mxu0 }
 0x123   : > { %v2441_v32 = vpop.f32.mrb[5].mxu1  ;;  %v6162_v34 = vadd.f32 %v3064_v31, %v2439_v30  ;;  %v3066_v35 = vpop.f32.mrb[5].mxu0  ;;  %v5561_v31 = vld [vmem:[%s5948_s28 + $0x400] ss:$16 sps:$4 sm:$0xff]  }
 0x124   : > { %v2442_v36 = vpop.f32.mrb[6].mxu1  ;;  %v3067_v39 = vpop.f32.mrb[6].mxu0 }
 0x125   : > { %v2444_v40 = vpop.f32.mrb[7].mxu1  ;;  %v6167_v42 = vadd.f32 %v3067_v39, %v2442_v36  ;;  %v3069_v43 = vpop.f32.mrb[7].mxu0  ;;  %v5562_v36 = vld [vmem:[%s5948_s28 + $0x408] ss:$16 sps:$4 sm:$0xff]  }
 0x127   : > { %2654 = vmatmul.mubr.bf16.gmra.mrb[112].mxu1 %v5537_v33  ;;  %3279 = vmatmul.mubr.bf16.gmra.mrb[112].mxu0 %v5538_v37  ;;  %v5563_v37 = vld [vmem:[%s5948_s28 + $0x424] ss:$16 sps:$4 sm:$0xff]  }
 0x128   : > { %2661 = vmatprep.mubr.bf16.mxu1 %v5539_v38  ;;  %4921 = vmatprep.mubr.msk.bf16.mxu0 %vm2170_vm0, %v5541_v41 }
 0x12a   : > { %v2447_v44 = vpop.f32.mrb[8].mxu1  ;;  %v3072_v45 = vpop.f32.mrb[8].mxu0 }
 0x12b   : > { %v2449_v46 = vpop.f32.mrb[9].mxu1  ;;  %v3073_v48 = vadd.f32 %v3072_v45, %v2447_v44  ;;  %v3074_v49 = vpop.f32.mrb[9].mxu0 }
 0x12c   : > { %v2450_v50 = vpop.f32.mrb[10].mxu1  ;;  %v3075_v53 = vpop.f32.mrb[10].mxu0 }
 0x12d   : > { %v2452_v54 = vpop.f32.mrb[11].mxu1  ;;  %3651 = vst [vmem:[#allocation2 + $0x20] sm:$0xff] %v3073_v48  ;;  %v3076_v56 = vadd.f32 %v3075_v53, %v2450_v50  ;;  %v3077_v57 = vpop.f32.mrb[11].mxu0  ;;  %v5567_v50 = vld [vmem:[%s5948_s28 + $0x420] ss:$16 sps:$4 sm:$0xff]  }
 0x12e   : > { %v5568_v54 = vld [vmem:[%s5948_s28 + $0x428] ss:$16 sps:$4 sm:$0xff]  }
 0x12f   : > { %2662 = vmatmul.mubr.bf16.gmra.mrb[116].mxu1 %v5543_v47  ;;  %3652 = vst [vmem:[#allocation2 + $0x28] sm:$0xff] %v3076_v56  ;;  %3287 = vmatmul.mubr.bf16.gmra.mrb[116].mxu0 %v5544_v51  ;;  %v6200_v56 = vld [vmem:[%s6512_s2] ss:$0 sm:$0xff] }
 0x130   : > { %2669 = vmatprep.mubr.bf16.mxu1 %v5545_v52  ;;  %4922 = vmatprep.mubr.msk.bf16.mxu0 %vm2170_vm0, %v5547_v55  ;;  %v5569_v55 = vld [vmem:[%s5948_s28 + $0x444] ss:$16 sps:$4 sm:$0xff]  }
 0x132   : > { %v2455_v58 = vpop.f32.mrb[12].mxu1  ;;  %v3080_v59 = vpop.f32.mrb[12].mxu0 }
 0x133   : > { %v2457_v60 = vpop.f32.mrb[13].mxu1  ;;  %v3081_v62 = vadd.f32 %v3080_v59, %v2455_v58  ;;  %v3082_v63 = vpop.f32.mrb[13].mxu0  ;;  %v5571_v59 = vld [vmem:[%s5948_s28 + $0x44c] ss:$16 sps:$4 sm:$0xff]  }
 0x134   : > { %v2458_v0 = vpop.f32.mrb[14].mxu1  ;;  %v3083_v3 = vpop.f32.mrb[14].mxu0 }
 0x135   : > { %v2460_v4 = vpop.f32.mrb[15].mxu1  ;;  %3653 = vst [vmem:[#allocation2 + $0x30] sm:$0xff] %v3081_v62  ;;  %v3084_v6 = vadd.f32 %v3083_v3, %v2458_v0  ;;  %v3085_v7 = vpop.f32.mrb[15].mxu0 }
 0x136   : > { %v3807_v8 = vld [vmem:[#allocation2 + $0x25] sm:$0xff] }
 0x137   : > { %2670 = vmatmul.mubr.bf16.gmra.mrb[120].mxu1 %v5549_v61  ;;  %v3812_v9 = vmax.f32 %v6153_v20, %v3807_v8  ;;  %3654 = vst [vmem:[#allocation2 + $0x38] sm:$0xff] %v3084_v6  ;;  %3295 = vmatmul.mubr.bf16.gmra.mrb[120].mxu0 %v5550_v1  ;;  %v5559_v20 = vld [vmem:[%s5948_s28 + $0x40c] ss:$16 sps:$4 sm:$0xff]   ;;  %v5573_v6 = vld [vmem:[%s5948_s28 + $0x440] ss:$16 sps:$4 sm:$0xff]  }
 0x138   : > { %2677 = vmatprep.mubr.bf16.mxu1 %v5551_v2  ;;  %4923 = vmatprep.mubr.msk.bf16.mxu0 %vm2170_vm0, %v5553_v5  ;;  %v5574_v7 = vld [vmem:[%s5948_s28 + $0x448] ss:$16 sps:$4 sm:$0xff]  }
 0x139   : > { %3817 = vst [vmem:[#allocation3] sm:$0xff] %v3812_v9 }
 0x13a   : > { %v2463_v10 = vpop.f32.mrb[16].mxu1  ;;  %v3088_v11 = vpop.f32.mrb[16].mxu0 }
 0x13b   : > { %v2465_v12 = vpop.f32.mrb[17].mxu1  ;;  %v3089_v14 = vadd.f32 %v3088_v11, %v2463_v10  ;;  %v3090_v15 = vpop.f32.mrb[17].mxu0 }
 0x13c   : > { %v2466_v16 = vpop.f32.mrb[18].mxu1  ;;  %v3808_v19 = vld [vmem:[#allocation2 + $0x2d] sm:$0xff]  ;;  %v3091_v21 = vpop.f32.mrb[18].mxu0 }
 0x13d   : > { %v2468_v22 = vpop.f32.mrb[19].mxu1  ;;  %v3813_v23 = vmax.f32 %v6158_v28, %v3808_v19  ;;  %3655 = vst [vmem:[#allocation2 + $0x40] sm:$0xff] %v3089_v14  ;;  %v3092_v24 = vadd.f32 %v3091_v21, %v2466_v16  ;;  %v3093_v25 = vpop.f32.mrb[19].mxu0  ;;  %v5577_v16 = vld [vmem:[%s5948_s28 + $0x46c] ss:$16 sps:$4 sm:$0xff]  }
 0x13e   : > { %v3809_v26 = vld [vmem:[#allocation2 + $0x35] sm:$0xff] }
 0x13f   : > { %2678 = vmatmul.mubr.bf16.gmra.mrb[124].mxu1 %v5555_v13  ;;  %3818 = vst [vmem:[#allocation3 + $0x8] sm:$0xff] %v3813_v23  ;;  %v3814_v27 = vmax.f32 %v6162_v34, %v3809_v26  ;;  %3656 = vst [vmem:[#allocation2 + $0x48] sm:$0xff] %v3092_v24  ;;  %3303 = vmatmul.mubr.bf16.gmra.mrb[124].mxu0 %v5556_v17  ;;  %v5565_v34 = vld [vmem:[%s5948_s28 + $0x42c] ss:$16 sps:$4 sm:$0xff]   ;;  %v5575_v13 = vld [vmem:[%s5948_s28 + $0x464] ss:$16 sps:$4 sm:$0xff]  }
 0x140   : > { %2685 = vmatprep.mubr.bf16.mxu1 %v5557_v18  ;;  %4924 = vmatprep.mubr.msk.bf16.mxu0 %vm2170_vm0, %v5559_v20  ;;  %v5579_v23 = vld [vmem:[%s5948_s28 + $0x460] ss:$16 sps:$4 sm:$0xff]  }
 0x141   : > { %3819 = vst [vmem:[#allocation3 + $0x10] sm:$0xff] %v3814_v27  ;;  %v5580_v27 = vld [vmem:[%s5948_s28 + $0x468] ss:$16 sps:$4 sm:$0xff]  }
 0x142   : > { %v2471_v29 = vpop.f32.mrb[20].mxu1  ;;  %v3096_v28 = vpop.f32.mrb[20].mxu0 }
 0x143   : > { %v2473_v30 = vpop.f32.mrb[21].mxu1  ;;  %v3097_v32 = vadd.f32 %v3096_v28, %v2471_v29  ;;  %v3098_v33 = vpop.f32.mrb[21].mxu0  ;;  %v5581_v29 = vld [vmem:[%s5948_s28 + $0x484] ss:$16 sps:$4 sm:$0xff]  }
 0x144   : > { %v2474_v35 = vpop.f32.mrb[22].mxu1  ;;  %v3810_v38 = vld [vmem:[#allocation2 + $0x3d] sm:$0xff]  ;;  %v3099_v39 = vpop.f32.mrb[22].mxu0 }
 0x145   : > { %v2476_v40 = vpop.f32.mrb[23].mxu1  ;;  %v3815_v41 = vmax.f32 %v6167_v42, %v3810_v38  ;;  %3657 = vst [vmem:[#allocation2 + $0x50] sm:$0xff] %v3097_v32  ;;  %v3100_v43 = vadd.f32 %v3099_v39, %v2474_v35  ;;  %v3101_v44 = vpop.f32.mrb[23].mxu0  ;;  %v5583_v33 = vld [vmem:[%s5948_s28 + $0x48c] ss:$16 sps:$4 sm:$0xff]  }
 0x146   : > { %v3822_v45 = vld [vmem:[#allocation3] ss:$2 sm:$0xff]  ;;  %v3826_v46 = vld [vmem:[#allocation3 + $0x1] ss:$2 sm:$0xff] }
 0x147   : > { %2686 = vmatmul.mubr.bf16.gmra.mrb[128].mxu1 %v5561_v31  ;;  %3820 = vst [vmem:[#allocation3 + $0x18] sm:$0xff] %v3815_v41  ;;  %3658 = vst [vmem:[#allocation2 + $0x58] sm:$0xff] %v3100_v43  ;;  %3311 = vmatmul.mubr.bf16.gmra.mrb[128].mxu0 %v5562_v36  ;;  %v3829_v42 = vmax.f32 %v3822_v45, %v3826_v46  ;;  %v5585_v44 = vld [vmem:[%s5948_s28 + $0x480] ss:$16 sps:$4 sm:$0xff]  }
 0x148   : > { %2693 = vmatprep.mubr.bf16.mxu1 %v5563_v37  ;;  %4925 = vmatprep.mubr.msk.bf16.mxu0 %vm2170_vm0, %v5565_v34 }
 0x149   : > { %v3831_v0 = vadd.f32 %v6200_v56, %v3829_v42 }
 0x14a   : > { %v2479_v47 = vpop.f32.mrb[24].mxu1  ;;  %v3104_v48 = vpop.f32.mrb[24].mxu0 }
 0x14b   : > { %v2481_v49 = vpop.f32.mrb[25].mxu1  ;;  %v3105_v51 = vadd.f32 %v3104_v48, %v2479_v47  ;;  %v3106_v52 = vpop.f32.mrb[25].mxu0  ;;  %v3833_v8 = vmax.f32 %v3831_v0, 0.0  ;;  %v5586_v48 = vld [vmem:[%s5948_s28 + $0x488] ss:$16 sps:$4 sm:$0xff]  }
 0x14c   : > { %v2482_v53 = vpop.f32.mrb[26].mxu1  ;;  %v3107_v57 = vpop.f32.mrb[26].mxu0  ;;  %v3845_v28 = vld [vmem:[#allocation2 + $0x4a] sm:$0xff]  ;;  %v5587_v49 = vld [vmem:[%s5948_s28 + $0x4a4] ss:$16 sps:$4 sm:$0xff]  }
 0x14d   : > { %v2484_v58 = vpop.f32.mrb[27].mxu1  ;;  %3659 = vst [vmem:[#allocation2 + $0x60] sm:$0xff] %v3105_v51  ;;  %v3108_v60 = vadd.f32 %v3107_v57, %v2482_v53  ;;  %v3109_v61 = vpop.f32.mrb[27].mxu0  ;;  %v5589_v53 = vld [vmem:[%s5948_s28 + $0x4ac] ss:$16 sps:$4 sm:$0xff]  }
 0x14e   : > { %v3824_v62 = vld [vmem:[#allocation3 + $0x10] ss:$2 sm:$0xff]  ;;  %v3828_v63 = vld [vmem:[#allocation3 + $0x11] ss:$2 sm:$0xff] }
 0x14f   : > { %2694 = vmatmul.mubr.bf16.gmra.mrb[132].mxu1 %v5567_v50  ;;  %v3830_v1 = vmax.f32 %v3824_v62, %v3828_v63  ;;  %3660 = vst [vmem:[#allocation2 + $0x68] sm:$0xff] %v3108_v60  ;;  %3319 = vmatmul.mubr.bf16.gmra.mrb[132].mxu0 %v5568_v54  ;;  %v3846_v38 = vld [vmem:[#allocation2 + $0x52] sm:$0xff] }
 0x150   : > { %2701 = vmatprep.mubr.bf16.mxu1 %v5569_v55  ;;  %4926 = vmatprep.mubr.msk.bf16.mxu0 %vm2170_vm0, %v5571_v59  ;;  %v5591_v62 = vld [vmem:[%s5948_s28 + $0x4a0] ss:$16 sps:$4 sm:$0xff]   ;;  %v5592_v63 = vld [vmem:[%s5948_s28 + $0x4a8] ss:$16 sps:$4 sm:$0xff]  }
 0x151   : > { %v3832_v2 = vadd.f32 %v6200_v56, %v3830_v1 }
 0x152   : > { %v2487_v3 = vpop.f32.mrb[28].mxu1  ;;  %v3112_v4 = vpop.f32.mrb[28].mxu0 }
 0x153   : > { %v2489_v5 = vpop.f32.mrb[29].mxu1  ;;  %v3834_v9 = vmax.f32 %v3832_v2, 0.0  ;;  %v3113_v10 = vadd.f32 %v3112_v4, %v2487_v3  ;;  %v3114_v11 = vpop.f32.mrb[29].mxu0 }
 0x154   : > { %v2490_v12 = vpop.f32.mrb[30].mxu1  ;;  %v3115_v14 = vpop.f32.mrb[30].mxu0  ;;  %v3847_v50 = vld [vmem:[#allocation2 + $0x5a] sm:$0xff] }
 0x155   : > { %v2492_v15 = vpop.f32.mrb[31].mxu1  ;;  %v5067_v17 = vpack.c.bf16 %v3834_v9, %v3833_v8  ;;  %3661 = vst [vmem:[#allocation2 + $0x70] sm:$0xff] %v3113_v10  ;;  %v3116_v18 = vadd.f32 %v3115_v14, %v2490_v12  ;;  %v3117_v19 = vpop.f32.mrb[31].mxu0  ;;  %v5595_v8 = vld [vmem:[%s5948_s28 + $0x4cc] ss:$16 sps:$4 sm:$0xff]  }
 0x156   : > { %v3848_v58 = vld [vmem:[#allocation2 + $0x62] sm:$0xff] }
 0x157   : > { %2702 = vmatmul.mubr.bf16.gmra.mrb[136].mxu1 %v5573_v6  ;;  %5068 = vst [vmem:[%s6213_s21] sm:$0xff] %v5067_v17   ;;  %3662 = vst [vmem:[#allocation2 + $0x78] sm:$0xff] %v3116_v18  ;;  %3327 = vmatmul.mubr.bf16.gmra.mrb[136].mxu0 %v5574_v7  ;;  %v5593_v7 = vld [vmem:[%s5948_s28 + $0x4c4] ss:$16 sps:$4 sm:$0xff]  }
 0x158   : > { %2709 = vmatprep.mubr.bf16.mxu1 %v5575_v13  ;;  %4927 = vmatprep.mubr.msk.bf16.mxu0 %vm2170_vm0, %v5577_v16 }
 0x15a   : > { %v2495_v21 = vpop.f32.mrb[32].mxu1  ;;  %v3120_v22 = vpop.f32.mrb[32].mxu0 }
 0x15b   : > { %v2497_v20 = vpop.f32.mrb[33].mxu1  ;;  %v3121_v24 = vadd.f32 %v3120_v22, %v2495_v21  ;;  %v3122_v25 = vpop.f32.mrb[33].mxu0  ;;  %v5597_v22 = vld [vmem:[%s5948_s28 + $0x4c0] ss:$16 sps:$4 sm:$0xff]  }
 0x15c   : > { %v2498_v26 = vpop.f32.mrb[34].mxu1  ;;  %v3850_v30 = vld [vmem:[#allocation2 + $0x6f] sm:$0xff]  ;;  %v3123_v31 = vpop.f32.mrb[34].mxu0 }
 0x15d   : > { %v2500_v32 = vpop.f32.mrb[35].mxu1  ;;  %v3855_v35 = vmax.f32 %v3845_v28, %v3850_v30  ;;  %3663 = vst [vmem:[#allocation2 + $0x80] sm:$0xff] %v3121_v24  ;;  %v3124_v36 = vadd.f32 %v3123_v31, %v2498_v26  ;;  %v3125_v37 = vpop.f32.mrb[35].mxu0  ;;  %v5598_v26 = vld [vmem:[%s5948_s28 + $0x4c8] ss:$16 sps:$4 sm:$0xff]  }
 0x15e   : > { %v3851_v39 = vld [vmem:[#allocation2 + $0x77] sm:$0xff] }
 0x15f   : > { %2710 = vmatmul.mubr.bf16.gmra.mrb[140].mxu1 %v5579_v23  ;;  %3860 = vst [vmem:[#allocation3] sm:$0xff] %v3855_v35  ;;  %v3856_v40 = vmax.f32 %v3846_v38, %v3851_v39  ;;  %3664 = vst [vmem:[#allocation2 + $0x88] sm:$0xff] %v3124_v36  ;;  %3335 = vmatmul.mubr.bf16.gmra.mrb[140].mxu0 %v5580_v27  ;;  %v5599_v27 = vld [vmem:[%s5948_s28 + $0x4e4] ss:$16 sps:$4 sm:$0xff]   ;;  %v5601_v30 = vld [vmem:[%s5948_s28 + $0x4ec] ss:$16 sps:$4 sm:$0xff]  }
 0x160   : > { %2717 = vmatprep.mubr.bf16.mxu1 %v5581_v29  ;;  %4928 = vmatprep.mubr.msk.bf16.mxu0 %vm2170_vm0, %v5583_v33 }
 0x161   : > { %3861 = vst [vmem:[#allocation3 + $0x8] sm:$0xff] %v3856_v40  ;;  %v5603_v40 = vld [vmem:[%s5948_s28 + $0x4e0] ss:$16 sps:$4 sm:$0xff]  }
 0x162   : > { %v2503_v34 = vpop.f32.mrb[36].mxu1  ;;  %v3128_v41 = vpop.f32.mrb[36].mxu0 }
 0x163   : > { %v2505_v43 = vpop.f32.mrb[37].mxu1  ;;  %v3129_v45 = vadd.f32 %v3128_v41, %v2503_v34  ;;  %v3130_v46 = vpop.f32.mrb[37].mxu0 }
 0x164   : > { %v2506_v47 = vpop.f32.mrb[38].mxu1  ;;  %v3852_v42 = vld [vmem:[#allocation2 + $0x7f] sm:$0xff]  ;;  %v3131_v51 = vpop.f32.mrb[38].mxu0 }
 0x165   : > { %v2508_v52 = vpop.f32.mrb[39].mxu1  ;;  %v3857_v54 = vmax.f32 %v3847_v50, %v3852_v42  ;;  %3665 = vst [vmem:[#allocation2 + $0x90] sm:$0xff] %v3129_v45  ;;  %v3132_v55 = vadd.f32 %v3131_v51, %v2506_v47  ;;  %v3133_v57 = vpop.f32.mrb[39].mxu0  ;;  %v5605_v45 = vld [vmem:[%s5948_s28 + $0x504] ss:$16 sps:$4 sm:$0xff]  }
 0x166   : > { %v3853_v59 = vld [vmem:[#allocation2 + $0x87] sm:$0xff] }
 0x167   : > { %2718 = vmatmul.mubr.bf16.gmra.mrb[144].mxu1 %v5585_v44  ;;  %3862 = vst [vmem:[#allocation3 + $0x10] sm:$0xff] %v3857_v54  ;;  %v3858_v60 = vmax.f32 %v3848_v58, %v3853_v59  ;;  %3666 = vst [vmem:[#allocation2 + $0x98] sm:$0xff] %v3132_v55  ;;  %3343 = vmatmul.mubr.bf16.gmra.mrb[144].mxu0 %v5586_v48  ;;  %v5604_v44 = vld [vmem:[%s5948_s28 + $0x4e8] ss:$16 sps:$4 sm:$0xff]   ;;  %v5607_v48 = vld [vmem:[%s5948_s28 + $0x50c] ss:$16 sps:$4 sm:$0xff]  }
 0x168   : > { %2725 = vmatprep.mubr.bf16.mxu1 %v5587_v49  ;;  %4929 = vmatprep.mubr.msk.bf16.mxu0 %vm2170_vm0, %v5589_v53  ;;  %v3865_v0 = vld [vmem:[#allocation3] ss:$2 sm:$0xff]  ;;  %v3867_v1 = vld [vmem:[#allocation3 + $0x1] ss:$2 sm:$0xff] }
 0x169   : > { %3863 = vst [vmem:[#allocation3 + $0x18] sm:$0xff] %v3858_v60  ;;  %v3869_v11 = vmax.f32 %v3865_v0, %v3867_v1  ;;  %v5609_v53 = vld [vmem:[%s5948_s28 + $0x500] ss:$16 sps:$4 sm:$0xff]   ;;  %v5610_v58 = vld [vmem:[%s5948_s28 + $0x508] ss:$16 sps:$4 sm:$0xff]  }
 0x16a   : > { %v2511_v61 = vpop.f32.mrb[40].mxu1  ;;  %v3136_v2 = vpop.f32.mrb[40].mxu0  ;;  %v5611_v59 = vld [vmem:[%s5948_s28 + $0x524] ss:$16 sps:$4 sm:$0xff]   ;;  %v5613_v0 = vld [vmem:[%s5948_s28 + $0x52c] ss:$16 sps:$4 sm:$0xff]  }
 0x16b   : > { %v2513_v3 = vpop.f32.mrb[41].mxu1  ;;  %v3137_v4 = vadd.f32 %v3136_v2, %v2511_v61  ;;  %v3138_v5 = vpop.f32.mrb[41].mxu0  ;;  %v3871_v16 = vadd.f32 %v6200_v56, %v3869_v11 }
 0x16c   : > { %v2514_v6 = vpop.f32.mrb[42].mxu1  ;;  %v3139_v9 = vpop.f32.mrb[42].mxu0 }
 0x16d   : > { %v2516_v10 = vpop.f32.mrb[43].mxu1  ;;  %3667 = vst [vmem:[#allocation2 + $0xa0] sm:$0xff] %v3137_v4  ;;  %v3140_v12 = vadd.f32 %v3139_v9, %v2514_v6  ;;  %v3141_v13 = vpop.f32.mrb[43].mxu0  ;;  %v3873_v31 = vmax.f32 %v3871_v16, 0.0 }
 0x16e   : > { %v3886_v60 = vld [vmem:[#allocation2 + $0x94] sm:$0xff]  ;;  %v5615_v10 = vld [vmem:[%s5948_s28 + $0x520] ss:$16 sps:$4 sm:$0xff]  }
 0x16f   : > { %2726 = vmatmul.mubr.bf16.gmra.mrb[148].mxu1 %v5591_v62  ;;  %3668 = vst [vmem:[#allocation2 + $0xa8] sm:$0xff] %v3140_v12  ;;  %3351 = vmatmul.mubr.bf16.gmra.mrb[148].mxu0 %v5592_v63 }
 0x170   : > { %2733 = vmatprep.mubr.bf16.mxu1 %v5593_v7  ;;  %v3866_v14 = vld [vmem:[#allocation3 + $0x10] ss:$2 sm:$0xff]  ;;  %v3868_v15 = vld [vmem:[#allocation3 + $0x11] ss:$2 sm:$0xff]  ;;  %4930 = vmatprep.mubr.msk.bf16.mxu0 %vm2170_vm0, %v5595_v8 }
 0x171   : > { %v3870_v17 = vmax.f32 %v3866_v14, %v3868_v15  ;;  %v5616_v14 = vld [vmem:[%s5948_s28 + $0x528] ss:$16 sps:$4 sm:$0xff]   ;;  %v5617_v15 = vld [vmem:[%s5948_s28 + $0x544] ss:$16 sps:$4 sm:$0xff]  }
 0x172   : > { %v2519_v18 = vpop.f32.mrb[44].mxu1  ;;  %v3144_v19 = vpop.f32.mrb[44].mxu0 }
 0x173   : > { %v2521_v21 = vpop.f32.mrb[45].mxu1  ;;  %v3872_v20 = vadd.f32 %v6200_v56, %v3870_v17  ;;  %v3145_v23 = vadd.f32 %v3144_v19, %v2519_v18  ;;  %v3146_v24 = vpop.f32.mrb[45].mxu0 }
 0x174   : > { %v2522_v25 = vpop.f32.mrb[46].mxu1  ;;  %v3147_v29 = vpop.f32.mrb[46].mxu0  ;;  %v3887_v4 = vld [vmem:[#allocation2 + $0x9c] sm:$0xff] }
 0x175   : > { %v2524_v28 = vpop.f32.mrb[47].mxu1  ;;  %v3874_v32 = vmax.f32 %v3872_v20, 0.0  ;;  %3669 = vst [vmem:[#allocation2 + $0xb0] sm:$0xff] %v3145_v23  ;;  %v3148_v33 = vadd.f32 %v3147_v29, %v2522_v25  ;;  %v3149_v35 = vpop.f32.mrb[47].mxu0  ;;  %v5619_v21 = vld [vmem:[%s5948_s28 + $0x54c] ss:$16 sps:$4 sm:$0xff]  }
 0x176   : > { %v3888_v16 = vld [vmem:[#allocation2 + $0xa4] sm:$0xff]  ;;  %v5621_v29 = vld [vmem:[%s5948_s28 + $0x540] ss:$16 sps:$4 sm:$0xff]  }
 0x177   : > { %2734 = vmatmul.mubr.bf16.gmra.mrb[152].mxu1 %v5597_v22  ;;  %v5072_v36 = vpack.c.bf16 %v3874_v32, %v3873_v31  ;;  %3670 = vst [vmem:[#allocation2 + $0xb8] sm:$0xff] %v3148_v33  ;;  %3359 = vmatmul.mubr.bf16.gmra.mrb[152].mxu0 %v5598_v26 }
 0x178   : > { %2741 = vmatprep.mubr.bf16.mxu1 %v5599_v27  ;;  %4931 = vmatprep.mubr.msk.bf16.mxu0 %vm2170_vm0, %v5601_v30 }
 0x179   : > { %5144 = vst [vmem:[%s6213_s21 + $0x8] sm:$0xff] %v5072_v36  }
 0x17a   : > { %v2527_v37 = vpop.f32.mrb[48].mxu1  ;;  %v3152_v38 = vpop.f32.mrb[48].mxu0 }
 0x17b   : > { %v2529_v39 = vpop.f32.mrb[49].mxu1  ;;  %v3153_v34 = vadd.f32 %v3152_v38, %v2527_v37  ;;  %v3154_v41 = vpop.f32.mrb[49].mxu0  ;;  %v5622_v37 = vld [vmem:[%s5948_s28 + $0x548] ss:$16 sps:$4 sm:$0xff]   ;;  %v5623_v38 = vld [vmem:[%s5948_s28 + $0x564] ss:$16 sps:$4 sm:$0xff]  }
 0x17c   : > { %v2530_v43 = vpop.f32.mrb[50].mxu1  ;;  %v3155_v46 = vpop.f32.mrb[50].mxu0  ;;  %v3889_v22 = vld [vmem:[#allocation2 + $0xac] sm:$0xff] }
 0x17d   : > { %v2532_v47 = vpop.f32.mrb[51].mxu1  ;;  %3671 = vst [vmem:[#allocation2 + $0xc0] sm:$0xff] %v3153_v34  ;;  %v3156_v49 = vadd.f32 %v3155_v46, %v2530_v43  ;;  %v3157_v50 = vpop.f32.mrb[51].mxu0  ;;  %v5625_v34 = vld [vmem:[%s5948_s28 + $0x56c] ss:$16 sps:$4 sm:$0xff]  }
 0x17f   : > { %2742 = vmatmul.mubr.bf16.gmra.mrb[156].mxu1 %v5603_v40  ;;  %3672 = vst [vmem:[#allocation2 + $0xc8] sm:$0xff] %v3156_v49  ;;  %3367 = vmatmul.mubr.bf16.gmra.mrb[156].mxu0 %v5604_v44 }
 0x180   : > { %2749 = vmatprep.mubr.bf16.mxu1 %v5605_v45  ;;  %4932 = vmatprep.mubr.msk.bf16.mxu0 %vm2170_vm0, %v5607_v48 }
 0x182   : > { %v2535_v42 = vpop.f32.mrb[52].mxu1  ;;  %v3160_v51 = vpop.f32.mrb[52].mxu0 }
 0x183   : > { %v2537_v52 = vpop.f32.mrb[53].mxu1  ;;  %v3161_v54 = vadd.f32 %v3160_v51, %v2535_v42  ;;  %v3162_v55 = vpop.f32.mrb[53].mxu0  ;;  %v5627_v51 = vld [vmem:[%s5948_s28 + $0x560] ss:$16 sps:$4 sm:$0xff]  }
 0x184   : > { %v2538_v57 = vpop.f32.mrb[54].mxu1  ;;  %v3891_v61 = vld [vmem:[#allocation2 + $0xb9] sm:$0xff]  ;;  %v3163_v62 = vpop.f32.mrb[54].mxu0 }
 0x185   : > { %v2540_v63 = vpop.f32.mrb[55].mxu1  ;;  %v3896_v1 = vmax.f32 %v3886_v60, %v3891_v61  ;;  %3673 = vst [vmem:[#allocation2 + $0xd0] sm:$0xff] %v3161_v54  ;;  %v3164_v2 = vadd.f32 %v3163_v62, %v2538_v57  ;;  %v3165_v3 = vpop.f32.mrb[55].mxu0  ;;  %v5628_v57 = vld [vmem:[%s5948_s28 + $0x568] ss:$16 sps:$4 sm:$0xff]  }
 0x186   : > { %v3892_v5 = vld [vmem:[#allocation2 + $0xc1] sm:$0xff]  ;;  %v5631_v61 = vld [vmem:[%s5948_s28 + $0x58c] ss:$16 sps:$4 sm:$0xff]  }
 0x187   : > { %2750 = vmatmul.mubr.bf16.gmra.mrb[160].mxu1 %v5609_v53  ;;  %3901 = vst [vmem:[#allocation3] sm:$0xff] %v3896_v1  ;;  %v3897_v6 = vmax.f32 %v3887_v4, %v3892_v5  ;;  %3674 = vst [vmem:[#allocation2 + $0xd8] sm:$0xff] %v3164_v2  ;;  %3375 = vmatmul.mubr.bf16.gmra.mrb[160].mxu0 %v5610_v58  ;;  %v5629_v58 = vld [vmem:[%s5948_s28 + $0x584] ss:$16 sps:$4 sm:$0xff]  }
 0x188   : > { %2757 = vmatprep.mubr.bf16.mxu1 %v5611_v59  ;;  %4933 = vmatprep.mubr.msk.bf16.mxu0 %vm2170_vm0, %v5613_v0 }
 0x189   : > { %3902 = vst [vmem:[#allocation3 + $0x8] sm:$0xff] %v3897_v6  ;;  %v5633_v6 = vld [vmem:[%s5948_s28 + $0x580] ss:$16 sps:$4 sm:$0xff]  }
 0x18a   : > { %v2543_v7 = vpop.f32.mrb[56].mxu1  ;;  %v3168_v8 = vpop.f32.mrb[56].mxu0 }
 0x18b   : > { %v2545_v9 = vpop.f32.mrb[57].mxu1  ;;  %v3169_v11 = vadd.f32 %v3168_v8, %v2543_v7  ;;  %v3170_v12 = vpop.f32.mrb[57].mxu0 }
 0x18c   : > { %v2546_v13 = vpop.f32.mrb[58].mxu1  ;;  %v3893_v17 = vld [vmem:[#allocation2 + $0xc9] sm:$0xff]  ;;  %v3171_v18 = vpop.f32.mrb[58].mxu0 }
 0x18d   : > { %v2548_v19 = vpop.f32.mrb[59].mxu1  ;;  %v3898_v20 = vmax.f32 %v3888_v16, %v3893_v17  ;;  %3675 = vst [vmem:[#allocation2 + $0xe0] sm:$0xff] %v3169_v11  ;;  %v3172_v23 = vadd.f32 %v3171_v18, %v2546_v13  ;;  %v3173_v24 = vpop.f32.mrb[59].mxu0  ;;  %v5635_v11 = vld [vmem:[%s5948_s28 + $0x5a4] ss:$16 sps:$4 sm:$0xff]  }
 0x18e   : > { %v3894_v25 = vld [vmem:[#allocation2 + $0xd1] sm:$0xff] }
 0x18f   : > { %2758 = vmatmul.mubr.bf16.gmra.mrb[164].mxu1 %v5615_v10  ;;  %3903 = vst [vmem:[#allocation3 + $0x10] sm:$0xff] %v3898_v20  ;;  %v3899_v26 = vmax.f32 %v3889_v22, %v3894_v25  ;;  %3676 = vst [vmem:[#allocation2 + $0xe8] sm:$0xff] %v3172_v23  ;;  %3383 = vmatmul.mubr.bf16.gmra.mrb[164].mxu0 %v5616_v14  ;;  %v5634_v10 = vld [vmem:[%s5948_s28 + $0x588] ss:$16 sps:$4 sm:$0xff]   ;;  %v5637_v14 = vld [vmem:[%s5948_s28 + $0x5ac] ss:$16 sps:$4 sm:$0xff]  }
 0x190   : > { %2765 = vmatprep.mubr.bf16.mxu1 %v5617_v15  ;;  %4934 = vmatprep.mubr.msk.bf16.mxu0 %vm2170_vm0, %v5619_v21  ;;  %v3906_v28 = vld [vmem:[#allocation3] ss:$2 sm:$0xff]  ;;  %v3908_v30 = vld [vmem:[#allocation3 + $0x1] ss:$2 sm:$0xff] }
 0x191   : > { %3904 = vst [vmem:[#allocation3 + $0x18] sm:$0xff] %v3899_v26  ;;  %v3910_v41 = vmax.f32 %v3906_v28, %v3908_v30  ;;  %v5639_v23 = vld [vmem:[%s5948_s28 + $0x5a0] ss:$16 sps:$4 sm:$0xff]  }
 0x192   : > { %v2551_v27 = vpop.f32.mrb[60].mxu1  ;;  %v3176_v31 = vpop.f32.mrb[60].mxu0 }
 0x193   : > { %v2553_v32 = vpop.f32.mrb[61].mxu1  ;;  %v3177_v33 = vadd.f32 %v3176_v31, %v2551_v27  ;;  %v3178_v35 = vpop.f32.mrb[61].mxu0  ;;  %v3912_v47 = vadd.f32 %v6200_v56, %v3910_v41  ;;  %v5640_v27 = vld [vmem:[%s5948_s28 + $0x5a8] ss:$16 sps:$4 sm:$0xff]   ;;  %v5645_v41 = vld [vmem:[%s5948_s28 + $0x5c0] ss:$16 sps:$4 sm:$0xff]  }
 0x194   : > { %v2554_v36 = vpop.f32.mrb[62].mxu1  ;;  %v3179_v39 = vpop.f32.mrb[62].mxu0  ;;  %v3927_v17 = vld [vmem:[#allocation2 + $0xde] sm:$0xff] }
 0x195   : > { %v2556_v40 = vpop.f32.mrb[63].mxu1  ;;  %3677 = vst [vmem:[#allocation2 + $0xf0] sm:$0xff] %v3177_v33  ;;  %v3180_v43 = vadd.f32 %v3179_v39, %v2554_v36  ;;  %v3181_v44 = vpop.f32.mrb[63].mxu0  ;;  %v3914_v62 = vmax.f32 %v3912_v47, 0.0  ;;  %v5643_v33 = vld [vmem:[%s5948_s28 + $0x5cc] ss:$16 sps:$4 sm:$0xff]  }
 0x196   : > { %v3928_v28 = vld [vmem:[#allocation2 + $0xe6] sm:$0xff] }
 0x197   : > { %2766 = vmatmul.mubr.bf16.gmra.mrb[168].mxu1 %v5621_v29  ;;  %3678 = vst [vmem:[#allocation2 + $0xf8] sm:$0xff] %v3180_v43  ;;  %3391 = vmatmul.mubr.bf16.gmra.mrb[168].mxu0 %v5622_v37  ;;  %v5641_v29 = vld [vmem:[%s5948_s28 + $0x5c4] ss:$16 sps:$4 sm:$0xff]  }
 0x198   : > { %2773 = vmatprep.mubr.bf16.mxu1 %v5623_v38  ;;  %v3907_v45 = vld [vmem:[#allocation3 + $0x10] ss:$2 sm:$0xff]  ;;  %v3909_v46 = vld [vmem:[#allocation3 + $0x11] ss:$2 sm:$0xff]  ;;  %4935 = vmatprep.mubr.msk.bf16.mxu0 %vm2170_vm0, %v5625_v34 }
 0x199   : > { %v3911_v48 = vmax.f32 %v3907_v45, %v3909_v46  ;;  %v5646_v45 = vld [vmem:[%s5948_s28 + $0x5c8] ss:$16 sps:$4 sm:$0xff]   ;;  %v5647_v46 = vld [vmem:[%s5948_s28 + $0x5e4] ss:$16 sps:$4 sm:$0xff]  }
 0x19a   : > { %v2559_v49 = vpop.f32.mrb[64].mxu1  ;;  %v3184_v50 = vpop.f32.mrb[64].mxu0 }
 0x19b   : > { %v2561_v42 = vpop.f32.mrb[65].mxu1  ;;  %v3913_v52 = vadd.f32 %v6200_v56, %v3911_v48  ;;  %v3185_v53 = vadd.f32 %v3184_v50, %v2559_v49  ;;  %v3186_v54 = vpop.f32.mrb[65].mxu0  ;;  %v5649_v50 = vld [vmem:[%s5948_s28 + $0x5ec] ss:$16 sps:$4 sm:$0xff]  }
 0x19c   : > { %v2562_v55 = vpop.f32.mrb[66].mxu1  ;;  %v3187_v59 = vpop.f32.mrb[66].mxu0  ;;  %v3929_v38 = vld [vmem:[#allocation2 + $0xee] sm:$0xff] }
 0x19d   : > { %v2564_v60 = vpop.f32.mrb[67].mxu1  ;;  %v3915_v63 = vmax.f32 %v3913_v52, 0.0  ;;  %3679 = vst [vmem:[#allocation2 + $0x100] sm:$0xff] %v3185_v53  ;;  %v3188_v0 = vadd.f32 %v3187_v59, %v2562_v55  ;;  %v3189_v1 = vpop.f32.mrb[67].mxu0 }
 0x19e   : > { %v3930_v42 = vld [vmem:[#allocation2 + $0xf6] sm:$0xff] }
 0x19f   : > { %2774 = vmatmul.mubr.bf16.gmra.mrb[172].mxu1 %v5627_v51  ;;  %v5077_v2 = vpack.c.bf16 %v3915_v63, %v3914_v62  ;;  %3680 = vst [vmem:[#allocation2 + $0x108] sm:$0xff] %v3188_v0  ;;  %3399 = vmatmul.mubr.bf16.gmra.mrb[172].mxu0 %v5628_v57  ;;  %v5651_v63 = vld [vmem:[%s5948_s28 + $0x5e0] ss:$16 sps:$4 sm:$0xff]  }
 0x1a0   : > { %2781 = vmatprep.mubr.bf16.mxu1 %v5629_v58  ;;  %4936 = vmatprep.mubr.msk.bf16.mxu0 %vm2170_vm0, %v5631_v61 }
 0x1a1   : > { %5145 = vst [vmem:[%s6213_s21 + $0x10] sm:$0xff] %v5077_v2  }
 0x1a2   : > { %v2567_v3 = vpop.f32.mrb[68].mxu1  ;;  %v3192_v4 = vpop.f32.mrb[68].mxu0 }
 0x1a3   : > { %v2569_v5 = vpop.f32.mrb[69].mxu1  ;;  %v3193_v7 = vadd.f32 %v3192_v4, %v2567_v3  ;;  %v3194_v8 = vpop.f32.mrb[69].mxu0  ;;  %v5652_v4 = vld [vmem:[%s5948_s28 + $0x5e8] ss:$16 sps:$4 sm:$0xff]  }
 0x1a4   : > { %v2570_v9 = vpop.f32.mrb[70].mxu1  ;;  %v3195_v12 = vpop.f32.mrb[70].mxu0  ;;  %v5653_v5 = vld [vmem:[%s5948_s28 + $0x604] ss:$16 sps:$4 sm:$0xff]   ;;  %v5655_v8 = vld [vmem:[%s5948_s28 + $0x60c] ss:$16 sps:$4 sm:$0xff]  }
 0x1a5   : > { %v2572_v13 = vpop.f32.mrb[71].mxu1  ;;  %3681 = vst [vmem:[#allocation2 + $0x110] sm:$0xff] %v3193_v7  ;;  %v3196_v15 = vadd.f32 %v3195_v12, %v2570_v9  ;;  %v3197_v16 = vpop.f32.mrb[71].mxu0 }
 0x1a6   : > { %v3932_v18 = vld [vmem:[#allocation2 + $0x103] sm:$0xff] }
 0x1a7   : > { %2782 = vmatmul.mubr.bf16.gmra.mrb[176].mxu1 %v5633_v6  ;;  %v3937_v19 = vmax.f32 %v3927_v17, %v3932_v18  ;;  %3682 = vst [vmem:[#allocation2 + $0x118] sm:$0xff] %v3196_v15  ;;  %3407 = vmatmul.mubr.bf16.gmra.mrb[176].mxu0 %v5634_v10 }
 0x1a8   : > { %2789 = vmatprep.mubr.bf16.mxu1 %v5635_v11  ;;  %4937 = vmatprep.mubr.msk.bf16.mxu0 %vm2170_vm0, %v5637_v14 }
 0x1a9   : > { %3942 = vst [vmem:[#allocation3] sm:$0xff] %v3937_v19  ;;  %v5657_v19 = vld [vmem:[%s5948_s28 + $0x600] ss:$16 sps:$4 sm:$0xff]  }
 0x1aa   : > { %v2575_v21 = vpop.f32.mrb[72].mxu1  ;;  %v3200_v22 = vpop.f32.mrb[72].mxu0 }
 0x1ab   : > { %v2577_v20 = vpop.f32.mrb[73].mxu1  ;;  %v3201_v24 = vadd.f32 %v3200_v22, %v2575_v21  ;;  %v3202_v25 = vpop.f32.mrb[73].mxu0  ;;  %v5658_v21 = vld [vmem:[%s5948_s28 + $0x608] ss:$16 sps:$4 sm:$0xff]  }
 0x1ac   : > { %v2578_v26 = vpop.f32.mrb[74].mxu1  ;;  %v3933_v30 = vld [vmem:[#allocation2 + $0x10b] sm:$0xff]  ;;  %v3203_v31 = vpop.f32.mrb[74].mxu0 }
 0x1ad   : > { %v2580_v32 = vpop.f32.mrb[75].mxu1  ;;  %v3938_v35 = vmax.f32 %v3928_v28, %v3933_v30  ;;  %3683 = vst [vmem:[#allocation2 + $0x120] sm:$0xff] %v3201_v24  ;;  %v6278_v36 = vadd.f32 %v3203_v31, %v2578_v26  ;;  %v3205_v37 = vpop.f32.mrb[75].mxu0  ;;  %v5659_v26 = vld [vmem:[%s5948_s28 + $0x624] ss:$16 sps:$4 sm:$0xff]  }
 0x1ae   : > { %v3934_v39 = vld [vmem:[#allocation2 + $0x113] sm:$0xff]  ;;  %v5661_v28 = vld [vmem:[%s5948_s28 + $0x62c] ss:$16 sps:$4 sm:$0xff]  }
 0x1af   : > { %2790 = vmatmul.mubr.bf16.gmra.mrb[180].mxu1 %v5639_v23  ;;  %3943 = vst [vmem:[#allocation3 + $0x8] sm:$0xff] %v3938_v35  ;;  %v3939_v40 = vmax.f32 %v3929_v38, %v3934_v39  ;;  %3415 = vmatmul.mubr.bf16.gmra.mrb[180].mxu0 %v5640_v27  ;;  %v5663_v38 = vld [vmem:[%s5948_s28 + $0x620] ss:$16 sps:$4 sm:$0xff]  }
 0x1b0   : > { %2797 = vmatprep.mubr.bf16.mxu1 %v5641_v29  ;;  %4938 = vmatprep.mubr.msk.bf16.mxu0 %vm2170_vm0, %v5643_v33 }
 0x1b1   : > { %3944 = vst [vmem:[#allocation3 + $0x10] sm:$0xff] %v3939_v40 }
 0x1b2   : > { %v2583_v34 = vpop.f32.mrb[76].mxu1  ;;  %v3208_v43 = vpop.f32.mrb[76].mxu0 }
 0x1b3   : > { %v2585_v44 = vpop.f32.mrb[77].mxu1  ;;  %v6284_v47 = vadd.f32 %v3208_v43, %v2583_v34  ;;  %v3210_v48 = vpop.f32.mrb[77].mxu0  ;;  %v5665_v43 = vld [vmem:[%s5948_s28 + $0x644] ss:$16 sps:$4 sm:$0xff]  }
 0x1b4   : > { %v2586_v49 = vpop.f32.mrb[78].mxu1  ;;  %v3935_v51 = vld [vmem:[#allocation2 + $0x11b] sm:$0xff]  ;;  %v3211_v52 = vpop.f32.mrb[78].mxu0 }
 0x1b5   : > { %v2588_v53 = vpop.f32.mrb[79].mxu1  ;;  %v3940_v54 = vmax.f32 %v3930_v42, %v3935_v51  ;;  %v6287_v55 = vadd.f32 %v3211_v52, %v2586_v49  ;;  %v3213_v57 = vpop.f32.mrb[79].mxu0  ;;  %v5667_v48 = vld [vmem:[%s5948_s28 + $0x64c] ss:$16 sps:$4 sm:$0xff]  }
 0x1b6   : > { %v3947_v58 = vld [vmem:[#allocation3] ss:$2 sm:$0xff]  ;;  %v3949_v59 = vld [vmem:[#allocation3 + $0x1] ss:$2 sm:$0xff] }
 0x1b7   : > { %2798 = vmatmul.mubr.bf16.gmra.mrb[184].mxu1 %v5645_v41  ;;  %3945 = vst [vmem:[#allocation3 + $0x18] sm:$0xff] %v3940_v54  ;;  %3423 = vmatmul.mubr.bf16.gmra.mrb[184].mxu0 %v5646_v45  ;;  %v3951_v0 = vmax.f32 %v3947_v58, %v3949_v59  ;;  %v5664_v41 = vld [vmem:[%s5948_s28 + $0x628] ss:$16 sps:$4 sm:$0xff]   ;;  %v5669_v57 = vld [vmem:[%s5948_s28 + $0x640] ss:$16 sps:$4 sm:$0xff]  }
 0x1b8   : > { %2805 = vmatprep.mubr.bf16.mxu1 %v5647_v46  ;;  %4939 = vmatprep.mubr.msk.bf16.mxu0 %vm2170_vm0, %v5649_v50 }
 0x1b9   : > { %v3953_v13 = vadd.f32 %v6200_v56, %v3951_v0 }
 0x1ba   : > { %v2591_v60 = vpop.f32.mrb[80].mxu1  ;;  %v3216_v61 = vpop.f32.mrb[80].mxu0 }
 0x1bb   : > { %v2593_v62 = vpop.f32.mrb[81].mxu1  ;;  %v6291_v1 = vadd.f32 %v3216_v61, %v2591_v60  ;;  %v3218_v2 = vpop.f32.mrb[81].mxu0  ;;  %v3955_v22 = vmax.f32 %v3953_v13, 0.0  ;;  %v5670_v61 = vld [vmem:[%s5948_s28 + $0x648] ss:$16 sps:$4 sm:$0xff]  }
 0x1bc   : > { %v2594_v3 = vpop.f32.mrb[82].mxu1  ;;  %v3219_v6 = vpop.f32.mrb[82].mxu0  ;;  %v5671_v62 = vld [vmem:[%s5948_s28 + $0x664] ss:$16 sps:$4 sm:$0xff]  }
 0x1bd   : > { %v2596_v7 = vpop.f32.mrb[83].mxu1  ;;  %v3220_v9 = vadd.f32 %v3219_v6, %v2594_v3  ;;  %v3221_v10 = vpop.f32.mrb[83].mxu0 }
 0x1be   : > { %v3948_v11 = vld [vmem:[#allocation3 + $0x10] ss:$2 sm:$0xff]  ;;  %v3950_v12 = vld [vmem:[#allocation3 + $0x11] ss:$2 sm:$0xff] }
 0x1bf   : > { %2806 = vmatmul.mubr.bf16.gmra.mrb[188].mxu1 %v5651_v63  ;;  %v3952_v14 = vmax.f32 %v3948_v11, %v3950_v12  ;;  %3688 = vst [vmem:[#allocation2 + $0x148] sm:$0xff] %v3220_v9  ;;  %3431 = vmatmul.mubr.bf16.gmra.mrb[188].mxu0 %v5652_v4  ;;  %v5675_v9 = vld [vmem:[%s5948_s28 + $0x660] ss:$16 sps:$4 sm:$0xff]   ;;  %v5676_v10 = vld [vmem:[%s5948_s28 + $0x668] ss:$16 sps:$4 sm:$0xff]  }
 0x1c0   : > { %2813 = vmatprep.mubr.bf16.mxu1 %v5653_v5  ;;  %4940 = vmatprep.mubr.msk.bf16.mxu0 %vm2170_vm0, %v5655_v8 }
 0x1c1   : > { %v3954_v15 = vadd.f32 %v6200_v56, %v3952_v14 }
 0x1c2   : > { %v2599_v16 = vpop.f32.mrb[84].mxu1  ;;  %v3224_v17 = vpop.f32.mrb[84].mxu0 }
 0x1c3   : > { %v2601_v18 = vpop.f32.mrb[85].mxu1  ;;  %v3956_v20 = vmax.f32 %v3954_v15, 0.0  ;;  %v3225_v23 = vadd.f32 %v3224_v17, %v2599_v16  ;;  %v3226_v24 = vpop.f32.mrb[85].mxu0  ;;  %v5677_v17 = vld [vmem:[%s5948_s28 + $0x684] ss:$16 sps:$4 sm:$0xff]  }
 0x1c4   : > { %v2602_v25 = vpop.f32.mrb[86].mxu1  ;;  %v3227_v27 = vpop.f32.mrb[86].mxu0 }
 0x1c5   : > { %v2604_v29 = vpop.f32.mrb[87].mxu1  ;;  %v5082_v30 = vpack.c.bf16 %v3956_v20, %v3955_v22  ;;  %3689 = vst [vmem:[#allocation2 + $0x150] sm:$0xff] %v3225_v23  ;;  %v3228_v31 = vadd.f32 %v3227_v27, %v2602_v25  ;;  %v3229_v32 = vpop.f32.mrb[87].mxu0 }
 0x1c7   : > { %2814 = vmatmul.mubr.bf16.gmra.mrb[192].mxu1 %v5657_v19  ;;  %5146 = vst [vmem:[%s6213_s21 + $0x18] sm:$0xff] %v5082_v30   ;;  %3690 = vst [vmem:[#allocation2 + $0x158] sm:$0xff] %v3228_v31  ;;  %3439 = vmatmul.mubr.bf16.gmra.mrb[192].mxu0 %v5658_v21  ;;  %v5681_v30 = vld [vmem:[%s5948_s28 + $0x680] ss:$16 sps:$4 sm:$0xff]  }
 0x1c8   : > { %2821 = vmatprep.mubr.bf16.mxu1 %v5659_v26  ;;  %4941 = vmatprep.mubr.msk.bf16.mxu0 %vm2170_vm0, %v5661_v28 }
 0x1ca   : > { %v2607_v33 = vpop.f32.mrb[88].mxu1  ;;  %v3232_v35 = vpop.f32.mrb[88].mxu0 }
 0x1cb   : > { %v2609_v37 = vpop.f32.mrb[89].mxu1  ;;  %v3233_v39 = vadd.f32 %v3232_v35, %v2607_v33  ;;  %v3234_v40 = vpop.f32.mrb[89].mxu0 }
 0x1cc   : > { %v2610_v34 = vpop.f32.mrb[90].mxu1  ;;  %v3973_v44 = vld [vmem:[#allocation2 + $0x14d] sm:$0xff]  ;;  %v3235_v45 = vpop.f32.mrb[90].mxu0  ;;  %v5682_v37 = vld [vmem:[%s5948_s28 + $0x688] ss:$16 sps:$4 sm:$0xff]  }
 0x1cd   : > { %v2612_v46 = vpop.f32.mrb[91].mxu1  ;;  %v3978_v49 = vmax.f32 %v6278_v36, %v3973_v44  ;;  %3691 = vst [vmem:[#allocation2 + $0x160] sm:$0xff] %v3233_v39  ;;  %v3236_v50 = vadd.f32 %v3235_v45, %v2610_v34  ;;  %v3237_v42 = vpop.f32.mrb[91].mxu0  ;;  %v5685_v34 = vld [vmem:[%s5948_s28 + $0x6ac] ss:$16 sps:$4 sm:$0xff]  }
 0x1ce   : > { %v3974_v51 = vld [vmem:[#allocation2 + $0x155] sm:$0xff] }
 0x1cf   : > { %2822 = vmatmul.mubr.bf16.gmra.mrb[196].mxu1 %v5663_v38  ;;  %3983 = vst [vmem:[#allocation3] sm:$0xff] %v3978_v49  ;;  %v3979_v52 = vmax.f32 %v6284_v47, %v3974_v51  ;;  %3692 = vst [vmem:[#allocation2 + $0x168] sm:$0xff] %v3236_v50  ;;  %3447 = vmatmul.mubr.bf16.gmra.mrb[196].mxu0 %v5664_v41  ;;  %v5673_v47 = vld [vmem:[%s5948_s28 + $0x66c] ss:$16 sps:$4 sm:$0xff]   ;;  %v5683_v38 = vld [vmem:[%s5948_s28 + $0x6a4] ss:$16 sps:$4 sm:$0xff]  }
 0x1d0   : > { %2829 = vmatprep.mubr.bf16.mxu1 %v5665_v43  ;;  %4942 = vmatprep.mubr.msk.bf16.mxu0 %vm2170_vm0, %v5667_v48  ;;  %v5687_v50 = vld [vmem:[%s5948_s28 + $0x6a0] ss:$16 sps:$4 sm:$0xff]  }
 0x1d1   : > { %3984 = vst [vmem:[#allocation3 + $0x8] sm:$0xff] %v3979_v52 }
 0x1d2   : > { %v2615_v53 = vpop.f32.mrb[92].mxu1  ;;  %v3240_v36 = vpop.f32.mrb[92].mxu0 }
 0x1d3   : > { %v2617_v54 = vpop.f32.mrb[93].mxu1  ;;  %v3241_v58 = vadd.f32 %v3240_v36, %v2615_v53  ;;  %v3242_v59 = vpop.f32.mrb[93].mxu0  ;;  %v5688_v53 = vld [vmem:[%s5948_s28 + $0x6a8] ss:$16 sps:$4 sm:$0xff]   ;;  %v5689_v36 = vld [vmem:[%s5948_s28 + $0x6c4] ss:$16 sps:$4 sm:$0xff]  }
 0x1d4   : > { %v2618_v60 = vpop.f32.mrb[94].mxu1  ;;  %v3975_v63 = vld [vmem:[#allocation2 + $0x15d] sm:$0xff]  ;;  %v3243_v0 = vpop.f32.mrb[94].mxu0 }
 0x1d5   : > { %v2620_v2 = vpop.f32.mrb[95].mxu1  ;;  %v3980_v3 = vmax.f32 %v6287_v55, %v3975_v63  ;;  %3693 = vst [vmem:[#allocation2 + $0x170] sm:$0xff] %v3241_v58  ;;  %v3244_v4 = vadd.f32 %v3243_v0, %v2618_v60  ;;  %v3245_v5 = vpop.f32.mrb[95].mxu0  ;;  %v5691_v58 = vld [vmem:[%s5948_s28 + $0x6cc] ss:$16 sps:$4 sm:$0xff]  }
 0x1d6   : > { %v3976_v6 = vld [vmem:[#allocation2 + $0x165] sm:$0xff] }
 0x1d7   : > { %2830 = vmatmul.mubr.bf16.gmra.mrb[200].mxu1 %v5669_v57  ;;  %3985 = vst [vmem:[#allocation3 + $0x10] sm:$0xff] %v3980_v3  ;;  %v3981_v7 = vmax.f32 %v6291_v1, %v3976_v6  ;;  %3694 = vst [vmem:[#allocation2 + $0x178] sm:$0xff] %v3244_v4  ;;  %3455 = vmatmul.mubr.bf16.gmra.mrb[200].mxu0 %v5670_v61  ;;  %v5679_v1 = vld [vmem:[%s5948_s28 + $0x68c] ss:$16 sps:$4 sm:$0xff]   ;;  %v5693_v3 = vld [vmem:[%s5948_s28 + $0x6c0] ss:$16 sps:$4 sm:$0xff]  }
 0x1d8   : > { %2837 = vmatprep.mubr.bf16.mxu1 %v5671_v62  ;;  %4943 = vmatprep.mubr.msk.bf16.mxu0 %vm2170_vm0, %v5673_v47  ;;  %v3988_v55 = vld [vmem:[#allocation3] ss:$2 sm:$0xff]  ;;  %v3990_v11 = vld [vmem:[#allocation3 + $0x1] ss:$2 sm:$0xff] }
 0x1d9   : > { %3986 = vst [vmem:[#allocation3 + $0x18] sm:$0xff] %v3981_v7  ;;  %v3992_v21 = vmax.f32 %v3988_v55, %v3990_v11  ;;  %v5694_v7 = vld [vmem:[%s5948_s28 + $0x6c8] ss:$16 sps:$4 sm:$0xff]  }
 0x1da   : > { %v2623_v8 = vpop.f32.mrb[96].mxu1  ;;  %v3248_v12 = vpop.f32.mrb[96].mxu0 }
 0x1db   : > { %v2625_v13 = vpop.f32.mrb[97].mxu1  ;;  %v3249_v14 = vadd.f32 %v3248_v12, %v2623_v8  ;;  %v3250_v15 = vpop.f32.mrb[97].mxu0  ;;  %v3994_v25 = vadd.f32 %v6200_v56, %v3992_v21  ;;  %v5695_v8 = vld [vmem:[%s5948_s28 + $0x6e4] ss:$16 sps:$4 sm:$0xff]   ;;  %v5697_v12 = vld [vmem:[%s5948_s28 + $0x6ec] ss:$16 sps:$4 sm:$0xff]  }
 0x1dc   : > { %v2626_v16 = vpop.f32.mrb[98].mxu1  ;;  %v3251_v18 = vpop.f32.mrb[98].mxu0 }
 0x1dd   : > { %v2628_v19 = vpop.f32.mrb[99].mxu1  ;;  %3695 = vst [vmem:[#allocation2 + $0x180] sm:$0xff] %v3249_v14  ;;  %v3252_v22 = vadd.f32 %v3251_v18, %v2626_v16  ;;  %v3253_v20 = vpop.f32.mrb[99].mxu0  ;;  %v3996_v41 = vmax.f32 %v3994_v25, 0.0  ;;  %v5700_v25 = vld [vmem:[%s5948_s28 + $0x6e8] ss:$16 sps:$4 sm:$0xff]  }
 0x1de   : > { %v4009_v61 = vld [vmem:[#allocation2 + $0x172] sm:$0xff] }
 0x1df   : > { %2838 = vmatmul.mubr.bf16.gmra.mrb[204].mxu1 %v5675_v9  ;;  %3696 = vst [vmem:[#allocation2 + $0x188] sm:$0xff] %v3252_v22  ;;  %3463 = vmatmul.mubr.bf16.gmra.mrb[204].mxu0 %v5676_v10  ;;  %v5699_v22 = vld [vmem:[%s5948_s28 + $0x6e0] ss:$16 sps:$4 sm:$0xff]  }
 0x1e0   : > { %2845 = vmatprep.mubr.bf16.mxu1 %v5677_v17  ;;  %v3989_v23 = vld [vmem:[#allocation3 + $0x10] ss:$2 sm:$0xff]  ;;  %v3991_v24 = vld [vmem:[#allocation3 + $0x11] ss:$2 sm:$0xff]  ;;  %4944 = vmatprep.mubr.msk.bf16.mxu0 %vm2170_vm0, %v5679_v1 }
 0x1e1   : > { %v3993_v26 = vmax.f32 %v3989_v23, %v3991_v24 }
 0x1e2   : > { %v2631_v27 = vpop.f32.mrb[100].mxu1  ;;  %v3256_v29 = vpop.f32.mrb[100].mxu0 }
 0x1e3   : > { %v2633_v28 = vpop.f32.mrb[101].mxu1  ;;  %v3995_v31 = vadd.f32 %v6200_v56, %v3993_v26  ;;  %v3257_v32 = vadd.f32 %v3256_v29, %v2631_v27  ;;  %v3258_v33 = vpop.f32.mrb[101].mxu0  ;;  %v5701_v26 = vld [vmem:[%s5948_s28 + $0x704] ss:$16 sps:$4 sm:$0xff]  }
 0x1e4   : > { %v2634_v35 = vpop.f32.mrb[102].mxu1  ;;  %v3259_v39 = vpop.f32.mrb[102].mxu0  ;;  %v4010_v9 = vld [vmem:[#allocation2 + $0x17a] sm:$0xff] }
 0x1e5   : > { %v2636_v40 = vpop.f32.mrb[103].mxu1  ;;  %v3997_v43 = vmax.f32 %v3995_v31, 0.0  ;;  %3697 = vst [vmem:[#allocation2 + $0x190] sm:$0xff] %v3257_v32  ;;  %v3260_v44 = vadd.f32 %v3259_v39, %v2634_v35  ;;  %v3261_v45 = vpop.f32.mrb[103].mxu0  ;;  %v5703_v31 = vld [vmem:[%s5948_s28 + $0x70c] ss:$16 sps:$4 sm:$0xff]  }
 0x1e6   : > { %v4011_v16 = vld [vmem:[#allocation2 + $0x182] sm:$0xff] }
 0x1e7   : > { %2846 = vmatmul.mubr.bf16.gmra.mrb[208].mxu1 %v5681_v30  ;;  %v5087_v46 = vpack.c.bf16 %v3997_v43, %v3996_v41  ;;  %3698 = vst [vmem:[#allocation2 + $0x198] sm:$0xff] %v3260_v44  ;;  %3471 = vmatmul.mubr.bf16.gmra.mrb[208].mxu0 %v5682_v37  ;;  %v5705_v41 = vld [vmem:[%s5948_s28 + $0x700] ss:$16 sps:$4 sm:$0xff]  }
 0x1e8   : > { %2853 = vmatprep.mubr.bf16.mxu1 %v5683_v38  ;;  %4945 = vmatprep.mubr.msk.bf16.mxu0 %vm2170_vm0, %v5685_v34 }
 0x1e9   : > { %5147 = vst [vmem:[%s6213_s21 + $0x20] sm:$0xff] %v5087_v46  }
 0x1ea   : > { %v2639_v56 = vpop.f32.mrb[104].mxu1  ;;  %v3264_v48 = vpop.f32.mrb[104].mxu0 }
 0x1eb   : > { %v2641_v49 = vpop.f32.mrb[105].mxu1  ;;  %v3265_v42 = vadd.f32 %v3264_v48, %v2639_v56  ;;  %v3266_v51 = vpop.f32.mrb[105].mxu0  ;;  %v5706_v56 = vld [vmem:[%s5948_s28 + $0x708] ss:$16 sps:$4 sm:$0xff]   ;;  %v5707_v48 = vld [vmem:[%s5948_s28 + $0x724] ss:$16 sps:$4 sm:$0xff]  }
 0x1ec   : > { %v2642_v52 = vpop.f32.mrb[106].mxu1  ;;  %v3267_v54 = vpop.f32.mrb[106].mxu0  ;;  %v4012_v27 = vld [vmem:[#allocation2 + $0x18a] sm:$0xff] }
 0x1ed   : > { %v2644_v57 = vpop.f32.mrb[107].mxu1  ;;  %3699 = vst [vmem:[#allocation2 + $0x1a0] sm:$0xff] %v3265_v42  ;;  %v3268_v59 = vadd.f32 %v3267_v54, %v2642_v52  ;;  %v3269_v60 = vpop.f32.mrb[107].mxu0  ;;  %v5709_v42 = vld [vmem:[%s5948_s28 + $0x72c] ss:$16 sps:$4 sm:$0xff]  }
 0x1ee   : > { %v4014_v62 = vld [vmem:[#allocation2 + $0x197] sm:$0xff]  ;;  %v6354_v54 = vld [vmem:[%s6512_s2] ss:$0 sm:$0xff] }
 0x1ef   : > { %2854 = vmatmul.mubr.bf16.gmra.mrb[212].mxu1 %v5687_v50  ;;  %v4019_v63 = vmax.f32 %v4009_v61, %v4014_v62  ;;  %3700 = vst [vmem:[#allocation2 + $0x1a8] sm:$0xff] %v3268_v59  ;;  %3479 = vmatmul.mubr.bf16.gmra.mrb[212].mxu0 %v5688_v53 }
 0x1f0   : > { %2861 = vmatprep.mubr.bf16.mxu1 %v5689_v36  ;;  %4946 = vmatprep.mubr.msk.bf16.mxu0 %vm2170_vm0, %v5691_v58 }
 0x1f1   : > { %4024 = vst [vmem:[#allocation3] sm:$0xff] %v4019_v63  ;;  %v5711_v63 = vld [vmem:[%s5948_s28 + $0x720] ss:$16 sps:$4 sm:$0xff]  }
 0x1f2   : > { %v2647_v0 = vpop.f32.mrb[108].mxu1  ;;  %v3272_v2 = vpop.f32.mrb[108].mxu0 }
 0x1f3   : > { %v2649_v47 = vpop.f32.mrb[109].mxu1  ;;  %v3273_v4 = vadd.f32 %v3272_v2, %v2647_v0  ;;  %v3274_v5 = vpop.f32.mrb[109].mxu0  ;;  %v5712_v0 = vld [vmem:[%s5948_s28 + $0x728] ss:$16 sps:$4 sm:$0xff]  }
 0x1f4   : > { %v2650_v6 = vpop.f32.mrb[110].mxu1  ;;  %v4015_v10 = vld [vmem:[#allocation2 + $0x19f] sm:$0xff]  ;;  %v3275_v55 = vpop.f32.mrb[110].mxu0 }
 0x1f5   : > { %v2652_v11 = vpop.f32.mrb[111].mxu1  ;;  %v4020_v13 = vmax.f32 %v4010_v9, %v4015_v10  ;;  %3701 = vst [vmem:[#allocation2 + $0x1b0] sm:$0xff] %v3273_v4  ;;  %v3276_v14 = vadd.f32 %v3275_v55, %v2650_v6  ;;  %v3277_v15 = vpop.f32.mrb[111].mxu0  ;;  %v5713_v6 = vld [vmem:[%s5948_s28 + $0x744] ss:$16 sps:$4 sm:$0xff]  }
 0x1f6   : > { %v4016_v17 = vld [vmem:[#allocation2 + $0x1a7] sm:$0xff]  ;;  %v5717_v15 = vld [vmem:[%s5948_s28 + $0x740] ss:$16 sps:$4 sm:$0xff]  }
 0x1f7   : > { %2862 = vmatmul.mubr.bf16.gmra.mrb[216].mxu1 %v5693_v3  ;;  %4025 = vst [vmem:[#allocation3 + $0x8] sm:$0xff] %v4020_v13  ;;  %v4021_v1 = vmax.f32 %v4011_v16, %v4016_v17  ;;  %3702 = vst [vmem:[#allocation2 + $0x1b8] sm:$0xff] %v3276_v14  ;;  %3487 = vmatmul.mubr.bf16.gmra.mrb[216].mxu0 %v5694_v7  ;;  %v5715_v9 = vld [vmem:[%s5948_s28 + $0x74c] ss:$16 sps:$4 sm:$0xff]  }
 0x1f8   : > { %2869 = vmatprep.mubr.bf16.mxu1 %v5695_v8  ;;  %4947 = vmatprep.mubr.msk.bf16.mxu0 %vm2170_vm0, %v5697_v12 }
 0x1f9   : > { %4026 = vst [vmem:[#allocation3 + $0x10] sm:$0xff] %v4021_v1 }
 0x1fa   : > { %v2655_v18 = vpop.f32.mrb[112].mxu1  ;;  %v3280_v19 = vpop.f32.mrb[112].mxu0 }
 0x1fb   : > { %v2657_v21 = vpop.f32.mrb[113].mxu1  ;;  %v3281_v20 = vadd.f32 %v3280_v19, %v2655_v18  ;;  %v3282_v23 = vpop.f32.mrb[113].mxu0  ;;  %v5718_v18 = vld [vmem:[%s5948_s28 + $0x748] ss:$16 sps:$4 sm:$0xff]   ;;  %v5719_v19 = vld [vmem:[%s5948_s28 + $0x764] ss:$16 sps:$4 sm:$0xff]  }
 0x1fc   : > { %v2658_v24 = vpop.f32.mrb[114].mxu1  ;;  %v4017_v29 = vld [vmem:[#allocation2 + $0x1af] sm:$0xff]  ;;  %v3283_v28 = vpop.f32.mrb[114].mxu0 }
 0x1fd   : > { %v2660_v30 = vpop.f32.mrb[115].mxu1  ;;  %v4022_v32 = vmax.f32 %v4012_v27, %v4017_v29  ;;  %3703 = vst [vmem:[#allocation2 + $0x1c0] sm:$0xff] %v3281_v20  ;;  %v3284_v33 = vadd.f32 %v3283_v28, %v2658_v24  ;;  %v3285_v35 = vpop.f32.mrb[115].mxu0  ;;  %v5721_v20 = vld [vmem:[%s5948_s28 + $0x76c] ss:$16 sps:$4 sm:$0xff]  }
 0x1fe   : > { %v4029_v37 = vld [vmem:[#allocation3] ss:$2 sm:$0xff]  ;;  %v4031_v38 = vld [vmem:[#allocation3 + $0x1] ss:$2 sm:$0xff] }
 0x1ff   : > { %2870 = vmatmul.mubr.bf16.gmra.mrb[220].mxu1 %v5699_v22  ;;  %4027 = vst [vmem:[#allocation3 + $0x18] sm:$0xff] %v4022_v32  ;;  %3704 = vst [vmem:[#allocation2 + $0x1c8] sm:$0xff] %v3284_v33  ;;  %3495 = vmatmul.mubr.bf16.gmra.mrb[220].mxu0 %v5700_v25  ;;  %v4033_v43 = vmax.f32 %v4029_v37, %v4031_v38  ;;  %v5724_v37 = vld [vmem:[%s5948_s28 + $0x768] ss:$16 sps:$4 sm:$0xff]   ;;  %v5725_v38 = vld [vmem:[%s5948_s28 + $0x784] ss:$16 sps:$4 sm:$0xff]  }
 0x200   : > { %2877 = vmatprep.mubr.bf16.mxu1 %v5701_v26  ;;  %4948 = vmatprep.mubr.msk.bf16.mxu0 %vm2170_vm0, %v5703_v31  ;;  %v5723_v31 = vld [vmem:[%s5948_s28 + $0x760] ss:$16 sps:$4 sm:$0xff]  }
 0x201   : > { %v4035_v57 = vadd.f32 %v6354_v54, %v4033_v43  ;;  %v5727_v43 = vld [vmem:[%s5948_s28 + $0x78c] ss:$16 sps:$4 sm:$0xff]  }
 0x202   : > { %v2663_v39 = vpop.f32.mrb[116].mxu1  ;;  %v3288_v40 = vpop.f32.mrb[116].mxu0 }
 0x203   : > { %v2665_v34 = vpop.f32.mrb[117].mxu1  ;;  %v3289_v44 = vadd.f32 %v3288_v40, %v2663_v39  ;;  %v3290_v45 = vpop.f32.mrb[117].mxu0  ;;  %v4037_v2 = vmax.f32 %v4035_v57, 0.0 }
 0x204   : > { %v2666_v46 = vpop.f32.mrb[118].mxu1  ;;  %v3291_v49 = vpop.f32.mrb[118].mxu0  ;;  %v4050_v25 = vld [vmem:[#allocation2 + $0x1bc] sm:$0xff] }
 0x205   : > { %v2668_v50 = vpop.f32.mrb[119].mxu1  ;;  %3705 = vst [vmem:[#allocation2 + $0x1d0] sm:$0xff] %v3289_v44  ;;  %v3292_v51 = vadd.f32 %v3291_v49, %v2666_v46  ;;  %v3293_v52 = vpop.f32.mrb[119].mxu0 }
 0x206   : > { %v4030_v53 = vld [vmem:[#allocation3 + $0x10] ss:$2 sm:$0xff]  ;;  %v4032_v36 = vld [vmem:[#allocation3 + $0x11] ss:$2 sm:$0xff]  ;;  %v4051_v39 = vld [vmem:[#allocation2 + $0x1c4] sm:$0xff] }
 0x207   : > { %2878 = vmatmul.mubr.bf16.gmra.mrb[224].mxu1 %v5705_v41  ;;  %v4034_v58 = vmax.f32 %v4030_v53, %v4032_v36  ;;  %3706 = vst [vmem:[#allocation2 + $0x1d8] sm:$0xff] %v3292_v51  ;;  %3503 = vmatmul.mubr.bf16.gmra.mrb[224].mxu0 %v5706_v56  ;;  %v5730_v53 = vld [vmem:[%s5948_s28 + $0x788] ss:$16 sps:$4 sm:$0xff]   ;;  %v5731_v36 = vld [vmem:[%s5948_s28 + $0x7a4] ss:$16 sps:$4 sm:$0xff]  }
 0x208   : > { %2885 = vmatprep.mubr.bf16.mxu1 %v5707_v48  ;;  %4949 = vmatprep.mubr.msk.bf16.mxu0 %vm2170_vm0, %v5709_v42  ;;  %v5729_v42 = vld [vmem:[%s5948_s28 + $0x780] ss:$16 sps:$4 sm:$0xff]  }
 0x209   : > { %v4036_v59 = vadd.f32 %v6354_v54, %v4034_v58 }
 0x20a   : > { %v2671_v60 = vpop.f32.mrb[120].mxu1  ;;  %v3296_v61 = vpop.f32.mrb[120].mxu0 }
 0x20b   : > { %v2673_v62 = vpop.f32.mrb[121].mxu1  ;;  %v4038_v47 = vmax.f32 %v4036_v59, 0.0  ;;  %v3297_v3 = vadd.f32 %v3296_v61, %v2671_v60  ;;  %v3298_v4 = vpop.f32.mrb[121].mxu0  ;;  %v5733_v60 = vld [vmem:[%s5948_s28 + $0x7ac] ss:$16 sps:$4 sm:$0xff]  }
 0x20c   : > { %v2674_v5 = vpop.f32.mrb[122].mxu1  ;;  %v3299_v7 = vpop.f32.mrb[122].mxu0  ;;  %v4052_v56 = vld [vmem:[#allocation2 + $0x1cc] sm:$0xff] }
 0x20d   : > { %v2676_v8 = vpop.f32.mrb[123].mxu1  ;;  %v5092_v10 = vpack.c.bf16 %v4038_v47, %v4037_v2  ;;  %3707 = vst [vmem:[#allocation2 + $0x1e0] sm:$0xff] %v3297_v3  ;;  %v3300_v55 = vadd.f32 %v3299_v7, %v2674_v5  ;;  %v3301_v11 = vpop.f32.mrb[123].mxu0 }
 0x20e   : > { %v4053_v61 = vld [vmem:[#allocation2 + $0x1d4] sm:$0xff] }
 0x20f   : > { %2886 = vmatmul.mubr.bf16.gmra.mrb[228].mxu1 %v5711_v63  ;;  %5148 = vst [vmem:[%s6213_s21 + $0x28] sm:$0xff] %v5092_v10   ;;  %3708 = vst [vmem:[#allocation2 + $0x1e8] sm:$0xff] %v3300_v55  ;;  %3511 = vmatmul.mubr.bf16.gmra.mrb[228].mxu0 %v5712_v0 }
 0x210   : > { %2893 = vmatprep.mubr.bf16.mxu1 %v5713_v6  ;;  %4950 = vmatprep.mubr.msk.bf16.mxu0 %vm2170_vm0, %v5715_v9  ;;  %v5735_v9 = vld [vmem:[%s5948_s28 + $0x7a0] ss:$16 sps:$4 sm:$0xff]  }
 0x212   : > { %v2679_v12 = vpop.f32.mrb[124].mxu1  ;;  %v3304_v13 = vpop.f32.mrb[124].mxu0 }
 0x213   : > { %v2681_v14 = vpop.f32.mrb[125].mxu1  ;;  %v3305_v16 = vadd.f32 %v3304_v13, %v2679_v12  ;;  %v3306_v17 = vpop.f32.mrb[125].mxu0  ;;  %v5736_v13 = vld [vmem:[%s5948_s28 + $0x7a8] ss:$16 sps:$4 sm:$0xff]  }
 0x214   : > { %v2682_v1 = vpop.f32.mrb[126].mxu1  ;;  %v3307_v21 = vpop.f32.mrb[126].mxu0  ;;  %v5737_v14 = vld [vmem:[%s5948_s28 + $0x7c4] ss:$16 sps:$4 sm:$0xff]   ;;  %v5739_v17 = vld [vmem:[%s5948_s28 + $0x7cc] ss:$16 sps:$4 sm:$0xff]  }
 0x215   : > { %v2684_v22 = vpop.f32.mrb[127].mxu1  ;;  %3709 = vst [vmem:[#allocation2 + $0x1f0] sm:$0xff] %v3305_v16  ;;  %v3308_v23 = vadd.f32 %v3307_v21, %v2682_v1  ;;  %v3309_v24 = vpop.f32.mrb[127].mxu0 }
 0x216   : > { %v4055_v26 = vld [vmem:[#allocation2 + $0x1e1] sm:$0xff] }
 0x217   : > { %2894 = vmatmul.mubr.bf16.gmra.mrb[232].mxu1 %v5717_v15  ;;  %v4060_v27 = vmax.f32 %v4050_v25, %v4055_v26  ;;  %3710 = vst [vmem:[#allocation2 + $0x1f8] sm:$0xff] %v3308_v23  ;;  %3519 = vmatmul.mubr.bf16.gmra.mrb[232].mxu0 %v5718_v18 }
 0x218   : > { %2901 = vmatprep.mubr.bf16.mxu1 %v5719_v19  ;;  %4951 = vmatprep.mubr.msk.bf16.mxu0 %vm2170_vm0, %v5721_v20 }
 0x219   : > { %4065 = vst [vmem:[#allocation3] sm:$0xff] %v4060_v27  ;;  %v5741_v27 = vld [vmem:[%s5948_s28 + $0x7c0] ss:$16 sps:$4 sm:$0xff]  }
 0x21a   : > { %v2687_v29 = vpop.f32.mrb[128].mxu1  ;;  %v3312_v28 = vpop.f32.mrb[128].mxu0 }
 0x21b   : > { %v2689_v30 = vpop.f32.mrb[129].mxu1  ;;  %v3313_v32 = vadd.f32 %v3312_v28, %v2687_v29  ;;  %v3314_v33 = vpop.f32.mrb[129].mxu0  ;;  %v5742_v29 = vld [vmem:[%s5948_s28 + $0x7c8] ss:$16 sps:$4 sm:$0xff]  }
 0x21c   : > { %v2690_v35 = vpop.f32.mrb[130].mxu1  ;;  %v4056_v40 = vld [vmem:[#allocation2 + $0x1e9] sm:$0xff]  ;;  %v3315_v34 = vpop.f32.mrb[130].mxu0 }
 0x21d   : > { %v2692_v41 = vpop.f32.mrb[131].mxu1  ;;  %v4061_v44 = vmax.f32 %v4051_v39, %v4056_v40  ;;  %3711 = vst [vmem:[#allocation2 + $0x200] sm:$0xff] %v3313_v32  ;;  %v3316_v45 = vadd.f32 %v3315_v34, %v2690_v35  ;;  %v3317_v46 = vpop.f32.mrb[131].mxu0  ;;  %v5743_v35 = vld [vmem:[%s5948_s28 + $0x7e4] ss:$16 sps:$4 sm:$0xff]  }
 0x21e   : > { %v4057_v48 = vld [vmem:[#allocation2 + $0x1f1] sm:$0xff]  ;;  %v5745_v39 = vld [vmem:[%s5948_s28 + $0x7ec] ss:$16 sps:$4 sm:$0xff]  }
 0x21f   : > { %2902 = vmatmul.mubr.bf16.gmra.mrb[236].mxu1 %v5723_v31  ;;  %4066 = vst [vmem:[#allocation3 + $0x8] sm:$0xff] %v4061_v44  ;;  %v4062_v49 = vmax.f32 %v4052_v56, %v4057_v48  ;;  %3712 = vst [vmem:[#allocation2 + $0x208] sm:$0xff] %v3316_v45  ;;  %3527 = vmatmul.mubr.bf16.gmra.mrb[236].mxu0 %v5724_v37  ;;  %v5747_v46 = vld [vmem:[%s5948_s28 + $0x7e0] ss:$16 sps:$4 sm:$0xff]  }
 0x220   : > { %2909 = vmatprep.mubr.bf16.mxu1 %v5725_v38  ;;  %4952 = vmatprep.mubr.msk.bf16.mxu0 %vm2170_vm0, %v5727_v43 }
 0x221   : > { %4067 = vst [vmem:[#allocation3 + $0x10] sm:$0xff] %v4062_v49 }
 0x222   : > { %v2695_v50 = vpop.f32.mrb[132].mxu1  ;;  %v3320_v51 = vpop.f32.mrb[132].mxu0 }
 0x223   : > { %v2697_v52 = vpop.f32.mrb[133].mxu1  ;;  %v3321_v57 = vadd.f32 %v3320_v51, %v2695_v50  ;;  %v3322_v58 = vpop.f32.mrb[133].mxu0  ;;  %v5748_v50 = vld [vmem:[%s5948_s28 + $0x7e8] ss:$16 sps:$4 sm:$0xff]  }
 0x224   : > { %v2698_v59 = vpop.f32.mrb[134].mxu1  ;;  %v4058_v62 = vld [vmem:[#allocation2 + $0x1f9] sm:$0xff]  ;;  %v3323_v63 = vpop.f32.mrb[134].mxu0 }
 0x225   : > { %v2700_v0 = vpop.f32.mrb[135].mxu1  ;;  %v4063_v2 = vmax.f32 %v4053_v61, %v4058_v62  ;;  %3713 = vst [vmem:[#allocation2 + $0x210] sm:$0xff] %v3321_v57  ;;  %v3324_v47 = vadd.f32 %v3323_v63, %v2698_v59  ;;  %v3325_v3 = vpop.f32.mrb[135].mxu0  ;;  %v5754_v57 = vld [vmem:[%s5948_s28 + $0x80c] ss:$16 sps:$4 sm:$0xff]  }
 0x226   : > { %v4070_v4 = vld [vmem:[#allocation3] ss:$2 sm:$0xff]  ;;  %v4072_v5 = vld [vmem:[#allocation3 + $0x1] ss:$2 sm:$0xff] }
 0x227   : > { %2910 = vmatmul.mubr.bf16.gmra.mrb[240].mxu1 %v5729_v42  ;;  %4068 = vst [vmem:[#allocation3 + $0x18] sm:$0xff] %v4063_v2  ;;  %3714 = vst [vmem:[#allocation2 + $0x218] sm:$0xff] %v3324_v47  ;;  %3535 = vmatmul.mubr.bf16.gmra.mrb[240].mxu0 %v5730_v53  ;;  %v4074_v10 = vmax.f32 %v4070_v4, %v4072_v5  ;;  %v5751_v42 = vld [vmem:[%s5948_s28 + $0x804] ss:$16 sps:$4 sm:$0xff]   ;;  %v5749_v3 = vld [vmem:[%s5948_s28 + $0x800] ss:$16 sps:$4 sm:$0xff]  }
 0x228   : > { %2917 = vmatprep.mubr.bf16.mxu1 %v5731_v36  ;;  %4953 = vmatprep.mubr.msk.bf16.mxu0 %vm2170_vm0, %v5733_v60  ;;  %v4091_v51 = vld [vmem:[#allocation2 + $0x206] sm:$0xff] }
 0x229   : > { %v4076_v22 = vadd.f32 %v6354_v54, %v4074_v10 }
 0x22a   : > { %v2703_v6 = vpop.f32.mrb[136].mxu1  ;;  %v3328_v7 = vpop.f32.mrb[136].mxu0 }
 0x22b   : > { %v2705_v8 = vpop.f32.mrb[137].mxu1  ;;  %v3329_v55 = vadd.f32 %v3328_v7, %v2703_v6  ;;  %v3330_v11 = vpop.f32.mrb[137].mxu0  ;;  %v4078_v28 = vmax.f32 %v4076_v22, 0.0  ;;  %v5752_v7 = vld [vmem:[%s5948_s28 + $0x808] ss:$16 sps:$4 sm:$0xff]  }
 0x22c   : > { %v2706_v12 = vpop.f32.mrb[138].mxu1  ;;  %v3331_v15 = vpop.f32.mrb[138].mxu0  ;;  %v4092_v61 = vld [vmem:[#allocation2 + $0x20e] sm:$0xff] }
 0x22d   : > { %v2708_v16 = vpop.f32.mrb[139].mxu1  ;;  %3715 = vst [vmem:[#allocation2 + $0x220] sm:$0xff] %v3329_v55  ;;  %v3332_v1 = vadd.f32 %v3331_v15, %v2706_v12  ;;  %v3333_v18 = vpop.f32.mrb[139].mxu0  ;;  %v5757_v8 = vld [vmem:[%s5948_s28 + $0x824] ss:$16 sps:$4 sm:$0xff]  }
 0x22e   : > { %v4071_v19 = vld [vmem:[#allocation3 + $0x10] ss:$2 sm:$0xff]  ;;  %v4073_v21 = vld [vmem:[#allocation3 + $0x11] ss:$2 sm:$0xff] }
 0x22f   : > { %2918 = vmatmul.mubr.bf16.gmra.mrb[244].mxu1 %v5735_v9  ;;  %v4075_v20 = vmax.f32 %v4071_v19, %v4073_v21  ;;  %3716 = vst [vmem:[#allocation2 + $0x228] sm:$0xff] %v3332_v1  ;;  %3543 = vmatmul.mubr.bf16.gmra.mrb[244].mxu0 %v5736_v13  ;;  %v4093_v9 = vld [vmem:[#allocation2 + $0x216] sm:$0xff]  ;;  %v5755_v19 = vld [vmem:[%s5948_s28 + $0x820] ss:$16 sps:$4 sm:$0xff]  }
 0x230   : > { %2925 = vmatprep.mubr.bf16.mxu1 %v5737_v14  ;;  %4954 = vmatprep.mubr.msk.bf16.mxu0 %vm2170_vm0, %v5739_v17  ;;  %v5760_v12 = vld [vmem:[%s5948_s28 + $0x82c] ss:$16 sps:$4 sm:$0xff]  }
 0x231   : > { %v4077_v23 = vadd.f32 %v6354_v54, %v4075_v20 }
 0x232   : > { %v2711_v24 = vpop.f32.mrb[140].mxu1  ;;  %v3336_v25 = vpop.f32.mrb[140].mxu0 }
 0x233   : > { %v2713_v26 = vpop.f32.mrb[141].mxu1  ;;  %v4079_v30 = vmax.f32 %v4077_v23, 0.0  ;;  %v3337_v31 = vadd.f32 %v3336_v25, %v2711_v24  ;;  %v3338_v32 = vpop.f32.mrb[141].mxu0 }
 0x234   : > { %v2714_v33 = vpop.f32.mrb[142].mxu1  ;;  %v3339_v37 = vpop.f32.mrb[142].mxu0  ;;  %v4094_v13 = vld [vmem:[#allocation2 + $0x21e] sm:$0xff] }
 0x235   : > { %v2716_v38 = vpop.f32.mrb[143].mxu1  ;;  %v5097_v40 = vpack.c.bf16 %v4079_v30, %v4078_v28  ;;  %3717 = vst [vmem:[#allocation2 + $0x230] sm:$0xff] %v3337_v31  ;;  %v3340_v34 = vadd.f32 %v3339_v37, %v2714_v33  ;;  %v3341_v41 = vpop.f32.mrb[143].mxu0  ;;  %v5766_v31 = vld [vmem:[%s5948_s28 + $0x84c] ss:$16 sps:$4 sm:$0xff]  }
 0x237   : > { %2926 = vmatmul.mubr.bf16.gmra.mrb[248].mxu1 %v5741_v27  ;;  %5149 = vst [vmem:[%s6213_s21 + $0x30] sm:$0xff] %v5097_v40   ;;  %3718 = vst [vmem:[#allocation2 + $0x238] sm:$0xff] %v3340_v34  ;;  %3551 = vmatmul.mubr.bf16.gmra.mrb[248].mxu0 %v5742_v29  ;;  %v5758_v27 = vld [vmem:[%s5948_s28 + $0x828] ss:$16 sps:$4 sm:$0xff]   ;;  %v5763_v29 = vld [vmem:[%s5948_s28 + $0x844] ss:$16 sps:$4 sm:$0xff]  }
 0x238   : > { %2933 = vmatprep.mubr.bf16.mxu1 %v5743_v35  ;;  %4955 = vmatprep.mubr.msk.bf16.mxu0 %vm2170_vm0, %v5745_v39 }
 0x23a   : > { %v2719_v43 = vpop.f32.mrb[144].mxu1  ;;  %v3344_v44 = vpop.f32.mrb[144].mxu0 }
 0x23b   : > { %v2721_v45 = vpop.f32.mrb[145].mxu1  ;;  %v3345_v56 = vadd.f32 %v3344_v44, %v2719_v43  ;;  %v3346_v48 = vpop.f32.mrb[145].mxu0  ;;  %v5761_v44 = vld [vmem:[%s5948_s28 + $0x840] ss:$16 sps:$4 sm:$0xff]  }
 0x23c   : > { %v2722_v49 = vpop.f32.mrb[146].mxu1  ;;  %v4096_v52 = vld [vmem:[#allocation2 + $0x22b] sm:$0xff]  ;;  %v3347_v53 = vpop.f32.mrb[146].mxu0 }
 0x23d   : > { %v2724_v36 = vpop.f32.mrb[147].mxu1  ;;  %v4101_v58 = vmax.f32 %v4091_v51, %v4096_v52  ;;  %3719 = vst [vmem:[#allocation2 + $0x240] sm:$0xff] %v3345_v56  ;;  %v3348_v59 = vadd.f32 %v3347_v53, %v2722_v49  ;;  %v3349_v60 = vpop.f32.mrb[147].mxu0  ;;  %v5764_v49 = vld [vmem:[%s5948_s28 + $0x848] ss:$16 sps:$4 sm:$0xff]  }
 0x23e   : > { %v4097_v62 = vld [vmem:[#allocation2 + $0x233] sm:$0xff]  ;;  %v5772_v52 = vld [vmem:[%s5948_s28 + $0x86c] ss:$16 sps:$4 sm:$0xff]  }
 0x23f   : > { %2934 = vmatmul.mubr.bf16.gmra.mrb[252].mxu1 %v5747_v46  ;;  %4106 = vst [vmem:[#allocation3] sm:$0xff] %v4101_v58  ;;  %v4102_v63 = vmax.f32 %v4092_v61, %v4097_v62  ;;  %3720 = vst [vmem:[#allocation2 + $0x248] sm:$0xff] %v3348_v59  ;;  %3559 = vmatmul.mubr.bf16.gmra.mrb[252].mxu0 %v5748_v50  ;;  %v5769_v50 = vld [vmem:[%s5948_s28 + $0x864] ss:$16 sps:$4 sm:$0xff]  }
 0x240   : > { %2941 = vmatprep.mubr.bf16.mxu1 %v5751_v42  ;;  %4956 = vmatprep.mubr.msk.bf16.mxu0 %vm2170_vm0, %v5754_v57 }
 0x241   : > { %4107 = vst [vmem:[#allocation3 + $0x8] sm:$0xff] %v4102_v63  ;;  %v5767_v63 = vld [vmem:[%s5948_s28 + $0x860] ss:$16 sps:$4 sm:$0xff]  }
 0x242   : > { %v2727_v0 = vpop.f32.mrb[148].mxu1  ;;  %v3352_v2 = vpop.f32.mrb[148].mxu0 }
 0x243   : > { %v2729_v47 = vpop.f32.mrb[149].mxu1  ;;  %v6399_v4 = vadd.f32 %v3352_v2, %v2727_v0  ;;  %v3354_v5 = vpop.f32.mrb[149].mxu0 }
 0x244   : > { %v2730_v6 = vpop.f32.mrb[150].mxu1  ;;  %v4098_v10 = vld [vmem:[#allocation2 + $0x23b] sm:$0xff]  ;;  %v3355_v55 = vpop.f32.mrb[150].mxu0  ;;  %v5775_v5 = vld [vmem:[%s5948_s28 + $0x884] ss:$16 sps:$4 sm:$0xff]  }
 0x245   : > { %v2732_v11 = vpop.f32.mrb[151].mxu1  ;;  %v4103_v14 = vmax.f32 %v4093_v9, %v4098_v10  ;;  %v6404_v15 = vadd.f32 %v3355_v55, %v2730_v6  ;;  %v3357_v16 = vpop.f32.mrb[151].mxu0 }
 0x246   : > { %v4099_v17 = vld [vmem:[#allocation2 + $0x243] sm:$0xff] }
 0x247   : > { %2942 = vmatmul.mubr.bf16.gmra.mrb[148].mxu1 %v5749_v3  ;;  %4108 = vst [vmem:[#allocation3 + $0x10] sm:$0xff] %v4103_v14  ;;  %v4104_v1 = vmax.f32 %v4094_v13, %v4099_v17  ;;  %3567 = vmatmul.mubr.bf16.gmra.mrb[0].mxu0 %v5752_v7  ;;  %v5770_v3 = vld [vmem:[%s5948_s28 + $0x868] ss:$16 sps:$4 sm:$0xff]   ;;  %v5773_v16 = vld [vmem:[%s5948_s28 + $0x880] ss:$16 sps:$4 sm:$0xff]  }
 0x248   : > { %2949 = vmatprep.mubr.bf16.mxu1 %v5757_v8  ;;  %4957 = vmatprep.mubr.msk.bf16.mxu0 %vm2170_vm0, %v5760_v12  ;;  %v4111_v21 = vld [vmem:[#allocation3] ss:$2 sm:$0xff]  ;;  %v4113_v22 = vld [vmem:[#allocation3 + $0x1] ss:$2 sm:$0xff] }
 0x249   : > { %4109 = vst [vmem:[#allocation3 + $0x18] sm:$0xff] %v4104_v1  ;;  %v4115_v32 = vmax.f32 %v4111_v21, %v4113_v22  ;;  %v5778_v8 = vld [vmem:[%s5948_s28 + $0x88c] ss:$16 sps:$4 sm:$0xff]   ;;  %v5781_v21 = vld [vmem:[%s5948_s28 + $0x8a4] ss:$16 sps:$4 sm:$0xff]  }
 0x24a   : > { %v2735_v18 = vpop.f32.mrb[152].mxu1  ;;  %v3360_v20 = vpop.f32.mrb[152].mxu0 }
 0x24b   : > { %v2737_v23 = vpop.f32.mrb[153].mxu1  ;;  %v6408_v24 = vadd.f32 %v3360_v20, %v2735_v18  ;;  %v3362_v25 = vpop.f32.mrb[153].mxu0  ;;  %v4117_v39 = vadd.f32 %v6354_v54, %v4115_v32  ;;  %v5779_v32 = vld [vmem:[%s5948_s28 + $0x8a0] ss:$16 sps:$4 sm:$0xff]  }
 0x24c   : > { %v2738_v26 = vpop.f32.mrb[154].mxu1  ;;  %v3363_v28 = vpop.f32.mrb[154].mxu0 }
 0x24d   : > { %v2740_v30 = vpop.f32.mrb[155].mxu1  ;;  %v6413_v33 = vadd.f32 %v3363_v28, %v2738_v26  ;;  %v3365_v35 = vpop.f32.mrb[155].mxu0  ;;  %v4119_v53 = vmax.f32 %v4117_v39, 0.0  ;;  %v5782_v39 = vld [vmem:[%s5948_s28 + $0x8a8] ss:$16 sps:$4 sm:$0xff]  }
 0x24f   : > { %2950 = vmatmul.mubr.bf16.gmra.mrb[152].mxu1 %v5755_v19  ;;  %3575 = vmatmul.mubr.bf16.gmra.mrb[4].mxu0 %v5758_v27  ;;  %v5776_v19 = vld [vmem:[%s5948_s28 + $0x888] ss:$16 sps:$4 sm:$0xff]  }
 0x250   : > { %2957 = vmatprep.mubr.bf16.mxu1 %v5763_v29  ;;  %v4112_v37 = vld [vmem:[#allocation3 + $0x10] ss:$2 sm:$0xff]  ;;  %v4114_v38 = vld [vmem:[#allocation3 + $0x11] ss:$2 sm:$0xff]  ;;  %4958 = vmatprep.mubr.msk.bf16.mxu0 %vm2170_vm0, %v5766_v31 }
 0x251   : > { %v4116_v40 = vmax.f32 %v4112_v37, %v4114_v38 }
 0x252   : > { %v2743_v34 = vpop.f32.mrb[156].mxu1  ;;  %v3368_v41 = vpop.f32.mrb[156].mxu0 }
 0x253   : > { %v2745_v43 = vpop.f32.mrb[157].mxu1  ;;  %v4118_v45 = vadd.f32 %v6354_v54, %v4116_v40  ;;  %v3369_v46 = vadd.f32 %v3368_v41, %v2743_v34  ;;  %v3370_v56 = vpop.f32.mrb[157].mxu0  ;;  %v5787_v40 = vld [vmem:[%s5948_s28 + $0x8c4] ss:$16 sps:$4 sm:$0xff]  }
 0x254   : > { %v2746_v48 = vpop.f32.mrb[158].mxu1  ;;  %v3371_v42 = vpop.f32.mrb[158].mxu0 }
 0x255   : > { %v2748_v51 = vpop.f32.mrb[159].mxu1  ;;  %v4120_v36 = vmax.f32 %v4118_v45, 0.0  ;;  %3725 = vst [vmem:[#allocation2 + $0x270] sm:$0xff] %v3369_v46  ;;  %v3372_v57 = vadd.f32 %v3371_v42, %v2746_v48  ;;  %v3373_v58 = vpop.f32.mrb[159].mxu0 }
 0x256   : > { %v5785_v51 = vld [vmem:[%s5948_s28 + $0x8c0] ss:$16 sps:$4 sm:$0xff]   ;;  %v5793_v58 = vld [vmem:[%s5948_s28 + $0x8e4] ss:$16 sps:$4 sm:$0xff]  }
 0x257   : > { %2958 = vmatmul.mubr.bf16.gmra.mrb[156].mxu1 %v5761_v44  ;;  %v5102_v59 = vpack.c.bf16 %v4120_v36, %v4119_v53  ;;  %3726 = vst [vmem:[#allocation2 + $0x278] sm:$0xff] %v3372_v57  ;;  %3583 = vmatmul.mubr.bf16.gmra.mrb[8].mxu0 %v5764_v49  ;;  %v5788_v57 = vld [vmem:[%s5948_s28 + $0x8c8] ss:$16 sps:$4 sm:$0xff]  }
 0x258   : > { %2965 = vmatprep.mubr.bf16.mxu1 %v5769_v50  ;;  %4959 = vmatprep.mubr.msk.bf16.mxu0 %vm2170_vm0, %v5772_v52 }
 0x259   : > { %5150 = vst [vmem:[%s6213_s21 + $0x38] sm:$0xff] %v5102_v59  }
 0x25a   : > { %v2751_v60 = vpop.f32.mrb[160].mxu1  ;;  %v3376_v61 = vpop.f32.mrb[160].mxu0 }
 0x25b   : > { %v2753_v62 = vpop.f32.mrb[161].mxu1  ;;  %v3377_v0 = vadd.f32 %v3376_v61, %v2751_v60  ;;  %v3378_v2 = vpop.f32.mrb[161].mxu0  ;;  %v5796_v61 = vld [vmem:[%s5948_s28 + $0x8ec] ss:$16 sps:$4 sm:$0xff]  }
 0x25c   : > { %v2754_v47 = vpop.f32.mrb[162].mxu1  ;;  %v3379_v6 = vpop.f32.mrb[162].mxu0 }
 0x25d   : > { %v2756_v7 = vpop.f32.mrb[163].mxu1  ;;  %3727 = vst [vmem:[#allocation2 + $0x280] sm:$0xff] %v3377_v0  ;;  %v3380_v9 = vadd.f32 %v3379_v6, %v2754_v47  ;;  %v3381_v10 = vpop.f32.mrb[163].mxu0 }
 0x25e   : > { %v4137_v55 = vld [vmem:[#allocation2 + $0x275] sm:$0xff] }
 0x25f   : > { %2966 = vmatmul.mubr.bf16.gmra.mrb[160].mxu1 %v5767_v63  ;;  %v4142_v11 = vmax.f32 %v6399_v4, %v4137_v55  ;;  %3728 = vst [vmem:[#allocation2 + $0x288] sm:$0xff] %v3380_v9  ;;  %3591 = vmatmul.mubr.bf16.gmra.mrb[12].mxu0 %v5770_v3  ;;  %v5784_v4 = vld [vmem:[%s5948_s28 + $0x8ac] ss:$16 sps:$4 sm:$0xff]   ;;  %v5791_v9 = vld [vmem:[%s5948_s28 + $0x8e0] ss:$16 sps:$4 sm:$0xff]  }
 0x260   : > { %2973 = vmatprep.mubr.bf16.mxu1 %v5775_v5  ;;  %4960 = vmatprep.mubr.msk.bf16.mxu0 %vm2170_vm0, %v5778_v8  ;;  %v5794_v10 = vld [vmem:[%s5948_s28 + $0x8e8] ss:$16 sps:$4 sm:$0xff]  }
 0x261   : > { %4147 = vst [vmem:[#allocation3] sm:$0xff] %v4142_v11 }
 0x262   : > { %v2759_v12 = vpop.f32.mrb[164].mxu1  ;;  %v3384_v13 = vpop.f32.mrb[164].mxu0 }
 0x263   : > { %v2761_v14 = vpop.f32.mrb[165].mxu1  ;;  %v3385_v17 = vadd.f32 %v3384_v13, %v2759_v12  ;;  %v3386_v1 = vpop.f32.mrb[165].mxu0 }
 0x264   : > { %v2762_v18 = vpop.f32.mrb[166].mxu1  ;;  %v4138_v22 = vld [vmem:[#allocation2 + $0x27d] sm:$0xff]  ;;  %v3387_v20 = vpop.f32.mrb[166].mxu0 }
 0x265   : > { %v2764_v23 = vpop.f32.mrb[167].mxu1  ;;  %v4143_v25 = vmax.f32 %v6404_v15, %v4138_v22  ;;  %3729 = vst [vmem:[#allocation2 + $0x290] sm:$0xff] %v3385_v17  ;;  %v3388_v26 = vadd.f32 %v3387_v20, %v2762_v18  ;;  %v3389_v27 = vpop.f32.mrb[167].mxu0  ;;  %v5802_v18 = vld [vmem:[%s5948_s28 + $0x90c] ss:$16 sps:$4 sm:$0xff]  }
 0x266   : > { %v4139_v29 = vld [vmem:[#allocation2 + $0x285] sm:$0xff] }
 0x267   : > { %2974 = vmatmul.mubr.bf16.gmra.mrb[164].mxu1 %v5773_v16  ;;  %4148 = vst [vmem:[#allocation3 + $0x8] sm:$0xff] %v4143_v25  ;;  %v4144_v28 = vmax.f32 %v6408_v24, %v4139_v29  ;;  %3730 = vst [vmem:[#allocation2 + $0x298] sm:$0xff] %v3388_v26  ;;  %3599 = vmatmul.mubr.bf16.gmra.mrb[16].mxu0 %v5776_v19  ;;  %v5790_v24 = vld [vmem:[%s5948_s28 + $0x8cc] ss:$16 sps:$4 sm:$0xff]   ;;  %v5799_v16 = vld [vmem:[%s5948_s28 + $0x904] ss:$16 sps:$4 sm:$0xff]  }
 0x268   : > { %2981 = vmatprep.mubr.bf16.mxu1 %v5781_v21  ;;  %4961 = vmatprep.mubr.msk.bf16.mxu0 %vm2170_vm0, %v5784_v4  ;;  %v5797_v25 = vld [vmem:[%s5948_s28 + $0x900] ss:$16 sps:$4 sm:$0xff]  }
 0x269   : > { %4149 = vst [vmem:[#allocation3 + $0x10] sm:$0xff] %v4144_v28  ;;  %v5800_v28 = vld [vmem:[%s5948_s28 + $0x908] ss:$16 sps:$4 sm:$0xff]  }
 0x26a   : > { %v2767_v30 = vpop.f32.mrb[168].mxu1  ;;  %v3392_v15 = vpop.f32.mrb[168].mxu0 }
 0x26b   : > { %v2769_v31 = vpop.f32.mrb[169].mxu1  ;;  %v3393_v35 = vadd.f32 %v3392_v15, %v2767_v30  ;;  %v3394_v37 = vpop.f32.mrb[169].mxu0  ;;  %v5805_v30 = vld [vmem:[%s5948_s28 + $0x924] ss:$16 sps:$4 sm:$0xff]  }
 0x26c   : > { %v2770_v38 = vpop.f32.mrb[170].mxu1  ;;  %v4140_v34 = vld [vmem:[#allocation2 + $0x28d] sm:$0xff]  ;;  %v3395_v41 = vpop.f32.mrb[170].mxu0 }
 0x26d   : > { %v2772_v43 = vpop.f32.mrb[171].mxu1  ;;  %v4145_v44 = vmax.f32 %v6413_v33, %v4140_v34  ;;  %3731 = vst [vmem:[#allocation2 + $0x2a0] sm:$0xff] %v3393_v35  ;;  %v3396_v45 = vadd.f32 %v3395_v41, %v2770_v38  ;;  %v3397_v46 = vpop.f32.mrb[171].mxu0  ;;  %v5808_v37 = vld [vmem:[%s5948_s28 + $0x92c] ss:$16 sps:$4 sm:$0xff]  }
 0x26e   : > { %v4152_v56 = vld [vmem:[#allocation3] ss:$2 sm:$0xff]  ;;  %v4154_v48 = vld [vmem:[#allocation3 + $0x1] ss:$2 sm:$0xff] }
 0x26f   : > { %2982 = vmatmul.mubr.bf16.gmra.mrb[168].mxu1 %v5779_v32  ;;  %4150 = vst [vmem:[#allocation3 + $0x18] sm:$0xff] %v4145_v44  ;;  %3732 = vst [vmem:[#allocation2 + $0x2a8] sm:$0xff] %v3396_v45  ;;  %3607 = vmatmul.mubr.bf16.gmra.mrb[20].mxu0 %v5782_v39  ;;  %v4156_v33 = vmax.f32 %v4152_v56, %v4154_v48  ;;  %v5803_v46 = vld [vmem:[%s5948_s28 + $0x920] ss:$16 sps:$4 sm:$0xff]  }
 0x270   : > { %2989 = vmatprep.mubr.bf16.mxu1 %v5787_v40  ;;  %4962 = vmatprep.mubr.msk.bf16.mxu0 %vm2170_vm0, %v5790_v24 }
 0x271   : > { %v4158_v47 = vadd.f32 %v6354_v54, %v4156_v33 }
 0x272   : > { %v2775_v49 = vpop.f32.mrb[172].mxu1  ;;  %v3400_v50 = vpop.f32.mrb[172].mxu0 }
 0x273   : > { %v2777_v42 = vpop.f32.mrb[173].mxu1  ;;  %v3401_v52 = vadd.f32 %v3400_v50, %v2775_v49  ;;  %v3402_v53 = vpop.f32.mrb[173].mxu0  ;;  %v4160_v55 = vmax.f32 %v4158_v47, 0.0  ;;  %v5806_v50 = vld [vmem:[%s5948_s28 + $0x928] ss:$16 sps:$4 sm:$0xff]  }
 0x274   : > { %v2778_v36 = vpop.f32.mrb[174].mxu1  ;;  %v3403_v59 = vpop.f32.mrb[174].mxu0  ;;  %v4173_v15 = vld [vmem:[#allocation2 + $0x29a] sm:$0xff] }
 0x275   : > { %v2780_v60 = vpop.f32.mrb[175].mxu1  ;;  %3733 = vst [vmem:[#allocation2 + $0x2b0] sm:$0xff] %v3401_v52  ;;  %v3404_v62 = vadd.f32 %v3403_v59, %v2778_v36  ;;  %v3405_v63 = vpop.f32.mrb[175].mxu0 }
 0x276   : > { %v4153_v0 = vld [vmem:[#allocation3 + $0x10] ss:$2 sm:$0xff]  ;;  %v4155_v2 = vld [vmem:[#allocation3 + $0x11] ss:$2 sm:$0xff]  ;;  %v4174_v34 = vld [vmem:[#allocation2 + $0x2a2] sm:$0xff] }
 0x277   : > { %2990 = vmatmul.mubr.bf16.gmra.mrb[172].mxu1 %v5785_v51  ;;  %v4157_v3 = vmax.f32 %v4153_v0, %v4155_v2  ;;  %3734 = vst [vmem:[#allocation2 + $0x2b8] sm:$0xff] %v3404_v62  ;;  %3615 = vmatmul.mubr.bf16.gmra.mrb[24].mxu0 %v5788_v57 }
 0x278   : > { %2997 = vmatprep.mubr.bf16.mxu1 %v5793_v58  ;;  %4963 = vmatprep.mubr.msk.bf16.mxu0 %vm2170_vm0, %v5796_v61 }
 0x279   : > { %v4159_v5 = vadd.f32 %v6354_v54, %v4157_v3 }
 0x27a   : > { %v2783_v6 = vpop.f32.mrb[176].mxu1  ;;  %v3408_v7 = vpop.f32.mrb[176].mxu0 }
 0x27b   : > { %v2785_v8 = vpop.f32.mrb[177].mxu1  ;;  %v4161_v11 = vmax.f32 %v4159_v5, 0.0  ;;  %v3409_v12 = vadd.f32 %v3408_v7, %v2783_v6  ;;  %v3410_v13 = vpop.f32.mrb[177].mxu0 }
 0x27c   : > { %v2786_v14 = vpop.f32.mrb[178].mxu1  ;;  %v3411_v17 = vpop.f32.mrb[178].mxu0  ;;  %v4175_v42 = vld [vmem:[#allocation2 + $0x2aa] sm:$0xff] }
 0x27d   : > { %v2788_v1 = vpop.f32.mrb[179].mxu1  ;;  %v5107_v19 = vpack.c.bf16 %v4161_v11, %v4160_v55  ;;  %3735 = vst [vmem:[#allocation2 + $0x2c0] sm:$0xff] %v3409_v12  ;;  %v3412_v21 = vadd.f32 %v3411_v17, %v2786_v14  ;;  %v3413_v22 = vpop.f32.mrb[179].mxu0 }
 0x27e   : > { %v4176_v58 = vld [vmem:[#allocation2 + $0x2b2] sm:$0xff] }
 0x27f   : > { %2998 = vmatmul.mubr.bf16.gmra.mrb[176].mxu1 %v5791_v9  ;;  %5151 = vst [vmem:[%s6213_s21 + $0x40] sm:$0xff] %v5107_v19   ;;  %3736 = vst [vmem:[#allocation2 + $0x2c8] sm:$0xff] %v3412_v21  ;;  %3623 = vmatmul.mubr.bf16.gmra.mrb[28].mxu0 %v5794_v10 }
 0x280   : > { %3005 = vmatprep.mubr.bf16.mxu1 %v5799_v16  ;;  %4964 = vmatprep.mubr.msk.bf16.mxu0 %vm2170_vm0, %v5802_v18 }
 0x282   : > { %v2791_v20 = vpop.f32.mrb[180].mxu1  ;;  %v3416_v23 = vpop.f32.mrb[180].mxu0 }
 0x283   : > { %v2793_v4 = vpop.f32.mrb[181].mxu1  ;;  %v3417_v26 = vadd.f32 %v3416_v23, %v2791_v20  ;;  %v3418_v27 = vpop.f32.mrb[181].mxu0 }
 0x284   : > { %v2794_v29 = vpop.f32.mrb[182].mxu1  ;;  %v4178_v31 = vld [vmem:[#allocation2 + $0x2bf] sm:$0xff]  ;;  %v3419_v32 = vpop.f32.mrb[182].mxu0 }
 0x285   : > { %v2796_v35 = vpop.f32.mrb[183].mxu1  ;;  %v4183_v38 = vmax.f32 %v4173_v15, %v4178_v31  ;;  %3737 = vst [vmem:[#allocation2 + $0x2d0] sm:$0xff] %v3417_v26  ;;  %v3420_v39 = vadd.f32 %v3419_v32, %v2794_v29  ;;  %v3421_v40 = vpop.f32.mrb[183].mxu0 }
 0x286   : > { %v4179_v41 = vld [vmem:[#allocation2 + $0x2c7] sm:$0xff] }
 0x287   : > { %3006 = vmatmul.mubr.bf16.gmra.mrb[180].mxu1 %v5797_v25  ;;  %4188 = vst [vmem:[#allocation3] sm:$0xff] %v4183_v38  ;;  %v4184_v43 = vmax.f32 %v4174_v34, %v4179_v41  ;;  %3738 = vst [vmem:[#allocation2 + $0x2d8] sm:$0xff] %v3420_v39  ;;  %3631 = vmatmul.mubr.bf16.gmra.mrb[32].mxu0 %v5800_v28 }
 0x288   : > { %3013 = vmatprep.mubr.bf16.mxu1 %v5805_v30  ;;  %4965 = vmatprep.mubr.msk.bf16.mxu0 %vm2170_vm0, %v5808_v37 }
 0x289   : > { %4189 = vst [vmem:[#allocation3 + $0x8] sm:$0xff] %v4184_v43 }
 0x28a   : > { %v2799_v24 = vpop.f32.mrb[184].mxu1  ;;  %v3424_v44 = vpop.f32.mrb[184].mxu0 }
 0x28b   : > { %v2801_v45 = vpop.f32.mrb[185].mxu1  ;;  %v3425_v56 = vadd.f32 %v3424_v44, %v2799_v24  ;;  %v3426_v48 = vpop.f32.mrb[185].mxu0 }
 0x28c   : > { %v2802_v49 = vpop.f32.mrb[186].mxu1  ;;  %v4180_v51 = vld [vmem:[#allocation2 + $0x2cf] sm:$0xff]  ;;  %v3427_v33 = vpop.f32.mrb[186].mxu0 }
 0x28d   : > { %v2804_v52 = vpop.f32.mrb[187].mxu1  ;;  %v4185_v53 = vmax.f32 %v4175_v42, %v4180_v51  ;;  %3739 = vst [vmem:[#allocation2 + $0x2e0] sm:$0xff] %v3425_v56  ;;  %v3428_v36 = vadd.f32 %v3427_v33, %v2802_v49  ;;  %v3429_v57 = vpop.f32.mrb[187].mxu0 }
 0x28e   : > { %v4181_v59 = vld [vmem:[#allocation2 + $0x2d7] sm:$0xff] }
 0x28f   : > { %3014 = vmatmul.mubr.bf16.gmra.mrb[184].mxu1 %v5803_v46  ;;  %4190 = vst [vmem:[#allocation3 + $0x10] sm:$0xff] %v4185_v53  ;;  %v4186_v60 = vmax.f32 %v4176_v58, %v4181_v59  ;;  %3740 = vst [vmem:[#allocation2 + $0x2e8] sm:$0xff] %v3428_v36  ;;  %3639 = vmatmul.mubr.bf16.gmra.mrb[36].mxu0 %v5806_v50 }
 0x290   : > { %v4193_v62 = vld [vmem:[#allocation3] ss:$2 sm:$0xff]  ;;  %v4195_v63 = vld [vmem:[#allocation3 + $0x1] ss:$2 sm:$0xff] }
 0x291   : > { %4191 = vst [vmem:[#allocation3 + $0x18] sm:$0xff] %v4186_v60  ;;  %v4197_v8 = vmax.f32 %v4193_v62, %v4195_v63 }
 0x292   : > { %v2807_v61 = vpop.f32.mrb[188].mxu1  ;;  %v3432_v0 = vpop.f32.mrb[188].mxu0 }
 0x293   : > { %v2809_v2 = vpop.f32.mrb[189].mxu1  ;;  %v3433_v47 = vadd.f32 %v3432_v0, %v2807_v61  ;;  %v3434_v3 = vpop.f32.mrb[189].mxu0  ;;  %v4199_v12 = vadd.f32 %v6354_v54, %v4197_v8 }
 0x294   : > { %v2810_v5 = vpop.f32.mrb[190].mxu1  ;;  %v3435_v6 = vpop.f32.mrb[190].mxu0 }
 0x295   : > { %v2812_v7 = vpop.f32.mrb[191].mxu1  ;;  %3741 = vst [vmem:[#allocation2 + $0x2f0] sm:$0xff] %v3433_v47  ;;  %v3436_v9 = vadd.f32 %v3435_v6, %v2810_v5  ;;  %v3437_v10 = vpop.f32.mrb[191].mxu0  ;;  %v4201_v23 = vmax.f32 %v4199_v12, 0.0 }
 0x296   : > { %v4214_v44 = vld [vmem:[#allocation2 + $0x2e4] sm:$0xff] }
 0x297   : > { %3742 = vst [vmem:[#allocation2 + $0x2f8] sm:$0xff] %v3436_v9 }
 0x298   : > { %v4194_v55 = vld [vmem:[#allocation3 + $0x10] ss:$2 sm:$0xff]  ;;  %v4196_v11 = vld [vmem:[#allocation3 + $0x11] ss:$2 sm:$0xff] }
 0x299   : > { %v4198_v13 = vmax.f32 %v4194_v55, %v4196_v11 }
 0x29a   : > { %v2815_v14 = vpop.f32.mrb[192].mxu1  ;;  %v3440_v16 = vpop.f32.mrb[192].mxu0 }
 0x29b   : > { %v2817_v17 = vpop.f32.mrb[193].mxu1  ;;  %v4200_v1 = vadd.f32 %v6354_v54, %v4198_v13  ;;  %v3441_v18 = vadd.f32 %v3440_v16, %v2815_v14  ;;  %v3442_v19 = vpop.f32.mrb[193].mxu0 }
 0x29c   : > { %v2818_v21 = vpop.f32.mrb[194].mxu1  ;;  %v3443_v22 = vpop.f32.mrb[194].mxu0  ;;  %v4215_v42 = vld [vmem:[#allocation2 + $0x2ec] sm:$0xff] }
 0x29d   : > { %v2820_v20 = vpop.f32.mrb[195].mxu1  ;;  %v4202_v4 = vmax.f32 %v4200_v1, 0.0  ;;  %3743 = vst [vmem:[#allocation2 + $0x300] sm:$0xff] %v3441_v18  ;;  %v3444_v25 = vadd.f32 %v3443_v22, %v2818_v21  ;;  %v3445_v26 = vpop.f32.mrb[195].mxu0  ;;  %v6469_v22 = vld [vmem:[%s6512_s2] ss:$0 sm:$0xff] }
 0x29e   : > { %v4216_v60 = vld [vmem:[#allocation2 + $0x2f4] sm:$0xff] }
 0x29f   : > { %v5112_v27 = vpack.c.bf16 %v4202_v4, %v4201_v23  ;;  %3744 = vst [vmem:[#allocation2 + $0x308] sm:$0xff] %v3444_v25 }
 0x2a1   : > { %5152 = vst [vmem:[%s6213_s21 + $0x48] sm:$0xff] %v5112_v27  }
 0x2a2   : > { %v2823_v29 = vpop.f32.mrb[196].mxu1  ;;  %v3448_v28 = vpop.f32.mrb[196].mxu0 }
 0x2a3   : > { %v2825_v30 = vpop.f32.mrb[197].mxu1  ;;  %v3449_v15 = vadd.f32 %v3448_v28, %v2823_v29  ;;  %v3450_v31 = vpop.f32.mrb[197].mxu0 }
 0x2a4   : > { %v2826_v32 = vpop.f32.mrb[198].mxu1  ;;  %v3451_v54 = vpop.f32.mrb[198].mxu0  ;;  %v4217_v0 = vld [vmem:[#allocation2 + $0x2fc] sm:$0xff] }
 0x2a5   : > { %v2828_v35 = vpop.f32.mrb[199].mxu1  ;;  %3745 = vst [vmem:[#allocation2 + $0x310] sm:$0xff] %v3449_v15  ;;  %v3452_v37 = vadd.f32 %v3451_v54, %v2826_v32  ;;  %v3453_v38 = vpop.f32.mrb[199].mxu0 }
 0x2a7   : > { %3746 = vst [vmem:[#allocation2 + $0x318] sm:$0xff] %v3452_v37 }
 0x2aa   : > { %v2831_v39 = vpop.f32.mrb[200].mxu1  ;;  %v3456_v40 = vpop.f32.mrb[200].mxu0 }
 0x2ab   : > { %v2833_v34 = vpop.f32.mrb[201].mxu1  ;;  %v3457_v41 = vadd.f32 %v3456_v40, %v2831_v39  ;;  %v3458_v43 = vpop.f32.mrb[201].mxu0 }
 0x2ac   : > { %v2834_v24 = vpop.f32.mrb[202].mxu1  ;;  %v4219_v45 = vld [vmem:[#allocation2 + $0x309] sm:$0xff]  ;;  %v3459_v46 = vpop.f32.mrb[202].mxu0 }
 0x2ad   : > { %v2836_v56 = vpop.f32.mrb[203].mxu1  ;;  %v4224_v48 = vmax.f32 %v4214_v44, %v4219_v45  ;;  %3747 = vst [vmem:[#allocation2 + $0x320] sm:$0xff] %v3457_v41  ;;  %v3460_v49 = vadd.f32 %v3459_v46, %v2834_v24  ;;  %v3461_v50 = vpop.f32.mrb[203].mxu0 }
 0x2ae   : > { %v4220_v51 = vld [vmem:[#allocation2 + $0x311] sm:$0xff] }
 0x2af   : > { %4229 = vst [vmem:[#allocation3] sm:$0xff] %v4224_v48  ;;  %v4225_v33 = vmax.f32 %v4215_v42, %v4220_v51  ;;  %3748 = vst [vmem:[#allocation2 + $0x328] sm:$0xff] %v3460_v49 }
 0x2b1   : > { %4230 = vst [vmem:[#allocation3 + $0x8] sm:$0xff] %v4225_v33 }
 0x2b2   : > { %v2839_v52 = vpop.f32.mrb[204].mxu1  ;;  %v3464_v53 = vpop.f32.mrb[204].mxu0 }
 0x2b3   : > { %v2841_v36 = vpop.f32.mrb[205].mxu1  ;;  %v3465_v57 = vadd.f32 %v3464_v53, %v2839_v52  ;;  %v3466_v58 = vpop.f32.mrb[205].mxu0 }
 0x2b4   : > { %v2842_v59 = vpop.f32.mrb[206].mxu1  ;;  %v4221_v61 = vld [vmem:[#allocation2 + $0x319] sm:$0xff]  ;;  %v3467_v62 = vpop.f32.mrb[206].mxu0 }
 0x2b5   : > { %v2844_v63 = vpop.f32.mrb[207].mxu1  ;;  %v4226_v2 = vmax.f32 %v4216_v60, %v4221_v61  ;;  %3749 = vst [vmem:[#allocation2 + $0x330] sm:$0xff] %v3465_v57  ;;  %v3468_v47 = vadd.f32 %v3467_v62, %v2842_v59  ;;  %v3469_v3 = vpop.f32.mrb[207].mxu0 }
 0x2b6   : > { %v4222_v5 = vld [vmem:[#allocation2 + $0x321] sm:$0xff] }
 0x2b7   : > { %4231 = vst [vmem:[#allocation3 + $0x10] sm:$0xff] %v4226_v2  ;;  %v4227_v6 = vmax.f32 %v4217_v0, %v4222_v5  ;;  %3750 = vst [vmem:[#allocation2 + $0x338] sm:$0xff] %v3468_v47 }
 0x2b8   : > { %v4234_v8 = vld [vmem:[#allocation3] ss:$2 sm:$0xff]  ;;  %v4236_v9 = vld [vmem:[#allocation3 + $0x1] ss:$2 sm:$0xff] }
 0x2b9   : > { %4232 = vst [vmem:[#allocation3 + $0x18] sm:$0xff] %v4227_v6  ;;  %v4238_v17 = vmax.f32 %v4234_v8, %v4236_v9 }
 0x2ba   : > { %v2847_v7 = vpop.f32.mrb[208].mxu1  ;;  %v3472_v10 = vpop.f32.mrb[208].mxu0 }
 0x2bb   : > { %v2849_v55 = vpop.f32.mrb[209].mxu1  ;;  %v3473_v11 = vadd.f32 %v3472_v10, %v2847_v7  ;;  %v3474_v12 = vpop.f32.mrb[209].mxu0  ;;  %v4240_v20 = vadd.f32 %v6469_v22, %v4238_v17 }
 0x2bc   : > { %v2850_v13 = vpop.f32.mrb[210].mxu1  ;;  %v3475_v14 = vpop.f32.mrb[210].mxu0  ;;  %v4255_v48 = vld [vmem:[#allocation2 + $0x32e] sm:$0xff] }
 0x2bd   : > { %v2852_v16 = vpop.f32.mrb[211].mxu1  ;;  %3751 = vst [vmem:[#allocation2 + $0x340] sm:$0xff] %v3473_v11  ;;  %v3476_v1 = vadd.f32 %v3475_v14, %v2850_v13  ;;  %v3477_v18 = vpop.f32.mrb[211].mxu0  ;;  %v4242_v32 = vmax.f32 %v4240_v20, 0.0 }
 0x2be   : > { %v4256_v57 = vld [vmem:[#allocation2 + $0x336] sm:$0xff] }
 0x2bf   : > { %3752 = vst [vmem:[#allocation2 + $0x348] sm:$0xff] %v3476_v1 }
 0x2c0   : > { %v4235_v19 = vld [vmem:[#allocation3 + $0x10] ss:$2 sm:$0xff]  ;;  %v4237_v21 = vld [vmem:[#allocation3 + $0x11] ss:$2 sm:$0xff] }
 0x2c1   : > { %v4239_v23 = vmax.f32 %v4235_v19, %v4237_v21 }
 0x2c2   : > { %v2855_v4 = vpop.f32.mrb[212].mxu1  ;;  %v3480_v25 = vpop.f32.mrb[212].mxu0 }
 0x2c3   : > { %v2857_v26 = vpop.f32.mrb[213].mxu1  ;;  %v4241_v27 = vadd.f32 %v6469_v22, %v4239_v23  ;;  %v3481_v29 = vadd.f32 %v3480_v25, %v2855_v4  ;;  %v3482_v28 = vpop.f32.mrb[213].mxu0 }
 0x2c4   : > { %v2858_v30 = vpop.f32.mrb[214].mxu1  ;;  %v3483_v15 = vpop.f32.mrb[214].mxu0  ;;  %v4257_v0 = vld [vmem:[#allocation2 + $0x33e] sm:$0xff] }
 0x2c5   : > { %v2860_v31 = vpop.f32.mrb[215].mxu1  ;;  %v4243_v54 = vmax.f32 %v4241_v27, 0.0  ;;  %3753 = vst [vmem:[#allocation2 + $0x350] sm:$0xff] %v3481_v29  ;;  %v3484_v35 = vadd.f32 %v3483_v15, %v2858_v30  ;;  %v3485_v37 = vpop.f32.mrb[215].mxu0 }
 0x2c6   : > { %v4258_v10 = vld [vmem:[#allocation2 + $0x346] sm:$0xff] }
 0x2c7   : > { %v5117_v38 = vpack.c.bf16 %v4243_v54, %v4242_v32  ;;  %3754 = vst [vmem:[#allocation2 + $0x358] sm:$0xff] %v3484_v35 }
 0x2c9   : > { %5153 = vst [vmem:[%s6213_s21 + $0x50] sm:$0xff] %v5117_v38  }
 0x2ca   : > { %v2863_v39 = vpop.f32.mrb[216].mxu1  ;;  %v3488_v40 = vpop.f32.mrb[216].mxu0 }
 0x2cb   : > { %v2865_v34 = vpop.f32.mrb[217].mxu1  ;;  %v3489_v41 = vadd.f32 %v3488_v40, %v2863_v39  ;;  %v3490_v43 = vpop.f32.mrb[217].mxu0 }
 0x2cc   : > { %v2866_v24 = vpop.f32.mrb[218].mxu1  ;;  %v3491_v44 = vpop.f32.mrb[218].mxu0 }
 0x2cd   : > { %v2868_v45 = vpop.f32.mrb[219].mxu1  ;;  %3755 = vst [vmem:[#allocation2 + $0x360] sm:$0xff] %v3489_v41  ;;  %v3492_v46 = vadd.f32 %v3491_v44, %v2866_v24  ;;  %v3493_v56 = vpop.f32.mrb[219].mxu0 }
 0x2ce   : > { %v4260_v49 = vld [vmem:[#allocation2 + $0x353] sm:$0xff] }
 0x2cf   : > { %v4265_v50 = vmax.f32 %v4255_v48, %v4260_v49  ;;  %3756 = vst [vmem:[#allocation2 + $0x368] sm:$0xff] %v3492_v46 }
 0x2d1   : > { %4270 = vst [vmem:[#allocation3] sm:$0xff] %v4265_v50 }
 0x2d2   : > { %v2871_v42 = vpop.f32.mrb[220].mxu1  ;;  %v3496_v51 = vpop.f32.mrb[220].mxu0 }
 0x2d3   : > { %v2873_v33 = vpop.f32.mrb[221].mxu1  ;;  %v3497_v52 = vadd.f32 %v3496_v51, %v2871_v42  ;;  %v3498_v53 = vpop.f32.mrb[221].mxu0 }
 0x2d4   : > { %v2874_v36 = vpop.f32.mrb[222].mxu1  ;;  %v4261_v58 = vld [vmem:[#allocation2 + $0x35b] sm:$0xff]  ;;  %v3499_v59 = vpop.f32.mrb[222].mxu0 }
 0x2d5   : > { %v2876_v60 = vpop.f32.mrb[223].mxu1  ;;  %v4266_v61 = vmax.f32 %v4256_v57, %v4261_v58  ;;  %3757 = vst [vmem:[#allocation2 + $0x370] sm:$0xff] %v3497_v52  ;;  %v6474_v62 = vadd.f32 %v3499_v59, %v2874_v36  ;;  %v3501_v63 = vpop.f32.mrb[223].mxu0 }
 0x2d6   : > { %v4262_v2 = vld [vmem:[#allocation2 + $0x363] sm:$0xff] }
 0x2d7   : > { %4271 = vst [vmem:[#allocation3 + $0x8] sm:$0xff] %v4266_v61  ;;  %v4267_v47 = vmax.f32 %v4257_v0, %v4262_v2 }
 0x2d9   : > { %4272 = vst [vmem:[#allocation3 + $0x10] sm:$0xff] %v4267_v47 }
 0x2da   : > { %v2879_v3 = vpop.f32.mrb[224].mxu1  ;;  %v3504_v5 = vpop.f32.mrb[224].mxu0 }
 0x2db   : > { %v2881_v6 = vpop.f32.mrb[225].mxu1  ;;  %v6476_v7 = vadd.f32 %v3504_v5, %v2879_v3  ;;  %v3506_v8 = vpop.f32.mrb[225].mxu0 }
 0x2dc   : > { %v2882_v9 = vpop.f32.mrb[226].mxu1  ;;  %v4263_v55 = vld [vmem:[#allocation2 + $0x36b] sm:$0xff]  ;;  %v3507_v11 = vpop.f32.mrb[226].mxu0 }
 0x2dd   : > { %v2884_v12 = vpop.f32.mrb[227].mxu1  ;;  %v4268_v13 = vmax.f32 %v4258_v10, %v4263_v55  ;;  %v6478_v14 = vadd.f32 %v3507_v11, %v2882_v9  ;;  %v3509_v16 = vpop.f32.mrb[227].mxu0 }
 0x2de   : > { %v4275_v17 = vld [vmem:[#allocation3] ss:$2 sm:$0xff]  ;;  %v4277_v1 = vld [vmem:[#allocation3 + $0x1] ss:$2 sm:$0xff] }
 0x2df   : > { %4273 = vst [vmem:[#allocation3 + $0x18] sm:$0xff] %v4268_v13  ;;  %v4279_v20 = vmax.f32 %v4275_v17, %v4277_v1 }
 0x2e1   : > { %v4281_v31 = vadd.f32 %v6469_v22, %v4279_v20 }
 0x2e2   : > { %v2887_v18 = vpop.f32.mrb[228].mxu1  ;;  %v3512_v19 = vpop.f32.mrb[228].mxu0 }
 0x2e3   : > { %v2889_v21 = vpop.f32.mrb[229].mxu1  ;;  %v6480_v23 = vadd.f32 %v3512_v19, %v2887_v18  ;;  %v3514_v4 = vpop.f32.mrb[229].mxu0  ;;  %v4283_v39 = vmax.f32 %v4281_v31, 0.0 }
 0x2e4   : > { %v2890_v25 = vpop.f32.mrb[230].mxu1  ;;  %v3515_v26 = vpop.f32.mrb[230].mxu0 }
 0x2e5   : > { %v2892_v27 = vpop.f32.mrb[231].mxu1  ;;  %v3516_v29 = vadd.f32 %v3515_v26, %v2890_v25  ;;  %v3517_v28 = vpop.f32.mrb[231].mxu0 }
 0x2e6   : > { %v4276_v30 = vld [vmem:[#allocation3 + $0x10] ss:$2 sm:$0xff]  ;;  %v4278_v15 = vld [vmem:[#allocation3 + $0x11] ss:$2 sm:$0xff] }
 0x2e7   : > { %v4280_v32 = vmax.f32 %v4276_v30, %v4278_v15  ;;  %3762 = vst [vmem:[#allocation2 + $0x398] sm:$0xff] %v3516_v29 }
 0x2e9   : > { %v4282_v54 = vadd.f32 %v6469_v22, %v4280_v32 }
 0x2ea   : > { %v2895_v35 = vpop.f32.mrb[232].mxu1  ;;  %v3520_v37 = vpop.f32.mrb[232].mxu0 }
 0x2eb   : > { %v2897_v38 = vpop.f32.mrb[233].mxu1  ;;  %v4284_v40 = vmax.f32 %v4282_v54, 0.0  ;;  %v3521_v34 = vadd.f32 %v3520_v37, %v2895_v35  ;;  %v3522_v41 = vpop.f32.mrb[233].mxu0 }
 0x2ec   : > { %v2898_v43 = vpop.f32.mrb[234].mxu1  ;;  %v3523_v24 = vpop.f32.mrb[234].mxu0 }
 0x2ed   : > { %v2900_v44 = vpop.f32.mrb[235].mxu1  ;;  %v5122_v45 = vpack.c.bf16 %v4284_v40, %v4283_v39  ;;  %3763 = vst [vmem:[#allocation2 + $0x3a0] sm:$0xff] %v3521_v34  ;;  %v3524_v46 = vadd.f32 %v3523_v24, %v2898_v43  ;;  %v3525_v56 = vpop.f32.mrb[235].mxu0 }
 0x2ef   : > { %5154 = vst [vmem:[%s6213_s21 + $0x58] sm:$0xff] %v5122_v45   ;;  %3764 = vst [vmem:[#allocation2 + $0x3a8] sm:$0xff] %v3524_v46 }
 0x2f2   : > { %v2903_v48 = vpop.f32.mrb[236].mxu1  ;;  %v3528_v49 = vpop.f32.mrb[236].mxu0 }
 0x2f3   : > { %v2905_v50 = vpop.f32.mrb[237].mxu1  ;;  %v3529_v42 = vadd.f32 %v3528_v49, %v2903_v48  ;;  %v3530_v51 = vpop.f32.mrb[237].mxu0 }
 0x2f4   : > { %v2906_v33 = vpop.f32.mrb[238].mxu1  ;;  %v4301_v52 = vld [vmem:[#allocation2 + $0x39d] sm:$0xff]  ;;  %v3531_v53 = vpop.f32.mrb[238].mxu0 }
 0x2f5   : > { %v2908_v36 = vpop.f32.mrb[239].mxu1  ;;  %v4306_v57 = vmax.f32 %v6474_v62, %v4301_v52  ;;  %3765 = vst [vmem:[#allocation2 + $0x3b0] sm:$0xff] %v3529_v42  ;;  %v3532_v58 = vadd.f32 %v3531_v53, %v2906_v33  ;;  %v3533_v59 = vpop.f32.mrb[239].mxu0 }
 0x2f6   : > { %v4302_v60 = vld [vmem:[#allocation2 + $0x3a5] sm:$0xff] }
 0x2f7   : > { %4311 = vst [vmem:[#allocation3] sm:$0xff] %v4306_v57  ;;  %v4307_v61 = vmax.f32 %v6476_v7, %v4302_v60  ;;  %3766 = vst [vmem:[#allocation2 + $0x3b8] sm:$0xff] %v3532_v58 }
 0x2f9   : > { %4312 = vst [vmem:[#allocation3 + $0x8] sm:$0xff] %v4307_v61 }
 0x2fa   : > { %v2911_v63 = vpop.f32.mrb[240].mxu1  ;;  %v3536_v0 = vpop.f32.mrb[240].mxu0 }
 0x2fb   : > { %v2913_v2 = vpop.f32.mrb[241].mxu1  ;;  %v3537_v47 = vadd.f32 %v3536_v0, %v2911_v63  ;;  %v3538_v3 = vpop.f32.mrb[241].mxu0 }
 0x2fc   : > { %v2914_v5 = vpop.f32.mrb[242].mxu1  ;;  %v4303_v6 = vld [vmem:[#allocation2 + $0x3ad] sm:$0xff]  ;;  %v3539_v8 = vpop.f32.mrb[242].mxu0 }
 0x2fd   : > { %v2916_v9 = vpop.f32.mrb[243].mxu1  ;;  %v4308_v62 = vmax.f32 %v6478_v14, %v4303_v6  ;;  %3767 = vst [vmem:[#allocation2 + $0x3c0] sm:$0xff] %v3537_v47  ;;  %v3540_v10 = vadd.f32 %v3539_v8, %v2914_v5  ;;  %v3541_v55 = vpop.f32.mrb[243].mxu0 }
 0x2fe   : > { %v4304_v11 = vld [vmem:[#allocation2 + $0x3b5] sm:$0xff] }
 0x2ff   : > { %4313 = vst [vmem:[#allocation3 + $0x10] sm:$0xff] %v4308_v62  ;;  %v4309_v7 = vmax.f32 %v6480_v23, %v4304_v11  ;;  %3768 = vst [vmem:[#allocation2 + $0x3c8] sm:$0xff] %v3540_v10 }
 0x300   : > { %v4316_v13 = vld [vmem:[#allocation3] ss:$2 sm:$0xff]  ;;  %v4318_v16 = vld [vmem:[#allocation3 + $0x1] ss:$2 sm:$0xff] }
 0x301   : > { %4314 = vst [vmem:[#allocation3 + $0x18] sm:$0xff] %v4309_v7  ;;  %v4320_v14 = vmax.f32 %v4316_v13, %v4318_v16 }
 0x302   : > { %v2919_v12 = vpop.f32.mrb[244].mxu1  ;;  %v3544_v17 = vpop.f32.mrb[244].mxu0 }
 0x303   : > { %v2921_v1 = vpop.f32.mrb[245].mxu1  ;;  %v3545_v18 = vadd.f32 %v3544_v17, %v2919_v12  ;;  %v3546_v19 = vpop.f32.mrb[245].mxu0  ;;  %v4322_v23 = vadd.f32 %v6469_v22, %v4320_v14 }
 0x304   : > { %v2922_v21 = vpop.f32.mrb[246].mxu1  ;;  %v3547_v20 = vpop.f32.mrb[246].mxu0 }
 0x305   : > { %v2924_v4 = vpop.f32.mrb[247].mxu1  ;;  %3769 = vst [vmem:[#allocation2 + $0x3d0] sm:$0xff] %v3545_v18  ;;  %v3548_v25 = vadd.f32 %v3547_v20, %v2922_v21  ;;  %v3549_v26 = vpop.f32.mrb[247].mxu0  ;;  %v4324_v40 = vmax.f32 %v4322_v23, 0.0 }
 0x306   : > { %v4337_v52 = vld [vmem:[#allocation2 + $0x3c2] sm:$0xff] }
 0x307   : > { %3770 = vst [vmem:[#allocation2 + $0x3d8] sm:$0xff] %v3548_v25 }
 0x308   : > { %v4317_v27 = vld [vmem:[#allocation3 + $0x10] ss:$2 sm:$0xff]  ;;  %v4319_v29 = vld [vmem:[#allocation3 + $0x11] ss:$2 sm:$0xff] }
 0x309   : > { %v4321_v28 = vmax.f32 %v4317_v27, %v4319_v29 }
 0x30a   : > { %v2927_v30 = vpop.f32.mrb[248].mxu1  ;;  %v3552_v15 = vpop.f32.mrb[248].mxu0 }
 0x30b   : > { %v2929_v31 = vpop.f32.mrb[249].mxu1  ;;  %v4323_v32 = vadd.f32 %v6469_v22, %v4321_v28  ;;  %v3553_v54 = vadd.f32 %v3552_v15, %v2927_v30  ;;  %v3554_v35 = vpop.f32.mrb[249].mxu0 }
 0x30c   : > { %v2930_v37 = vpop.f32.mrb[250].mxu1  ;;  %v3555_v38 = vpop.f32.mrb[250].mxu0  ;;  %v4338_v0 = vld [vmem:[#allocation2 + $0x3ca] sm:$0xff] }
 0x30d   : > { %v2932_v39 = vpop.f32.mrb[251].mxu1  ;;  %v4325_v34 = vmax.f32 %v4323_v32, 0.0  ;;  %3771 = vst [vmem:[#allocation2 + $0x3e0] sm:$0xff] %v3553_v54  ;;  %v3556_v41 = vadd.f32 %v3555_v38, %v2930_v37  ;;  %v3557_v43 = vpop.f32.mrb[251].mxu0 }
 0x30e   : > { %v4339_v9 = vld [vmem:[#allocation2 + $0x3d2] sm:$0xff] }
 0x30f   : > { %v5127_v24 = vpack.c.bf16 %v4325_v34, %v4324_v40  ;;  %3772 = vst [vmem:[#allocation2 + $0x3e8] sm:$0xff] %v3556_v41 }
 0x311   : > { %5155 = vst [vmem:[%s6213_s21 + $0x60] sm:$0xff] %v5127_v24  }
 0x312   : > { %v2935_v44 = vpop.f32.mrb[252].mxu1  ;;  %v3560_v45 = vpop.f32.mrb[252].mxu0 }
 0x313   : > { %v2937_v46 = vpop.f32.mrb[253].mxu1  ;;  %v3561_v56 = vadd.f32 %v3560_v45, %v2935_v44  ;;  %v3562_v48 = vpop.f32.mrb[253].mxu0 }
 0x314   : > { %v2938_v49 = vpop.f32.mrb[254].mxu1  ;;  %v3563_v50 = vpop.f32.mrb[254].mxu0  ;;  %v4340_v17 = vld [vmem:[#allocation2 + $0x3da] sm:$0xff] }
 0x315   : > { %v2940_v42 = vpop.f32.mrb[255].mxu1  ;;  %3773 = vst [vmem:[#allocation2 + $0x3f0] sm:$0xff] %v3561_v56  ;;  %v3564_v51 = vadd.f32 %v3563_v50, %v2938_v49  ;;  %v3565_v33 = vpop.f32.mrb[255].mxu0 }
 0x316   : > { %v4342_v53 = vld [vmem:[#allocation2 + $0x3e7] sm:$0xff] }
 0x317   : > { %v4347_v36 = vmax.f32 %v4337_v52, %v4342_v53  ;;  %3774 = vst [vmem:[#allocation2 + $0x3f8] sm:$0xff] %v3564_v51 }
 0x319   : > { %4352 = vst [vmem:[#allocation3] sm:$0xff] %v4347_v36 }
 0x31a   : > { %v2943_v57 = vpop.f32.mrb[148].mxu1  ;;  %v3568_v58 = vpop.f32.mrb[0].mxu0 }
 0x31b   : > { %v2945_v59 = vpop.f32.mrb[149].mxu1  ;;  %v3569_v60 = vadd.f32 %v3568_v58, %v2943_v57  ;;  %v3570_v61 = vpop.f32.mrb[1].mxu0 }
 0x31c   : > { %v2946_v63 = vpop.f32.mrb[150].mxu1  ;;  %v4343_v2 = vld [vmem:[#allocation2 + $0x3ef] sm:$0xff]  ;;  %v3571_v47 = vpop.f32.mrb[2].mxu0 }
 0x31d   : > { %v2948_v3 = vpop.f32.mrb[151].mxu1  ;;  %v4348_v5 = vmax.f32 %v4338_v0, %v4343_v2  ;;  %3775 = vst [vmem:[#allocation2 + $0x400] sm:$0xff] %v3569_v60  ;;  %v3572_v6 = vadd.f32 %v3571_v47, %v2946_v63  ;;  %v3573_v8 = vpop.f32.mrb[3].mxu0 }
 0x31e   : > { %v4344_v62 = vld [vmem:[#allocation2 + $0x3f7] sm:$0xff] }
 0x31f   : > { %4353 = vst [vmem:[#allocation3 + $0x8] sm:$0xff] %v4348_v5  ;;  %v4349_v10 = vmax.f32 %v4339_v9, %v4344_v62  ;;  %3776 = vst [vmem:[#allocation2 + $0x408] sm:$0xff] %v3572_v6 }
 0x321   : > { %4354 = vst [vmem:[#allocation3 + $0x10] sm:$0xff] %v4349_v10 }
 0x322   : > { %v2951_v55 = vpop.f32.mrb[152].mxu1  ;;  %v3576_v11 = vpop.f32.mrb[4].mxu0 }
 0x323   : > { %v2953_v7 = vpop.f32.mrb[153].mxu1  ;;  %v3577_v12 = vadd.f32 %v3576_v11, %v2951_v55  ;;  %v3578_v13 = vpop.f32.mrb[5].mxu0 }
 0x324   : > { %v2954_v16 = vpop.f32.mrb[154].mxu1  ;;  %v4345_v1 = vld [vmem:[#allocation2 + $0x3ff] sm:$0xff]  ;;  %v3579_v18 = vpop.f32.mrb[6].mxu0 }
 0x325   : > { %v2956_v19 = vpop.f32.mrb[155].mxu1  ;;  %v4350_v21 = vmax.f32 %v4340_v17, %v4345_v1  ;;  %3777 = vst [vmem:[#allocation2 + $0x410] sm:$0xff] %v3577_v12  ;;  %v3580_v20 = vadd.f32 %v3579_v18, %v2954_v16  ;;  %v3581_v4 = vpop.f32.mrb[7].mxu0 }
 0x326   : > { %v4357_v14 = vld [vmem:[#allocation3] ss:$2 sm:$0xff]  ;;  %v4359_v25 = vld [vmem:[#allocation3 + $0x1] ss:$2 sm:$0xff] }
 0x327   : > { %4355 = vst [vmem:[#allocation3 + $0x18] sm:$0xff] %v4350_v21  ;;  %3778 = vst [vmem:[#allocation2 + $0x418] sm:$0xff] %v3580_v20  ;;  %v4361_v23 = vmax.f32 %v4357_v14, %v4359_v25 }
 0x329   : > { %v4363_v39 = vadd.f32 %v6469_v22, %v4361_v23 }
 0x32a   : > { %v2959_v26 = vpop.f32.mrb[156].mxu1  ;;  %v3584_v27 = vpop.f32.mrb[8].mxu0 }
 0x32b   : > { %v2961_v29 = vpop.f32.mrb[157].mxu1  ;;  %v3585_v28 = vadd.f32 %v3584_v27, %v2959_v26  ;;  %v3586_v30 = vpop.f32.mrb[9].mxu0  ;;  %v4365_v44 = vmax.f32 %v4363_v39, 0.0 }
 0x32c   : > { %v2962_v15 = vpop.f32.mrb[158].mxu1  ;;  %v3587_v31 = vpop.f32.mrb[10].mxu0  ;;  %v4378_v2 = vld [vmem:[#allocation2 + $0x40c] sm:$0xff] }
 0x32d   : > { %v2964_v32 = vpop.f32.mrb[159].mxu1  ;;  %3779 = vst [vmem:[#allocation2 + $0x420] sm:$0xff] %v3585_v28  ;;  %v3588_v54 = vadd.f32 %v3587_v31, %v2962_v15  ;;  %v3589_v35 = vpop.f32.mrb[11].mxu0 }
 0x32e   : > { %v4358_v37 = vld [vmem:[#allocation3 + $0x10] ss:$2 sm:$0xff]  ;;  %v4360_v38 = vld [vmem:[#allocation3 + $0x11] ss:$2 sm:$0xff] }
 0x32f   : > { %v4362_v40 = vmax.f32 %v4358_v37, %v4360_v38  ;;  %3780 = vst [vmem:[#allocation2 + $0x428] sm:$0xff] %v3588_v54  ;;  %v4379_v55 = vld [vmem:[#allocation2 + $0x414] sm:$0xff] }
 0x331   : > { %v4364_v34 = vadd.f32 %v6469_v22, %v4362_v40 }
 0x332   : > { %v2967_v41 = vpop.f32.mrb[160].mxu1  ;;  %v3592_v43 = vpop.f32.mrb[12].mxu0 }
 0x333   : > { %v2969_v24 = vpop.f32.mrb[161].mxu1  ;;  %v4366_v45 = vmax.f32 %v4364_v34, 0.0  ;;  %v3593_v46 = vadd.f32 %v3592_v43, %v2967_v41  ;;  %v3594_v56 = vpop.f32.mrb[13].mxu0 }
 0x334   : > { %v2970_v48 = vpop.f32.mrb[162].mxu1  ;;  %v3595_v49 = vpop.f32.mrb[14].mxu0  ;;  %v4380_v1 = vld [vmem:[#allocation2 + $0x41c] sm:$0xff] }
 0x335   : > { %v2972_v50 = vpop.f32.mrb[163].mxu1  ;;  %v5132_v42 = vpack.c.bf16 %v4366_v45, %v4365_v44  ;;  %3781 = vst [vmem:[#allocation2 + $0x430] sm:$0xff] %v3593_v46  ;;  %v3596_v51 = vadd.f32 %v3595_v49, %v2970_v48  ;;  %v3597_v33 = vpop.f32.mrb[15].mxu0 }
 0x336   : > { %v4381_v27 = vld [vmem:[#allocation2 + $0x424] sm:$0xff] }
 0x337   : > { %5156 = vst [vmem:[%s6213_s21 + $0x68] sm:$0xff] %v5132_v42   ;;  %3782 = vst [vmem:[#allocation2 + $0x438] sm:$0xff] %v3596_v51 }
 0x33a   : > { %v2975_v52 = vpop.f32.mrb[164].mxu1  ;;  %v3600_v53 = vpop.f32.mrb[16].mxu0 }
 0x33b   : > { %v2977_v36 = vpop.f32.mrb[165].mxu1  ;;  %v3601_v57 = vadd.f32 %v3600_v53, %v2975_v52  ;;  %v3602_v58 = vpop.f32.mrb[17].mxu0 }
 0x33c   : > { %v2978_v59 = vpop.f32.mrb[166].mxu1  ;;  %v3603_v60 = vpop.f32.mrb[18].mxu0 }
 0x33d   : > { %v2980_v61 = vpop.f32.mrb[167].mxu1  ;;  %3783 = vst [vmem:[#allocation2 + $0x440] sm:$0xff] %v3601_v57  ;;  %v3604_v63 = vadd.f32 %v3603_v60, %v2978_v59  ;;  %v3605_v0 = vpop.f32.mrb[19].mxu0 }
 0x33e   : > { %v4383_v47 = vld [vmem:[#allocation2 + $0x431] sm:$0xff] }
 0x33f   : > { %v4388_v3 = vmax.f32 %v4378_v2, %v4383_v47  ;;  %3784 = vst [vmem:[#allocation2 + $0x448] sm:$0xff] %v3604_v63 }
 0x341   : > { %4393 = vst [vmem:[#allocation3] sm:$0xff] %v4388_v3 }
 0x342   : > { %v2983_v5 = vpop.f32.mrb[168].mxu1  ;;  %v3608_v6 = vpop.f32.mrb[20].mxu0 }
 0x343   : > { %v2985_v8 = vpop.f32.mrb[169].mxu1  ;;  %v3609_v9 = vadd.f32 %v3608_v6, %v2983_v5  ;;  %v3610_v62 = vpop.f32.mrb[21].mxu0 }
 0x344   : > { %v2986_v10 = vpop.f32.mrb[170].mxu1  ;;  %v4384_v11 = vld [vmem:[#allocation2 + $0x439] sm:$0xff]  ;;  %v3611_v7 = vpop.f32.mrb[22].mxu0 }
 0x345   : > { %v2988_v12 = vpop.f32.mrb[171].mxu1  ;;  %v4389_v13 = vmax.f32 %v4379_v55, %v4384_v11  ;;  %3785 = vst [vmem:[#allocation2 + $0x450] sm:$0xff] %v3609_v9  ;;  %v3612_v16 = vadd.f32 %v3611_v7, %v2986_v10  ;;  %v3613_v17 = vpop.f32.mrb[23].mxu0 }
 0x346   : > { %v4385_v18 = vld [vmem:[#allocation2 + $0x441] sm:$0xff] }
 0x347   : > { %4394 = vst [vmem:[#allocation3 + $0x8] sm:$0xff] %v4389_v13  ;;  %v4390_v19 = vmax.f32 %v4380_v1, %v4385_v18  ;;  %3786 = vst [vmem:[#allocation2 + $0x458] sm:$0xff] %v3612_v16 }
 0x349   : > { %4395 = vst [vmem:[#allocation3 + $0x10] sm:$0xff] %v4390_v19 }
 0x34a   : > { %v2991_v21 = vpop.f32.mrb[172].mxu1  ;;  %v3616_v20 = vpop.f32.mrb[24].mxu0 }
 0x34b   : > { %v2993_v4 = vpop.f32.mrb[173].mxu1  ;;  %v3617_v14 = vadd.f32 %v3616_v20, %v2991_v21  ;;  %v3618_v25 = vpop.f32.mrb[25].mxu0 }
 0x34c   : > { %v2994_v26 = vpop.f32.mrb[174].mxu1  ;;  %v4386_v29 = vld [vmem:[#allocation2 + $0x449] sm:$0xff]  ;;  %v3619_v23 = vpop.f32.mrb[26].mxu0 }
 0x34d   : > { %v2996_v28 = vpop.f32.mrb[175].mxu1  ;;  %v4391_v30 = vmax.f32 %v4381_v27, %v4386_v29  ;;  %3787 = vst [vmem:[#allocation2 + $0x460] sm:$0xff] %v3617_v14  ;;  %v3620_v15 = vadd.f32 %v3619_v23, %v2994_v26  ;;  %v3621_v31 = vpop.f32.mrb[27].mxu0 }
 0x34e   : > { %v4398_v32 = vld [vmem:[#allocation3] ss:$2 sm:$0xff]  ;;  %v4400_v54 = vld [vmem:[#allocation3 + $0x1] ss:$2 sm:$0xff]  ;;  %v4419_v9 = vld [vmem:[#allocation2 + $0x456] sm:$0xff] }
 0x34f   : > { %4396 = vst [vmem:[#allocation3 + $0x18] sm:$0xff] %v4391_v30  ;;  %3788 = vst [vmem:[#allocation2 + $0x468] sm:$0xff] %v3620_v15  ;;  %v4402_v39 = vmax.f32 %v4398_v32, %v4400_v54 }
 0x351   : > { %v4404_v48 = vadd.f32 %v6469_v22, %v4402_v39 }
 0x352   : > { %v2999_v35 = vpop.f32.mrb[176].mxu1  ;;  %v3624_v37 = vpop.f32.mrb[28].mxu0 }
 0x353   : > { %v3001_v38 = vpop.f32.mrb[177].mxu1  ;;  %v3625_v40 = vadd.f32 %v3624_v37, %v2999_v35  ;;  %v3626_v34 = vpop.f32.mrb[29].mxu0  ;;  %v4406_v52 = vmax.f32 %v4404_v48, 0.0 }
 0x354   : > { %v3002_v41 = vpop.f32.mrb[178].mxu1  ;;  %v3627_v43 = vpop.f32.mrb[30].mxu0  ;;  %v4420_v13 = vld [vmem:[#allocation2 + $0x45e] sm:$0xff] }
 0x355   : > { %v3004_v24 = vpop.f32.mrb[179].mxu1  ;;  %3789 = vst [vmem:[#allocation2 + $0x470] sm:$0xff] %v3625_v40  ;;  %v3628_v44 = vadd.f32 %v3627_v43, %v3002_v41  ;;  %v3629_v45 = vpop.f32.mrb[31].mxu0 }
 0x356   : > { %v4399_v46 = vld [vmem:[#allocation3 + $0x10] ss:$2 sm:$0xff]  ;;  %v4401_v56 = vld [vmem:[#allocation3 + $0x11] ss:$2 sm:$0xff]  ;;  %v4421_v1 = vld [vmem:[#allocation2 + $0x466] sm:$0xff] }
 0x357   : > { %v4403_v49 = vmax.f32 %v4399_v46, %v4401_v56  ;;  %3790 = vst [vmem:[#allocation2 + $0x478] sm:$0xff] %v3628_v44 }
 0x359   : > { %v4405_v50 = vadd.f32 %v6469_v22, %v4403_v49 }
 0x35a   : > { %v3007_v42 = vpop.f32.mrb[180].mxu1  ;;  %v3632_v51 = vpop.f32.mrb[32].mxu0 }
 0x35b   : > { %v3009_v33 = vpop.f32.mrb[181].mxu1  ;;  %v4407_v53 = vmax.f32 %v4405_v50, 0.0  ;;  %v3633_v36 = vadd.f32 %v3632_v51, %v3007_v42  ;;  %v3634_v57 = vpop.f32.mrb[33].mxu0 }
 0x35c   : > { %v3010_v58 = vpop.f32.mrb[182].mxu1  ;;  %v3635_v59 = vpop.f32.mrb[34].mxu0  ;;  %v4422_v19 = vld [vmem:[#allocation2 + $0x46e] sm:$0xff] }
 0x35d   : > { %v3012_v60 = vpop.f32.mrb[183].mxu1  ;;  %v5137_v61 = vpack.c.bf16 %v4407_v53, %v4406_v52  ;;  %3791 = vst [vmem:[#allocation2 + $0x480] sm:$0xff] %v3633_v36  ;;  %v3636_v63 = vadd.f32 %v3635_v59, %v3010_v58  ;;  %v3637_v0 = vpop.f32.mrb[35].mxu0 }
 0x35f   : > { %5157 = vst [vmem:[%s6213_s21 + $0x70] sm:$0xff] %v5137_v61   ;;  %3792 = vst [vmem:[#allocation2 + $0x488] sm:$0xff] %v3636_v63 }
 0x362   : > { %v3015_v2 = vpop.f32.mrb[184].mxu1  ;;  %v3640_v47 = vpop.f32.mrb[36].mxu0 }
 0x363   : > { %v3017_v3 = vpop.f32.mrb[185].mxu1  ;;  %v3641_v5 = vadd.f32 %v3640_v47, %v3015_v2  ;;  %v3642_v6 = vpop.f32.mrb[37].mxu0 }
 0x364   : > { %v3018_v8 = vpop.f32.mrb[186].mxu1  ;;  %v4424_v62 = vld [vmem:[#allocation2 + $0x47b] sm:$0xff]  ;;  %v3643_v10 = vpop.f32.mrb[38].mxu0 }
 0x365   : > { %v3020_v55 = vpop.f32.mrb[187].mxu1  ;;  %v4429_v11 = vmax.f32 %v4419_v9, %v4424_v62  ;;  %3793 = vst [vmem:[#allocation2 + $0x490] sm:$0xff] %v3641_v5  ;;  %v3644_v7 = vadd.f32 %v3643_v10, %v3018_v8  ;;  %v3645_v12 = vpop.f32.mrb[39].mxu0 }
 0x366   : > { %v4425_v16 = vld [vmem:[#allocation2 + $0x483] sm:$0xff] }
 0x367   : > { %4434 = vst [vmem:[#allocation3] sm:$0xff] %v4429_v11  ;;  %v4430_v17 = vmax.f32 %v4420_v13, %v4425_v16  ;;  %3794 = vst [vmem:[#allocation2 + $0x498] sm:$0xff] %v3644_v7 }
 0x369   : > { %4435 = vst [vmem:[#allocation3 + $0x8] sm:$0xff] %v4430_v17 }
 0x36c   : > { %v4426_v18 = vld [vmem:[#allocation2 + $0x48b] sm:$0xff] }
 0x36d   : > { %v4431_v21 = vmax.f32 %v4421_v1, %v4426_v18 }
 0x36e   : > { %v4427_v20 = vld [vmem:[#allocation2 + $0x493] sm:$0xff] }
 0x36f   : > { %4436 = vst [vmem:[#allocation3 + $0x10] sm:$0xff] %v4431_v21  ;;  %v4432_v4 = vmax.f32 %v4422_v19, %v4427_v20 }
 0x370   : > { %v4439_v14 = vld [vmem:[#allocation3] ss:$2 sm:$0xff]  ;;  %v4441_v25 = vld [vmem:[#allocation3 + $0x1] ss:$2 sm:$0xff] }
 0x371   : > { %4437 = vst [vmem:[#allocation3 + $0x18] sm:$0xff] %v4432_v4  ;;  %v4443_v26 = vmax.f32 %v4439_v14, %v4441_v25 }
 0x373   : > { %v4445_v23 = vadd.f32 %v6469_v22, %v4443_v26 }
 0x375   : > { %v4447_v15 = vmax.f32 %v4445_v23, 0.0 }
 0x378   : > { %v4440_v27 = vld [vmem:[#allocation3 + $0x10] ss:$2 sm:$0xff]  ;;  %v4442_v29 = vld [vmem:[#allocation3 + $0x11] ss:$2 sm:$0xff] }
 0x379   : > { %v4444_v28 = vmax.f32 %v4440_v27, %v4442_v29 }
 0x37b   : > { %v4446_v30 = vadd.f32 %v6469_v22, %v4444_v28 }
 0x37d   : > { %v4448_v31 = vmax.f32 %v4446_v30, 0.0 }
 0x37f   : > { %v5142_v32 = vpack.c.bf16 %v4448_v31, %v4447_v15 }
 0x381   : > { %5158 = vst [vmem:[%s6213_s21 + $0x78] sm:$0xff] %v5142_v32  }
 0x382 PF: > { %s13_s14 = sadd.s32 1, %s5833_s14   ;;  %s6514_s12 = smov %s5829_s13 }
 0x383   : > { %p10_p5 = scmp.ge.s32.totalorder %s13_s14, 4   ;;  %s6515_s13 = smov %s6517_s15 }
 0x385   :  { %12 = sbr.rel (!%p10_p5) target bundleno = 2 (0x2), region = 80 }

// kernel: repr_net_forward.6
= control target key start
LH: loop header
LB: loop body
LE: loop exit
PB: predicated region body
PF: predicated region fallthrough
CT: control target
= control target key end

     0   :  { %s2083_s12 = smov 0   ;;  %s2085_s13 = smov 0   ;;  %s2412_s0 = inlined_call_operand.vmem [shape: bf16[2,192,640], index: 0, kind: input, shape index: {}]   ;;  %s2413_s1 = inlined_call_operand.vmem [shape: bf16[640,128], index: 1, kind: input, shape index: {}]   ;;  %s2414_s2 = inlined_call_operand.vmem [shape: f32[1,128], index: 2, kind: input, shape index: {}]   ;;  %s2415_s3 = inlined_call_operand.vmem [shape: bf16[2,6,6,128], index: 3, kind: output, shape index: {}]  }
   0x1   :  { %s2087_s14 = smov 0  }
   0x2 LB: > { %s25_s15 = sadd.s32 1, %s2057_s13  ;;  %p1526_p0 = scmp.ge.s32.totalorder %s2061_s14, 1  ;;  %s2061_s14 = sphi %s2087_s14, %s13_s14   ;;  %s2057_s13 = sphi %s2085_s13, %s2417_s13   ;;  %s2053_s12 = sphi %s2083_s12, %s2416_s12  }
   0x3   : > { %p27_p1 = scmp.ge.s32.totalorder %s25_s15, 2  ;;  %p159_p2 = scmp.lt.s32.totalorder %s2061_s14, 3 }
   0x5   : > { %s2419_s15 = smov (%p27_p1, %s25_s15), 0  ;;  %p160_p3 = pnand %p1526_p0, %p159_p2 }
   0x6   : > { %v1915_v0 = vld [vmem:[%s2413_s1 + $0x40] sm:$0xff] (!%p160_p3)   ;;  %v1919_v4 = vld [vmem:[%s2413_s1 + $0x48] sm:$0xff] (!%p160_p3)   ;;  %v1923_v8 = vld [vmem:[%s2413_s1 + $0x50] sm:$0xff] (!%p160_p3)   ;;  %p193_p4 = scmp.lt.s32.totalorder (!%p160_p3), %s2053_s12, 1 }
   0x7   : > { %163 = sbr.rel (%p160_p3) target bundleno = 416 (0x1a0), region = 32  ;;  %v1916_v1 = vld [vmem:[%s2413_s1 + $0xc0] sm:$0xff] (!%p160_p3)   ;;  %1637 = vmatprep.subr.bf16.mxu0 (!%p160_p3), %v1915_v0  ;;  %v1920_v5 = vld [vmem:[%s2413_s1 + $0xc8] sm:$0xff] (!%p160_p3)   ;;  %v1924_v9 = vld [vmem:[%s2413_s1 + $0xd0] sm:$0xff] (!%p160_p3)  }
   0x8   : > { %v1917_v2 = vld [vmem:[%s2413_s1] sm:$0xff] (!%p160_p3)   ;;  %1725 = vmatprep.subr.bf16.mxu1 (!%p160_p3), %v1916_v1  ;;  %v1921_v6 = vld [vmem:[%s2413_s1 + $0x8] sm:$0xff] (!%p160_p3)   ;;  %v1925_v10 = vld [vmem:[%s2413_s1 + $0x10] sm:$0xff] (!%p160_p3)  }
   0x9   : > { %v1918_v3 = vld [vmem:[%s2413_s1 + $0x80] sm:$0xff] (!%p160_p3)   ;;  %1638 = vmatpush3.bf16.msra.mxu0 (!%p160_p3), %v1917_v2  ;;  %v1922_v7 = vld [vmem:[%s2413_s1 + $0x88] sm:$0xff] (!%p160_p3)   ;;  %v1926_v11 = vld [vmem:[%s2413_s1 + $0x90] sm:$0xff] (!%p160_p3)  }
   0xa   : > { %1726 = vmatpush3.bf16.msra.mxu1 (!%p160_p3), %v1918_v3  ;;  %1639 = vmatprep.subr.bf16.mxu0 (!%p160_p3), %v1919_v4  ;;  %v1927_v12 = vld [vmem:[%s2413_s1 + $0x58] sm:$0xff] (!%p160_p3)   ;;  %v1931_v16 = vld [vmem:[%s2413_s1 + $0x60] sm:$0xff] (!%p160_p3)   ;;  %v1935_v20 = vld [vmem:[%s2413_s1 + $0x68] sm:$0xff] (!%p160_p3)  }
   0xb   : > { %1727 = vmatprep.subr.bf16.mxu1 (!%p160_p3), %v1920_v5  ;;  %v1928_v13 = vld [vmem:[%s2413_s1 + $0xd8] sm:$0xff] (!%p160_p3)   ;;  %v1932_v17 = vld [vmem:[%s2413_s1 + $0xe0] sm:$0xff] (!%p160_p3)   ;;  %v1936_v21 = vld [vmem:[%s2413_s1 + $0xe8] sm:$0xff] (!%p160_p3)  }
   0xc   : > { %v1929_v14 = vld [vmem:[%s2413_s1 + $0x18] sm:$0xff] (!%p160_p3)   ;;  %v1933_v18 = vld [vmem:[%s2413_s1 + $0x20] sm:$0xff] (!%p160_p3)   ;;  %v1937_v22 = vld [vmem:[%s2413_s1 + $0x28] sm:$0xff] (!%p160_p3)  }
   0xd   : > { %1640 = vmatpush3.bf16.msra.mxu0 (!%p160_p3), %v1921_v6  ;;  %v1930_v15 = vld [vmem:[%s2413_s1 + $0x98] sm:$0xff] (!%p160_p3)   ;;  %v1934_v19 = vld [vmem:[%s2413_s1 + $0xa0] sm:$0xff] (!%p160_p3)   ;;  %v1938_v23 = vld [vmem:[%s2413_s1 + $0xa8] sm:$0xff] (!%p160_p3)  }
   0xe   : > { %1728 = vmatpush3.bf16.msra.mxu1 %v1922_v7  ;;  %1641 = vmatprep.subr.bf16.mxu0 %v1923_v8  ;;  %s2421_s12 = smov (!%p193_p4, %s2053_s12), 1  ;;  %v1939_v24 = vld [vmem:[%s2413_s1 + $0x70] sm:$0xff]   ;;  %v1943_v28 = vld [vmem:[%s2413_s1 + $0x78] sm:$0xff]   ;;  %v1953_v36 = vld [vmem:[%s2413_s1 + $0x100] sm:$0xff]  }
   0xf   : > { %1729 = vmatprep.subr.bf16.mxu1 %v1924_v9  ;;  %v1940_v25 = vld [vmem:[%s2413_s1 + $0xf0] sm:$0xff]   ;;  %s1889_s22 = smul.u32 480, %s2421_s12  ;;  %v1944_v29 = vld [vmem:[%s2413_s1 + $0xf8] sm:$0xff]   ;;  %v1960_v39 = vld [vmem:[%s2413_s1 + $0x108] sm:$0xff]  }
  0x10   : > { %v1941_v26 = vld [vmem:[%s2413_s1 + $0x30] sm:$0xff]   ;;  %v1945_v30 = vld [vmem:[%s2413_s1 + $0x38] sm:$0xff]   ;;  %v1993_v50 = vld [vmem:[%s2413_s1 + $0x120] sm:$0xff]  }
  0x11   : > { %1642 = vmatpush3.bf16.msra.mxu0 %v1925_v10  ;;  %v1942_v27 = vld [vmem:[%s2413_s1 + $0xb0] sm:$0xff]   ;;  %s2201_s6 = scalar_lea.vmem %s2412_s0, %s1889_s22  ;;  %v1946_v31 = vld [vmem:[%s2413_s1 + $0xb8] sm:$0xff]   ;;  %v2000_v55 = vld [vmem:[%s2413_s1 + $0x128] sm:$0xff]  }
  0x12   : > { %1730 = vmatpush3.bf16.msra.mxu1 %v1926_v11  ;;  %1643 = vmatprep.subr.bf16.mxu0 %v1927_v12  ;;  %v1947_v32 = vld [vmem:[%s2201_s6] ss:$20 sps:$4 sm:$0xff]   ;;  %v1949_v33 = vld [vmem:[%s2201_s6 + $0x4] ss:$20 sps:$4 sm:$0xff]   ;;  %v1950_v34 = vld [vmem:[%s2201_s6 + $0x8] ss:$20 sps:$4 sm:$0xff]  }
  0x13   : > { %1731 = vmatprep.subr.bf16.mxu1 %v1928_v13  ;;  %v1952_v35 = vld [vmem:[%s2201_s6 + $0xc] ss:$20 sps:$4 sm:$0xff]   ;;  %950 = vmatprep.mubr.bf16.mxu0 %v1949_v33  ;;  %v1956_v38 = vld [vmem:[%s2201_s6 + $0x34] ss:$20 sps:$4 sm:$0xff]   ;;  %v1959_v41 = vld [vmem:[%s2201_s6 + $0x30] ss:$20 sps:$4 sm:$0xff]  }
  0x14   : > { %1079 = vmatprep.mubr.bf16.mxu1 %v1952_v35  ;;  %v1954_v37 = vld [vmem:[%s2201_s6 + $0x2c] ss:$20 sps:$4 sm:$0xff]   ;;  %v1958_v40 = vld [vmem:[%s2201_s6 + $0x28] ss:$20 sps:$4 sm:$0xff]   ;;  %v1973_v44 = vld [vmem:[%s2413_s1 + $0x110] sm:$0xff]  }
  0x15   : > { %1644 = vmatpush3.bf16.msra.mxu0 %v1929_v14  ;;  %v1961_v42 = vld [vmem:[%s2201_s6 + $0x54] ss:$20 sps:$4 sm:$0xff]   ;;  %v1963_v43 = vld [vmem:[%s2201_s6 + $0x5c] ss:$20 sps:$4 sm:$0xff]   ;;  %v1966_v46 = vld [vmem:[%s2201_s6 + $0x58] ss:$20 sps:$4 sm:$0xff]  }
  0x16   : > { %1732 = vmatpush3.bf16.msra.mxu1 %v1930_v15  ;;  %1645 = vmatprep.subr.bf16.mxu0 %v1931_v16  ;;  %v1965_v45 = vld [vmem:[%s2201_s6 + $0x50] ss:$20 sps:$4 sm:$0xff]   ;;  %v1980_v48 = vld [vmem:[%s2413_s1 + $0x118] sm:$0xff]   ;;  %v1972_v52 = vld [vmem:[%s2201_s6 + $0x80] ss:$20 sps:$4 sm:$0xff]  }
  0x17   : > { %1733 = vmatprep.subr.bf16.mxu1 %v1932_v17  ;;  %v1967_v47 = vld [vmem:[%s2201_s6 + $0x7c] ss:$20 sps:$4 sm:$0xff]   ;;  %v1969_v49 = vld [vmem:[%s2201_s6 + $0x84] ss:$20 sps:$4 sm:$0xff]   ;;  %v1976_v54 = vld [vmem:[%s2201_s6 + $0xac] ss:$20 sps:$4 sm:$0xff]  }
  0x18   : > { %v1971_v51 = vld [vmem:[%s2201_s6 + $0x78] ss:$20 sps:$4 sm:$0xff]   ;;  %v1978_v56 = vld [vmem:[%s2201_s6 + $0xa0] ss:$20 sps:$4 sm:$0xff]   ;;  %v1979_v57 = vld [vmem:[%s2201_s6 + $0xa8] ss:$20 sps:$4 sm:$0xff]  }
  0x19   : > { %1646 = vmatpush3.bf16.msra.mxu0 %v1933_v18  ;;  %v1974_v53 = vld [vmem:[%s2201_s6 + $0xa4] ss:$20 sps:$4 sm:$0xff]   ;;  %v1981_v58 = vld [vmem:[%s2201_s6 + $0xcc] ss:$20 sps:$4 sm:$0xff]   ;;  %v2013_v59 = vld [vmem:[%s2413_s1 + $0x130] sm:$0xff]  }
  0x1a   : > { %1734 = vmatpush3.bf16.msra.mxu1 %v1934_v19  ;;  %1647 = vmatprep.subr.bf16.mxu0 %v1935_v20  ;;  %v1983_v60 = vld [vmem:[%s2201_s6 + $0xd4] ss:$20 sps:$4 sm:$0xff]   ;;  %v2020_v61 = vld [vmem:[%s2413_s1 + $0x138] sm:$0xff]   ;;  %v1986_v63 = vld [vmem:[%s2201_s6 + $0xd0] ss:$20 sps:$4 sm:$0xff]  }
  0x1b   : > { %1735 = vmatprep.subr.bf16.mxu1 %v1936_v21  ;;  %v1985_v62 = vld [vmem:[%s2201_s6 + $0xc8] ss:$20 sps:$4 sm:$0xff]   ;;  %v1991_v2 = vld [vmem:[%s2201_s6 + $0xf0] ss:$20 sps:$4 sm:$0xff]   ;;  %v1992_v3 = vld [vmem:[%s2201_s6 + $0xf8] ss:$20 sps:$4 sm:$0xff]  }
  0x1c   : > { %v1987_v0 = vld [vmem:[%s2201_s6 + $0xf4] ss:$20 sps:$4 sm:$0xff]   ;;  %v1989_v1 = vld [vmem:[%s2201_s6 + $0xfc] ss:$20 sps:$4 sm:$0xff]   ;;  %v1996_v5 = vld [vmem:[%s2201_s6 + $0x124] ss:$20 sps:$4 sm:$0xff]  }
  0x1d   : > { %1648 = vmatpush3.bf16.msra.mxu0 %v1937_v22  ;;  %v1994_v4 = vld [vmem:[%s2201_s6 + $0x11c] ss:$20 sps:$4 sm:$0xff]   ;;  %v1998_v6 = vld [vmem:[%s2201_s6 + $0x118] ss:$20 sps:$4 sm:$0xff]   ;;  %v1999_v7 = vld [vmem:[%s2201_s6 + $0x120] ss:$20 sps:$4 sm:$0xff]  }
  0x1e   : > { %1736 = vmatpush3.bf16.msra.mxu1 %v1938_v23  ;;  %1649 = vmatprep.subr.bf16.mxu0 %v1939_v24  ;;  %v2001_v8 = vld [vmem:[%s2201_s6 + $0x144] ss:$20 sps:$4 sm:$0xff]   ;;  %v2003_v9 = vld [vmem:[%s2201_s6 + $0x14c] ss:$20 sps:$4 sm:$0xff]   ;;  %v2006_v11 = vld [vmem:[%s2201_s6 + $0x148] ss:$20 sps:$4 sm:$0xff]  }
  0x1f   : > { %1737 = vmatprep.subr.bf16.mxu1 %v1940_v25  ;;  %v2005_v10 = vld [vmem:[%s2201_s6 + $0x140] ss:$20 sps:$4 sm:$0xff]   ;;  %v2011_v14 = vld [vmem:[%s2201_s6 + $0x168] ss:$20 sps:$4 sm:$0xff]   ;;  %v2012_v15 = vld [vmem:[%s2201_s6 + $0x170] ss:$20 sps:$4 sm:$0xff]  }
  0x20   : > { %v2007_v12 = vld [vmem:[%s2201_s6 + $0x16c] ss:$20 sps:$4 sm:$0xff]   ;;  %v2009_v13 = vld [vmem:[%s2201_s6 + $0x174] ss:$20 sps:$4 sm:$0xff]   ;;  %v2016_v17 = vld [vmem:[%s2201_s6 + $0x19c] ss:$20 sps:$4 sm:$0xff]  }
  0x21   : > { %1650 = vmatpush3.bf16.msra.mxu0 %v1941_v26  ;;  %v2014_v16 = vld [vmem:[%s2201_s6 + $0x194] ss:$20 sps:$4 sm:$0xff]   ;;  %v2018_v18 = vld [vmem:[%s2201_s6 + $0x190] ss:$20 sps:$4 sm:$0xff]   ;;  %v2019_v19 = vld [vmem:[%s2201_s6 + $0x198] ss:$20 sps:$4 sm:$0xff]  }
  0x22   : > { %1738 = vmatpush3.bf16.msra.mxu1 %v1942_v27  ;;  %1651 = vmatprep.subr.bf16.mxu0 %v1943_v28  ;;  %v2021_v20 = vld [vmem:[%s2201_s6 + $0x1bc] ss:$20 sps:$4 sm:$0xff]   ;;  %v2023_v21 = vld [vmem:[%s2201_s6 + $0x1c4] ss:$20 sps:$4 sm:$0xff]   ;;  %v2026_v23 = vld [vmem:[%s2201_s6 + $0x1c0] ss:$20 sps:$4 sm:$0xff]  }
  0x23   : > { %1739 = vmatprep.subr.bf16.mxu1 %v1944_v29  ;;  %v2025_v22 = vld [vmem:[%s2201_s6 + $0x1b8] ss:$20 sps:$4 sm:$0xff]   ;;  %v2027_v24 = vld [vmem:[%s2201_s6 + $0x10] ss:$20 sps:$4 sm:$0xff]   ;;  %v2028_v25 = vld [vmem:[%s2201_s6 + $0x100] ss:$20 sps:$4 sm:$0xff]  }
  0x24   : > { %v2029_v26 = vld [vmem:[%s2201_s6 + $0x38] ss:$20 sps:$4 sm:$0xff]   ;;  %v2030_v27 = vld [vmem:[%s2201_s6 + $0x128] ss:$20 sps:$4 sm:$0xff]   ;;  %v2031_v28 = vld [vmem:[%s2201_s6 + $0x60] ss:$20 sps:$4 sm:$0xff]  }
  0x25   : > { %1652 = vmatpush3.bf16.msra.mxu0 %v1945_v30  ;;  %v2032_v29 = vld [vmem:[%s2201_s6 + $0x150] ss:$20 sps:$4 sm:$0xff]   ;;  %v2033_v30 = vld [vmem:[%s2201_s6 + $0x88] ss:$20 sps:$4 sm:$0xff]   ;;  %v2036_v33 = vld [vmem:[%s2201_s6 + $0x1a0] ss:$20 sps:$4 sm:$0xff]  }
  0x26   : > { %1740 = vmatpush3.bf16.msra.mxu1 %v1946_v31  ;;  %1833 = vmatprep.subr.bf16.mxu0 %v1953_v36  ;;  %v2034_v31 = vld [vmem:[%s2201_s6 + $0x178] ss:$20 sps:$4 sm:$0xff]   ;;  %v2038_v35 = vld [vmem:[%s2201_s6 + $0x1c8] ss:$20 sps:$4 sm:$0xff]  }
  0x27   : > { %1873 = vmatprep.subr.bf16.mxu1 %v1953_v36 }
  0x28   : > { %951 = vmatmul.mubr.bf16.vlgmr.msra.gmra.mrb[0].mxu0 %v1947_v32  ;;  %v2035_v32 = vld [vmem:[%s2201_s6 + $0xb0] ss:$20 sps:$4 sm:$0xff]  }
  0x29   : > { %1080 = vmatmul.mubr.bf16.vlgmr.msra.gmra.mrb[0].mxu1 %v1950_v34  ;;  %1834 = vmatpush3.bf16.msra.mxu0 %v1953_v36  ;;  %v2037_v34 = vld [vmem:[%s2201_s6 + $0xd8] ss:$20 sps:$4 sm:$0xff]   ;;  %s1890_s6 = smul.u32 24, %s2421_s12 }
  0x2a   : > { %958 = vmatprep.mubr.bf16.mxu0 %v1954_v37  ;;  %1087 = vmatprep.mubr.bf16.mxu1 %v1956_v38 }
  0x2b   : > { %1881 = vmatpush3.bf16.msra.mxu1 %v1953_v36  ;;  %1835 = vmatprep.subr.bf16.mxu0 %v1960_v39  ;;  %s2383_s8 = scalar_lea.vmem %s2415_s3, %s1890_s6 }
  0x2c   : > { %1874 = vmatprep.subr.bf16.mxu1 %v1960_v39 }
  0x2d   : > { %1836 = vmatpush3.bf16.msra.mxu0 %v1960_v39 }
  0x2e   : > { %1837 = vmatprep.subr.bf16.mxu0 %v1973_v44 }
  0x2f   : > { %1882 = vmatpush3.bf16.msra.mxu1 %v1960_v39 }
  0x30   : > { %959 = vmatmul.mubr.bf16.gmra.mrb[4].mxu0 %v1958_v40  ;;  %1875 = vmatprep.subr.bf16.mxu1 %v1973_v44 }
  0x31   : > { %1088 = vmatmul.mubr.bf16.gmra.mrb[4].mxu1 %v1959_v41  ;;  %966 = vmatprep.mubr.bf16.mxu0 %v1961_v42 }
  0x32   : > { %1095 = vmatprep.mubr.bf16.mxu1 %v1963_v43  ;;  %1838 = vmatpush3.bf16.msra.mxu0 %v1973_v44 }
  0x33   : > { %1883 = vmatpush3.bf16.msra.mxu1 %v1973_v44  ;;  %1839 = vmatprep.subr.bf16.mxu0 %v1980_v48 }
  0x34   : > { %1876 = vmatprep.subr.bf16.mxu1 %v1980_v48 }
  0x36   : > { %1840 = vmatpush3.bf16.msra.mxu0 %v1980_v48 }
  0x37   : > { %1884 = vmatpush3.bf16.msra.mxu1 %v1980_v48  ;;  %1841 = vmatprep.subr.bf16.mxu0 %v1993_v50 }
  0x38   : > { %967 = vmatmul.mubr.bf16.gmra.mrb[8].mxu0 %v1965_v45  ;;  %1877 = vmatprep.subr.bf16.mxu1 %v1993_v50 }
  0x39   : > { %1096 = vmatmul.mubr.bf16.gmra.mrb[8].mxu1 %v1966_v46  ;;  %974 = vmatprep.mubr.bf16.mxu0 %v1967_v47 }
  0x3a   : > { %1103 = vmatprep.mubr.bf16.mxu1 %v1969_v49  ;;  %1842 = vmatpush3.bf16.msra.mxu0 %v1993_v50 }
  0x3b   : > { %1885 = vmatpush3.bf16.msra.mxu1 %v1993_v50  ;;  %1843 = vmatprep.subr.bf16.mxu0 %v2000_v55 }
  0x3c   : > { %1878 = vmatprep.subr.bf16.mxu1 %v2000_v55 }
  0x3e   : > { %1844 = vmatpush3.bf16.msra.mxu0 %v2000_v55 }
  0x3f   : > { %1886 = vmatpush3.bf16.msra.mxu1 %v2000_v55  ;;  %1845 = vmatprep.subr.bf16.mxu0 %v2013_v59 }
  0x40   : > { %975 = vmatmul.mubr.bf16.gmra.mrb[12].mxu0 %v1971_v51  ;;  %1879 = vmatprep.subr.bf16.mxu1 %v2013_v59 }
  0x41   : > { %1104 = vmatmul.mubr.bf16.gmra.mrb[12].mxu1 %v1972_v52  ;;  %982 = vmatprep.mubr.bf16.mxu0 %v1974_v53 }
  0x42   : > { %1111 = vmatprep.mubr.bf16.mxu1 %v1976_v54  ;;  %1846 = vmatpush3.bf16.msra.mxu0 %v2013_v59 }
  0x43   : > { %1887 = vmatpush3.bf16.msra.mxu1 %v2013_v59  ;;  %1847 = vmatprep.subr.bf16.mxu0 %v2020_v61 }
  0x44   : > { %1880 = vmatprep.subr.bf16.mxu1 %v2020_v61 }
  0x46   : > { %1848 = vmatpush3.bf16.msra.mxu0 %v2020_v61 }
  0x47   : > { %1888 = vmatpush3.bf16.msra.mxu1 %v2020_v61 }
  0x48   : > { %983 = vmatmul.mubr.bf16.gmra.mrb[16].mxu0 %v1978_v56 }
  0x49   : > { %1112 = vmatmul.mubr.bf16.gmra.mrb[16].mxu1 %v1979_v57  ;;  %990 = vmatprep.mubr.bf16.mxu0 %v1981_v58 }
  0x4a   : > { %1119 = vmatprep.mubr.bf16.mxu1 %v1983_v60 }
  0x50   : > { %991 = vmatmul.mubr.bf16.gmra.mrb[20].mxu0 %v1985_v62 }
  0x51   : > { %1120 = vmatmul.mubr.bf16.gmra.mrb[20].mxu1 %v1986_v63  ;;  %998 = vmatprep.mubr.bf16.mxu0 %v1987_v0 }
  0x52   : > { %1127 = vmatprep.mubr.bf16.mxu1 %v1989_v1 }
  0x58   : > { %999 = vmatmul.mubr.bf16.gmra.mrb[24].mxu0 %v1991_v2 }
  0x59   : > { %1128 = vmatmul.mubr.bf16.gmra.mrb[24].mxu1 %v1992_v3  ;;  %1006 = vmatprep.mubr.bf16.mxu0 %v1994_v4 }
  0x5a   : > { %1135 = vmatprep.mubr.bf16.mxu1 %v1996_v5 }
  0x60   : > { %1007 = vmatmul.mubr.bf16.gmra.mrb[28].mxu0 %v1998_v6 }
  0x61   : > { %1136 = vmatmul.mubr.bf16.gmra.mrb[28].mxu1 %v1999_v7  ;;  %1014 = vmatprep.mubr.bf16.mxu0 %v2001_v8 }
  0x62   : > { %1143 = vmatprep.mubr.bf16.mxu1 %v2003_v9 }
  0x68   : > { %1015 = vmatmul.mubr.bf16.gmra.mrb[32].mxu0 %v2005_v10 }
  0x69   : > { %1144 = vmatmul.mubr.bf16.gmra.mrb[32].mxu1 %v2006_v11  ;;  %1022 = vmatprep.mubr.bf16.mxu0 %v2007_v12 }
  0x6a   : > { %1151 = vmatprep.mubr.bf16.mxu1 %v2009_v13 }
  0x70   : > { %1023 = vmatmul.mubr.bf16.gmra.mrb[36].mxu0 %v2011_v14 }
  0x71   : > { %1152 = vmatmul.mubr.bf16.gmra.mrb[36].mxu1 %v2012_v15  ;;  %1030 = vmatprep.mubr.bf16.mxu0 %v2014_v16 }
  0x72   : > { %1159 = vmatprep.mubr.bf16.mxu1 %v2016_v17 }
  0x78   : > { %1031 = vmatmul.mubr.bf16.gmra.mrb[40].mxu0 %v2018_v18 }
  0x79   : > { %1160 = vmatmul.mubr.bf16.gmra.mrb[40].mxu1 %v2019_v19  ;;  %1038 = vmatprep.mubr.bf16.mxu0 %v2021_v20 }
  0x7a   : > { %1167 = vmatprep.mubr.bf16.mxu1 %v2023_v21 }
  0x80   : > { %1039 = vmatmul.mubr.bf16.gmra.mrb[44].mxu0 %v2025_v22 }
  0x81   : > { %1168 = vmatmul.mubr.bf16.gmra.mrb[44].mxu1 %v2026_v23  ;;  %1849 = vmatprep.mubr.bf16.mxu0 %v2027_v24 }
  0x82   : > { %1861 = vmatprep.mubr.bf16.mxu1 %v2028_v25 }
  0x88   : > { %1850 = vmatmul.mubr.bf16.vlgmr.msra.gmra.mrb[48].mxu0 %v2029_v26 }
  0x89   : > { %1862 = vmatmul.mubr.bf16.vlgmr.msra.gmra.mrb[48].mxu1 %v2030_v27  ;;  %1853 = vmatprep.mubr.bf16.mxu0 %v2031_v28 }
  0x8a   : > { %1865 = vmatprep.mubr.bf16.mxu1 %v2032_v29 }
  0x90   : > { %1854 = vmatmul.mubr.bf16.gmra.mrb[52].mxu0 %v2033_v30 }
  0x91   : > { %1866 = vmatmul.mubr.bf16.gmra.mrb[52].mxu1 %v2034_v31  ;;  %1857 = vmatprep.mubr.bf16.mxu0 %v2035_v32 }
  0x92   : > { %1869 = vmatprep.mubr.bf16.mxu1 %v2036_v33 }
  0x98   : > { %1858 = vmatmul.mubr.bf16.gmra.mrb[56].mxu0 %v2037_v34 }
  0x99   : > { %1870 = vmatmul.mubr.bf16.gmra.mrb[56].mxu1 %v2038_v35 }
  0xfb   : > { %v1653_v36 = vpop.f32.mrb[0].mxu0 }
  0xfc   : > { %v1741_v37 = vpop.f32.mrb[0].mxu1  ;;  %v1654_v38 = vpop.f32.mrb[1].mxu0 }
  0xfd   : > { %v1655_v39 = vadd.f32 %v1654_v38, %v1653_v36  ;;  %v1742_v40 = vpop.f32.mrb[1].mxu1  ;;  %v1656_v41 = vpop.f32.mrb[2].mxu0 }
  0xfe   : > { %v1743_v42 = vadd.f32 %v1742_v40, %v1741_v37  ;;  %v1744_v43 = vpop.f32.mrb[2].mxu1  ;;  %v1657_v44 = vpop.f32.mrb[3].mxu0 }
  0xff   : > { %v1658_v45 = vadd.f32 %v1657_v44, %v1656_v41  ;;  %v1745_v46 = vpop.f32.mrb[3].mxu1 }
 0x100   : > { %v1746_v47 = vadd.f32 %v1745_v46, %v1744_v43  ;;  %v2293_v48 = vadd.f32 %v1743_v42, %v1655_v39 }
 0x102   : > { %v2295_v49 = vadd.f32 %v1746_v47, %v1658_v45 }
 0x103   : > { %v1659_v50 = vpop.f32.mrb[4].mxu0 }
 0x104   : > { %v1747_v51 = vpop.f32.mrb[4].mxu1  ;;  %v1660_v52 = vpop.f32.mrb[5].mxu0 }
 0x105   : > { %v1661_v53 = vadd.f32 %v1660_v52, %v1659_v50  ;;  %v1748_v54 = vpop.f32.mrb[5].mxu1  ;;  %v1662_v55 = vpop.f32.mrb[6].mxu0 }
 0x106   : > { %v1749_v56 = vadd.f32 %v1748_v54, %v1747_v51  ;;  %v1750_v57 = vpop.f32.mrb[6].mxu1  ;;  %v1663_v58 = vpop.f32.mrb[7].mxu0 }
 0x107   : > { %v1664_v59 = vadd.f32 %v1663_v58, %v1662_v55  ;;  %v1751_v60 = vpop.f32.mrb[7].mxu1 }
 0x108   : > { %v1752_v61 = vadd.f32 %v1751_v60, %v1750_v57  ;;  %v2297_v62 = vadd.f32 %v1749_v56, %v1661_v53 }
 0x10a   : > { %v2299_v63 = vadd.f32 %v1752_v61, %v1664_v59 }
 0x10b   : > { %v1665_v0 = vpop.f32.mrb[8].mxu0 }
 0x10c   : > { %v1753_v1 = vpop.f32.mrb[8].mxu1  ;;  %v1666_v2 = vpop.f32.mrb[9].mxu0 }
 0x10d   : > { %v1667_v3 = vadd.f32 %v1666_v2, %v1665_v0  ;;  %v1754_v4 = vpop.f32.mrb[9].mxu1  ;;  %v1668_v5 = vpop.f32.mrb[10].mxu0 }
 0x10e   : > { %v1755_v6 = vadd.f32 %v1754_v4, %v1753_v1  ;;  %v1756_v7 = vpop.f32.mrb[10].mxu1  ;;  %v1669_v8 = vpop.f32.mrb[11].mxu0 }
 0x10f   : > { %v1670_v9 = vadd.f32 %v1669_v8, %v1668_v5  ;;  %v1757_v10 = vpop.f32.mrb[11].mxu1 }
 0x110   : > { %v1758_v11 = vadd.f32 %v1757_v10, %v1756_v7  ;;  %v2301_v12 = vadd.f32 %v1755_v6, %v1667_v3 }
 0x112   : > { %v2303_v13 = vadd.f32 %v1758_v11, %v1670_v9 }
 0x113   : > { %v1671_v14 = vpop.f32.mrb[12].mxu0 }
 0x114   : > { %v1759_v15 = vpop.f32.mrb[12].mxu1  ;;  %v1672_v16 = vpop.f32.mrb[13].mxu0 }
 0x115   : > { %v1673_v17 = vadd.f32 %v1672_v16, %v1671_v14  ;;  %v1760_v18 = vpop.f32.mrb[13].mxu1  ;;  %v1674_v19 = vpop.f32.mrb[14].mxu0 }
 0x116   : > { %v1761_v20 = vadd.f32 %v1760_v18, %v1759_v15  ;;  %v1762_v21 = vpop.f32.mrb[14].mxu1  ;;  %v1675_v22 = vpop.f32.mrb[15].mxu0 }
 0x117   : > { %v1676_v23 = vadd.f32 %v1675_v22, %v1674_v19  ;;  %v1763_v24 = vpop.f32.mrb[15].mxu1 }
 0x118   : > { %v1764_v25 = vadd.f32 %v1763_v24, %v1762_v21  ;;  %v2305_v26 = vadd.f32 %v1761_v20, %v1673_v17 }
 0x11a   : > { %v2307_v27 = vadd.f32 %v1764_v25, %v1676_v23 }
 0x11b   : > { %v1677_v28 = vpop.f32.mrb[16].mxu0 }
 0x11c   : > { %v1765_v29 = vpop.f32.mrb[16].mxu1  ;;  %v1678_v30 = vpop.f32.mrb[17].mxu0 }
 0x11d   : > { %v1679_v31 = vadd.f32 %v1678_v30, %v1677_v28  ;;  %v1766_v32 = vpop.f32.mrb[17].mxu1  ;;  %v1680_v33 = vpop.f32.mrb[18].mxu0 }
 0x11e   : > { %v1767_v34 = vadd.f32 %v1766_v32, %v1765_v29  ;;  %v1768_v35 = vpop.f32.mrb[18].mxu1  ;;  %v1681_v36 = vpop.f32.mrb[19].mxu0 }
 0x11f   : > { %v1682_v37 = vadd.f32 %v1681_v36, %v1680_v33  ;;  %v1769_v38 = vpop.f32.mrb[19].mxu1 }
 0x120   : > { %v1770_v39 = vadd.f32 %v1769_v38, %v1768_v35  ;;  %v2309_v40 = vadd.f32 %v1767_v34, %v1679_v31 }
 0x122   : > { %v2311_v41 = vadd.f32 %v1770_v39, %v1682_v37 }
 0x123   : > { %v1683_v42 = vpop.f32.mrb[20].mxu0 }
 0x124   : > { %v1771_v43 = vpop.f32.mrb[20].mxu1  ;;  %v1684_v44 = vpop.f32.mrb[21].mxu0 }
 0x125   : > { %v1685_v45 = vadd.f32 %v1684_v44, %v1683_v42  ;;  %v1772_v46 = vpop.f32.mrb[21].mxu1  ;;  %v1686_v47 = vpop.f32.mrb[22].mxu0 }
 0x126   : > { %v1773_v50 = vadd.f32 %v1772_v46, %v1771_v43  ;;  %v1774_v51 = vpop.f32.mrb[22].mxu1  ;;  %v1687_v52 = vpop.f32.mrb[23].mxu0 }
 0x127   : > { %v1688_v53 = vadd.f32 %v1687_v52, %v1686_v47  ;;  %v1775_v54 = vpop.f32.mrb[23].mxu1 }
 0x128   : > { %v1776_v55 = vadd.f32 %v1775_v54, %v1774_v51  ;;  %v2313_v56 = vadd.f32 %v1773_v50, %v1685_v45 }
 0x12a   : > { %v2315_v57 = vadd.f32 %v1776_v55, %v1688_v53 }
 0x12b   : > { %v1689_v58 = vpop.f32.mrb[24].mxu0 }
 0x12c   : > { %v1777_v59 = vpop.f32.mrb[24].mxu1  ;;  %v1690_v60 = vpop.f32.mrb[25].mxu0 }
 0x12d   : > { %v1691_v61 = vadd.f32 %v1690_v60, %v1689_v58  ;;  %v1778_v0 = vpop.f32.mrb[25].mxu1  ;;  %v1692_v1 = vpop.f32.mrb[26].mxu0 }
 0x12e   : > { %v1779_v2 = vadd.f32 %v1778_v0, %v1777_v59  ;;  %v1780_v3 = vpop.f32.mrb[26].mxu1  ;;  %v1693_v4 = vpop.f32.mrb[27].mxu0 }
 0x12f   : > { %v1694_v5 = vadd.f32 %v1693_v4, %v1692_v1  ;;  %v1781_v6 = vpop.f32.mrb[27].mxu1 }
 0x130   : > { %v1782_v7 = vadd.f32 %v1781_v6, %v1780_v3  ;;  %v2317_v8 = vadd.f32 %v1779_v2, %v1691_v61 }
 0x132   : > { %v2319_v9 = vadd.f32 %v1782_v7, %v1694_v5 }
 0x133   : > { %v1695_v10 = vpop.f32.mrb[28].mxu0 }
 0x134   : > { %v1783_v11 = vpop.f32.mrb[28].mxu1  ;;  %v1696_v14 = vpop.f32.mrb[29].mxu0 }
 0x135   : > { %v1697_v15 = vadd.f32 %v1696_v14, %v1695_v10  ;;  %v1784_v16 = vpop.f32.mrb[29].mxu1  ;;  %v1698_v17 = vpop.f32.mrb[30].mxu0 }
 0x136   : > { %v1785_v18 = vadd.f32 %v1784_v16, %v1783_v11  ;;  %v1786_v19 = vpop.f32.mrb[30].mxu1  ;;  %v1699_v20 = vpop.f32.mrb[31].mxu0 }
 0x137   : > { %v1700_v21 = vadd.f32 %v1699_v20, %v1698_v17  ;;  %v1787_v22 = vpop.f32.mrb[31].mxu1 }
 0x138   : > { %v1788_v23 = vadd.f32 %v1787_v22, %v1786_v19  ;;  %v1138_v24 = vadd.f32 %v1785_v18, %v1697_v15 }
 0x13a   : > { %v2321_v25 = vadd.f32 %v1788_v23, %v1700_v21 }
 0x13b   : > { %v1701_v28 = vpop.f32.mrb[32].mxu0 }
 0x13c   : > { %v1789_v29 = vpop.f32.mrb[32].mxu1  ;;  %v1702_v30 = vpop.f32.mrb[33].mxu0 }
 0x13d   : > { %v1703_v31 = vadd.f32 %v1702_v30, %v1701_v28  ;;  %v1790_v32 = vpop.f32.mrb[33].mxu1  ;;  %v1704_v33 = vpop.f32.mrb[34].mxu0 }
 0x13e   : > { %v1791_v34 = vadd.f32 %v1790_v32, %v1789_v29  ;;  %v1792_v35 = vpop.f32.mrb[34].mxu1  ;;  %v1705_v36 = vpop.f32.mrb[35].mxu0 }
 0x13f   : > { %v1706_v37 = vadd.f32 %v1705_v36, %v1704_v33  ;;  %v1793_v38 = vpop.f32.mrb[35].mxu1 }
 0x140   : > { %v1794_v39 = vadd.f32 %v1793_v38, %v1792_v35  ;;  %v2323_v42 = vadd.f32 %v1791_v34, %v1703_v31 }
 0x142   : > { %v2325_v43 = vadd.f32 %v1794_v39, %v1706_v37 }
 0x143   : > { %v1707_v44 = vpop.f32.mrb[36].mxu0 }
 0x144   : > { %v1795_v45 = vpop.f32.mrb[36].mxu1  ;;  %v1708_v46 = vpop.f32.mrb[37].mxu0 }
 0x145   : > { %v1709_v47 = vadd.f32 %v1708_v46, %v1707_v44  ;;  %v1796_v50 = vpop.f32.mrb[37].mxu1  ;;  %v1710_v51 = vpop.f32.mrb[38].mxu0 }
 0x146   : > { %v1797_v52 = vadd.f32 %v1796_v50, %v1795_v45  ;;  %v1798_v53 = vpop.f32.mrb[38].mxu1  ;;  %v1711_v54 = vpop.f32.mrb[39].mxu0 }
 0x147   : > { %v1712_v55 = vadd.f32 %v1711_v54, %v1710_v51  ;;  %v1799_v58 = vpop.f32.mrb[39].mxu1 }
 0x148   : > { %v1800_v59 = vadd.f32 %v1799_v58, %v1798_v53  ;;  %v1154_v60 = vadd.f32 %v1797_v52, %v1709_v47 }
 0x14a   : > { %v2327_v61 = vadd.f32 %v1800_v59, %v1712_v55 }
 0x14b   : > { %v1713_v0 = vpop.f32.mrb[40].mxu0 }
 0x14c   : > { %v1801_v1 = vpop.f32.mrb[40].mxu1  ;;  %v1714_v2 = vpop.f32.mrb[41].mxu0 }
 0x14d   : > { %v1715_v3 = vadd.f32 %v1714_v2, %v1713_v0  ;;  %v1802_v4 = vpop.f32.mrb[41].mxu1  ;;  %v1716_v5 = vpop.f32.mrb[42].mxu0 }
 0x14e   : > { %v1803_v6 = vadd.f32 %v1802_v4, %v1801_v1  ;;  %v1804_v7 = vpop.f32.mrb[42].mxu1  ;;  %v1717_v10 = vpop.f32.mrb[43].mxu0 }
 0x14f   : > { %v1718_v11 = vadd.f32 %v1717_v10, %v1716_v5  ;;  %v1805_v14 = vpop.f32.mrb[43].mxu1 }
 0x150   : > { %v1806_v15 = vadd.f32 %v1805_v14, %v1804_v7  ;;  %v2329_v16 = vadd.f32 %v1803_v6, %v1715_v3 }
 0x152   : > { %v2331_v17 = vadd.f32 %v1806_v15, %v1718_v11 }
 0x153   : > { %v1719_v18 = vpop.f32.mrb[44].mxu0 }
 0x154   : > { %v1807_v19 = vpop.f32.mrb[44].mxu1  ;;  %v1720_v20 = vpop.f32.mrb[45].mxu0 }
 0x155   : > { %v1721_v21 = vadd.f32 %v1720_v20, %v1719_v18  ;;  %v1808_v22 = vpop.f32.mrb[45].mxu1  ;;  %v1722_v23 = vpop.f32.mrb[46].mxu0 }
 0x156   : > { %v1809_v28 = vadd.f32 %v1808_v22, %v1807_v19  ;;  %v1810_v29 = vpop.f32.mrb[46].mxu1  ;;  %v1723_v30 = vpop.f32.mrb[47].mxu0 }
 0x157   : > { %v1724_v31 = vadd.f32 %v1723_v30, %v1722_v23  ;;  %v1811_v32 = vpop.f32.mrb[47].mxu1 }
 0x158   : > { %v1812_v33 = vadd.f32 %v1811_v32, %v1810_v29  ;;  %v1170_v34 = vadd.f32 %v1809_v28, %v1721_v21 }
 0x15a   : > { %v2333_v35 = vadd.f32 %v1812_v33, %v1724_v31 }
 0x15b   : > { %v1851_v36 = vpop.f32.mrb[48].mxu0 }
 0x15c   : > { %v1219_v37 = vadd.f32 %v1851_v36, %v2297_v62  ;;  %v1863_v38 = vpop.f32.mrb[48].mxu1  ;;  %v1210_v39 = vpop.f32.mrb[49].mxu0 }
 0x15d   : > { %v2336_v44 = vadd.f32 %v1863_v38, %v1138_v24  ;;  %v1211_v45 = vadd.f32 %v1210_v39, %v2293_v48  ;;  %v1258_v46 = vpop.f32.mrb[49].mxu1  ;;  %v1852_v47 = vpop.f32.mrb[50].mxu0 }
 0x15e   : > { %v2340_v50 = vadd.f32 %v1258_v46, %v2317_v8  ;;  %v1222_v51 = vadd.f32 %v1852_v47, %v2299_v63  ;;  %v1864_v52 = vpop.f32.mrb[50].mxu1  ;;  %v1213_v53 = vpop.f32.mrb[51].mxu0 }
 0x15f   : > { %v1340_v54 = vmax.f32 %v1211_v45, %v1219_v37  ;;  %v2344_v55 = vadd.f32 %v1864_v52, %v2321_v25  ;;  %v1214_v62 = vadd.f32 %v1213_v53, %v2295_v49  ;;  %v1261_v58 = vpop.f32.mrb[51].mxu1 }
 0x160   : > { %v1388_v24 = vmax.f32 %v2340_v50, %v2336_v44  ;;  %v2350_v48 = vadd.f32 %v1261_v58, %v2319_v9 }
 0x161   : > { %1342 = vst [vmem:[#allocation3] sm:$0xff] %v1340_v54  ;;  %v1341_v8 = vmax.f32 %v1214_v62, %v1222_v51 }
 0x162   : > { %v1389_v63 = vmax.f32 %v2350_v48, %v2344_v55 }
 0x163   : > { %1343 = vst [vmem:[#allocation3 + $0x8] sm:$0xff] %v1341_v8  ;;  %v1855_v59 = vpop.f32.mrb[52].mxu0 }
 0x164   : > { %v1235_v0 = vadd.f32 %v1855_v59, %v2305_v26  ;;  %v1867_v25 = vpop.f32.mrb[52].mxu1  ;;  %v1226_v1 = vpop.f32.mrb[53].mxu0 }
 0x165   : > { %v2355_v2 = vadd.f32 %v1867_v25, %v1154_v60  ;;  %v1227_v49 = vadd.f32 %v1226_v1, %v2301_v12  ;;  %v1274_v3 = vpop.f32.mrb[53].mxu1  ;;  %v1856_v4 = vpop.f32.mrb[54].mxu0 }
 0x166   : > { %v2359_v9 = vadd.f32 %v1274_v3, %v2323_v42  ;;  %v1238_v5 = vadd.f32 %v1856_v4, %v2307_v27  ;;  %v1868_v6 = vpop.f32.mrb[54].mxu1  ;;  %v1229_v7 = vpop.f32.mrb[55].mxu0  ;;  %v2370_v42 = vld [vmem:[%s2414_s2] ss:$0 sm:$0xff] }
 0x167   : > { %v1356_v10 = vmax.f32 %v1227_v49, %v1235_v0  ;;  %v1286_v11 = vadd.f32 %v1868_v6, %v2327_v61  ;;  %v1230_v26 = vadd.f32 %v1229_v7, %v2303_v13  ;;  %v1277_v14 = vpop.f32.mrb[55].mxu1 }
 0x168   : > { %v1404_v60 = vmax.f32 %v2359_v9, %v2355_v2  ;;  %v1278_v12 = vadd.f32 %v1277_v14, %v2325_v43 }
 0x169   : > { %v1357_v27 = vmax.f32 %v1230_v26, %v1238_v5 }
 0x16a   : > { %v1344_v15 = vld [vmem:[#allocation3] ss:$2 sm:$0x3f]  ;;  %v1346_v18 = vld [vmem:[#allocation3 + $0x1] ss:$2 sm:$0x3f]  ;;  %v1405_v19 = vmax.f32 %v1278_v12, %v1286_v11 }
 0x16b   : > { %v1347_v20 = vmax.f32 %v1344_v15, %v1346_v18  ;;  %1358 = vst [vmem:[#allocation3] sm:$0xff] %v1356_v10  ;;  %1359 = vst [vmem:[#allocation3 + $0x8] sm:$0xff] %v1357_v27  ;;  %v1859_v61 = vpop.f32.mrb[56].mxu0 }
 0x16c   : > { %v1251_v13 = vadd.f32 %v1859_v61, %v2313_v56  ;;  %v1871_v21 = vpop.f32.mrb[56].mxu1  ;;  %v1242_v22 = vpop.f32.mrb[57].mxu0 }
 0x16d   : > { %v1348_v43 = vadd.f32 %v2370_v42, %v1347_v20  ;;  %v1299_v23 = vadd.f32 %v1871_v21, %v1170_v34  ;;  %v1243_v28 = vadd.f32 %v1242_v22, %v2309_v40  ;;  %v1290_v29 = vpop.f32.mrb[57].mxu1  ;;  %v1860_v30 = vpop.f32.mrb[58].mxu0 }
 0x16e   : > { %v1291_v31 = vadd.f32 %v1290_v29, %v2329_v16  ;;  %v1254_v32 = vadd.f32 %v1860_v30, %v2315_v57  ;;  %v1872_v33 = vpop.f32.mrb[58].mxu1  ;;  %v1245_v36 = vpop.f32.mrb[59].mxu0 }
 0x16f   : > { %v1349_v37 = vmax.f32 %v1348_v43, 0.0  ;;  %v1372_v38 = vmax.f32 %v1243_v28, %v1251_v13  ;;  %v1302_v39 = vadd.f32 %v1872_v33, %v2333_v35  ;;  %v1246_v56 = vadd.f32 %v1245_v36, %v2311_v41  ;;  %v1293_v45 = vpop.f32.mrb[59].mxu1 }
 0x170   : > { %v1420_v40 = vmax.f32 %v1291_v31, %v1299_v23  ;;  %v1294_v16 = vadd.f32 %v1293_v45, %v2331_v17 }
 0x171   : > { %v1350_v57 = vpack.c.bf16 %v1349_v37, %v1349_v37  ;;  %v1373_v34 = vmax.f32 %v1246_v56, %v1254_v32 }
 0x172   : > { %v1360_v46 = vld [vmem:[#allocation3] ss:$2 sm:$0x3f]  ;;  %v1361_v47 = vld [vmem:[#allocation3 + $0x1] ss:$2 sm:$0x3f]  ;;  %v1421_v51 = vmax.f32 %v1294_v16, %v1302_v39 }
 0x173   : > { %1351 = vst [vmem:[%s2383_s8] sm:$0x7] %v1350_v57  ;;  %v1362_v35 = vmax.f32 %v1360_v46, %v1361_v47  ;;  %1374 = vst [vmem:[#allocation3] sm:$0xff] %v1372_v38 }
 0x174   : > { %1375 = vst [vmem:[#allocation3 + $0x8] sm:$0xff] %v1373_v34 }
 0x175   : > { %v1363_v41 = vadd.f32 %v2370_v42, %v1362_v35 }
 0x177   : > { %v1364_v52 = vmax.f32 %v1363_v41, 0.0 }
 0x179   : > { %v1365_v53 = vpack.c.bf16 %v1364_v52, %v1364_v52 }
 0x17b   : > { %v1376_v54 = vld [vmem:[#allocation3] ss:$2 sm:$0x3f]  ;;  %v1377_v62 = vld [vmem:[#allocation3 + $0x1] ss:$2 sm:$0x3f] }
 0x17c   : > { %1630 = vst [vmem:[%s2383_s8 + $0x4] sm:$0x7] %v1365_v53  ;;  %v1378_v58 = vmax.f32 %v1376_v54, %v1377_v62  ;;  %1390 = vst [vmem:[#allocation3] sm:$0xff] %v1388_v24 }
 0x17d   : > { %1391 = vst [vmem:[#allocation3 + $0x8] sm:$0xff] %v1389_v63 }
 0x17e   : > { %v1379_v17 = vadd.f32 %v2370_v42, %v1378_v58 }
 0x180   : > { %v1380_v8 = vmax.f32 %v1379_v17, 0.0 }
 0x182   : > { %v1381_v59 = vpack.c.bf16 %v1380_v8, %v1380_v8 }
 0x184   : > { %v1392_v0 = vld [vmem:[#allocation3] ss:$2 sm:$0x3f]  ;;  %v1393_v25 = vld [vmem:[#allocation3 + $0x1] ss:$2 sm:$0x3f] }
 0x185   : > { %1631 = vst [vmem:[%s2383_s8 + $0x8] sm:$0x7] %v1381_v59  ;;  %v1394_v1 = vmax.f32 %v1392_v0, %v1393_v25  ;;  %1406 = vst [vmem:[#allocation3] sm:$0xff] %v1404_v60 }
 0x186   : > { %1407 = vst [vmem:[#allocation3 + $0x8] sm:$0xff] %v1405_v19 }
 0x187   : > { %v1395_v2 = vadd.f32 %v2370_v42, %v1394_v1 }
 0x189   : > { %v1396_v44 = vmax.f32 %v1395_v2, 0.0 }
 0x18b   : > { %v1397_v50 = vpack.c.bf16 %v1396_v44, %v1396_v44 }
 0x18d   : > { %v1408_v24 = vld [vmem:[#allocation3] ss:$2 sm:$0x3f]  ;;  %v1409_v55 = vld [vmem:[#allocation3 + $0x1] ss:$2 sm:$0x3f] }
 0x18e   : > { %1632 = vst [vmem:[%s2383_s8 + $0xc] sm:$0x7] %v1397_v50  ;;  %v1410_v48 = vmax.f32 %v1408_v24, %v1409_v55  ;;  %1422 = vst [vmem:[#allocation3] sm:$0xff] %v1420_v40 }
 0x18f   : > { %1423 = vst [vmem:[#allocation3 + $0x8] sm:$0xff] %v1421_v51 }
 0x190   : > { %v1411_v63 = vadd.f32 %v2370_v42, %v1410_v48 }
 0x192   : > { %v1412_v49 = vmax.f32 %v1411_v63, 0.0 }
 0x194   : > { %v1413_v3 = vpack.c.bf16 %v1412_v49, %v1412_v49 }
 0x196   : > { %v1424_v4 = vld [vmem:[#allocation3] ss:$2 sm:$0x3f]  ;;  %v1425_v9 = vld [vmem:[#allocation3 + $0x1] ss:$2 sm:$0x3f] }
 0x197   : > { %1633 = vst [vmem:[%s2383_s8 + $0x10] sm:$0x7] %v1413_v3  ;;  %v1426_v5 = vmax.f32 %v1424_v4, %v1425_v9 }
 0x199   : > { %v1427_v6 = vadd.f32 %v2370_v42, %v1426_v5 }
 0x19b   : > { %v1428_v7 = vmax.f32 %v1427_v6, 0.0 }
 0x19d   : > { %v1429_v10 = vpack.c.bf16 %v1428_v7, %v1428_v7 }
 0x19f   : > { %1634 = vst [vmem:[%s2383_s8 + $0x14] sm:$0x7] %v1429_v10 }
 0x1a0 PF: > { %s13_s14 = sadd.s32 1, %s2061_s14   ;;  %s2416_s12 = smov %s2057_s13 }
 0x1a1   : > { %p10_p5 = scmp.ge.s32.totalorder %s13_s14, 4   ;;  %s2417_s13 = smov %s2419_s15 }
 0x1a3   :  { %12 = sbr.rel (!%p10_p5) target bundleno = 2 (0x2), region = 68 }

// kernel: repr_net_forward.7
= control target key start
LH: loop header
LB: loop body
LE: loop exit
PB: predicated region body
PF: predicated region fallthrough
CT: control target
= control target key end

     0   :  { %s2696_s18 = smov 0   ;;  %s3453_s0 = inlined_call_operand.vmem [shape: bf16[2,4,1280], index: 0, kind: input, shape index: {}]   ;;  %s3454_s1 = inlined_call_operand.vmem [shape: bf16[1280,256], index: 1, kind: input, shape index: {}]   ;;  %s3455_s2 = inlined_call_operand.vmem [shape: f32[1,256], index: 2, kind: input, shape index: {}]   ;;  %s3456_s3 = inlined_call_operand.vmem [shape: bf16[256,512], index: 3, kind: input, shape index: {}]   ;;  %s3457_s4 = inlined_call_operand.vmem [shape: f32[1,512], index: 4, kind: input, shape index: {}]   ;;  %s3458_s5 = inlined_call_operand.vmem [shape: f32[2,1,512], index: 5, kind: output, shape index: {}]  }
   0x1 LB: > { %s2059_s19 = sadd.s32 4294967295, %s2662_s18   ;;  %p2063_p0 = scmp.ge.s32.totalorder %s2662_s18, 1  ;;  %s2662_s18 = sphi %s2696_s18, %s15_s18  }
   0x2   : > { %p187_p1 = scmp.lt.s32.totalorder %s2662_s18, 3 }
   0x4   : > { %p188_p2 = pnand %p2063_p0, %p187_p1 }
   0x5   : > { %v2318_v0 = vld [vmem:[%s3454_s1 + $0x104] ss:$8 sps:$4 sm:$0xff] (!%p188_p2)   ;;  %v2320_v1 = vld [vmem:[%s3454_s1 + $0x100] ss:$8 sps:$4 sm:$0xff] (!%p188_p2)   ;;  %v2321_v2 = vld [vmem:[%s3454_s1 + $0x114] ss:$8 sps:$4 sm:$0xff] (!%p188_p2)   ;;  %v393_v11 = vlaneseq (!%p188_p2) }
   0x6   : > { %191 = sbr.rel (%p188_p2) target bundleno = 782 (0x30e), region = 40  ;;  %1282 = vmatprep.subr.bf16.mxu0 (!%p188_p2), %v2318_v0  ;;  %v2323_v3 = vld [vmem:[%s3454_s1 + $0x110] ss:$8 sps:$4 sm:$0xff] (!%p188_p2)   ;;  %v2324_v4 = vld [vmem:[%s3454_s1 + $0x124] ss:$8 sps:$4 sm:$0xff] (!%p188_p2)   ;;  %p214_p3 = scmp.lt.s32.totalorder (!%p188_p2), %s2059_s19, 1 }
   0x7   : > { %1283 = vmatpush1.bf16.msra.mxu0 (!%p188_p2), %v2320_v1  ;;  %v2326_v5 = vld [vmem:[%s3454_s1 + $0x120] ss:$8 sps:$4 sm:$0xff] (!%p188_p2)   ;;  %v2327_v6 = vld [vmem:[%s3454_s1 + $0x134] ss:$8 sps:$4 sm:$0xff] (!%p188_p2)   ;;  %v2329_v7 = vld [vmem:[%s3454_s1 + $0x130] ss:$8 sps:$4 sm:$0xff] (!%p188_p2)  }
   0x8   : > { %1284 = vmatprep.subr.bf16.mxu0 (!%p188_p2), %v2321_v2  ;;  %v2330_v8 = vld [vmem:[%s3454_s1 + $0x144] ss:$8 sps:$4 sm:$0xff] (!%p188_p2)   ;;  %v2664_v9 = vmov (!%p188_p2), 1983009808   ;;  %v2332_v12 = vld [vmem:[%s3454_s1 + $0x140] ss:$8 sps:$4 sm:$0xff] (!%p188_p2)  }
   0x9   : > { %v391_v10 = vunpack.c.l.s4 (!%p188_p2), %v2664_v9  ;;  %v2333_v13 = vld [vmem:[%s3454_s1 + $0x154] ss:$8 sps:$4 sm:$0xff] (!%p188_p2)   ;;  %v2741_v15 = vshrl.u32 (!%p188_p2), %v393_v11, 7  ;;  %v2335_v16 = vld [vmem:[%s3454_s1 + $0x150] ss:$8 sps:$4 sm:$0xff] (!%p188_p2)   ;;  %vm2003_vm0 = vcmp.lt.s32.totalorder (!%p188_p2), %v393_v11, 512 }
   0xa   : > { %v2336_v17 = vld [vmem:[%s3454_s1 + $0x164] ss:$8 sps:$4 sm:$0xff] (!%p188_p2)   ;;  %v2338_v21 = vld [vmem:[%s3454_s1 + $0x160] ss:$8 sps:$4 sm:$0xff] (!%p188_p2)   ;;  %v2339_v22 = vld [vmem:[%s3454_s1 + $0x174] ss:$8 sps:$4 sm:$0xff] (!%p188_p2)  }
   0xb   : > { %1285 = vmatpush1.bf16.msra.mxu0 (!%p188_p2), %v2323_v3  ;;  %v392_v14 = vunpack.c.0.s8 (!%p188_p2), %v391_v10  ;;  %v2341_v25 = vld [vmem:[%s3454_s1 + $0x170] ss:$8 sps:$4 sm:$0xff] (!%p188_p2)   ;;  %v2342_v26 = vld [vmem:[%s3454_s1 + $0x184] ss:$8 sps:$4 sm:$0xff] (!%p188_p2)   ;;  %v2344_v27 = vld [vmem:[%s3454_s1 + $0x180] ss:$8 sps:$4 sm:$0xff] (!%p188_p2)  }
   0xc   : > { %1286 = vmatprep.subr.bf16.mxu0 (!%p188_p2), %v2324_v4  ;;  %v2345_v28 = vld [vmem:[%s3454_s1 + $0x194] ss:$8 sps:$4 sm:$0xff] (!%p188_p2)   ;;  %v2347_v29 = vld [vmem:[%s3454_s1 + $0x190] ss:$8 sps:$4 sm:$0xff] (!%p188_p2)   ;;  %v2348_v30 = vld [vmem:[%s3454_s1 + $0x1a4] ss:$8 sps:$4 sm:$0xff] (!%p188_p2)  }
   0xd   : > { %s3460_s19 = smov (!%p214_p3, %s2059_s19), 1  ;;  %v2755_v18 = vsub.s32 %v392_v14, %v2741_v15  ;;  %v2350_v31 = vld [vmem:[%s3454_s1 + $0x1a0] ss:$8 sps:$4 sm:$0xff]   ;;  %v2351_v32 = vld [vmem:[%s3454_s1 + $0x1b4] ss:$8 sps:$4 sm:$0xff]  }
   0xe   : > { %s2307_s13 = smul.u32 20, %s3460_s19  ;;  %v2353_v33 = vld [vmem:[%s3454_s1 + $0x1b0] ss:$8 sps:$4 sm:$0xff]   ;;  %v2354_v34 = vld [vmem:[%s3454_s1 + $0x1c4] ss:$8 sps:$4 sm:$0xff]   ;;  %s2065_s28 = sshll.u32 %s3460_s19, 2 }
   0xf   : > { %1287 = vmatpush1.bf16.msra.mxu0 %v2326_v5  ;;  %v2356_v35 = vld [vmem:[%s3454_s1 + $0x1c0] ss:$8 sps:$4 sm:$0xff]   ;;  %v2357_v36 = vld [vmem:[%s3454_s1 + $0x1d4] ss:$8 sps:$4 sm:$0xff]   ;;  %v2359_v37 = vld [vmem:[%s3454_s1 + $0x1d0] ss:$8 sps:$4 sm:$0xff]   ;;  %s222_s6 = scalar_lea.vmem %s3458_s5, %s2065_s28 }
  0x10   : > { %1288 = vmatprep.subr.bf16.mxu0 %v2327_v6  ;;  %s2746_s22 = scalar_lea.vmem %s3453_s0, %s2307_s13  ;;  %v2360_v38 = vld [vmem:[%s3454_s1 + $0x1e4] ss:$8 sps:$4 sm:$0xff]   ;;  %v2362_v39 = vld [vmem:[%s3454_s1 + $0x1e0] ss:$8 sps:$4 sm:$0xff]   ;;  %v2363_v40 = vld [vmem:[%s3454_s1 + $0x1f4] ss:$8 sps:$4 sm:$0xff]  }
  0x11   : > { %v2758_v19 = vld [vmem:[%s2746_s22] sm:$0xff]  ;;  %v2818_v41 = vld [vmem:[%s2746_s22 + $0x8] sm:$0xff]  ;;  %v2365_v42 = vld [vmem:[%s3454_s1 + $0x1f0] ss:$8 sps:$4 sm:$0xff]  }
  0x12   : > { %v389_v20 = vcombine.high %v2758_v19, %v2758_v19  ;;  %v2825_v43 = vrot.slane %v2818_v41, %v2755_v18  ;;  %v2369_v44 = vld [vmem:[%s3454_s1 + $0x204] ss:$8 sps:$4 sm:$0xff]   ;;  %v2367_v45 = vld [vmem:[%s3454_s1 + $0x200] ss:$8 sps:$4 sm:$0xff]   ;;  %v2372_v47 = vld [vmem:[%s3454_s1 + $0x214] ss:$8 sps:$4 sm:$0xff]  }
  0x13   : > { %1289 = vmatpush1.bf16.msra.mxu0 %v2329_v7  ;;  %v2463_v48 = vld [vmem:[%s3454_s1 + $0x4] ss:$8 sps:$4 sm:$0xff]   ;;  %v2465_v49 = vld [vmem:[%s3454_s1] ss:$8 sps:$4 sm:$0xff]   ;;  %v2370_v50 = vld [vmem:[%s3454_s1 + $0x210] ss:$8 sps:$4 sm:$0xff]  }
  0x14   : > { %1290 = vmatprep.subr.bf16.mxu0 %v2330_v8  ;;  %v403_v23 = vrot.slane %v389_v20, %v2755_v18  ;;  %v421_v46 = vcombine.high %v2825_v43, %v2825_v43  ;;  %v2375_v51 = vld [vmem:[%s3454_s1 + $0x224] ss:$8 sps:$4 sm:$0xff]   ;;  %1241 = vmatprep.subr.bf16.mxu1 %v2463_v48  ;;  %v2470_v52 = vld [vmem:[%s3454_s1 + $0x14] ss:$8 sps:$4 sm:$0xff]   ;;  %v2472_v53 = vld [vmem:[%s3454_s1 + $0x10] ss:$8 sps:$4 sm:$0xff]  }
  0x15   : > { %1242 = vmatpush1.bf16.msra.mxu1 %v2465_v49  ;;  %v2476_v54 = vld [vmem:[%s3454_s1 + $0x24] ss:$8 sps:$4 sm:$0xff]   ;;  %v2373_v55 = vld [vmem:[%s3454_s1 + $0x220] ss:$8 sps:$4 sm:$0xff]   ;;  %v2378_v56 = vld [vmem:[%s3454_s1 + $0x234] ss:$8 sps:$4 sm:$0xff]  }
  0x16   : > { %v405_v24 = vcombine.high %v403_v23, %v403_v23  ;;  %1243 = vmatprep.subr.bf16.mxu1 %v2470_v52  ;;  %v2478_v57 = vld [vmem:[%s3454_s1 + $0x20] ss:$8 sps:$4 sm:$0xff]   ;;  %v2482_v58 = vld [vmem:[%s3454_s1 + $0x34] ss:$8 sps:$4 sm:$0xff]   ;;  %v2376_v59 = vld [vmem:[%s3454_s1 + $0x230] ss:$8 sps:$4 sm:$0xff]  }
  0x17   : > { %1291 = vmatpush1.bf16.msra.mxu0 %v2332_v12  ;;  %v2381_v60 = vld [vmem:[%s3454_s1 + $0x244] ss:$8 sps:$4 sm:$0xff]   ;;  %v2484_v61 = vld [vmem:[%s3454_s1 + $0x30] ss:$8 sps:$4 sm:$0xff]   ;;  %v2379_v63 = vld [vmem:[%s3454_s1 + $0x240] ss:$8 sps:$4 sm:$0xff]  }
  0x18   : > { %1292 = vmatprep.subr.bf16.mxu0 %v2333_v13  ;;  %1314 = vmatprep.mubr.bf16.mxu0 %v405_v24  ;;  %v2488_v62 = vld [vmem:[%s3454_s1 + $0x44] ss:$8 sps:$4 sm:$0xff]   ;;  %v2384_v0 = vld [vmem:[%s3454_s1 + $0x254] ss:$8 sps:$4 sm:$0xff]   ;;  %v2490_v1 = vld [vmem:[%s3454_s1 + $0x40] ss:$8 sps:$4 sm:$0xff]  }
  0x19   : > { %1244 = vmatpush1.bf16.msra.mxu1 %v2472_v53  ;;  %v2494_v2 = vld [vmem:[%s3454_s1 + $0x54] ss:$8 sps:$4 sm:$0xff]   ;;  %v2382_v3 = vld [vmem:[%s3454_s1 + $0x250] ss:$8 sps:$4 sm:$0xff]   ;;  %v2387_v4 = vld [vmem:[%s3454_s1 + $0x264] ss:$8 sps:$4 sm:$0xff]  }
  0x1a   : > { %1245 = vmatprep.subr.bf16.mxu1 %v2476_v54  ;;  %v2496_v5 = vld [vmem:[%s3454_s1 + $0x50] ss:$8 sps:$4 sm:$0xff]   ;;  %v2500_v6 = vld [vmem:[%s3454_s1 + $0x64] ss:$8 sps:$4 sm:$0xff]   ;;  %v2385_v7 = vld [vmem:[%s3454_s1 + $0x260] ss:$8 sps:$4 sm:$0xff]  }
  0x1b   : > { %1293 = vmatpush1.bf16.msra.mxu0 %v2335_v16  ;;  %v2390_v8 = vld [vmem:[%s3454_s1 + $0x274] ss:$8 sps:$4 sm:$0xff]   ;;  %v2502_v9 = vld [vmem:[%s3454_s1 + $0x60] ss:$8 sps:$4 sm:$0xff]   ;;  %v2388_v12 = vld [vmem:[%s3454_s1 + $0x270] ss:$8 sps:$4 sm:$0xff]  }
  0x1c   : > { %1294 = vmatprep.subr.bf16.mxu0 %v2336_v17  ;;  %v2506_v10 = vld [vmem:[%s3454_s1 + $0x74] ss:$8 sps:$4 sm:$0xff]   ;;  %v2393_v13 = vld [vmem:[%s3454_s1 + $0x284] ss:$8 sps:$4 sm:$0xff]   ;;  %v2508_v14 = vld [vmem:[%s3454_s1 + $0x70] ss:$8 sps:$4 sm:$0xff]  }
  0x1d   : > { %1246 = vmatpush1.bf16.msra.mxu1 %v2478_v57  ;;  %v2512_v16 = vld [vmem:[%s3454_s1 + $0x84] ss:$8 sps:$4 sm:$0xff]   ;;  %v2391_v17 = vld [vmem:[%s3454_s1 + $0x280] ss:$8 sps:$4 sm:$0xff]   ;;  %v2396_v20 = vld [vmem:[%s3454_s1 + $0x294] ss:$8 sps:$4 sm:$0xff]  }
  0x1e   : > { %1247 = vmatprep.subr.bf16.mxu1 %v2482_v58  ;;  %v2399_v24 = vld [vmem:[%s3454_s1 + $0x2a4] ss:$8 sps:$4 sm:$0xff]   ;;  %v2550_v48 = vld [vmem:[%s3454_s1 + $0xe0] ss:$8 sps:$4 sm:$0xff]   ;;  %v2412_v49 = vld [vmem:[%s3454_s1 + $0x2f0] ss:$8 sps:$4 sm:$0xff]  }
  0x1f   : > { %1295 = vmatpush1.bf16.msra.mxu0 %v2338_v21  ;;  %v2514_v21 = vld [vmem:[%s3454_s1 + $0x80] ss:$8 sps:$4 sm:$0xff]   ;;  %v2556_v53 = vld [vmem:[%s3454_s1 + $0xf0] ss:$8 sps:$4 sm:$0xff]   ;;  %v2562_v57 = vld [vmem:[%s3456_s3 + $0x4] ss:$16 sps:$4 sm:$0xff]  }
  0x20   : > { %1296 = vmatprep.subr.bf16.mxu0 %v2339_v22  ;;  %v2518_v22 = vld [vmem:[%s3454_s1 + $0x94] ss:$8 sps:$4 sm:$0xff]   ;;  %v2418_v58 = vld [vmem:[%s3454_s1 + $0x310] ss:$8 sps:$4 sm:$0xff]  }
  0x21   : > { %1248 = vmatpush1.bf16.msra.mxu1 %v2484_v61  ;;  %v2421_v61 = vld [vmem:[%s3454_s1 + $0x320] ss:$8 sps:$4 sm:$0xff]  }
  0x22   : > { %1249 = vmatprep.subr.bf16.mxu1 %v2488_v62  ;;  %v2568_v62 = vld [vmem:[%s3456_s3 + $0x44] ss:$16 sps:$4 sm:$0xff]  }
  0x23   : > { %1297 = vmatpush1.bf16.msra.mxu0 %v2341_v25  ;;  %v2520_v25 = vld [vmem:[%s3454_s1 + $0x90] ss:$8 sps:$4 sm:$0xff]  }
  0x24   : > { %1298 = vmatprep.subr.bf16.mxu0 %v2342_v26  ;;  %v2524_v26 = vld [vmem:[%s3454_s1 + $0xa4] ss:$8 sps:$4 sm:$0xff]  }
  0x25   : > { %1250 = vmatpush1.bf16.msra.mxu1 %v2490_v1  ;;  %v2424_v1 = vld [vmem:[%s3454_s1 + $0x330] ss:$8 sps:$4 sm:$0xff]  }
  0x26   : > { %1251 = vmatprep.subr.bf16.mxu1 %v2494_v2  ;;  %v2571_v2 = vld [vmem:[%s3456_s3 + $0x64] ss:$16 sps:$4 sm:$0xff]  }
  0x27   : > { %1299 = vmatpush1.bf16.msra.mxu0 %v2344_v27  ;;  %v2397_v27 = vld [vmem:[%s3454_s1 + $0x2a0] ss:$8 sps:$4 sm:$0xff]  }
  0x28   : > { %1300 = vmatprep.subr.bf16.mxu0 %v2345_v28  ;;  %v2402_v28 = vld [vmem:[%s3454_s1 + $0x2b4] ss:$8 sps:$4 sm:$0xff]  }
  0x29   : > { %1252 = vmatpush1.bf16.msra.mxu1 %v2496_v5  ;;  %v2427_v5 = vld [vmem:[%s3454_s1 + $0x340] ss:$8 sps:$4 sm:$0xff]  }
  0x2a   : > { %1253 = vmatprep.subr.bf16.mxu1 %v2500_v6  ;;  %v2574_v6 = vld [vmem:[%s3456_s3 + $0x84] ss:$16 sps:$4 sm:$0xff]  }
  0x2b   : > { %1301 = vmatpush1.bf16.msra.mxu0 %v2347_v29  ;;  %v2526_v29 = vld [vmem:[%s3454_s1 + $0xa0] ss:$8 sps:$4 sm:$0xff]  }
  0x2c   : > { %1302 = vmatprep.subr.bf16.mxu0 %v2348_v30  ;;  %v2530_v30 = vld [vmem:[%s3454_s1 + $0xb4] ss:$8 sps:$4 sm:$0xff]  }
  0x2d   : > { %1254 = vmatpush1.bf16.msra.mxu1 %v2502_v9  ;;  %v2430_v9 = vld [vmem:[%s3454_s1 + $0x350] ss:$8 sps:$4 sm:$0xff]  }
  0x2e   : > { %1255 = vmatprep.subr.bf16.mxu1 %v2506_v10  ;;  %v2577_v10 = vld [vmem:[%s3456_s3 + $0xa4] ss:$16 sps:$4 sm:$0xff]  }
  0x2f   : > { %1303 = vmatpush1.bf16.msra.mxu0 %v2350_v31  ;;  %v2400_v31 = vld [vmem:[%s3454_s1 + $0x2b0] ss:$8 sps:$4 sm:$0xff]  }
  0x30   : > { %1304 = vmatprep.subr.bf16.mxu0 %v2351_v32  ;;  %v2405_v32 = vld [vmem:[%s3454_s1 + $0x2c4] ss:$8 sps:$4 sm:$0xff]  }
  0x31   : > { %1256 = vmatpush1.bf16.msra.mxu1 %v2508_v14  ;;  %v2433_v14 = vld [vmem:[%s3454_s1 + $0x360] ss:$8 sps:$4 sm:$0xff]  }
  0x32   : > { %1257 = vmatprep.subr.bf16.mxu1 %v2512_v16  ;;  %v2580_v16 = vld [vmem:[%s3456_s3 + $0xc4] ss:$16 sps:$4 sm:$0xff]  }
  0x33   : > { %1305 = vmatpush1.bf16.msra.mxu0 %v2353_v33  ;;  %v2532_v33 = vld [vmem:[%s3454_s1 + $0xb0] ss:$8 sps:$4 sm:$0xff]  }
  0x34   : > { %1306 = vmatprep.subr.bf16.mxu0 %v2354_v34  ;;  %v2536_v34 = vld [vmem:[%s3454_s1 + $0xc4] ss:$8 sps:$4 sm:$0xff]  }
  0x35   : > { %1258 = vmatpush1.bf16.msra.mxu1 %v2514_v21  ;;  %v2436_v21 = vld [vmem:[%s3454_s1 + $0x370] ss:$8 sps:$4 sm:$0xff]  }
  0x36   : > { %1259 = vmatprep.subr.bf16.mxu1 %v2518_v22  ;;  %v2583_v22 = vld [vmem:[%s3456_s3 + $0xe4] ss:$16 sps:$4 sm:$0xff]  }
  0x37   : > { %1307 = vmatpush1.bf16.msra.mxu0 %v2356_v35  ;;  %v2403_v35 = vld [vmem:[%s3454_s1 + $0x2c0] ss:$8 sps:$4 sm:$0xff]  }
  0x38   : > { %1308 = vmatprep.subr.bf16.mxu0 %v2357_v36  ;;  %v2408_v36 = vld [vmem:[%s3454_s1 + $0x2d4] ss:$8 sps:$4 sm:$0xff]  }
  0x39   : > { %1260 = vmatpush1.bf16.msra.mxu1 %v2520_v25  ;;  %v2439_v25 = vld [vmem:[%s3454_s1 + $0x380] ss:$8 sps:$4 sm:$0xff]  }
  0x3a   : > { %1261 = vmatprep.subr.bf16.mxu1 %v2524_v26  ;;  %v2586_v26 = vld [vmem:[%s3456_s3 + $0x104] ss:$16 sps:$4 sm:$0xff]  }
  0x3b   : > { %1309 = vmatpush1.bf16.msra.mxu0 %v2359_v37  ;;  %v2538_v37 = vld [vmem:[%s3454_s1 + $0xc0] ss:$8 sps:$4 sm:$0xff]  }
  0x3c   : > { %1310 = vmatprep.subr.bf16.mxu0 %v2360_v38  ;;  %v2542_v38 = vld [vmem:[%s3454_s1 + $0xd4] ss:$8 sps:$4 sm:$0xff]  }
  0x3d   : > { %1262 = vmatpush1.bf16.msra.mxu1 %v2526_v29  ;;  %v2442_v29 = vld [vmem:[%s3454_s1 + $0x390] ss:$8 sps:$4 sm:$0xff]  }
  0x3e   : > { %1263 = vmatprep.subr.bf16.mxu1 %v2530_v30  ;;  %v2589_v30 = vld [vmem:[%s3456_s3 + $0x124] ss:$16 sps:$4 sm:$0xff]  }
  0x3f   : > { %1311 = vmatpush1.bf16.msra.mxu0 %v2362_v39  ;;  %v2406_v39 = vld [vmem:[%s3454_s1 + $0x2d0] ss:$8 sps:$4 sm:$0xff]  }
  0x40   : > { %1312 = vmatprep.subr.bf16.mxu0 %v2363_v40  ;;  %v2411_v40 = vld [vmem:[%s3454_s1 + $0x2e4] ss:$8 sps:$4 sm:$0xff]  }
  0x41   : > { %1264 = vmatpush1.bf16.msra.mxu1 %v2532_v33  ;;  %v2445_v33 = vld [vmem:[%s3454_s1 + $0x3a0] ss:$8 sps:$4 sm:$0xff]  }
  0x42   : > { %1265 = vmatprep.subr.bf16.mxu1 %v2536_v34  ;;  %v2592_v34 = vld [vmem:[%s3456_s3 + $0x144] ss:$16 sps:$4 sm:$0xff]  }
  0x43   : > { %1313 = vmatpush1.bf16.msra.mxu0 %v2365_v42  ;;  %v2544_v42 = vld [vmem:[%s3454_s1 + $0xd0] ss:$8 sps:$4 sm:$0xff]  }
  0x44   : > { %1323 = vmatprep.subr.bf16.mxu0 %v2369_v44  ;;  %v2548_v44 = vld [vmem:[%s3454_s1 + $0xe4] ss:$8 sps:$4 sm:$0xff]  }
  0x45   : > { %1266 = vmatpush1.bf16.msra.mxu1 %v2538_v37  ;;  %v2448_v37 = vld [vmem:[%s3454_s1 + $0x3b0] ss:$8 sps:$4 sm:$0xff]  }
  0x46   : > { %1315 = vmatmul.mubr.bf16.vlgmr.msra.gmra.mrb[0].mxu0 %v403_v23  ;;  %v2394_v23 = vld [vmem:[%s3454_s1 + $0x290] ss:$8 sps:$4 sm:$0xff]   ;;  %1267 = vmatprep.subr.bf16.mxu1 %v2542_v38  ;;  %v2453_v38 = vld [vmem:[%s3454_s1 + $0x3c4] ss:$8 sps:$4 sm:$0xff]  }
  0x47   : > { %1324 = vmatpush1.bf16.msra.mxu0 %v2367_v45  ;;  %1355 = vmatprep.mubr.bf16.mxu0 %v421_v46  ;;  %v2409_v45 = vld [vmem:[%s3454_s1 + $0x2e0] ss:$8 sps:$4 sm:$0xff]   ;;  %v2414_v46 = vld [vmem:[%s3454_s1 + $0x2f4] ss:$8 sps:$4 sm:$0xff]  }
  0x48   : > { %1325 = vmatprep.subr.bf16.mxu0 %v2372_v47  ;;  %v406_v47 = vcombine.high %v2818_v41, %v2818_v41  ;;  %v2417_v41 = vld [vmem:[%s3454_s1 + $0x304] ss:$8 sps:$4 sm:$0xff]  }
  0x49   : > { %1268 = vmatpush1.bf16.msra.mxu1 %v2544_v42  ;;  %v2454_v42 = vld [vmem:[%s3454_s1 + $0x3d0] ss:$8 sps:$4 sm:$0xff]  }
  0x4a   : > { %1269 = vmatprep.subr.bf16.mxu1 %v2548_v44  ;;  %v3026_v52 = vrot.slane %v406_v47, %v2755_v18  ;;  %v2459_v44 = vld [vmem:[%s3454_s1 + $0x3e4] ss:$8 sps:$4 sm:$0xff]   ;;  %v2460_v47 = vld [vmem:[%s3454_s1 + $0x3f0] ss:$8 sps:$4 sm:$0xff]  }
  0x4b   : > { %1326 = vmatpush1.bf16.msra.mxu0 %v2370_v50  ;;  %v2554_v50 = vld [vmem:[%s3454_s1 + $0xf4] ss:$8 sps:$4 sm:$0xff]  }
  0x4c   : > { %1327 = vmatprep.subr.bf16.mxu0 %v2375_v51  ;;  %v396_v51 = vrot.slane %v2758_v19, %v2755_v18  ;;  %v2420_v19 = vld [vmem:[%s3454_s1 + $0x314] ss:$8 sps:$4 sm:$0xff]   ;;  %v422_v18 = vcombine.high %v3026_v52, %v3026_v52 }
  0x4d   : > { %1270 = vmatpush1.bf16.msra.mxu1 %v2550_v48  ;;  %v2469_v48 = vld [vmem:[%s3454_s1 + $0x404] ss:$8 sps:$4 sm:$0xff]  }
  0x4e   : > { %v404_v54 = vcombine.high %v396_v51, %v396_v51  ;;  %1271 = vmatprep.subr.bf16.mxu1 %v2554_v50  ;;  %v2467_v50 = vld [vmem:[%s3454_s1 + $0x400] ss:$8 sps:$4 sm:$0xff]  }
  0x4f   : > { %1328 = vmatpush1.bf16.msra.mxu0 %v2373_v55  ;;  %v2415_v55 = vld [vmem:[%s3454_s1 + $0x300] ss:$8 sps:$4 sm:$0xff]  }
  0x50   : > { %1329 = vmatprep.subr.bf16.mxu0 %v2378_v56  ;;  %1273 = vmatprep.mubr.bf16.mxu1 %v404_v54  ;;  %v2560_v56 = vld [vmem:[%s3456_s3] ss:$16 sps:$4 sm:$0xff]   ;;  %v2481_v54 = vld [vmem:[%s3454_s1 + $0x424] ss:$8 sps:$4 sm:$0xff]  }
  0x51   : > { %1272 = vmatpush1.bf16.msra.mxu1 %v2556_v53  ;;  %v2473_v53 = vld [vmem:[%s3454_s1 + $0x410] ss:$8 sps:$4 sm:$0xff]  }
  0x52   : > { %1886 = vmatprep.subr.bf16.mxu1 %v2562_v57  ;;  %v2499_v57 = vld [vmem:[%s3454_s1 + $0x454] ss:$8 sps:$4 sm:$0xff]  }
  0x53   : > { %1330 = vmatpush1.bf16.msra.mxu0 %v2376_v59  ;;  %v2565_v59 = vld [vmem:[%s3456_s3 + $0x24] ss:$16 sps:$4 sm:$0xff]  }
  0x54   : > { %1331 = vmatprep.subr.bf16.mxu0 %v2381_v60  ;;  %1274 = vmatmul.mubr.bf16.vlgmr.msra.gmra.mrb[0].mxu1 %v396_v51  ;;  %v2563_v60 = vld [vmem:[%s3456_s3 + $0x20] ss:$16 sps:$4 sm:$0xff]  }
  0x55   : > { %1887 = vmatpush1.bf16.msra.mxu1 %v2560_v56  ;;  %v2491_v56 = vld [vmem:[%s3454_s1 + $0x440] ss:$8 sps:$4 sm:$0xff]  }
  0x56   : > { %1888 = vmatprep.subr.bf16.mxu1 %v2565_v59  ;;  %v2505_v59 = vld [vmem:[%s3454_s1 + $0x464] ss:$8 sps:$4 sm:$0xff]  }
  0x57   : > { %1332 = vmatpush1.bf16.msra.mxu0 %v2379_v63  ;;  %v2426_v63 = vld [vmem:[%s3454_s1 + $0x334] ss:$8 sps:$4 sm:$0xff]  }
  0x58   : > { %1333 = vmatprep.subr.bf16.mxu0 %v2384_v0  ;;  %v2566_v0 = vld [vmem:[%s3456_s3 + $0x40] ss:$16 sps:$4 sm:$0xff]  }
  0x59   : > { %1889 = vmatpush1.bf16.msra.mxu1 %v2563_v60  ;;  %v2511_v60 = vld [vmem:[%s3454_s1 + $0x474] ss:$8 sps:$4 sm:$0xff]  }
  0x5a   : > { %1890 = vmatprep.subr.bf16.mxu1 %v2568_v62  ;;  %v2595_v62 = vld [vmem:[%s3456_s3 + $0x164] ss:$16 sps:$4 sm:$0xff]  }
  0x5b   : > { %1334 = vmatpush1.bf16.msra.mxu0 %v2382_v3  ;;  %v2429_v3 = vld [vmem:[%s3454_s1 + $0x344] ss:$8 sps:$4 sm:$0xff]  }
  0x5c   : > { %1335 = vmatprep.subr.bf16.mxu0 %v2387_v4  ;;  %v2569_v4 = vld [vmem:[%s3456_s3 + $0x60] ss:$16 sps:$4 sm:$0xff]  }
  0x5d   : > { %1891 = vmatpush1.bf16.msra.mxu1 %v2566_v0  ;;  %v2517_v0 = vld [vmem:[%s3454_s1 + $0x484] ss:$8 sps:$4 sm:$0xff]  }
  0x5e   : > { %1892 = vmatprep.subr.bf16.mxu1 %v2571_v2  ;;  %v2523_v2 = vld [vmem:[%s3454_s1 + $0x494] ss:$8 sps:$4 sm:$0xff]  }
  0x5f   : > { %1336 = vmatpush1.bf16.msra.mxu0 %v2385_v7  ;;  %v2432_v7 = vld [vmem:[%s3454_s1 + $0x354] ss:$8 sps:$4 sm:$0xff]  }
  0x60   : > { %1337 = vmatprep.subr.bf16.mxu0 %v2390_v8  ;;  %v2572_v8 = vld [vmem:[%s3456_s3 + $0x80] ss:$16 sps:$4 sm:$0xff]  }
  0x61   : > { %1893 = vmatpush1.bf16.msra.mxu1 %v2569_v4  ;;  %v2529_v4 = vld [vmem:[%s3454_s1 + $0x4a4] ss:$8 sps:$4 sm:$0xff]  }
  0x62   : > { %1894 = vmatprep.subr.bf16.mxu1 %v2574_v6  ;;  %v2535_v6 = vld [vmem:[%s3454_s1 + $0x4b4] ss:$8 sps:$4 sm:$0xff]  }
  0x63   : > { %1338 = vmatpush1.bf16.msra.mxu0 %v2388_v12  ;;  %v2435_v12 = vld [vmem:[%s3454_s1 + $0x364] ss:$8 sps:$4 sm:$0xff]  }
  0x64   : > { %1339 = vmatprep.subr.bf16.mxu0 %v2393_v13  ;;  %v2575_v13 = vld [vmem:[%s3456_s3 + $0xa0] ss:$16 sps:$4 sm:$0xff]  }
  0x65   : > { %1895 = vmatpush1.bf16.msra.mxu1 %v2572_v8  ;;  %v2541_v8 = vld [vmem:[%s3454_s1 + $0x4c4] ss:$8 sps:$4 sm:$0xff]  }
  0x66   : > { %1896 = vmatprep.subr.bf16.mxu1 %v2577_v10  ;;  %v2547_v10 = vld [vmem:[%s3454_s1 + $0x4d4] ss:$8 sps:$4 sm:$0xff]  }
  0x67   : > { %1340 = vmatpush1.bf16.msra.mxu0 %v2391_v17  ;;  %v2438_v17 = vld [vmem:[%s3454_s1 + $0x374] ss:$8 sps:$4 sm:$0xff]  }
  0x68   : > { %1341 = vmatprep.subr.bf16.mxu0 %v2396_v20  ;;  %v2578_v20 = vld [vmem:[%s3456_s3 + $0xc0] ss:$16 sps:$4 sm:$0xff]  }
  0x69   : > { %1897 = vmatpush1.bf16.msra.mxu1 %v2575_v13  ;;  %v2553_v13 = vld [vmem:[%s3454_s1 + $0x4e4] ss:$8 sps:$4 sm:$0xff]  }
  0x6a   : > { %1898 = vmatprep.subr.bf16.mxu1 %v2580_v16  ;;  %v2559_v16 = vld [vmem:[%s3454_s1 + $0x4f4] ss:$8 sps:$4 sm:$0xff]  }
  0x6b   : > { %1342 = vmatpush1.bf16.msra.mxu0 %v2394_v23  ;;  %v2441_v23 = vld [vmem:[%s3454_s1 + $0x384] ss:$8 sps:$4 sm:$0xff]  }
  0x6c   : > { %1343 = vmatprep.subr.bf16.mxu0 %v2399_v24  ;;  %v2581_v24 = vld [vmem:[%s3456_s3 + $0xe0] ss:$16 sps:$4 sm:$0xff]  }
  0x6d   : > { %1899 = vmatpush1.bf16.msra.mxu1 %v2578_v20  ;;  %v2598_v20 = vld [vmem:[%s3456_s3 + $0x184] ss:$16 sps:$4 sm:$0xff]  }
  0x6e   : > { %1900 = vmatprep.subr.bf16.mxu1 %v2583_v22 }
  0x6f   : > { %1344 = vmatpush1.bf16.msra.mxu0 %v2397_v27  ;;  %v2444_v27 = vld [vmem:[%s3454_s1 + $0x394] ss:$8 sps:$4 sm:$0xff]  }
  0x70   : > { %1345 = vmatprep.subr.bf16.mxu0 %v2402_v28  ;;  %v2584_v28 = vld [vmem:[%s3456_s3 + $0x100] ss:$16 sps:$4 sm:$0xff]  }
  0x71   : > { %1901 = vmatpush1.bf16.msra.mxu1 %v2581_v24 }
  0x72   : > { %1902 = vmatprep.subr.bf16.mxu1 %v2586_v26 }
  0x73   : > { %1346 = vmatpush1.bf16.msra.mxu0 %v2400_v31  ;;  %v2447_v31 = vld [vmem:[%s3454_s1 + $0x3a4] ss:$8 sps:$4 sm:$0xff]  }
  0x74   : > { %1347 = vmatprep.subr.bf16.mxu0 %v2405_v32  ;;  %v2587_v32 = vld [vmem:[%s3456_s3 + $0x120] ss:$16 sps:$4 sm:$0xff]  }
  0x75   : > { %1903 = vmatpush1.bf16.msra.mxu1 %v2584_v28  ;;  %v2604_v28 = vld [vmem:[%s3456_s3 + $0x1c4] ss:$16 sps:$4 sm:$0xff]  }
  0x76   : > { %1904 = vmatprep.subr.bf16.mxu1 %v2589_v30  ;;  %v2607_v30 = vld [vmem:[%s3456_s3 + $0x1e4] ss:$16 sps:$4 sm:$0xff]  }
  0x77   : > { %1348 = vmatpush1.bf16.msra.mxu0 %v2403_v35  ;;  %v2450_v35 = vld [vmem:[%s3454_s1 + $0x3b4] ss:$8 sps:$4 sm:$0xff]  }
  0x78   : > { %1349 = vmatprep.subr.bf16.mxu0 %v2408_v36  ;;  %v2590_v36 = vld [vmem:[%s3456_s3 + $0x140] ss:$16 sps:$4 sm:$0xff]  }
  0x79   : > { %1905 = vmatpush1.bf16.msra.mxu1 %v2587_v32  ;;  %v2610_v32 = vld [vmem:[%s3456_s3 + $0xc] ss:$16 sps:$4 sm:$0xff]  }
  0x7a   : > { %1906 = vmatprep.subr.bf16.mxu1 %v2592_v34 }
  0x7b   : > { %1350 = vmatpush1.bf16.msra.mxu0 %v2406_v39  ;;  %v2451_v39 = vld [vmem:[%s3454_s1 + $0x3c0] ss:$8 sps:$4 sm:$0xff]  }
  0x7c   : > { %1351 = vmatprep.subr.bf16.mxu0 %v2411_v40  ;;  %v2456_v40 = vld [vmem:[%s3454_s1 + $0x3d4] ss:$8 sps:$4 sm:$0xff]  }
  0x7d   : > { %1907 = vmatpush1.bf16.msra.mxu1 %v2590_v36 }
  0x7e   : > { %1908 = vmatprep.subr.bf16.mxu1 %v2595_v62  ;;  %v2617_v62 = vld [vmem:[%s3456_s3 + $0x68] ss:$16 sps:$4 sm:$0xff]  }
  0x7f   : > { %1352 = vmatpush1.bf16.msra.mxu0 %v2409_v45  ;;  %v2457_v45 = vld [vmem:[%s3454_s1 + $0x3e0] ss:$8 sps:$4 sm:$0xff]  }
  0x80   : > { %1353 = vmatprep.subr.bf16.mxu0 %v2414_v46  ;;  %v2462_v46 = vld [vmem:[%s3454_s1 + $0x3f4] ss:$8 sps:$4 sm:$0xff]  }
  0x83   : > { %1354 = vmatpush1.bf16.msra.mxu0 %v2412_v49  ;;  %v3197_v49 = vld.sshfl [vmem:[%s2746_s22 + $0x10] sm:$0x33 pattern:$0x76325410] }
  0x84   : > { %1364 = vmatprep.subr.bf16.mxu0 %v2417_v41  ;;  %v430_v51 = vcombine.high %v3197_v49, %v3197_v49  ;;  %v2475_v41 = vld [vmem:[%s3454_s1 + $0x414] ss:$8 sps:$4 sm:$0xff]  }
  0x86   : > { %1356 = vmatmul.mubr.bf16.vlgmr.msra.gmra.mrb[0].mxu0 %v2825_v43  ;;  %v2423_v43 = vld [vmem:[%s3454_s1 + $0x324] ss:$8 sps:$4 sm:$0xff]  }
  0x87   : > { %1365 = vmatpush1.bf16.msra.mxu0 %v2415_v55  ;;  %1396 = vmatprep.mubr.bf16.mxu0 %v422_v18  ;;  %v2479_v55 = vld [vmem:[%s3454_s1 + $0x420] ss:$8 sps:$4 sm:$0xff]   ;;  %v2493_v18 = vld [vmem:[%s3454_s1 + $0x444] ss:$8 sps:$4 sm:$0xff]  }
  0x88   : > { %1366 = vmatprep.subr.bf16.mxu0 %v2420_v19  ;;  %v2485_v19 = vld [vmem:[%s3454_s1 + $0x430] ss:$8 sps:$4 sm:$0xff]  }
  0x8b   : > { %1367 = vmatpush1.bf16.msra.mxu0 %v2418_v58  ;;  %v2497_v58 = vld [vmem:[%s3454_s1 + $0x450] ss:$8 sps:$4 sm:$0xff]  }
  0x8c   : > { %1368 = vmatprep.subr.bf16.mxu0 %v2423_v43  ;;  %v2503_v43 = vld [vmem:[%s3454_s1 + $0x460] ss:$8 sps:$4 sm:$0xff]  }
  0x8f   : > { %1369 = vmatpush1.bf16.msra.mxu0 %v2421_v61  ;;  %v2593_v61 = vld [vmem:[%s3456_s3 + $0x160] ss:$16 sps:$4 sm:$0xff]  }
  0x90   : > { %1370 = vmatprep.subr.bf16.mxu0 %v2426_v63  ;;  %v2509_v63 = vld [vmem:[%s3454_s1 + $0x470] ss:$8 sps:$4 sm:$0xff]   ;;  %1909 = vmatpush1.bf16.msra.mxu1 %v2593_v61  ;;  %v2619_v61 = vld [vmem:[%s3456_s3 + $0x6c] ss:$16 sps:$4 sm:$0xff]  }
  0x91   : > { %1910 = vmatprep.subr.bf16.mxu1 %v2598_v20  ;;  %v2644_v20 = vld [vmem:[%s3456_s3 + $0x188] ss:$16 sps:$4 sm:$0xff]  }
  0x93   : > { %1371 = vmatpush1.bf16.msra.mxu0 %v2424_v1  ;;  %v2515_v1 = vld [vmem:[%s3454_s1 + $0x480] ss:$8 sps:$4 sm:$0xff]  }
  0x94   : > { %1372 = vmatprep.subr.bf16.mxu0 %v2429_v3  ;;  %v2521_v3 = vld [vmem:[%s3454_s1 + $0x490] ss:$8 sps:$4 sm:$0xff]  }
  0x97   : > { %1373 = vmatpush1.bf16.msra.mxu0 %v2427_v5  ;;  %v2527_v5 = vld [vmem:[%s3454_s1 + $0x4a0] ss:$8 sps:$4 sm:$0xff]  }
  0x98   : > { %1374 = vmatprep.subr.bf16.mxu0 %v2432_v7  ;;  %v2533_v7 = vld [vmem:[%s3454_s1 + $0x4b0] ss:$8 sps:$4 sm:$0xff]  }
  0x9b   : > { %1375 = vmatpush1.bf16.msra.mxu0 %v2430_v9  ;;  %v2539_v9 = vld [vmem:[%s3454_s1 + $0x4c0] ss:$8 sps:$4 sm:$0xff]  }
  0x9c   : > { %1376 = vmatprep.subr.bf16.mxu0 %v2435_v12  ;;  %v2545_v12 = vld [vmem:[%s3454_s1 + $0x4d0] ss:$8 sps:$4 sm:$0xff]  }
  0x9f   : > { %1377 = vmatpush1.bf16.msra.mxu0 %v2433_v14  ;;  %v2551_v14 = vld [vmem:[%s3454_s1 + $0x4e0] ss:$8 sps:$4 sm:$0xff]  }
  0xa0   : > { %1378 = vmatprep.subr.bf16.mxu0 %v2438_v17  ;;  %v2557_v17 = vld [vmem:[%s3454_s1 + $0x4f0] ss:$8 sps:$4 sm:$0xff]  }
  0xa3   : > { %1379 = vmatpush1.bf16.msra.mxu0 %v2436_v21  ;;  %v2596_v21 = vld [vmem:[%s3456_s3 + $0x180] ss:$16 sps:$4 sm:$0xff]  }
  0xa4   : > { %1380 = vmatprep.subr.bf16.mxu0 %v2441_v23  ;;  %1911 = vmatpush1.bf16.msra.mxu1 %v2596_v21  ;;  %v2649_v21 = vld [vmem:[%s3456_s3 + $0x1ac] ss:$16 sps:$4 sm:$0xff]  }
  0xa7   : > { %1381 = vmatpush1.bf16.msra.mxu0 %v2439_v25  ;;  %v2601_v25 = vld [vmem:[%s3456_s3 + $0x1a4] ss:$16 sps:$4 sm:$0xff]  }
  0xa8   : > { %1382 = vmatprep.subr.bf16.mxu0 %v2444_v27  ;;  %v2599_v27 = vld [vmem:[%s3456_s3 + $0x1a0] ss:$16 sps:$4 sm:$0xff]   ;;  %1912 = vmatprep.subr.bf16.mxu1 %v2601_v25  ;;  %v2655_v25 = vld [vmem:[%s3456_s3 + $0x1ec] ss:$16 sps:$4 sm:$0xff]  }
  0xa9   : > { %1913 = vmatpush1.bf16.msra.mxu1 %v2599_v27  ;;  %v1544_v27 = vld [vmem:[%s3457_s4] sm:$0xf] }
  0xaa   : > { %1914 = vmatprep.subr.bf16.mxu1 %v2604_v28 }
  0xab   : > { %1383 = vmatpush1.bf16.msra.mxu0 %v2442_v29  ;;  %v2602_v29 = vld [vmem:[%s3456_s3 + $0x1c0] ss:$16 sps:$4 sm:$0xff]  }
  0xac   : > { %1384 = vmatprep.subr.bf16.mxu0 %v2447_v31  ;;  %v2605_v31 = vld [vmem:[%s3456_s3 + $0x1e0] ss:$16 sps:$4 sm:$0xff]  }
  0xad   : > { %1915 = vmatpush1.bf16.msra.mxu1 %v2602_v29 }
  0xae   : > { %1916 = vmatprep.subr.bf16.mxu1 %v2607_v30 }
  0xaf   : > { %1385 = vmatpush1.bf16.msra.mxu0 %v2445_v33 }
  0xb0   : > { %1386 = vmatprep.subr.bf16.mxu0 %v2450_v35 }
  0xb1   : > { %1917 = vmatpush1.bf16.msra.mxu1 %v2605_v31 }
  0xb2   : > { %1927 = vmatprep.subr.bf16.mxu1 %v2610_v32 }
  0xb3   : > { %1387 = vmatpush1.bf16.msra.mxu0 %v2448_v37 }
  0xb4   : > { %1388 = vmatprep.subr.bf16.mxu0 %v2453_v38 }
  0xb7   : > { %1389 = vmatpush1.bf16.msra.mxu0 %v2451_v39  ;;  %v1466_v39 = vsub.s32 0, %v2741_v15 }
  0xb8   : > { %1390 = vmatprep.subr.bf16.mxu0 %v2456_v40 }
  0xb9   : > { %v1869_v28 = vrot.slane %v1544_v27, %v1466_v39 }
  0xbb   : > { %1391 = vmatpush1.bf16.msra.mxu0 %v2454_v42  ;;  %v1462_v42 = vld [vmem:[%s3455_s2] sm:$0x3] }
  0xbc   : > { %1392 = vmatprep.subr.bf16.mxu0 %v2459_v44 }
  0xbf   : > { %1393 = vmatpush1.bf16.msra.mxu0 %v2457_v45  ;;  %v1470_v45 = vsub.s32 1, %v2741_v15 }
  0xc0   : > { %1394 = vmatprep.subr.bf16.mxu0 %v2462_v46 }
  0xc1   : > { %v1873_v29 = vrot.slane %v1544_v27, %v1470_v45 }
  0xc3   : > { %1395 = vmatpush1.bf16.msra.mxu0 %v2460_v47 }
  0xc4   : > { %1405 = vmatprep.subr.bf16.mxu0 %v2469_v48 }
  0xc6   : > { %1397 = vmatmul.mubr.bf16.vlgmr.msra.gmra.mrb[0].mxu0 %v3026_v52  ;;  %v2487_v52 = vld [vmem:[%s3454_s1 + $0x434] ss:$8 sps:$4 sm:$0xff]  }
  0xc7   : > { %1406 = vmatpush1.bf16.msra.mxu0 %v2467_v50  ;;  %1437 = vmatprep.mubr.bf16.mxu0 %v430_v51  ;;  %v1471_v51 = vrot.slane %v1462_v42, %v1470_v45 }
  0xc8   : > { %1407 = vmatprep.subr.bf16.mxu0 %v2475_v41 }
  0xcb   : > { %1408 = vmatpush1.bf16.msra.mxu0 %v2473_v53 }
  0xcc   : > { %1409 = vmatprep.subr.bf16.mxu0 %v2481_v54 }
  0xcf   : > { %1410 = vmatpush1.bf16.msra.mxu0 %v2479_v55 }
  0xd0   : > { %1411 = vmatprep.subr.bf16.mxu0 %v2487_v52 }
  0xd3   : > { %1412 = vmatpush1.bf16.msra.mxu0 %v2485_v19 }
  0xd4   : > { %1413 = vmatprep.subr.bf16.mxu0 %v2493_v18 }
  0xd7   : > { %1414 = vmatpush1.bf16.msra.mxu0 %v2491_v56  ;;  %v2608_v56 = vld [vmem:[%s3456_s3 + $0x8] ss:$16 sps:$4 sm:$0xff]  }
  0xd8   : > { %1415 = vmatprep.subr.bf16.mxu0 %v2499_v57 }
  0xdb   : > { %1416 = vmatpush1.bf16.msra.mxu0 %v2497_v58  ;;  %v2613_v58 = vld [vmem:[%s3456_s3 + $0x2c] ss:$16 sps:$4 sm:$0xff]  }
  0xdc   : > { %1417 = vmatprep.subr.bf16.mxu0 %v2505_v59  ;;  %v2611_v59 = vld [vmem:[%s3456_s3 + $0x28] ss:$16 sps:$4 sm:$0xff]  }
  0xdf   : > { %1418 = vmatpush1.bf16.msra.mxu0 %v2503_v43  ;;  %v2616_v43 = vld [vmem:[%s3456_s3 + $0x4c] ss:$16 sps:$4 sm:$0xff]  }
  0xe0   : > { %1419 = vmatprep.subr.bf16.mxu0 %v2511_v60  ;;  %v2614_v60 = vld [vmem:[%s3456_s3 + $0x48] ss:$16 sps:$4 sm:$0xff]  }
  0xe3   : > { %1420 = vmatpush1.bf16.msra.mxu0 %v2509_v63  ;;  %v2622_v63 = vld [vmem:[%s3456_s3 + $0x8c] ss:$16 sps:$4 sm:$0xff]  }
  0xe4   : > { %1421 = vmatprep.subr.bf16.mxu0 %v2517_v0  ;;  %v2620_v0 = vld [vmem:[%s3456_s3 + $0x88] ss:$16 sps:$4 sm:$0xff]  }
  0xe7   : > { %1422 = vmatpush1.bf16.msra.mxu0 %v2515_v1  ;;  %v2625_v1 = vld [vmem:[%s3456_s3 + $0xac] ss:$16 sps:$4 sm:$0xff]  }
  0xe8   : > { %1423 = vmatprep.subr.bf16.mxu0 %v2523_v2  ;;  %v2623_v2 = vld [vmem:[%s3456_s3 + $0xa8] ss:$16 sps:$4 sm:$0xff]  }
  0xeb   : > { %1424 = vmatpush1.bf16.msra.mxu0 %v2521_v3  ;;  %v2628_v3 = vld [vmem:[%s3456_s3 + $0xcc] ss:$16 sps:$4 sm:$0xff]  }
  0xec   : > { %1425 = vmatprep.subr.bf16.mxu0 %v2529_v4  ;;  %v2626_v4 = vld [vmem:[%s3456_s3 + $0xc8] ss:$16 sps:$4 sm:$0xff]  }
  0xef   : > { %1426 = vmatpush1.bf16.msra.mxu0 %v2527_v5  ;;  %v2631_v5 = vld [vmem:[%s3456_s3 + $0xec] ss:$16 sps:$4 sm:$0xff]  }
  0xf0   : > { %1427 = vmatprep.subr.bf16.mxu0 %v2535_v6  ;;  %v2629_v6 = vld [vmem:[%s3456_s3 + $0xe8] ss:$16 sps:$4 sm:$0xff]  }
  0xf3   : > { %1428 = vmatpush1.bf16.msra.mxu0 %v2533_v7  ;;  %v2634_v7 = vld [vmem:[%s3456_s3 + $0x10c] ss:$16 sps:$4 sm:$0xff]  }
  0xf4   : > { %1429 = vmatprep.subr.bf16.mxu0 %v2541_v8  ;;  %v2632_v8 = vld [vmem:[%s3456_s3 + $0x108] ss:$16 sps:$4 sm:$0xff]  }
  0xf7   : > { %1430 = vmatpush1.bf16.msra.mxu0 %v2539_v9  ;;  %v2637_v9 = vld [vmem:[%s3456_s3 + $0x12c] ss:$16 sps:$4 sm:$0xff]  }
  0xf8   : > { %1431 = vmatprep.subr.bf16.mxu0 %v2547_v10  ;;  %v2635_v10 = vld [vmem:[%s3456_s3 + $0x128] ss:$16 sps:$4 sm:$0xff]  }
  0xfb   : > { %1432 = vmatpush1.bf16.msra.mxu0 %v2545_v12  ;;  %v2640_v12 = vld [vmem:[%s3456_s3 + $0x14c] ss:$16 sps:$4 sm:$0xff]  }
  0xfc   : > { %1433 = vmatprep.subr.bf16.mxu0 %v2553_v13  ;;  %v2638_v13 = vld [vmem:[%s3456_s3 + $0x148] ss:$16 sps:$4 sm:$0xff]  }
  0xff   : > { %1434 = vmatpush1.bf16.msra.mxu0 %v2551_v14  ;;  %v2643_v14 = vld [vmem:[%s3456_s3 + $0x16c] ss:$16 sps:$4 sm:$0xff]  }
 0x100   : > { %1435 = vmatprep.subr.bf16.mxu0 %v2559_v16  ;;  %v2641_v16 = vld [vmem:[%s3456_s3 + $0x168] ss:$16 sps:$4 sm:$0xff]  }
 0x103   : > { %1436 = vmatpush1.bf16.msra.mxu0 %v2557_v17  ;;  %v2646_v17 = vld [vmem:[%s3456_s3 + $0x18c] ss:$16 sps:$4 sm:$0xff]  }
 0x106   : > { %1438 = vmatmul.mubr.bf16.vlgmr.msra.gmra.mrb[0].mxu0 %v3197_v49  ;;  %v1467_v49 = vrot.slane %v1462_v42, %v1466_v39  ;;  %v1880_v42 = vsub.s32 3, %v2741_v15 }
 0x127   : > { %v1275_v22 = vpop.f32.mrb[0].mxu1 }
 0x128   : > { %v1277_v23 = vpop.f32.mrb[1].mxu1 }
 0x129   : > { %v1279_v24 = vpop.f32.mrb[2].mxu1 }
 0x12a   : > { %v1280_v26 = vpop.f32.mrb[3].mxu1  ;;  %v2650_v24 = vld [vmem:[%s3456_s3 + $0x1c8] ss:$16 sps:$4 sm:$0xff]  }
 0x12b   : > { %v2653_v26 = vld [vmem:[%s3456_s3 + $0x1e8] ss:$16 sps:$4 sm:$0xff]  }
 0x1d9   : > { %v1439_v33 = vpop.f32.mrb[0].mxu0 }
 0x1da   : > { %v2293_v34 = vadd.f32 %v1439_v33, %v1275_v22  ;;  %v1441_v35 = vpop.f32.mrb[1].mxu0  ;;  %v2647_v22 = vld [vmem:[%s3456_s3 + $0x1a8] ss:$16 sps:$4 sm:$0xff]  }
 0x1db   : > { %v2294_v36 = vadd.f32 %v1441_v35, %v1277_v23  ;;  %v1443_v37 = vpop.f32.mrb[2].mxu0  ;;  %v2652_v23 = vld [vmem:[%s3456_s3 + $0x1cc] ss:$16 sps:$4 sm:$0xff]  }
 0x1dc   : > { %v1448_v38 = vrot.slane %v2293_v34, 1  ;;  %v1444_v40 = vpop.f32.mrb[3].mxu0 }
 0x1dd   : > { %v1449_v44 = vrot.slane %v2294_v36, 1  ;;  %v1876_v40 = vsub.s32 2, %v2741_v15 }
 0x1de   : > { %v1452_v46 = vmax.f32 %v2293_v34, %v1448_v38 }
 0x1df   : > { %v1453_v47 = vmax.f32 %v2294_v36, %v1449_v44  ;;  %v2665_v44 = vmov 1966171168   ;;  %v1877_v39 = vrot.slane %v1544_v27, %v1876_v40 }
 0x1e0   : > { %v1456_v48 = vrot.slane %v1452_v46, 2 }
 0x1e1   : > { %v1457_v50 = vrot.slane %v1453_v47, 2 }
 0x1e2   : > { %v1460_v41 = vmax.f32 %v1452_v46, %v1456_v48  ;;  %v1979_v46 = vunpack.c.l.s4 %v2665_v44 }
 0x1e3   : > { %v1461_v53 = vmax.f32 %v1453_v47, %v1457_v50  ;;  %v1881_v47 = vrot.slane %v1544_v27, %v1880_v42 }
 0x1e4   : > { %v1474_v54 = vadd.f32 %v1467_v49, %v1460_v41  ;;  %v1980_v48 = vunpack.c.0.s8 %v1979_v46 }
 0x1e5   : > { %v1475_v55 = vadd.f32 %v1471_v51, %v1461_v53 }
 0x1e6   : > { %v1476_v52 = vmax.f32 %v1474_v54, 0.0 }
 0x1e7   : > { %v1477_v19 = vmax.f32 %v1475_v55, 0.0  ;;  %v1983_v55 = vsub.s32 %v1980_v48, %v2741_v15 }
 0x1e8   : > { %v3341_v57 = vpack.c.bf16 %v1476_v52, %v1476_v52 }
 0x1e9   : > { %v1479_v18 = vpack.c.bf16 %v1477_v19, %v1477_v19 }
 0x1eb   : > { %1918 = vmatprep.mubr.bf16.mxu1 %v1479_v18 }
 0x1ec   : > { %1919 = vmatmul.mubr.bf16.vlgmr.msra.gmra.mrb[4].mxu1 %v3341_v57 }
 0x1ed   : > { %1928 = vmatpush1.bf16.msra.mxu1 %v2608_v56  ;;  %1959 = vmatprep.mubr.bf16.mxu1 %v1479_v18 }
 0x1ee   : > { %1929 = vmatprep.subr.bf16.mxu1 %v2613_v58 }
 0x1f1   : > { %1930 = vmatpush1.bf16.msra.mxu1 %v2611_v59 }
 0x1f2   : > { %1931 = vmatprep.subr.bf16.mxu1 %v2616_v43 }
 0x1f5   : > { %1932 = vmatpush1.bf16.msra.mxu1 %v2614_v60 }
 0x1f6   : > { %1933 = vmatprep.subr.bf16.mxu1 %v2619_v61 }
 0x1f9   : > { %1934 = vmatpush1.bf16.msra.mxu1 %v2617_v62 }
 0x1fa   : > { %1935 = vmatprep.subr.bf16.mxu1 %v2622_v63 }
 0x1fd   : > { %1936 = vmatpush1.bf16.msra.mxu1 %v2620_v0 }
 0x1fe   : > { %1937 = vmatprep.subr.bf16.mxu1 %v2625_v1 }
 0x201   : > { %1938 = vmatpush1.bf16.msra.mxu1 %v2623_v2 }
 0x202   : > { %1939 = vmatprep.subr.bf16.mxu1 %v2628_v3 }
 0x205   : > { %1940 = vmatpush1.bf16.msra.mxu1 %v2626_v4 }
 0x206   : > { %1941 = vmatprep.subr.bf16.mxu1 %v2631_v5 }
 0x209   : > { %1942 = vmatpush1.bf16.msra.mxu1 %v2629_v6 }
 0x20a   : > { %1943 = vmatprep.subr.bf16.mxu1 %v2634_v7 }
 0x20d   : > { %1944 = vmatpush1.bf16.msra.mxu1 %v2632_v8 }
 0x20e   : > { %1945 = vmatprep.subr.bf16.mxu1 %v2637_v9 }
 0x211   : > { %1946 = vmatpush1.bf16.msra.mxu1 %v2635_v10 }
 0x212   : > { %1947 = vmatprep.subr.bf16.mxu1 %v2640_v12 }
 0x215   : > { %1948 = vmatpush1.bf16.msra.mxu1 %v2638_v13 }
 0x216   : > { %1949 = vmatprep.subr.bf16.mxu1 %v2643_v14 }
 0x219   : > { %1950 = vmatpush1.bf16.msra.mxu1 %v2641_v16 }
 0x21a   : > { %1951 = vmatprep.subr.bf16.mxu1 %v2646_v17 }
 0x21d   : > { %1952 = vmatpush1.bf16.msra.mxu1 %v2644_v20 }
 0x21e   : > { %1953 = vmatprep.subr.bf16.mxu1 %v2649_v21 }
 0x221   : > { %1954 = vmatpush1.bf16.msra.mxu1 %v2647_v22 }
 0x222   : > { %1955 = vmatprep.subr.bf16.mxu1 %v2652_v23 }
 0x225   : > { %1956 = vmatpush1.bf16.msra.mxu1 %v2650_v24 }
 0x226   : > { %1957 = vmatprep.subr.bf16.mxu1 %v2655_v25 }
 0x229   : > { %1958 = vmatpush1.bf16.msra.mxu1 %v2653_v26 }
 0x22c   : > { %1960 = vmatmul.mubr.bf16.vlgmr.msra.gmra.mrb[8].mxu1 %v3341_v57 }
 0x2bf   : > { %v1920_v30 = vpop.f32.mrb[4].mxu1 }
 0x2c0   : > { %v1921_v31 = vadd.f32 %v1920_v30, %v1869_v28  ;;  %v1922_v32 = vpop.f32.mrb[5].mxu1 }
 0x2c1   : > { %v1923_v33 = vadd.f32 %v1922_v32, %v1873_v29  ;;  %v1924_v34 = vpop.f32.mrb[6].mxu1 }
 0x2c2   : > { %v1968_v35 = vmax.f32 %v1921_v31, 0.0  ;;  %v1925_v36 = vpop.f32.mrb[7].mxu1 }
 0x2c3   : > { %v1969_v37 = vmax.f32 %v1923_v33, 0.0 }
 0x2c5   : > { %v1976_v38 = vcombine.low %v1968_v35, %v1969_v37 }
 0x2c7   : > { %v1984_v18 = vrot.slane %v1976_v38, %v1983_v55 }
 0x2ff   : > { %v1961_v45 = vpop.f32.mrb[8].mxu1 }
 0x300   : > { %v1962_v49 = vadd.f32 %v1961_v45, %v1877_v39  ;;  %v1963_v50 = vpop.f32.mrb[9].mxu1 }
 0x301   : > { %v1964_v51 = vadd.f32 %v1963_v50, %v1881_v47  ;;  %v1965_v41 = vpop.f32.mrb[10].mxu1 }
 0x302   : > { %v1970_v53 = vmax.f32 %v1962_v49, 0.0  ;;  %v1966_v54 = vpop.f32.mrb[11].mxu1 }
 0x303   : > { %v1971_v52 = vmax.f32 %v1964_v51, 0.0 }
 0x305   : > { %v1977_v19 = vcombine.low %v1970_v53, %v1971_v52 }
 0x307   : > { %v1991_v56 = vrot.slane %v1977_v19, %v1983_v55 }
 0x309   : > { %v1992_v57 = vcombine.low %v1984_v18, %v1991_v56 }
 0x30b   : > { %v1999_v58 = vrot.slane %v1992_v57, %v1983_v55 }
 0x30d   : > { %2005 = vst.msk [vmem:[%s222_s6] sm:$0xf] %vm2003_vm0, %v1999_v58 }
 0x30e PF: > { %s15_s18 = sadd.s32 1, %s2662_s18  }
 0x30f   : > { %p12_p4 = scmp.ge.s32.totalorder %s15_s18, 4  }
 0x311   :  { %14 = sbr.rel (!%p12_p4) target bundleno = 1 (0x1), region = 70 }

</bundles_post_ra>
